<compile_context>
chip_gen: v5e
topology: v5e:2x2
jax: 0.10.0
libtpu: 0.0.40
codegen_flags: <defaults>
</compile_context>

<pallas_src>
import numpy as np

import jax
import jax.numpy as jnp
from jax.experimental import pallas as pl
from jax.experimental.pallas import tpu as pltpu


# ----------------------------------------------------------------------------
# Fused kernel: conv1 -> conv2 -> conv3 -> fc1(relu) -> fc2
# ----------------------------------------------------------------------------
def _qnet_kernel(x_ref, w1_ref, b1_ref, w2_ref, b2_ref, w3_ref, b3_ref,
                 fc1w_ref, fc1b_ref, fc2w_ref, fc2b_ref,
                 o_ref, a1_ref, a2_ref, a3_ref, af_ref):
    f32, bf16 = jnp.float32, jnp.bfloat16
    B, H, WC = x_ref.shape
    S1 = a1_ref.shape[0] // B            # H  + 2 rows per sample (incl. pads)
    S2 = a2_ref.shape[0] // B            # H1 + 2
    S3 = a3_ref.shape[0] // B            # H2 + 2
    H1, H2 = S2 - 2, S3 - 2
    H3 = S3 - w3_ref.shape[0] + 1
    C3W = w3_ref.shape[2]                # W3 * 64 (lane width of conv3 output)

    # ---- zero only the 2B H-padding border rows of each stacked scratch ----
    for (ref, S, Hin) in ((a1_ref, S1, H), (a2_ref, S2, H1), (a3_ref, S3, H2)):
        zrow = jnp.zeros((1, ref.shape[1]), f32)
        for b in range(B):
            ref[b * S:b * S + 1, :] = zrow                       # top pad
            ref[b * S + Hin + 1:b * S + Hin + 2, :] = zrow       # bottom pad

    # ---- drop the lane-packed observation into a1's interior rows ----------
    for b in range(B):
        a1_ref[b * S1 + 1:b * S1 + 1 + H, :] = x_ref[b, :, :]

    def conv(src_ref, w_ref, b_ref):
        # src_ref: (B*(Hin+2), Win*Cin) batch-stacked, H-padded, lane-packed.
        # w_ref:   (kh, Win*Cin, Wout*Cout) banded weights (W-padding folded in).
        # One dot per dy over the WHOLE batch -> each W_dy pushed to the MXU once.
        kh = w_ref.shape[0]
        M = src_ref.shape[0] - kh + 1        # includes (B-1)*(kh-1) junk rows
        acc = jnp.zeros((M, w_ref.shape[2]), f32)
        for dy in range(kh):                 # static unroll (<= 8)
            lhs = src_ref[dy:dy + M, :].astype(bf16)
            acc = acc + jnp.dot(lhs, w_ref[dy], preferred_element_type=f32)
        return jnp.maximum(acc + b_ref[...], 0.0)                # f32 bias + ReLU

    # conv1 -> a2 interior (valid rows of sample b start at output row b*S1)
    out1 = conv(a1_ref, w1_ref, b1_ref)
    for b in range(B):
        a2_ref[b * S2 + 1:b * S2 + 1 + H1, :] = out1[b * S1:b * S1 + H1, :]

    # conv2 -> a3 interior
    out2 = conv(a2_ref, w2_ref, b2_ref)
    for b in range(B):
        a3_ref[b * S3 + 1:b * S3 + 1 + H2, :] = out2[b * S2:b * S2 + H2, :]

    # conv3 -> NHWC-flatten (h, w, c) directly into af_ref[b, :]
    out3 = conv(a3_ref, w3_ref, b3_ref)
    for b in range(B):
        for h in range(H3):
            af_ref[b:b + 1, h * C3W:(h + 1) * C3W] = \
                out3[b * S3 + h:b * S3 + h + 1, :]

    # fc1: single (B, H3*W3*64) @ (H3*W3*64, hidden) dot -> one weight push.
    h1 = jnp.maximum(
        jnp.dot(af_ref[...].astype(bf16), fc1w_ref[...],
                preferred_element_type=f32) + fc1b_ref[...], 0.0)

    # fc2 (no nonlinearity); single lane store of all B rows.
    q = jnp.dot(h1.astype(bf16), fc2w_ref[...],
                preferred_element_type=f32) + fc2b_ref[...]
    o_ref[...] = q.astype(o_ref.dtype)


# ----------------------------------------------------------------------------
# Wrapper: one pallas_call for the whole network
# ----------------------------------------------------------------------------
def qnetwork_forward(x_nhwc, kp):
    B, H, W, C = x_nhwc.shape
    K1, K2, K3 = kp["w1"].shape[0], kp["w2"].shape[0], kp["w3"].shape[0]
    H1 = (H + 2) - K1 + 1
    H2 = (H1 + 2) - K2 + 1
    H3 = (H2 + 2) - K3 + 1
    N1W = kp["w1"].shape[2]          # W1 * 16
    N2W = kp["w2"].shape[2]          # W2 * 32
    N3W = kp["w3"].shape[2]          # W3 * 64
    HID = kp["fc1b"].shape[1]
    NA = kp["fc2b"].shape[1]
    FLAT = kp["fc1w"].shape[0]       # H3 * W3 * 64

    # mirrors .type(torch.float32); pack (W, C) onto the lane axis (free reshape)
    x = x_nhwc.astype(jnp.float32).reshape(B, H, W * C)

    args = (x, kp["w1"], kp["b1"], kp["w2"], kp["b2"], kp["w3"], kp["b3"],
            kp["fc1w"], kp["fc1b"], kp["fc2w"], kp["fc2b"])

    def full_spec(shape):
        nd = len(shape)
        return pl.BlockSpec(tuple(shape), lambda i, _nd=nd: (0,) * _nd)

    flops = 2 * B * (K1 * H1 * (W * C) * N1W + K2 * H2 * N1W * N2W
                     + K3 * H3 * N2W * N3W + FLAT * HID + HID * NA)
    bytes_accessed = int(sum(int(a.size) * a.dtype.itemsize for a in args)) + B * NA * 4

    return pl.pallas_call(
        _qnet_kernel,
        out_shape=jax.ShapeDtypeStruct((B, NA), jnp.float32),
        grid=(1,),
        in_specs=[full_spec(a.shape) for a in args],
        out_specs=pl.BlockSpec((B, NA), lambda i: (0, 0)),
        scratch_shapes=[
            pltpu.VMEM((B * (H + 2), W * C), jnp.float32),    # stacked padded input
            pltpu.VMEM((B * (H1 + 2), N1W), jnp.float32),     # stacked padded conv1 out
            pltpu.VMEM((B * (H2 + 2), N2W), jnp.float32),     # stacked padded conv2 out
            pltpu.VMEM((B, FLAT), jnp.float32),               # NHWC-flat conv3 out
        ],
        compiler_params=pltpu.CompilerParams(
            dimension_semantics=("arbitrary",)),
        cost_estimate=pl.CostEstimate(
            flops=flops, transcendentals=0, bytes_accessed=bytes_accessed),
    )(*args)


# ----------------------------------------------------------------------------
# One-time parameter packing (PyTorch layout -> kernel layout)
# ----------------------------------------------------------------------------
def pack_params(p, height, width):
    """Repack PyTorch-layout params into the fused kernel's layout (done once).

    - conv weights (cout, cin, kh, kw) -> banded (kh, Win*cin, Wout*cout) bf16,
      with the W-direction zero-padding folded in.
    - conv biases tiled along the packed lane axis, f32 (1, Wout*cout).
    - fc1 rows permuted from NCHW-flatten order to the kernel's NHWC-flat order:
      (H3*W3*64, hidden) bf16 (single-K-push fc1).
    """
    def band(w_oihw, w_in, w_out, pad=1):
        cout, cin, kh, kw = w_oihw.shape
        w_np = np.asarray(w_oihw, np.float32)
        banded = np.zeros((kh, w_in * cin, w_out * cout), np.float32)
        for dy in range(kh):
            for xo in range(w_out):
                for dx in range(kw):
                    xi = xo + dx - pad
                    if 0 <= xi < w_in:
                        banded[dy, xi * cin:(xi + 1) * cin,
                               xo * cout:(xo + 1) * cout] = w_np[:, :, dy, dx].T
        return jnp.asarray(banded, jnp.bfloat16)

    def tile_bias(bias, w_out):
        return jnp.asarray(np.tile(np.asarray(bias, np.float32), w_out)[None, :],
                           jnp.float32)

    H, W = height, width
    H1, W1 = H + 2 - 8 + 1, W + 2 - 8 + 1
    H2, W2 = H1 + 2 - 4 + 1, W1 + 2 - 4 + 1
    H3, W3 = H2 + 2 - 3 + 1, W2 + 2 - 3 + 1
    hidden = p["fc1_w"].shape[1]

    # fc1 rows are in NCHW-flatten order (c, h, w); permute to NHWC (h, w, c)
    # and flatten to a single contraction axis -> (H3*W3*64, hidden).
    fc1 = np.asarray(p["fc1_w"], np.float32)
    fc1 = fc1.reshape(64, H3, W3, hidden).transpose(1, 2, 0, 3)
    fc1 = np.ascontiguousarray(fc1).reshape(H3 * W3 * 64, hidden)

    return {
        "w1": band(p["conv1_w"], W, W1),  "b1": tile_bias(p["conv1_b"], W1),
        "w2": band(p["conv2_w"], W1, W2), "b2": tile_bias(p["conv2_b"], W2),
        "w3": band(p["conv3_w"], W2, W3), "b3": tile_bias(p["conv3_b"], W3),
        "fc1w": jnp.asarray(fc1, jnp.bfloat16),
        "fc1b": jnp.asarray(np.asarray(p["fc1_b"], np.float32)[None, :]),
        "fc2w": jnp.asarray(p["fc2_w"], jnp.bfloat16),
        "fc2b": jnp.asarray(np.asarray(p["fc2_b"], np.float32)[None, :]),
    }


# ----------------------------------------------------------------------------
# Deterministic "PyTorch-layout" parameter construction
# ----------------------------------------------------------------------------
def make_params(key, in_channels, height, width, hidden, n_actions):
    ks = jax.random.split(key, 10)

    def norm(k, shape, scale=0.05):
        return (scale * jax.random.normal(k, shape)).astype(jnp.float32)

    h1, w1 = height + 2 - 8 + 1, width + 2 - 8 + 1
    h2, w2 = h1 + 2 - 4 + 1, w1 + 2 - 4 + 1
    h3, w3 = h2 + 2 - 3 + 1, w2 + 2 - 3 + 1
    flat = 64 * h3 * w3                     # np.prod(conv(dummy).shape), batch 1

    params = {
        "conv1_w": norm(ks[0], (16, in_channels, 8, 8)),
        "conv1_b": norm(ks[1], (16,)),
        "conv2_w": norm(ks[2], (32, 16, 4, 4)),
        "conv2_b": norm(ks[3], (32,)),
        "conv3_w": norm(ks[4], (64, 32, 3, 3)),
        "conv3_b": norm(ks[5], (64,)),
        "fc1_w":   norm(ks[6], (flat, hidden), 0.01),   # rows in NCHW-flatten order
        "fc1_b":   norm(ks[7], (hidden,)),
        "fc2_w":   norm(ks[8], (hidden, n_actions), 0.01),
        "fc2_b":   norm(ks[9], (n_actions,)),
    }
    return params, flat


if __name__ == "__main__":
    # Small env-like shapes: observation (H=16, W=16, C=4), 6 discrete actions,
    # linear_sizes=[32], batch=2.
    BATCH, HEIGHT, WIDTH, CH = 2, 16, 16, 4
    HIDDEN, N_ACTIONS = 32, 6

    key = jax.random.PRNGKey(0)
    k_x, k_p = jax.random.split(key)
    x = jax.random.uniform(k_x, (BATCH, HEIGHT, WIDTH, CH), dtype=jnp.float32)
    params, flat = make_params(k_p, CH, HEIGHT, WIDTH, HIDDEN, N_ACTIONS)
    kparams = pack_params(params, HEIGHT, WIDTH)

    fwd = jax.jit(qnetwork_forward)
    q = fwd(x, kparams)
    jax.block_until_ready(q)
    assert q.shape == (BATCH, N_ACTIONS) and q.dtype == jnp.float32
    assert bool(jnp.all(jnp.isfinite(q)))
    print("KERNEL_OK")
</pallas_src>

<mosaic_0001>
module attributes {stable_mosaic.version = 11 : i64} {
  func.func @_qnet_kernel(%arg0: i32, %arg1: memref<2x16x64xf32, #tpu.memory_space<vmem>>, %arg2: memref<8x64x176xbf16, #tpu.memory_space<vmem>>, %arg3: memref<1x176xf32, #tpu.memory_space<vmem>>, %arg4: memref<4x176x320xbf16, #tpu.memory_space<vmem>>, %arg5: memref<1x320xf32, #tpu.memory_space<vmem>>, %arg6: memref<3x320x640xbf16, #tpu.memory_space<vmem>>, %arg7: memref<1x640xf32, #tpu.memory_space<vmem>>, %arg8: memref<6400x32xbf16, #tpu.memory_space<vmem>>, %arg9: memref<1x32xf32, #tpu.memory_space<vmem>>, %arg10: memref<32x6xbf16, #tpu.memory_space<vmem>>, %arg11: memref<1x6xf32, #tpu.memory_space<vmem>>, %arg12: memref<2x6xf32, #tpu.memory_space<vmem>>, %arg13: memref<36x64xf32, #tpu.memory_space<vmem>>, %arg14: memref<26x176xf32, #tpu.memory_space<vmem>>, %arg15: memref<24x320xf32, #tpu.memory_space<vmem>>, %arg16: memref<2x6400xf32, #tpu.memory_space<vmem>>) attributes {dimension_semantics = [#tpu.dimension_semantics<arbitrary>], iteration_bounds = array<i64: 1>, scalar_prefetch = 0 : i64, scratch_operands = 4 : i64, tpu.core_type = #tpu.core_type<tc>, window_params = [{pipeline_mode = #tpu.pipeline_mode<synchronous>, transform_indices = @transform_0, window_bounds = array<i64: 2, 16, 64>}, {pipeline_mode = #tpu.pipeline_mode<synchronous>, transform_indices = @transform_1, window_bounds = array<i64: 8, 64, 176>}, {pipeline_mode = #tpu.pipeline_mode<synchronous>, transform_indices = @transform_2, window_bounds = array<i64: 1, 176>}, {pipeline_mode = #tpu.pipeline_mode<synchronous>, transform_indices = @transform_3, window_bounds = array<i64: 4, 176, 320>}, {pipeline_mode = #tpu.pipeline_mode<synchronous>, transform_indices = @transform_4, window_bounds = array<i64: 1, 320>}, {pipeline_mode = #tpu.pipeline_mode<synchronous>, transform_indices = @transform_5, window_bounds = array<i64: 3, 320, 640>}, {pipeline_mode = #tpu.pipeline_mode<synchronous>, transform_indices = @transform_6, window_bounds = array<i64: 1, 640>}, {pipeline_mode = #tpu.pipeline_mode<synchronous>, transform_indices = @transform_7, window_bounds = array<i64: 6400, 32>}, {pipeline_mode = #tpu.pipeline_mode<synchronous>, transform_indices = @transform_8, window_bounds = array<i64: 1, 32>}, {pipeline_mode = #tpu.pipeline_mode<synchronous>, transform_indices = @transform_9, window_bounds = array<i64: 32, 6>}, {pipeline_mode = #tpu.pipeline_mode<synchronous>, transform_indices = @transform_10, window_bounds = array<i64: 1, 6>}, {pipeline_mode = #tpu.pipeline_mode<synchronous>, transform_indices = @transform_11, window_bounds = array<i64: 2, 6>}]} {
    %cst = arith.constant 0.000000e+00 : f32
    %0 = vector.broadcast %cst : f32 to vector<1x64xf32>
    %c0 = arith.constant 0 : index
    %c0_0 = arith.constant 0 : index
    %1 = vector.load %arg13[%c0, %c0_0] : memref<36x64xf32, #tpu.memory_space<vmem>>, vector<1x64xf32>
    tpu.vector_store %arg13[%c0, %c0_0], %0 {strides = array<i32>} : memref<36x64xf32, #tpu.memory_space<vmem>>, vector<1x64xf32>,
    %c17 = arith.constant 17 : index
    %c0_1 = arith.constant 0 : index
    %2 = vector.load %arg13[%c17, %c0_1] : memref<36x64xf32, #tpu.memory_space<vmem>>, vector<1x64xf32>
    tpu.vector_store %arg13[%c17, %c0_1], %0 {strides = array<i32>} : memref<36x64xf32, #tpu.memory_space<vmem>>, vector<1x64xf32>,
    %c18 = arith.constant 18 : index
    %c0_2 = arith.constant 0 : index
    %3 = vector.load %arg13[%c18, %c0_2] : memref<36x64xf32, #tpu.memory_space<vmem>>, vector<1x64xf32>
    tpu.vector_store %arg13[%c18, %c0_2], %0 {strides = array<i32>} : memref<36x64xf32, #tpu.memory_space<vmem>>, vector<1x64xf32>,
    %c35 = arith.constant 35 : index
    %c0_3 = arith.constant 0 : index
    %4 = vector.load %arg13[%c35, %c0_3] : memref<36x64xf32, #tpu.memory_space<vmem>>, vector<1x64xf32>
    tpu.vector_store %arg13[%c35, %c0_3], %0 {strides = array<i32>} : memref<36x64xf32, #tpu.memory_space<vmem>>, vector<1x64xf32>,
    %cst_4 = arith.constant 0.000000e+00 : f32
    %5 = vector.broadcast %cst_4 : f32 to vector<1x176xf32>
    %c0_5 = arith.constant 0 : index
    %c0_6 = arith.constant 0 : index
    %6 = vector.load %arg14[%c0_5, %c0_6] : memref<26x176xf32, #tpu.memory_space<vmem>>, vector<1x176xf32>
    tpu.vector_store %arg14[%c0_5, %c0_6], %5 {strides = array<i32>} : memref<26x176xf32, #tpu.memory_space<vmem>>, vector<1x176xf32>,
    %c12 = arith.constant 12 : index
    %c0_7 = arith.constant 0 : index
    %7 = vector.load %arg14[%c12, %c0_7] : memref<26x176xf32, #tpu.memory_space<vmem>>, vector<1x176xf32>
    tpu.vector_store %arg14[%c12, %c0_7], %5 {strides = array<i32>} : memref<26x176xf32, #tpu.memory_space<vmem>>, vector<1x176xf32>,
    %c13 = arith.constant 13 : index
    %c0_8 = arith.constant 0 : index
    %8 = vector.load %arg14[%c13, %c0_8] : memref<26x176xf32, #tpu.memory_space<vmem>>, vector<1x176xf32>
    tpu.vector_store %arg14[%c13, %c0_8], %5 {strides = array<i32>} : memref<26x176xf32, #tpu.memory_space<vmem>>, vector<1x176xf32>,
    %c25 = arith.constant 25 : index
    %c0_9 = arith.constant 0 : index
    %9 = vector.load %arg14[%c25, %c0_9] : memref<26x176xf32, #tpu.memory_space<vmem>>, vector<1x176xf32>
    tpu.vector_store %arg14[%c25, %c0_9], %5 {strides = array<i32>} : memref<26x176xf32, #tpu.memory_space<vmem>>, vector<1x176xf32>,
    %cst_10 = arith.constant 0.000000e+00 : f32
    %10 = vector.broadcast %cst_10 : f32 to vector<1x320xf32>
    %c0_11 = arith.constant 0 : index
    %c0_12 = arith.constant 0 : index
    %11 = vector.load %arg15[%c0_11, %c0_12] : memref<24x320xf32, #tpu.memory_space<vmem>>, vector<1x320xf32>
    tpu.vector_store %arg15[%c0_11, %c0_12], %10 {strides = array<i32>} : memref<24x320xf32, #tpu.memory_space<vmem>>, vector<1x320xf32>,
    %c11 = arith.constant 11 : index
    %c0_13 = arith.constant 0 : index
    %12 = vector.load %arg15[%c11, %c0_13] : memref<24x320xf32, #tpu.memory_space<vmem>>, vector<1x320xf32>
    tpu.vector_store %arg15[%c11, %c0_13], %10 {strides = array<i32>} : memref<24x320xf32, #tpu.memory_space<vmem>>, vector<1x320xf32>,
    %c12_14 = arith.constant 12 : index
    %c0_15 = arith.constant 0 : index
    %13 = vector.load %arg15[%c12_14, %c0_15] : memref<24x320xf32, #tpu.memory_space<vmem>>, vector<1x320xf32>
    tpu.vector_store %arg15[%c12_14, %c0_15], %10 {strides = array<i32>} : memref<24x320xf32, #tpu.memory_space<vmem>>, vector<1x320xf32>,
    %c23 = arith.constant 23 : index
    %c0_16 = arith.constant 0 : index
    %14 = vector.load %arg15[%c23, %c0_16] : memref<24x320xf32, #tpu.memory_space<vmem>>, vector<1x320xf32>
    tpu.vector_store %arg15[%c23, %c0_16], %10 {strides = array<i32>} : memref<24x320xf32, #tpu.memory_space<vmem>>, vector<1x320xf32>,
    %c0_17 = arith.constant 0 : index
    %c0_18 = arith.constant 0 : index
    %c0_19 = arith.constant 0 : index
    %15 = vector.load %arg1[%c0_17, %c0_18, %c0_19] : memref<2x16x64xf32, #tpu.memory_space<vmem>>, vector<1x16x64xf32>
    %16 = vector.shape_cast %15 : vector<1x16x64xf32> to vector<16x64xf32>
    %c1 = arith.constant 1 : index
    %c0_20 = arith.constant 0 : index
    %17 = vector.load %arg13[%c1, %c0_20] : memref<36x64xf32, #tpu.memory_space<vmem>>, vector<16x64xf32>
    tpu.vector_store %arg13[%c1, %c0_20], %16 {strides = array<i32>} : memref<36x64xf32, #tpu.memory_space<vmem>>, vector<16x64xf32>,
    %c1_21 = arith.constant 1 : index
    %c0_22 = arith.constant 0 : index
    %c0_23 = arith.constant 0 : index
    %18 = vector.load %arg1[%c1_21, %c0_22, %c0_23] : memref<2x16x64xf32, #tpu.memory_space<vmem>>, vector<1x16x64xf32>
    %19 = vector.shape_cast %18 : vector<1x16x64xf32> to vector<16x64xf32>
    %c19 = arith.constant 19 : index
    %c0_24 = arith.constant 0 : index
    %20 = vector.load %arg13[%c19, %c0_24] : memref<36x64xf32, #tpu.memory_space<vmem>>, vector<16x64xf32>
    tpu.vector_store %arg13[%c19, %c0_24], %19 {strides = array<i32>} : memref<36x64xf32, #tpu.memory_space<vmem>>, vector<16x64xf32>,
    %cst_25 = arith.constant 0.000000e+00 : f32
    %21 = vector.broadcast %cst_25 : f32 to vector<29x176xf32>
    %c0_26 = arith.constant 0 : index
    %c0_27 = arith.constant 0 : index
    %22 = vector.load %arg13[%c0_26, %c0_27] : memref<36x64xf32, #tpu.memory_space<vmem>>, vector<29x64xf32>
    %23 = arith.truncf %22 : vector<29x64xf32> to vector<29x64xbf16>
    %c0_28 = arith.constant 0 : index
    %c0_29 = arith.constant 0 : index
    %c0_30 = arith.constant 0 : index
    %24 = vector.load %arg2[%c0_28, %c0_29, %c0_30] : memref<8x64x176xbf16, #tpu.memory_space<vmem>>, vector<1x64x176xbf16>
    %25 = vector.shape_cast %24 : vector<1x64x176xbf16> to vector<64x176xbf16>
    %cst_31 = arith.constant dense<0.000000e+00> : vector<29x176xf32>
    %26 = tpu.matmul %23, %25, %cst_31 {dimension_numbers = #tpu.dot_dimension_numbers<[1], [0], [0], [1], [0, 0, 1, 1], [], []>} : vector<29x64xbf16>, vector<64x176xbf16>, vector<29x176xf32> -> vector<29x176xf32>
    %27 = arith.addf %21, %26 : vector<29x176xf32>
    %c1_32 = arith.constant 1 : index
    %c0_33 = arith.constant 0 : index
    %28 = vector.load %arg13[%c1_32, %c0_33] : memref<36x64xf32, #tpu.memory_space<vmem>>, vector<29x64xf32>
    %29 = arith.truncf %28 : vector<29x64xf32> to vector<29x64xbf16>
    %c1_34 = arith.constant 1 : index
    %c0_35 = arith.constant 0 : index
    %c0_36 = arith.constant 0 : index
    %30 = vector.load %arg2[%c1_34, %c0_35, %c0_36] : memref<8x64x176xbf16, #tpu.memory_space<vmem>>, vector<1x64x176xbf16>
    %31 = vector.shape_cast %30 : vector<1x64x176xbf16> to vector<64x176xbf16>
    %cst_37 = arith.constant dense<0.000000e+00> : vector<29x176xf32>
    %32 = tpu.matmul %29, %31, %cst_37 {dimension_numbers = #tpu.dot_dimension_numbers<[1], [0], [0], [1], [0, 0, 1, 1], [], []>} : vector<29x64xbf16>, vector<64x176xbf16>, vector<29x176xf32> -> vector<29x176xf32>
    %33 = arith.addf %27, %32 : vector<29x176xf32>
    %c2 = arith.constant 2 : index
    %c0_38 = arith.constant 0 : index
    %34 = vector.load %arg13[%c2, %c0_38] : memref<36x64xf32, #tpu.memory_space<vmem>>, vector<29x64xf32>
    %35 = arith.truncf %34 : vector<29x64xf32> to vector<29x64xbf16>
    %c2_39 = arith.constant 2 : index
    %c0_40 = arith.constant 0 : index
    %c0_41 = arith.constant 0 : index
    %36 = vector.load %arg2[%c2_39, %c0_40, %c0_41] : memref<8x64x176xbf16, #tpu.memory_space<vmem>>, vector<1x64x176xbf16>
    %37 = vector.shape_cast %36 : vector<1x64x176xbf16> to vector<64x176xbf16>
    %cst_42 = arith.constant dense<0.000000e+00> : vector<29x176xf32>
    %38 = tpu.matmul %35, %37, %cst_42 {dimension_numbers = #tpu.dot_dimension_numbers<[1], [0], [0], [1], [0, 0, 1, 1], [], []>} : vector<29x64xbf16>, vector<64x176xbf16>, vector<29x176xf32> -> vector<29x176xf32>
    %39 = arith.addf %33, %38 : vector<29x176xf32>
    %c3 = arith.constant 3 : index
    %c0_43 = arith.constant 0 : index
    %40 = vector.load %arg13[%c3, %c0_43] : memref<36x64xf32, #tpu.memory_space<vmem>>, vector<29x64xf32>
    %41 = arith.truncf %40 : vector<29x64xf32> to vector<29x64xbf16>
    %c3_44 = arith.constant 3 : index
    %c0_45 = arith.constant 0 : index
    %c0_46 = arith.constant 0 : index
    %42 = vector.load %arg2[%c3_44, %c0_45, %c0_46] : memref<8x64x176xbf16, #tpu.memory_space<vmem>>, vector<1x64x176xbf16>
    %43 = vector.shape_cast %42 : vector<1x64x176xbf16> to vector<64x176xbf16>
    %cst_47 = arith.constant dense<0.000000e+00> : vector<29x176xf32>
    %44 = tpu.matmul %41, %43, %cst_47 {dimension_numbers = #tpu.dot_dimension_numbers<[1], [0], [0], [1], [0, 0, 1, 1], [], []>} : vector<29x64xbf16>, vector<64x176xbf16>, vector<29x176xf32> -> vector<29x176xf32>
    %45 = arith.addf %39, %44 : vector<29x176xf32>
    %c4 = arith.constant 4 : index
    %c0_48 = arith.constant 0 : index
    %46 = vector.load %arg13[%c4, %c0_48] : memref<36x64xf32, #tpu.memory_space<vmem>>, vector<29x64xf32>
    %47 = arith.truncf %46 : vector<29x64xf32> to vector<29x64xbf16>
    %c4_49 = arith.constant 4 : index
    %c0_50 = arith.constant 0 : index
    %c0_51 = arith.constant 0 : index
    %48 = vector.load %arg2[%c4_49, %c0_50, %c0_51] : memref<8x64x176xbf16, #tpu.memory_space<vmem>>, vector<1x64x176xbf16>
    %49 = vector.shape_cast %48 : vector<1x64x176xbf16> to vector<64x176xbf16>
    %cst_52 = arith.constant dense<0.000000e+00> : vector<29x176xf32>
    %50 = tpu.matmul %47, %49, %cst_52 {dimension_numbers = #tpu.dot_dimension_numbers<[1], [0], [0], [1], [0, 0, 1, 1], [], []>} : vector<29x64xbf16>, vector<64x176xbf16>, vector<29x176xf32> -> vector<29x176xf32>
    %51 = arith.addf %45, %50 : vector<29x176xf32>
    %c5 = arith.constant 5 : index
    %c0_53 = arith.constant 0 : index
    %52 = vector.load %arg13[%c5, %c0_53] : memref<36x64xf32, #tpu.memory_space<vmem>>, vector<29x64xf32>
    %53 = arith.truncf %52 : vector<29x64xf32> to vector<29x64xbf16>
    %c5_54 = arith.constant 5 : index
    %c0_55 = arith.constant 0 : index
    %c0_56 = arith.constant 0 : index
    %54 = vector.load %arg2[%c5_54, %c0_55, %c0_56] : memref<8x64x176xbf16, #tpu.memory_space<vmem>>, vector<1x64x176xbf16>
    %55 = vector.shape_cast %54 : vector<1x64x176xbf16> to vector<64x176xbf16>
    %cst_57 = arith.constant dense<0.000000e+00> : vector<29x176xf32>
    %56 = tpu.matmul %53, %55, %cst_57 {dimension_numbers = #tpu.dot_dimension_numbers<[1], [0], [0], [1], [0, 0, 1, 1], [], []>} : vector<29x64xbf16>, vector<64x176xbf16>, vector<29x176xf32> -> vector<29x176xf32>
    %57 = arith.addf %51, %56 : vector<29x176xf32>
    %c6 = arith.constant 6 : index
    %c0_58 = arith.constant 0 : index
    %58 = vector.load %arg13[%c6, %c0_58] : memref<36x64xf32, #tpu.memory_space<vmem>>, vector<29x64xf32>
    %59 = arith.truncf %58 : vector<29x64xf32> to vector<29x64xbf16>
    %c6_59 = arith.constant 6 : index
    %c0_60 = arith.constant 0 : index
    %c0_61 = arith.constant 0 : index
    %60 = vector.load %arg2[%c6_59, %c0_60, %c0_61] : memref<8x64x176xbf16, #tpu.memory_space<vmem>>, vector<1x64x176xbf16>
    %61 = vector.shape_cast %60 : vector<1x64x176xbf16> to vector<64x176xbf16>
    %cst_62 = arith.constant dense<0.000000e+00> : vector<29x176xf32>
    %62 = tpu.matmul %59, %61, %cst_62 {dimension_numbers = #tpu.dot_dimension_numbers<[1], [0], [0], [1], [0, 0, 1, 1], [], []>} : vector<29x64xbf16>, vector<64x176xbf16>, vector<29x176xf32> -> vector<29x176xf32>
    %63 = arith.addf %57, %62 : vector<29x176xf32>
    %c7 = arith.constant 7 : index
    %c0_63 = arith.constant 0 : index
    %64 = vector.load %arg13[%c7, %c0_63] : memref<36x64xf32, #tpu.memory_space<vmem>>, vector<29x64xf32>
    %65 = arith.truncf %64 : vector<29x64xf32> to vector<29x64xbf16>
    %c7_64 = arith.constant 7 : index
    %c0_65 = arith.constant 0 : index
    %c0_66 = arith.constant 0 : index
    %66 = vector.load %arg2[%c7_64, %c0_65, %c0_66] : memref<8x64x176xbf16, #tpu.memory_space<vmem>>, vector<1x64x176xbf16>
    %67 = vector.shape_cast %66 : vector<1x64x176xbf16> to vector<64x176xbf16>
    %cst_67 = arith.constant dense<0.000000e+00> : vector<29x176xf32>
    %68 = tpu.matmul %65, %67, %cst_67 {dimension_numbers = #tpu.dot_dimension_numbers<[1], [0], [0], [1], [0, 0, 1, 1], [], []>} : vector<29x64xbf16>, vector<64x176xbf16>, vector<29x176xf32> -> vector<29x176xf32>
    %69 = arith.addf %63, %68 : vector<29x176xf32>
    %c0_68 = arith.constant 0 : index
    %c0_69 = arith.constant 0 : index
    %70 = vector.load %arg3[%c0_68, %c0_69] : memref<1x176xf32, #tpu.memory_space<vmem>>, vector<1x176xf32>
    %71 = vector.broadcast %70 : vector<1x176xf32> to vector<29x176xf32>
    %72 = arith.addf %69, %71 : vector<29x176xf32>
    %cst_70 = arith.constant 0.000000e+00 : f32
    %73 = vector.broadcast %cst_70 : f32 to vector<29x176xf32>
    %74 = arith.maximumf %72, %73 : vector<29x176xf32>
    %75 = vector.extract_strided_slice %74 {offsets = [0, 0], sizes = [11, 176], strides = [1, 1]} : vector<29x176xf32> to vector<11x176xf32>
    %c1_71 = arith.constant 1 : index
    %c0_72 = arith.constant 0 : index
    %76 = vector.load %arg14[%c1_71, %c0_72] : memref<26x176xf32, #tpu.memory_space<vmem>>, vector<11x176xf32>
    tpu.vector_store %arg14[%c1_71, %c0_72], %75 {strides = array<i32>} : memref<26x176xf32, #tpu.memory_space<vmem>>, vector<11x176xf32>,
    %77 = vector.extract_strided_slice %74 {offsets = [18, 0], sizes = [11, 176], strides = [1, 1]} : vector<29x176xf32> to vector<11x176xf32>
    %c14 = arith.constant 14 : index
    %c0_73 = arith.constant 0 : index
    %78 = vector.load %arg14[%c14, %c0_73] : memref<26x176xf32, #tpu.memory_space<vmem>>, vector<11x176xf32>
    tpu.vector_store %arg14[%c14, %c0_73], %77 {strides = array<i32>} : memref<26x176xf32, #tpu.memory_space<vmem>>, vector<11x176xf32>,
    %cst_74 = arith.constant 0.000000e+00 : f32
    %79 = vector.broadcast %cst_74 : f32 to vector<23x320xf32>
    %c0_75 = arith.constant 0 : index
    %c0_76 = arith.constant 0 : index
    %80 = vector.load %arg14[%c0_75, %c0_76] : memref<26x176xf32, #tpu.memory_space<vmem>>, vector<23x176xf32>
    %81 = arith.truncf %80 : vector<23x176xf32> to vector<23x176xbf16>
    %c0_77 = arith.constant 0 : index
    %c0_78 = arith.constant 0 : index
    %c0_79 = arith.constant 0 : index
    %82 = vector.load %arg4[%c0_77, %c0_78, %c0_79] : memref<4x176x320xbf16, #tpu.memory_space<vmem>>, vector<1x176x320xbf16>
    %83 = vector.shape_cast %82 : vector<1x176x320xbf16> to vector<176x320xbf16>
    %cst_80 = arith.constant dense<0.000000e+00> : vector<23x320xf32>
    %84 = tpu.matmul %81, %83, %cst_80 {dimension_numbers = #tpu.dot_dimension_numbers<[1], [0], [0], [1], [0, 0, 1, 1], [], []>} : vector<23x176xbf16>, vector<176x320xbf16>, vector<23x320xf32> -> vector<23x320xf32>
    %85 = arith.addf %79, %84 : vector<23x320xf32>
    %c1_81 = arith.constant 1 : index
    %c0_82 = arith.constant 0 : index
    %86 = vector.load %arg14[%c1_81, %c0_82] : memref<26x176xf32, #tpu.memory_space<vmem>>, vector<23x176xf32>
    %87 = arith.truncf %86 : vector<23x176xf32> to vector<23x176xbf16>
    %c1_83 = arith.constant 1 : index
    %c0_84 = arith.constant 0 : index
    %c0_85 = arith.constant 0 : index
    %88 = vector.load %arg4[%c1_83, %c0_84, %c0_85] : memref<4x176x320xbf16, #tpu.memory_space<vmem>>, vector<1x176x320xbf16>
    %89 = vector.shape_cast %88 : vector<1x176x320xbf16> to vector<176x320xbf16>
    %cst_86 = arith.constant dense<0.000000e+00> : vector<23x320xf32>
    %90 = tpu.matmul %87, %89, %cst_86 {dimension_numbers = #tpu.dot_dimension_numbers<[1], [0], [0], [1], [0, 0, 1, 1], [], []>} : vector<23x176xbf16>, vector<176x320xbf16>, vector<23x320xf32> -> vector<23x320xf32>
    %91 = arith.addf %85, %90 : vector<23x320xf32>
    %c2_87 = arith.constant 2 : index
    %c0_88 = arith.constant 0 : index
    %92 = vector.load %arg14[%c2_87, %c0_88] : memref<26x176xf32, #tpu.memory_space<vmem>>, vector<23x176xf32>
    %93 = arith.truncf %92 : vector<23x176xf32> to vector<23x176xbf16>
    %c2_89 = arith.constant 2 : index
    %c0_90 = arith.constant 0 : index
    %c0_91 = arith.constant 0 : index
    %94 = vector.load %arg4[%c2_89, %c0_90, %c0_91] : memref<4x176x320xbf16, #tpu.memory_space<vmem>>, vector<1x176x320xbf16>
    %95 = vector.shape_cast %94 : vector<1x176x320xbf16> to vector<176x320xbf16>
    %cst_92 = arith.constant dense<0.000000e+00> : vector<23x320xf32>
    %96 = tpu.matmul %93, %95, %cst_92 {dimension_numbers = #tpu.dot_dimension_numbers<[1], [0], [0], [1], [0, 0, 1, 1], [], []>} : vector<23x176xbf16>, vector<176x320xbf16>, vector<23x320xf32> -> vector<23x320xf32>
    %97 = arith.addf %91, %96 : vector<23x320xf32>
    %c3_93 = arith.constant 3 : index
    %c0_94 = arith.constant 0 : index
    %98 = vector.load %arg14[%c3_93, %c0_94] : memref<26x176xf32, #tpu.memory_space<vmem>>, vector<23x176xf32>
    %99 = arith.truncf %98 : vector<23x176xf32> to vector<23x176xbf16>
    %c3_95 = arith.constant 3 : index
    %c0_96 = arith.constant 0 : index
    %c0_97 = arith.constant 0 : index
    %100 = vector.load %arg4[%c3_95, %c0_96, %c0_97] : memref<4x176x320xbf16, #tpu.memory_space<vmem>>, vector<1x176x320xbf16>
    %101 = vector.shape_cast %100 : vector<1x176x320xbf16> to vector<176x320xbf16>
    %cst_98 = arith.constant dense<0.000000e+00> : vector<23x320xf32>
    %102 = tpu.matmul %99, %101, %cst_98 {dimension_numbers = #tpu.dot_dimension_numbers<[1], [0], [0], [1], [0, 0, 1, 1], [], []>} : vector<23x176xbf16>, vector<176x320xbf16>, vector<23x320xf32> -> vector<23x320xf32>
    %103 = arith.addf %97, %102 : vector<23x320xf32>
    %c0_99 = arith.constant 0 : index
    %c0_100 = arith.constant 0 : index
    %104 = vector.load %arg5[%c0_99, %c0_100] : memref<1x320xf32, #tpu.memory_space<vmem>>, vector<1x320xf32>
    %105 = vector.broadcast %104 : vector<1x320xf32> to vector<23x320xf32>
    %106 = arith.addf %103, %105 : vector<23x320xf32>
    %cst_101 = arith.constant 0.000000e+00 : f32
    %107 = vector.broadcast %cst_101 : f32 to vector<23x320xf32>
    %108 = arith.maximumf %106, %107 : vector<23x320xf32>
    %109 = vector.extract_strided_slice %108 {offsets = [0, 0], sizes = [10, 320], strides = [1, 1]} : vector<23x320xf32> to vector<10x320xf32>
    %c1_102 = arith.constant 1 : index
    %c0_103 = arith.constant 0 : index
    %110 = vector.load %arg15[%c1_102, %c0_103] : memref<24x320xf32, #tpu.memory_space<vmem>>, vector<10x320xf32>
    tpu.vector_store %arg15[%c1_102, %c0_103], %109 {strides = array<i32>} : memref<24x320xf32, #tpu.memory_space<vmem>>, vector<10x320xf32>,
    %111 = vector.extract_strided_slice %108 {offsets = [13, 0], sizes = [10, 320], strides = [1, 1]} : vector<23x320xf32> to vector<10x320xf32>
    %c13_104 = arith.constant 13 : index
    %c0_105 = arith.constant 0 : index
    %112 = vector.load %arg15[%c13_104, %c0_105] : memref<24x320xf32, #tpu.memory_space<vmem>>, vector<10x320xf32>
    tpu.vector_store %arg15[%c13_104, %c0_105], %111 {strides = array<i32>} : memref<24x320xf32, #tpu.memory_space<vmem>>, vector<10x320xf32>,
    %cst_106 = arith.constant 0.000000e+00 : f32
    %113 = vector.broadcast %cst_106 : f32 to vector<22x640xf32>
    %c0_107 = arith.constant 0 : index
    %c0_108 = arith.constant 0 : index
    %114 = vector.load %arg15[%c0_107, %c0_108] : memref<24x320xf32, #tpu.memory_space<vmem>>, vector<22x320xf32>
    %115 = arith.truncf %114 : vector<22x320xf32> to vector<22x320xbf16>
    %c0_109 = arith.constant 0 : index
    %c0_110 = arith.constant 0 : index
    %c0_111 = arith.constant 0 : index
    %116 = vector.load %arg6[%c0_109, %c0_110, %c0_111] : memref<3x320x640xbf16, #tpu.memory_space<vmem>>, vector<1x320x640xbf16>
    %117 = vector.shape_cast %116 : vector<1x320x640xbf16> to vector<320x640xbf16>
    %cst_112 = arith.constant dense<0.000000e+00> : vector<22x640xf32>
    %118 = tpu.matmul %115, %117, %cst_112 {dimension_numbers = #tpu.dot_dimension_numbers<[1], [0], [0], [1], [0, 0, 1, 1], [], []>} : vector<22x320xbf16>, vector<320x640xbf16>, vector<22x640xf32> -> vector<22x640xf32>
    %119 = arith.addf %113, %118 : vector<22x640xf32>
    %c1_113 = arith.constant 1 : index
    %c0_114 = arith.constant 0 : index
    %120 = vector.load %arg15[%c1_113, %c0_114] : memref<24x320xf32, #tpu.memory_space<vmem>>, vector<22x320xf32>
    %121 = arith.truncf %120 : vector<22x320xf32> to vector<22x320xbf16>
    %c1_115 = arith.constant 1 : index
    %c0_116 = arith.constant 0 : index
    %c0_117 = arith.constant 0 : index
    %122 = vector.load %arg6[%c1_115, %c0_116, %c0_117] : memref<3x320x640xbf16, #tpu.memory_space<vmem>>, vector<1x320x640xbf16>
    %123 = vector.shape_cast %122 : vector<1x320x640xbf16> to vector<320x640xbf16>
    %cst_118 = arith.constant dense<0.000000e+00> : vector<22x640xf32>
    %124 = tpu.matmul %121, %123, %cst_118 {dimension_numbers = #tpu.dot_dimension_numbers<[1], [0], [0], [1], [0, 0, 1, 1], [], []>} : vector<22x320xbf16>, vector<320x640xbf16>, vector<22x640xf32> -> vector<22x640xf32>
    %125 = arith.addf %119, %124 : vector<22x640xf32>
    %c2_119 = arith.constant 2 : index
    %c0_120 = arith.constant 0 : index
    %126 = vector.load %arg15[%c2_119, %c0_120] : memref<24x320xf32, #tpu.memory_space<vmem>>, vector<22x320xf32>
    %127 = arith.truncf %126 : vector<22x320xf32> to vector<22x320xbf16>
    %c2_121 = arith.constant 2 : index
    %c0_122 = arith.constant 0 : index
    %c0_123 = arith.constant 0 : index
    %128 = vector.load %arg6[%c2_121, %c0_122, %c0_123] : memref<3x320x640xbf16, #tpu.memory_space<vmem>>, vector<1x320x640xbf16>
    %129 = vector.shape_cast %128 : vector<1x320x640xbf16> to vector<320x640xbf16>
    %cst_124 = arith.constant dense<0.000000e+00> : vector<22x640xf32>
    %130 = tpu.matmul %127, %129, %cst_124 {dimension_numbers = #tpu.dot_dimension_numbers<[1], [0], [0], [1], [0, 0, 1, 1], [], []>} : vector<22x320xbf16>, vector<320x640xbf16>, vector<22x640xf32> -> vector<22x640xf32>
    %131 = arith.addf %125, %130 : vector<22x640xf32>
    %c0_125 = arith.constant 0 : index
    %c0_126 = arith.constant 0 : index
    %132 = vector.load %arg7[%c0_125, %c0_126] : memref<1x640xf32, #tpu.memory_space<vmem>>, vector<1x640xf32>
    %133 = vector.broadcast %132 : vector<1x640xf32> to vector<22x640xf32>
    %134 = arith.addf %131, %133 : vector<22x640xf32>
    %cst_127 = arith.constant 0.000000e+00 : f32
    %135 = vector.broadcast %cst_127 : f32 to vector<22x640xf32>
    %136 = arith.maximumf %134, %135 : vector<22x640xf32>
    %137 = vector.extract_strided_slice %136 {offsets = [0, 0], sizes = [1, 640], strides = [1, 1]} : vector<22x640xf32> to vector<1x640xf32>
    %c0_128 = arith.constant 0 : index
    %c0_129 = arith.constant 0 : index
    %138 = vector.load %arg16[%c0_128, %c0_129] : memref<2x6400xf32, #tpu.memory_space<vmem>>, vector<1x640xf32>
    tpu.vector_store %arg16[%c0_128, %c0_129], %137 {strides = array<i32>} : memref<2x6400xf32, #tpu.memory_space<vmem>>, vector<1x640xf32>,
    %139 = vector.extract_strided_slice %136 {offsets = [1, 0], sizes = [1, 640], strides = [1, 1]} : vector<22x640xf32> to vector<1x640xf32>
    %c0_130 = arith.constant 0 : index
    %c640 = arith.constant 640 : index
    %140 = vector.load %arg16[%c0_130, %c640] : memref<2x6400xf32, #tpu.memory_space<vmem>>, vector<1x640xf32>
    tpu.vector_store %arg16[%c0_130, %c640], %139 {strides = array<i32>} : memref<2x6400xf32, #tpu.memory_space<vmem>>, vector<1x640xf32>,
    %141 = vector.extract_strided_slice %136 {offsets = [2, 0], sizes = [1, 640], strides = [1, 1]} : vector<22x640xf32> to vector<1x640xf32>
    %c0_131 = arith.constant 0 : index
    %c1280 = arith.constant 1280 : index
    %142 = vector.load %arg16[%c0_131, %c1280] : memref<2x6400xf32, #tpu.memory_space<vmem>>, vector<1x640xf32>
    tpu.vector_store %arg16[%c0_131, %c1280], %141 {strides = array<i32>} : memref<2x6400xf32, #tpu.memory_space<vmem>>, vector<1x640xf32>,
    %143 = vector.extract_strided_slice %136 {offsets = [3, 0], sizes = [1, 640], strides = [1, 1]} : vector<22x640xf32> to vector<1x640xf32>
    %c0_132 = arith.constant 0 : index
    %c1920 = arith.constant 1920 : index
    %144 = vector.load %arg16[%c0_132, %c1920] : memref<2x6400xf32, #tpu.memory_space<vmem>>, vector<1x640xf32>
    tpu.vector_store %arg16[%c0_132, %c1920], %143 {strides = array<i32>} : memref<2x6400xf32, #tpu.memory_space<vmem>>, vector<1x640xf32>,
    %145 = vector.extract_strided_slice %136 {offsets = [4, 0], sizes = [1, 640], strides = [1, 1]} : vector<22x640xf32> to vector<1x640xf32>
    %c0_133 = arith.constant 0 : index
    %c2560 = arith.constant 2560 : index
    %146 = vector.load %arg16[%c0_133, %c2560] : memref<2x6400xf32, #tpu.memory_space<vmem>>, vector<1x640xf32>
    tpu.vector_store %arg16[%c0_133, %c2560], %145 {strides = array<i32>} : memref<2x6400xf32, #tpu.memory_space<vmem>>, vector<1x640xf32>,
    %147 = vector.extract_strided_slice %136 {offsets = [5, 0], sizes = [1, 640], strides = [1, 1]} : vector<22x640xf32> to vector<1x640xf32>
    %c0_134 = arith.constant 0 : index
    %c3200 = arith.constant 3200 : index
    %148 = vector.load %arg16[%c0_134, %c3200] : memref<2x6400xf32, #tpu.memory_space<vmem>>, vector<1x640xf32>
    tpu.vector_store %arg16[%c0_134, %c3200], %147 {strides = array<i32>} : memref<2x6400xf32, #tpu.memory_space<vmem>>, vector<1x640xf32>,
    %149 = vector.extract_strided_slice %136 {offsets = [6, 0], sizes = [1, 640], strides = [1, 1]} : vector<22x640xf32> to vector<1x640xf32>
    %c0_135 = arith.constant 0 : index
    %c3840 = arith.constant 3840 : index
    %150 = vector.load %arg16[%c0_135, %c3840] : memref<2x6400xf32, #tpu.memory_space<vmem>>, vector<1x640xf32>
    tpu.vector_store %arg16[%c0_135, %c3840], %149 {strides = array<i32>} : memref<2x6400xf32, #tpu.memory_space<vmem>>, vector<1x640xf32>,
    %151 = vector.extract_strided_slice %136 {offsets = [7, 0], sizes = [1, 640], strides = [1, 1]} : vector<22x640xf32> to vector<1x640xf32>
    %c0_136 = arith.constant 0 : index
    %c4480 = arith.constant 4480 : index
    %152 = vector.load %arg16[%c0_136, %c4480] : memref<2x6400xf32, #tpu.memory_space<vmem>>, vector<1x640xf32>
    tpu.vector_store %arg16[%c0_136, %c4480], %151 {strides = array<i32>} : memref<2x6400xf32, #tpu.memory_space<vmem>>, vector<1x640xf32>,
    %153 = vector.extract_strided_slice %136 {offsets = [8, 0], sizes = [1, 640], strides = [1, 1]} : vector<22x640xf32> to vector<1x640xf32>
    %c0_137 = arith.constant 0 : index
    %c5120 = arith.constant 5120 : index
    %154 = vector.load %arg16[%c0_137, %c5120] : memref<2x6400xf32, #tpu.memory_space<vmem>>, vector<1x640xf32>
    tpu.vector_store %arg16[%c0_137, %c5120], %153 {strides = array<i32>} : memref<2x6400xf32, #tpu.memory_space<vmem>>, vector<1x640xf32>,
    %155 = vector.extract_strided_slice %136 {offsets = [9, 0], sizes = [1, 640], strides = [1, 1]} : vector<22x640xf32> to vector<1x640xf32>
    %c0_138 = arith.constant 0 : index
    %c5760 = arith.constant 5760 : index
    %156 = vector.load %arg16[%c0_138, %c5760] : memref<2x6400xf32, #tpu.memory_space<vmem>>, vector<1x640xf32>
    tpu.vector_store %arg16[%c0_138, %c5760], %155 {strides = array<i32>} : memref<2x6400xf32, #tpu.memory_space<vmem>>, vector<1x640xf32>,
    %157 = vector.extract_strided_slice %136 {offsets = [12, 0], sizes = [1, 640], strides = [1, 1]} : vector<22x640xf32> to vector<1x640xf32>
    %c1_139 = arith.constant 1 : index
    %c0_140 = arith.constant 0 : index
    %158 = vector.load %arg16[%c1_139, %c0_140] : memref<2x6400xf32, #tpu.memory_space<vmem>>, vector<1x640xf32>
    tpu.vector_store %arg16[%c1_139, %c0_140], %157 {strides = array<i32>} : memref<2x6400xf32, #tpu.memory_space<vmem>>, vector<1x640xf32>,
    %159 = vector.extract_strided_slice %136 {offsets = [13, 0], sizes = [1, 640], strides = [1, 1]} : vector<22x640xf32> to vector<1x640xf32>
    %c1_141 = arith.constant 1 : index
    %c640_142 = arith.constant 640 : index
    %160 = vector.load %arg16[%c1_141, %c640_142] : memref<2x6400xf32, #tpu.memory_space<vmem>>, vector<1x640xf32>
    tpu.vector_store %arg16[%c1_141, %c640_142], %159 {strides = array<i32>} : memref<2x6400xf32, #tpu.memory_space<vmem>>, vector<1x640xf32>,
    %161 = vector.extract_strided_slice %136 {offsets = [14, 0], sizes = [1, 640], strides = [1, 1]} : vector<22x640xf32> to vector<1x640xf32>
    %c1_143 = arith.constant 1 : index
    %c1280_144 = arith.constant 1280 : index
    %162 = vector.load %arg16[%c1_143, %c1280_144] : memref<2x6400xf32, #tpu.memory_space<vmem>>, vector<1x640xf32>
    tpu.vector_store %arg16[%c1_143, %c1280_144], %161 {strides = array<i32>} : memref<2x6400xf32, #tpu.memory_space<vmem>>, vector<1x640xf32>,
    %163 = vector.extract_strided_slice %136 {offsets = [15, 0], sizes = [1, 640], strides = [1, 1]} : vector<22x640xf32> to vector<1x640xf32>
    %c1_145 = arith.constant 1 : index
    %c1920_146 = arith.constant 1920 : index
    %164 = vector.load %arg16[%c1_145, %c1920_146] : memref<2x6400xf32, #tpu.memory_space<vmem>>, vector<1x640xf32>
    tpu.vector_store %arg16[%c1_145, %c1920_146], %163 {strides = array<i32>} : memref<2x6400xf32, #tpu.memory_space<vmem>>, vector<1x640xf32>,
    %165 = vector.extract_strided_slice %136 {offsets = [16, 0], sizes = [1, 640], strides = [1, 1]} : vector<22x640xf32> to vector<1x640xf32>
    %c1_147 = arith.constant 1 : index
    %c2560_148 = arith.constant 2560 : index
    %166 = vector.load %arg16[%c1_147, %c2560_148] : memref<2x6400xf32, #tpu.memory_space<vmem>>, vector<1x640xf32>
    tpu.vector_store %arg16[%c1_147, %c2560_148], %165 {strides = array<i32>} : memref<2x6400xf32, #tpu.memory_space<vmem>>, vector<1x640xf32>,
    %167 = vector.extract_strided_slice %136 {offsets = [17, 0], sizes = [1, 640], strides = [1, 1]} : vector<22x640xf32> to vector<1x640xf32>
    %c1_149 = arith.constant 1 : index
    %c3200_150 = arith.constant 3200 : index
    %168 = vector.load %arg16[%c1_149, %c3200_150] : memref<2x6400xf32, #tpu.memory_space<vmem>>, vector<1x640xf32>
    tpu.vector_store %arg16[%c1_149, %c3200_150], %167 {strides = array<i32>} : memref<2x6400xf32, #tpu.memory_space<vmem>>, vector<1x640xf32>,
    %169 = vector.extract_strided_slice %136 {offsets = [18, 0], sizes = [1, 640], strides = [1, 1]} : vector<22x640xf32> to vector<1x640xf32>
    %c1_151 = arith.constant 1 : index
    %c3840_152 = arith.constant 3840 : index
    %170 = vector.load %arg16[%c1_151, %c3840_152] : memref<2x6400xf32, #tpu.memory_space<vmem>>, vector<1x640xf32>
    tpu.vector_store %arg16[%c1_151, %c3840_152], %169 {strides = array<i32>} : memref<2x6400xf32, #tpu.memory_space<vmem>>, vector<1x640xf32>,
    %171 = vector.extract_strided_slice %136 {offsets = [19, 0], sizes = [1, 640], strides = [1, 1]} : vector<22x640xf32> to vector<1x640xf32>
    %c1_153 = arith.constant 1 : index
    %c4480_154 = arith.constant 4480 : index
    %172 = vector.load %arg16[%c1_153, %c4480_154] : memref<2x6400xf32, #tpu.memory_space<vmem>>, vector<1x640xf32>
    tpu.vector_store %arg16[%c1_153, %c4480_154], %171 {strides = array<i32>} : memref<2x6400xf32, #tpu.memory_space<vmem>>, vector<1x640xf32>,
    %173 = vector.extract_strided_slice %136 {offsets = [20, 0], sizes = [1, 640], strides = [1, 1]} : vector<22x640xf32> to vector<1x640xf32>
    %c1_155 = arith.constant 1 : index
    %c5120_156 = arith.constant 5120 : index
    %174 = vector.load %arg16[%c1_155, %c5120_156] : memref<2x6400xf32, #tpu.memory_space<vmem>>, vector<1x640xf32>
    tpu.vector_store %arg16[%c1_155, %c5120_156], %173 {strides = array<i32>} : memref<2x6400xf32, #tpu.memory_space<vmem>>, vector<1x640xf32>,
    %175 = vector.extract_strided_slice %136 {offsets = [21, 0], sizes = [1, 640], strides = [1, 1]} : vector<22x640xf32> to vector<1x640xf32>
    %c1_157 = arith.constant 1 : index
    %c5760_158 = arith.constant 5760 : index
    %176 = vector.load %arg16[%c1_157, %c5760_158] : memref<2x6400xf32, #tpu.memory_space<vmem>>, vector<1x640xf32>
    tpu.vector_store %arg16[%c1_157, %c5760_158], %175 {strides = array<i32>} : memref<2x6400xf32, #tpu.memory_space<vmem>>, vector<1x640xf32>,
    %c0_159 = arith.constant 0 : index
    %c0_160 = arith.constant 0 : index
    %177 = vector.load %arg16[%c0_159, %c0_160] : memref<2x6400xf32, #tpu.memory_space<vmem>>, vector<2x6400xf32>
    %178 = arith.truncf %177 : vector<2x6400xf32> to vector<2x6400xbf16>
    %c0_161 = arith.constant 0 : index
    %c0_162 = arith.constant 0 : index
    %179 = vector.load %arg8[%c0_161, %c0_162] : memref<6400x32xbf16, #tpu.memory_space<vmem>>, vector<6400x32xbf16>
    %cst_163 = arith.constant dense<0.000000e+00> : vector<2x32xf32>
    %180 = tpu.matmul %178, %179, %cst_163 {dimension_numbers = #tpu.dot_dimension_numbers<[1], [0], [0], [1], [0, 0, 1, 1], [], []>} : vector<2x6400xbf16>, vector<6400x32xbf16>, vector<2x32xf32> -> vector<2x32xf32>
    %c0_164 = arith.constant 0 : index
    %c0_165 = arith.constant 0 : index
    %181 = vector.load %arg9[%c0_164, %c0_165] : memref<1x32xf32, #tpu.memory_space<vmem>>, vector<1x32xf32>
    %182 = vector.broadcast %181 : vector<1x32xf32> to vector<2x32xf32>
    %183 = arith.addf %180, %182 : vector<2x32xf32>
    %cst_166 = arith.constant 0.000000e+00 : f32
    %184 = vector.broadcast %cst_166 : f32 to vector<2x32xf32>
    %185 = arith.maximumf %183, %184 : vector<2x32xf32>
    %186 = arith.truncf %185 : vector<2x32xf32> to vector<2x32xbf16>
    %c0_167 = arith.constant 0 : index
    %c0_168 = arith.constant 0 : index
    %187 = vector.load %arg10[%c0_167, %c0_168] : memref<32x6xbf16, #tpu.memory_space<vmem>>, vector<32x6xbf16>
    %cst_169 = arith.constant dense<0.000000e+00> : vector<2x6xf32>
    %188 = tpu.matmul %186, %187, %cst_169 {dimension_numbers = #tpu.dot_dimension_numbers<[1], [0], [0], [1], [0, 0, 1, 1], [], []>} : vector<2x32xbf16>, vector<32x6xbf16>, vector<2x6xf32> -> vector<2x6xf32>
    %c0_170 = arith.constant 0 : index
    %c0_171 = arith.constant 0 : index
    %189 = vector.load %arg11[%c0_170, %c0_171] : memref<1x6xf32, #tpu.memory_space<vmem>>, vector<1x6xf32>
    %190 = vector.broadcast %189 : vector<1x6xf32> to vector<2x6xf32>
    %191 = arith.addf %188, %190 : vector<2x6xf32>
    %c0_172 = arith.constant 0 : index
    %c0_173 = arith.constant 0 : index
    %192 = vector.load %arg12[%c0_172, %c0_173] : memref<2x6xf32, #tpu.memory_space<vmem>>, vector<2x6xf32>
    tpu.vector_store %arg12[%c0_172, %c0_173], %191 {strides = array<i32>} : memref<2x6xf32, #tpu.memory_space<vmem>>, vector<2x6xf32>,
    return
  }
  func.func @transform_0(%arg0: i32) -> (i32, i32, i32) {
    %c0_i32 = arith.constant 0 : i32
    %c0_i32_0 = arith.constant 0 : i32
    %c0_i32_1 = arith.constant 0 : i32
    %c0_i32_2 = arith.constant 0 : i32
    return %c0_i32, %c0_i32_0, %c0_i32_1 : i32, i32, i32
  }
  func.func @transform_1(%arg0: i32) -> (i32, i32, i32) {
    %c0_i32 = arith.constant 0 : i32
    %c0_i32_0 = arith.constant 0 : i32
    %c0_i32_1 = arith.constant 0 : i32
    %c0_i32_2 = arith.constant 0 : i32
    return %c0_i32, %c0_i32_0, %c0_i32_1 : i32, i32, i32
  }
  func.func @transform_2(%arg0: i32) -> (i32, i32) {
    %c0_i32 = arith.constant 0 : i32
    %c0_i32_0 = arith.constant 0 : i32
    %c0_i32_1 = arith.constant 0 : i32
    return %c0_i32, %c0_i32_0 : i32, i32
  }
  func.func @transform_3(%arg0: i32) -> (i32, i32, i32) {
    %c0_i32 = arith.constant 0 : i32
    %c0_i32_0 = arith.constant 0 : i32
    %c0_i32_1 = arith.constant 0 : i32
    %c0_i32_2 = arith.constant 0 : i32
    return %c0_i32, %c0_i32_0, %c0_i32_1 : i32, i32, i32
  }
  func.func @transform_4(%arg0: i32) -> (i32, i32) {
    %c0_i32 = arith.constant 0 : i32
    %c0_i32_0 = arith.constant 0 : i32
    %c0_i32_1 = arith.constant 0 : i32
    return %c0_i32, %c0_i32_0 : i32, i32
  }
  func.func @transform_5(%arg0: i32) -> (i32, i32, i32) {
    %c0_i32 = arith.constant 0 : i32
    %c0_i32_0 = arith.constant 0 : i32
    %c0_i32_1 = arith.constant 0 : i32
    %c0_i32_2 = arith.constant 0 : i32
    return %c0_i32, %c0_i32_0, %c0_i32_1 : i32, i32, i32
  }
  func.func @transform_6(%arg0: i32) -> (i32, i32) {
    %c0_i32 = arith.constant 0 : i32
    %c0_i32_0 = arith.constant 0 : i32
    %c0_i32_1 = arith.constant 0 : i32
    return %c0_i32, %c0_i32_0 : i32, i32
  }
  func.func @transform_7(%arg0: i32) -> (i32, i32) {
    %c0_i32 = arith.constant 0 : i32
    %c0_i32_0 = arith.constant 0 : i32
    %c0_i32_1 = arith.constant 0 : i32
    return %c0_i32, %c0_i32_0 : i32, i32
  }
  func.func @transform_8(%arg0: i32) -> (i32, i32) {
    %c0_i32 = arith.constant 0 : i32
    %c0_i32_0 = arith.constant 0 : i32
    %c0_i32_1 = arith.constant 0 : i32
    return %c0_i32, %c0_i32_0 : i32, i32
  }
  func.func @transform_9(%arg0: i32) -> (i32, i32) {
    %c0_i32 = arith.constant 0 : i32
    %c0_i32_0 = arith.constant 0 : i32
    %c0_i32_1 = arith.constant 0 : i32
    return %c0_i32, %c0_i32_0 : i32, i32
  }
  func.func @transform_10(%arg0: i32) -> (i32, i32) {
    %c0_i32 = arith.constant 0 : i32
    %c0_i32_0 = arith.constant 0 : i32
    %c0_i32_1 = arith.constant 0 : i32
    return %c0_i32, %c0_i32_0 : i32, i32
  }
  func.func @transform_11(%arg0: i32) -> (i32, i32) {
    %c0_i32 = arith.constant 0 : i32
    %c0_i32_0 = arith.constant 0 : i32
    %c0_i32_1 = arith.constant 0 : i32
    return %c0_i32, %c0_i32_0 : i32, i32
  }
}

</mosaic_0001>

<bundles_post_ra>
// kernel: qnetwork_forward.1
= control target key start
LH: loop header
LB: loop body
LE: loop exit
PB: predicated region body
PF: predicated region fallthrough
CT: control target
= control target key end

     0   :  { %vm75_vm0 = vcmask 523264   ;;  %vm40_vm1 = vcmask 516096   ;;  %v14810_v53 = vmov 0.0   ;;  %s20393_s0 = inlined_call_operand.vmem [shape: f32[2,16,64], index: 0, kind: input, shape index: {}]   ;;  %s20394_s1 = inlined_call_operand.vmem [shape: bf16[8,64,176], index: 1, kind: input, shape index: {}]   ;;  %s20395_s2 = inlined_call_operand.vmem [shape: f32[1,176], index: 2, kind: input, shape index: {}]   ;;  %s20396_s3 = inlined_call_operand.vmem [shape: bf16[4,176,320], index: 3, kind: input, shape index: {}]   ;;  %s20397_s4 = inlined_call_operand.vmem [shape: f32[1,320], index: 4, kind: input, shape index: {}]   ;;  %s20398_s5 = inlined_call_operand.vmem [shape: bf16[3,320,640], index: 5, kind: input, shape index: {}]   ;;  %s20399_s6 = inlined_call_operand.vmem [shape: f32[1,640], index: 6, kind: input, shape index: {}]   ;;  %s20400_s7 = inlined_call_operand.vmem [shape: bf16[6400,32], index: 7, kind: input, shape index: {}]   ;;  %s20401_s8 = inlined_call_operand.vmem [shape: f32[1,32], index: 8, kind: input, shape index: {}]   ;;  %s20402_s9 = inlined_call_operand.vmem [shape: bf16[32,6], index: 9, kind: input, shape index: {}]   ;;  %s20403_s10 = inlined_call_operand.vmem [shape: f32[1,6], index: 10, kind: input, shape index: {}]   ;;  %s20404_s11 = inlined_call_operand.hbm [shape: f32[2,6], index: 11, kind: output, shape index: {}]  }
   0x1   :  { %v9805_v0 = vld [vmem:[%s20394_s1 + $0x70] sm:$0xf]  ;;  %v13893_v1 = vld [vmem:[%s20394_s1 + $0x74] sm:$0xf0]  ;;  %v13892_v2 = vld [vmem:[%s20394_s1 + $0x74] sm:$0xf] }
   0x2   :  { %v9806_v3 = vor.u32 %v13893_v1, %v9805_v0  ;;  %v9807_v4 = vld [vmem:[%s20394_s1 + $0x78] sm:$0xf0]  ;;  %v9841_v5 = vld [vmem:[%s20394_s1 + $0x30] sm:$0xf]  ;;  %v13885_v6 = vld [vmem:[%s20394_s1 + $0x34] sm:$0xf0] }
   0x3   :  { %v9810_v7 = vor.u32 %v13892_v2, %v9807_v4  ;;  %v9842_v8 = vor.u32 %v13885_v6, %v9841_v5  ;;  %v13884_v9 = vld [vmem:[%s20394_s1 + $0x34] sm:$0xf]  ;;  %v9843_v10 = vld [vmem:[%s20394_s1 + $0x38] sm:$0xf0]  ;;  %v9797_v11 = vld [vmem:[%s20394_s1 + $0x60] sm:$0xf] }
   0x4   :  { %162 = vmatpush.bf16.msra.mxu0 %v9806_v3  ;;  %v9846_v12 = vor.u32 %v13884_v9, %v9843_v10  ;;  %v13891_v13 = vld [vmem:[%s20394_s1 + $0x64] sm:$0xf0]  ;;  %v13890_v14 = vld [vmem:[%s20394_s1 + $0x64] sm:$0xf]  ;;  %v9799_v15 = vld [vmem:[%s20394_s1 + $0x68] sm:$0xf0] }
   0x5   :  { %181 = vmatpush.bf16.msra.mxu1 %v9810_v7  ;;  %246 = vmatpush.bf16.msra.mxu2 %v9842_v8  ;;  %v9798_v16 = vor.u32 %v13891_v13, %v9797_v11  ;;  %v9802_v17 = vor.u32 %v13890_v14, %v9799_v15  ;;  %v9833_v18 = vld [vmem:[%s20394_s1 + $0x20] sm:$0xf]  ;;  %v13883_v19 = vld [vmem:[%s20394_s1 + $0x24] sm:$0xf0]  ;;  %v13882_v20 = vld [vmem:[%s20394_s1 + $0x24] sm:$0xf] }
   0x6   :  { %265 = vmatpush.bf16.msra.mxu3 %v9846_v12  ;;  %v9834_v21 = vor.u32 %v13883_v19, %v9833_v18  ;;  %v9835_v22 = vld [vmem:[%s20394_s1 + $0x28] sm:$0xf0]  ;;  %v9789_v23 = vld [vmem:[%s20394_s1 + $0x50] sm:$0xf]  ;;  %v13889_v24 = vld [vmem:[%s20394_s1 + $0x54] sm:$0xf0] }
   0x7   :  { %v9838_v25 = vor.u32 %v13882_v20, %v9835_v22  ;;  %v13888_v26 = vld [vmem:[%s20394_s1 + $0x54] sm:$0xf]  ;;  %v9791_v27 = vld [vmem:[%s20394_s1 + $0x58] sm:$0xf0]  ;;  %v9825_v28 = vld [vmem:[%s20394_s1 + $0x10] sm:$0xf]  ;;  %v9790_v29 = vor.u32 %v13889_v24, %v9789_v23 }
   0x8   :  { %163 = vmatpush.bf16.msra.mxu0 %v9798_v16  ;;  %v13881_v30 = vld [vmem:[%s20394_s1 + $0x14] sm:$0xf0]  ;;  %v13880_v31 = vld [vmem:[%s20394_s1 + $0x14] sm:$0xf]  ;;  %v9827_v32 = vld [vmem:[%s20394_s1 + $0x18] sm:$0xf0]  ;;  %v9794_v33 = vor.u32 %v13888_v26, %v9791_v27 }
   0x9   :  { %182 = vmatpush.bf16.msra.mxu1 %v9802_v17  ;;  %247 = vmatpush.bf16.msra.mxu2 %v9834_v21  ;;  %v9826_v34 = vor.u32 %v13881_v30, %v9825_v28  ;;  %v9781_v35 = vld [vmem:[%s20394_s1 + $0x40] sm:$0xf]  ;;  %v13887_v36 = vld [vmem:[%s20394_s1 + $0x44] sm:$0xf0]  ;;  %v13886_v37 = vld [vmem:[%s20394_s1 + $0x44] sm:$0xf]  ;;  %v9830_v38 = vor.u32 %v13880_v31, %v9827_v32 }
   0xa   :  { %266 = vmatpush.bf16.msra.mxu3 %v9838_v25  ;;  %v9783_v39 = vld [vmem:[%s20394_s1 + $0x48] sm:$0xf0]  ;;  %v9817_v40 = vld [vmem:[%s20394_s1] sm:$0xf]  ;;  %v13879_v41 = vld [vmem:[%s20394_s1 + $0x4] sm:$0xf0]  ;;  %v9782_v45 = vor.u32 %v13887_v36, %v9781_v35 }
   0xb   :  { %v13878_v42 = vld [vmem:[%s20394_s1 + $0x4] sm:$0xf]  ;;  %v9819_v43 = vld [vmem:[%s20394_s1 + $0x8] sm:$0xf0]  ;;  %v9786_v47 = vor.u32 %v13886_v37, %v9783_v39  ;;  %v9818_v48 = vor.u32 %v13879_v41, %v9817_v40  ;;  %v9769_v49 = vld [vmem:[%s20393_s0 + $0x10] sm:$0xff] }
   0xc   :  { %v73_v44 = vld [vmem:[%s20393_s0] sm:$0xff]  ;;  %164 = vmatpush.bf16.msra.mxu0 %v9790_v29  ;;  %v74_v46 = vld [vmem:[%s20393_s0 + $0x8] sm:$0xff]  ;;  %v9885_v50 = vld [vmem:[%s20394_s1 + $0xb0] sm:$0xf]  ;;  %v9822_v52 = vor.u32 %v13878_v42, %v9819_v43  ;;  %41 = vst.msk [vmem:[#allocation2] sm:$0x1] %vm40_vm1, %v14810_v53 }
   0xd   :  { %76 = vst.msk [vmem:[#allocation2 + $0x1] sm:$0xff] %vm75_vm0, %v73_v44  ;;  %183 = vmatpush.bf16.msra.mxu1 %v9794_v33  ;;  %248 = vmatpush.bf16.msra.mxu2 %v9826_v34  ;;  %v13901_v51 = vld [vmem:[%s20394_s1 + $0xb4] sm:$0xf0]  ;;  %v13900_v56 = vld [vmem:[%s20394_s1 + $0xb4] sm:$0xf] }
   0xe   :  { %77 = vst.msk [vmem:[#allocation2 + $0x9] sm:$0xff] %vm75_vm0, %v74_v46  ;;  %267 = vmatpush.bf16.msra.mxu3 %v9830_v38  ;;  %v9770_v54 = vld [vmem:[%s20393_s0 + $0x18] sm:$0xff]  ;;  %v9886_v55 = vor.u32 %v13901_v51, %v9885_v50  ;;  %v9929_v59 = vld [vmem:[%s20394_s1 + $0xf0] sm:$0xf]  ;;  %v13908_v62 = vld [vmem:[%s20394_s1 + $0xf4] sm:$0xf] }
   0xf   :  { %v9887_v57 = vld [vmem:[%s20394_s1 + $0xb8] sm:$0xf0]  ;;  %42 = vst.msk [vmem:[#allocation2 + $0x11] sm:$0x1] %vm40_vm1, %v14810_v53  ;;  %v13909_v60 = vld [vmem:[%s20394_s1 + $0xf4] sm:$0xf0] }
  0x10   :  { %v9890_v58 = vor.u32 %v13900_v56, %v9887_v57  ;;  %165 = vmatpush.bf16.msra.mxu0 %v9782_v45  ;;  %43 = vst.msk [vmem:[#allocation2 + $0x12] sm:$0x1] %vm40_vm1, %v14810_v53  ;;  %v9930_v61 = vor.u32 %v13909_v60, %v9929_v59  ;;  %v9931_v63 = vld [vmem:[%s20394_s1 + $0xf8] sm:$0xf0]  ;;  %v9877_v1 = vld [vmem:[%s20394_s1 + $0xa0] sm:$0xf] }
  0x11   :  { %184 = vmatpush.bf16.msra.mxu1 %v9786_v47  ;;  %249 = vmatpush.bf16.msra.mxu2 %v9818_v48  ;;  %44 = vst.msk [vmem:[#allocation2 + $0x23] sm:$0x1] %vm40_vm1, %v14810_v53  ;;  %v9934_v0 = vor.u32 %v13908_v62, %v9931_v63  ;;  %v13899_v2 = vld [vmem:[%s20394_s1 + $0xa4] sm:$0xf0]  ;;  %v13898_v4 = vld [vmem:[%s20394_s1 + $0xa4] sm:$0xf] }
  0x12   :  { %268 = vmatpush.bf16.msra.mxu3 %v9822_v52  ;;  %81 = vst.msk [vmem:[#allocation2 + $0x13] sm:$0xff] %vm75_vm0, %v9769_v49  ;;  %v9878_v3 = vor.u32 %v13899_v2, %v9877_v1  ;;  %v9879_v5 = vld [vmem:[%s20394_s1 + $0xa8] sm:$0xf0]  ;;  %v9921_v7 = vld [vmem:[%s20394_s1 + $0xe0] sm:$0xf] }
  0x13   :  { %82 = vst.msk [vmem:[#allocation2 + $0x1b] sm:$0xff] %vm75_vm0, %v9770_v54  ;;  %v13907_v8 = vld [vmem:[%s20394_s1 + $0xe4] sm:$0xf0]  ;;  %v13906_v11 = vld [vmem:[%s20394_s1 + $0xe4] sm:$0xf]  ;;  %v9882_v14 = vor.u32 %v13898_v4, %v9879_v5 }
  0x14   :  { %345 = vmatpush.bf16.msrb.mxu0 %v9886_v55  ;;  %v97_v6 = vld [vmem:[#allocation2 + $0x1] sm:$0xff]  ;;  %v9922_v15 = vor.u32 %v13907_v8, %v9921_v7  ;;  %v13897_v20 = vld [vmem:[%s20394_s1 + $0x94] sm:$0xf0]  ;;  %v13896_v21 = vld [vmem:[%s20394_s1 + $0x94] sm:$0xf] }
  0x15   :  { %364 = vmatpush.bf16.msrb.mxu1 %v9890_v58  ;;  %452 = vmatpush.bf16.msrb.mxu2 %v9930_v61  ;;  %v98_v9 = vld [vmem:[#allocation2 + $0x9] sm:$0xff]  ;;  %v83_v13 = vld [vmem:[#allocation2] sm:$0xff]  ;;  %v9871_v22 = vld [vmem:[%s20394_s1 + $0x98] sm:$0xf0] }
  0x16   :  { %v84_v10 = vld [vmem:[#allocation2 + $0x8] sm:$0xff]  ;;  %471 = vmatpush.bf16.msrb.mxu3 %v9934_v0  ;;  %v101_v12 = vpack.c.bf16 %v98_v9, %v97_v6  ;;  %v9923_v16 = vld [vmem:[%s20394_s1 + $0xe8] sm:$0xf0]  ;;  %v13905_v25 = vld [vmem:[%s20394_s1 + $0xd4] sm:$0xf0]  ;;  %v9874_v30 = vor.u32 %v13896_v21, %v9871_v22 }
  0x17   :  { %v9869_v17 = vld [vmem:[%s20394_s1 + $0x90] sm:$0xf]  ;;  %v87_v18 = vpack.c.bf16 %v84_v10, %v83_v13  ;;  %v9926_v19 = vor.u32 %v13906_v11, %v9923_v16  ;;  %v13904_v26 = vld [vmem:[%s20394_s1 + $0xd4] sm:$0xf]  ;;  %v9915_v27 = vld [vmem:[%s20394_s1 + $0xd8] sm:$0xf0] }
  0x18   :  { %346 = vmatpush.bf16.msrb.mxu0 %v9878_v3  ;;  %9813 = vmatmul.msk.bf16.vlgmr.msra.gmra.mxu1 %vm75_vm0, %v101_v12  ;;  %v9870_v23 = vor.u32 %v13897_v20, %v9869_v17  ;;  %v9913_v24 = vld [vmem:[%s20394_s1 + $0xd0] sm:$0xf]  ;;  %v9861_v28 = vld [vmem:[%s20394_s1 + $0x80] sm:$0xf]  ;;  %v13895_v29 = vld [vmem:[%s20394_s1 + $0x84] sm:$0xf0]  ;;  %v9918_v32 = vor.u32 %v13904_v26, %v9915_v27 }
  0x19   :  { %9811 = vmatmul.msk.bf16.vlgmr.msra.gmra.mxu0 %vm75_vm0, %v101_v12  ;;  %9847 = vmatmul.msk.bf16.vlgmr.msra.gmra.mxu2 %vm75_vm0, %v87_v18  ;;  %v9914_v31 = vor.u32 %v13905_v25, %v9913_v24  ;;  %v9862_v33 = vor.u32 %v13895_v29, %v9861_v28  ;;  %v13894_v34 = vld [vmem:[%s20394_s1 + $0x84] sm:$0xf]  ;;  %v9863_v35 = vld [vmem:[%s20394_s1 + $0x88] sm:$0xf0]  ;;  %v9905_v36 = vld [vmem:[%s20394_s1 + $0xc0] sm:$0xf] }
  0x1a   :  { %9849 = vmatmul.msk.bf16.vlgmr.msra.gmra.mxu3 %vm75_vm0, %v87_v18  ;;  %365 = vmatpush.bf16.msrb.mxu1 %v9882_v14  ;;  %v13903_v37 = vld [vmem:[%s20394_s1 + $0xc4] sm:$0xf0]  ;;  %v13902_v38 = vld [vmem:[%s20394_s1 + $0xc4] sm:$0xf]  ;;  %v9907_v39 = vld [vmem:[%s20394_s1 + $0xc8] sm:$0xf0]  ;;  %v9866_v40 = vor.u32 %v13894_v34, %v9863_v35 }
  0x1b   :  { %453 = vmatpush.bf16.msrb.mxu2 %v9922_v15  ;;  %472 = vmatpush.bf16.msrb.mxu3 %v9926_v19  ;;  %v9906_v41 = vor.u32 %v13903_v37, %v9905_v36  ;;  %v9910_v42 = vor.u32 %v13902_v38, %v9907_v39 }
  0x1c   :  { %347 = vmatpush.bf16.msrb.mxu0 %v9870_v23 }
  0x1e   :  { %366 = vmatpush.bf16.msrb.mxu1 %v9874_v30 }
  0x1f   :  { %454 = vmatpush.bf16.msrb.mxu2 %v9914_v31  ;;  %473 = vmatpush.bf16.msrb.mxu3 %v9918_v32 }
  0x20   :  { %348 = vmatpush.bf16.msrb.mxu0 %v9862_v33 }
  0x21   :  { %16 = vsyncpa [#allocation7], 0  ;;  %v99_v43 = vld [vmem:[#allocation2 + $0x11] sm:$0xff]  ;;  %v100_v44 = vld [vmem:[#allocation2 + $0x19] sm:$0x1f]  ;;  %vm960_vm3 = vcmask 392193  }
  0x22   :  { %v85_v45 = vld [vmem:[#allocation2 + $0x10] sm:$0xff]  ;;  %v86_v46 = vld [vmem:[#allocation2 + $0x18] sm:$0x1f]  ;;  %367 = vmatpush.bf16.msrb.mxu1 %v9866_v40  ;;  %v102_v47 = vpack.c.bf16 %v100_v44, %v99_v43  ;;  %v9973_v49 = vld [vmem:[%s20394_s1 + $0x130] sm:$0xf]  ;;  %vm948_vm4 = vcmask 1040384  }
  0x23   :  { %455 = vmatpush.bf16.msrb.mxu2 %v9906_v41  ;;  %474 = vmatpush.bf16.msrb.mxu3 %v9910_v42  ;;  %v88_v48 = vpack.c.bf16 %v86_v46, %v85_v45  ;;  %v13917_v50 = vld [vmem:[%s20394_s1 + $0x134] sm:$0xf0]  ;;  %v13916_v51 = vld [vmem:[%s20394_s1 + $0x134] sm:$0xf]  ;;  %v9975_v54 = vld [vmem:[%s20394_s1 + $0x138] sm:$0xf0] }
  0x24   :  { %v9974_v52 = vor.u32 %v13917_v50, %v9973_v49  ;;  %v10017_v55 = vld [vmem:[%s20394_s1 + $0x170] sm:$0xf]  ;;  %v13925_v56 = vld [vmem:[%s20394_s1 + $0x174] sm:$0xf0]  ;;  %v9978_v57 = vor.u32 %v13916_v51, %v9975_v54  ;;  %v13924_v59 = vld [vmem:[%s20394_s1 + $0x174] sm:$0xf] }
  0x25   :  { %v10018_v58 = vor.u32 %v13925_v56, %v10017_v55  ;;  %v10019_v60 = vld [vmem:[%s20394_s1 + $0x178] sm:$0xf0]  ;;  %v9965_v61 = vld [vmem:[%s20394_s1 + $0x120] sm:$0xf]  ;;  %v13915_v63 = vld [vmem:[%s20394_s1 + $0x124] sm:$0xf0] }
  0x26   :  { %559 = vmatpush.bf16.msra.mxu0 %v9974_v52  ;;  %v10022_v62 = vor.u32 %v13924_v59, %v10019_v60  ;;  %v13914_v0 = vld [vmem:[%s20394_s1 + $0x124] sm:$0xf]  ;;  %v9967_v1 = vld [vmem:[%s20394_s1 + $0x128] sm:$0xf0]  ;;  %578 = vmatpush.bf16.msra.mxu1 %v9978_v57  ;;  %v9966_v2 = vor.u32 %v13915_v63, %v9965_v61  ;;  %v10009_v4 = vld [vmem:[%s20394_s1 + $0x160] sm:$0xf] }
  0x27   :  { %666 = vmatpush.bf16.msra.mxu2 %v10018_v58  ;;  %v9970_v3 = vor.u32 %v13914_v0, %v9967_v1  ;;  %v13923_v5 = vld [vmem:[%s20394_s1 + $0x164] sm:$0xf0]  ;;  %v13922_v6 = vld [vmem:[%s20394_s1 + $0x164] sm:$0xf]  ;;  %v10011_v8 = vld [vmem:[%s20394_s1 + $0x168] sm:$0xf0] }
  0x28   :  { %9814 = vmatmul.msk.bf16.gmra.mxu1 %vm75_vm0, %v102_v47  ;;  %685 = vmatpush.bf16.msra.mxu3 %v10022_v62  ;;  %v10010_v7 = vor.u32 %v13923_v5, %v10009_v4  ;;  %v9957_v9 = vld [vmem:[%s20394_s1 + $0x110] sm:$0xf]  ;;  %v13913_v10 = vld [vmem:[%s20394_s1 + $0x114] sm:$0xf0]  ;;  %v10014_v11 = vor.u32 %v13922_v6, %v10011_v8  ;;  %v13912_v12 = vld [vmem:[%s20394_s1 + $0x114] sm:$0xf] }
  0x29   :  { %9812 = vmatmul.msk.bf16.gmra.mxu0 %vm75_vm0, %v102_v47  ;;  %9848 = vmatmul.msk.bf16.gmra.mxu2 %vm75_vm0, %v88_v48  ;;  %v9959_v13 = vld [vmem:[%s20394_s1 + $0x118] sm:$0xf0]  ;;  %v10001_v14 = vld [vmem:[%s20394_s1 + $0x150] sm:$0xf]  ;;  %v9958_v15 = vor.u32 %v13913_v10, %v9957_v9  ;;  %v13921_v16 = vld [vmem:[%s20394_s1 + $0x154] sm:$0xf0] }
  0x2a   :  { %9850 = vmatmul.msk.bf16.gmra.mxu3 %vm75_vm0, %v88_v48  ;;  %560 = vmatpush.bf16.msra.mxu0 %v9966_v2  ;;  %v13920_v17 = vld [vmem:[%s20394_s1 + $0x154] sm:$0xf]  ;;  %v10003_v18 = vld [vmem:[%s20394_s1 + $0x158] sm:$0xf0]  ;;  %v9962_v19 = vor.u32 %v13912_v12, %v9959_v13  ;;  %v10002_v20 = vor.u32 %v13921_v16, %v10001_v14  ;;  %v9949_v21 = vld [vmem:[%s20394_s1 + $0x100] sm:$0xf] }
  0x2b   :  { %579 = vmatpush.bf16.msra.mxu1 %v9970_v3  ;;  %667 = vmatpush.bf16.msra.mxu2 %v10010_v7  ;;  %v13911_v22 = vld [vmem:[%s20394_s1 + $0x104] sm:$0xf0]  ;;  %v13910_v23 = vld [vmem:[%s20394_s1 + $0x104] sm:$0xf]  ;;  %v10006_v24 = vor.u32 %v13920_v17, %v10003_v18  ;;  %v9951_v25 = vld [vmem:[%s20394_s1 + $0x108] sm:$0xf0] }
  0x2c   :  { %686 = vmatpush.bf16.msra.mxu3 %v10014_v11  ;;  %v9993_v26 = vld [vmem:[%s20394_s1 + $0x140] sm:$0xf]  ;;  %v13919_v27 = vld [vmem:[%s20394_s1 + $0x144] sm:$0xf0]  ;;  %v281_v29 = vld [vmem:[#allocation2 + $0xa] sm:$0xff]  ;;  %v9950_v32 = vor.u32 %v13911_v22, %v9949_v21  ;;  %v9954_v33 = vor.u32 %v13910_v23, %v9951_v25  ;;  %vm963_vm5 = vcmask 388096  }
  0x2d   :  { %v280_v28 = vld [vmem:[#allocation2 + $0x2] sm:$0xff]  ;;  %v388_v31 = vld [vmem:[#allocation2 + $0xb] sm:$0xff]  ;;  %v9994_v34 = vor.u32 %v13919_v27, %v9993_v26  ;;  %v13918_v35 = vld [vmem:[%s20394_s1 + $0x144] sm:$0xf]  ;;  %vm983_vm6 = vcmask 392198   ;;  %vm969_vm7 = vcmask 1043456  }
  0x2e   :  { %v387_v30 = vld [vmem:[#allocation2 + $0x3] sm:$0xff]  ;;  %561 = vmatpush.bf16.msra.mxu0 %v9958_v15  ;;  %v284_v37 = vpack.c.bf16 %v281_v29, %v280_v28  ;;  %v282_v40 = vld [vmem:[#allocation2 + $0x12] sm:$0xff]  ;;  %v283_v41 = vld [vmem:[#allocation2 + $0x1a] sm:$0x1f]  ;;  %vm989_vm8 = vcmask 385024   ;;  %vm986_vm9 = vcmask 392192  }
  0x2f   :  { %580 = vmatpush.bf16.msra.mxu1 %v9962_v19  ;;  %668 = vmatpush.bf16.msra.mxu2 %v10002_v20  ;;  %v9995_v36 = vld [vmem:[%s20394_s1 + $0x148] sm:$0xf0]  ;;  %v391_v38 = vpack.c.bf16 %v388_v31, %v387_v30  ;;  %v389_v42 = vld [vmem:[#allocation2 + $0x13] sm:$0xff]  ;;  %v390_v43 = vld [vmem:[#allocation2 + $0x1b] sm:$0x1f]  ;;  %v285_v44 = vpack.c.bf16 %v283_v41, %v282_v40  ;;  %vm1772_vm11 = vcmask 1046528  }
  0x30   :  { %687 = vmatpush.bf16.msra.mxu3 %v10006_v24  ;;  %v9998_v39 = vor.u32 %v13918_v35, %v9995_v36  ;;  %v392_v45 = vpack.c.bf16 %v390_v43, %v389_v42  ;;  %v10061_v46 = vld [vmem:[%s20394_s1 + $0x1b0] sm:$0xf]  ;;  %v13933_v47 = vld [vmem:[%s20394_s1 + $0x1b4] sm:$0xf0]  ;;  %v13932_v48 = vld [vmem:[%s20394_s1 + $0x1b4] sm:$0xf] }
  0x31   :  { %v10062_v49 = vor.u32 %v13933_v47, %v10061_v46  ;;  %v10063_v50 = vld [vmem:[%s20394_s1 + $0x1b8] sm:$0xf0]  ;;  %v10105_v51 = vld [vmem:[%s20394_s1 + $0x1f0] sm:$0xf]  ;;  %v13941_v52 = vld [vmem:[%s20394_s1 + $0x1f4] sm:$0xf0] }
  0x32   :  { %562 = vmatpush.bf16.msra.mxu0 %v9950_v32  ;;  %v10066_v54 = vor.u32 %v13932_v48, %v10063_v50  ;;  %v10106_v55 = vor.u32 %v13941_v52, %v10105_v51  ;;  %v13940_v56 = vld [vmem:[%s20394_s1 + $0x1f4] sm:$0xf]  ;;  %v10107_v57 = vld [vmem:[%s20394_s1 + $0x1f8] sm:$0xf0]  ;;  %v10053_v58 = vld [vmem:[%s20394_s1 + $0x1a0] sm:$0xf] }
  0x33   :  { %581 = vmatpush.bf16.msra.mxu1 %v9954_v33  ;;  %669 = vmatpush.bf16.msra.mxu2 %v9994_v34  ;;  %v10110_v59 = vor.u32 %v13940_v56, %v10107_v57  ;;  %v13931_v60 = vld [vmem:[%s20394_s1 + $0x1a4] sm:$0xf0]  ;;  %v13930_v61 = vld [vmem:[%s20394_s1 + $0x1a4] sm:$0xf]  ;;  %v10055_v62 = vld [vmem:[%s20394_s1 + $0x1a8] sm:$0xf0] }
  0x34   :  { %688 = vmatpush.bf16.msra.mxu3 %v9998_v39  ;;  %v10054_v63 = vor.u32 %v13931_v60, %v10053_v58  ;;  %v10058_v0 = vor.u32 %v13930_v61, %v10055_v62  ;;  %v10097_v1 = vld [vmem:[%s20394_s1 + $0x1e0] sm:$0xf]  ;;  %v13939_v2 = vld [vmem:[%s20394_s1 + $0x1e4] sm:$0xf0]  ;;  %v13938_v3 = vld [vmem:[%s20394_s1 + $0x1e4] sm:$0xf] }
  0x35   :  { %v10098_v4 = vor.u32 %v13939_v2, %v10097_v1  ;;  %v10099_v5 = vld [vmem:[%s20394_s1 + $0x1e8] sm:$0xf0]  ;;  %v10045_v6 = vld [vmem:[%s20394_s1 + $0x190] sm:$0xf]  ;;  %v13929_v7 = vld [vmem:[%s20394_s1 + $0x194] sm:$0xf0] }
  0x36   :  { %v10102_v8 = vor.u32 %v13938_v3, %v10099_v5  ;;  %v13928_v9 = vld [vmem:[%s20394_s1 + $0x194] sm:$0xf]  ;;  %v10047_v10 = vld [vmem:[%s20394_s1 + $0x198] sm:$0xf0]  ;;  %v10089_v11 = vld [vmem:[%s20394_s1 + $0x1d0] sm:$0xf]  ;;  %v10046_v12 = vor.u32 %v13929_v7, %v10045_v6 }
  0x37   :  { %v13937_v13 = vld [vmem:[%s20394_s1 + $0x1d4] sm:$0xf0]  ;;  %v13936_v14 = vld [vmem:[%s20394_s1 + $0x1d4] sm:$0xf]  ;;  %v10091_v15 = vld [vmem:[%s20394_s1 + $0x1d8] sm:$0xf0]  ;;  %v10050_v16 = vor.u32 %v13928_v9, %v10047_v10 }
  0x38   :  { %9893 = vmatmul.msk.bf16.vlgmr.msrb.gmra.mxu1 %vm75_vm0, %v284_v37  ;;  %v10090_v17 = vor.u32 %v13937_v13, %v10089_v11  ;;  %v10037_v18 = vld [vmem:[%s20394_s1 + $0x180] sm:$0xf]  ;;  %v13927_v19 = vld [vmem:[%s20394_s1 + $0x184] sm:$0xf0]  ;;  %v13926_v20 = vld [vmem:[%s20394_s1 + $0x184] sm:$0xf]  ;;  %v10094_v21 = vor.u32 %v13936_v14, %v10091_v15 }
  0x39   :  { %9891 = vmatmul.msk.bf16.vlgmr.msrb.gmra.mxu0 %vm75_vm0, %v284_v37  ;;  %9935 = vmatmul.msk.bf16.vlgmr.msrb.gmra.mxu2 %vm75_vm0, %v391_v38  ;;  %v10039_v22 = vld [vmem:[%s20394_s1 + $0x188] sm:$0xf0]  ;;  %v10081_v23 = vld [vmem:[%s20394_s1 + $0x1c0] sm:$0xf]  ;;  %v13935_v24 = vld [vmem:[%s20394_s1 + $0x1c4] sm:$0xf0]  ;;  %v10038_v29 = vor.u32 %v13927_v19, %v10037_v18 }
  0x3a   :  { %9937 = vmatmul.msk.bf16.vlgmr.msrb.gmra.mxu3 %vm75_vm0, %v391_v38  ;;  %773 = vmatpush.bf16.msrb.mxu0 %v10062_v49  ;;  %v494_v25 = vld [vmem:[#allocation2 + $0x4] sm:$0xff]  ;;  %v495_v26 = vld [vmem:[#allocation2 + $0xc] sm:$0xff]  ;;  %v10042_v30 = vor.u32 %v13926_v20, %v10039_v22  ;;  %v10082_v31 = vor.u32 %v13935_v24, %v10081_v23  ;;  %v13934_v32 = vld [vmem:[%s20394_s1 + $0x1c4] sm:$0xf]  ;;  %vm1098_vm10 = vsmask.f32 7424 }
  0x3b   :  { %792 = vmatpush.bf16.msrb.mxu1 %v10066_v54  ;;  %880 = vmatpush.bf16.msrb.mxu2 %v10106_v55  ;;  %v601_v27 = vld [vmem:[#allocation2 + $0x5] sm:$0xff]  ;;  %v602_v28 = vld [vmem:[#allocation2 + $0xd] sm:$0xff]  ;;  %v498_v34 = vpack.c.bf16 %v495_v26, %v494_v25  ;;  %v497_v38 = vld [vmem:[#allocation2 + $0x1c] sm:$0x1f]  ;;  %vm2133_vm12 = vsmask.f32 6400 }
  0x3c   :  { %899 = vmatpush.bf16.msrb.mxu3 %v10110_v59  ;;  %v10083_v33 = vld [vmem:[%s20394_s1 + $0x1c8] sm:$0xf0]  ;;  %v605_v35 = vpack.c.bf16 %v602_v28, %v601_v27  ;;  %v496_v37 = vld [vmem:[#allocation2 + $0x14] sm:$0xff]  ;;  %v604_v40 = vld [vmem:[#allocation2 + $0x1d] sm:$0x1f]  ;;  %vm2518_vm14 = vcmask 523265  }
  0x3d   :  { %v10086_v36 = vor.u32 %v13934_v32, %v10083_v33  ;;  %v603_v39 = vld [vmem:[#allocation2 + $0x15] sm:$0xff]  ;;  %v499_v41 = vpack.c.bf16 %v497_v38, %v496_v37  ;;  %v708_v43 = vld [vmem:[#allocation2 + $0x6] sm:$0xff]  ;;  %v711_v50 = vld [vmem:[#allocation2 + $0x1e] sm:$0x1f]  ;;  %vm2526_vm15 = vcmask 523269   ;;  %vm2522_vm1 = vcmask 518144  }
  0x3e   :  { %774 = vmatpush.bf16.msrb.mxu0 %v10054_v63  ;;  %v606_v42 = vpack.c.bf16 %v604_v40, %v603_v39  ;;  %v816_v46 = vld [vmem:[#allocation2 + $0xf] sm:$0xff]  ;;  %v817_v51 = vld [vmem:[#allocation2 + $0x17] sm:$0xff]  ;;  %v818_v52 = vld [vmem:[#allocation2 + $0x1f] sm:$0x1f]  ;;  %s14811_s20 = smov [#allocation6]  }
  0x3f   :  { %793 = vmatpush.bf16.msrb.mxu1 %v10058_v0  ;;  %881 = vmatpush.bf16.msrb.mxu2 %v10098_v4  ;;  %v710_v49 = vld [vmem:[#allocation2 + $0x16] sm:$0xff]  ;;  %v820_v55 = vpack.c.bf16 %v818_v52, %v817_v51  ;;  %v10245_v38 = vld [vmem:[%s20396_s3 + $0x1b0] sm:$0xf]  ;;  %v13996_v40 = vld [vmem:[%s20396_s3 + $0x1b4] sm:$0xf] }
  0x40   :  { %900 = vmatpush.bf16.msrb.mxu3 %v10102_v8  ;;  %v713_v54 = vpack.c.bf16 %v711_v50, %v710_v49  ;;  %v13997_v39 = vld [vmem:[%s20396_s3 + $0x1b8] sm:$0xf0]  ;;  %v10235_v50 = vld [vmem:[%s20396_s3 + $0x1a4] sm:$0xf0] }
  0x41   :  { %v13993_v49 = vld [vmem:[%s20396_s3 + $0x19c] sm:$0xf] }
  0x42   :  { %775 = vmatpush.bf16.msrb.mxu0 %v10046_v12  ;;  %v10238_v51 = vor.u32 %v13993_v49, %v10235_v50 }
  0x43   :  { %794 = vmatpush.bf16.msrb.mxu1 %v10050_v16  ;;  %882 = vmatpush.bf16.msrb.mxu2 %v10090_v17 }
  0x44   :  { %901 = vmatpush.bf16.msrb.mxu3 %v10094_v21 }
  0x46   :  { %776 = vmatpush.bf16.msrb.mxu0 %v10038_v29 }
  0x47   :  { %795 = vmatpush.bf16.msrb.mxu1 %v10042_v30  ;;  %883 = vmatpush.bf16.msrb.mxu2 %v10082_v31 }
  0x48   :  { %9894 = vmatmul.msk.bf16.gmra.mxu1 %vm75_vm0, %v285_v44  ;;  %902 = vmatpush.bf16.msrb.mxu3 %v10086_v36 }
  0x49   :  { %9892 = vmatmul.msk.bf16.gmra.mxu0 %vm75_vm0, %v285_v44  ;;  %9936 = vmatmul.msk.bf16.gmra.mxu2 %vm75_vm0, %v392_v45  ;;  %v709_v44 = vld [vmem:[#allocation2 + $0xe] sm:$0xff] }
  0x4a   :  { %9938 = vmatmul.msk.bf16.gmra.mxu3 %vm75_vm0, %v392_v45  ;;  %v815_v45 = vld [vmem:[#allocation2 + $0x7] sm:$0xff]  ;;  %v712_v47 = vpack.c.bf16 %v709_v44, %v708_v43  ;;  %v10247_v43 = vld [vmem:[%s20396_s3 + $0x1bc] sm:$0xf0] }
  0x4b   :  { %v819_v48 = vpack.c.bf16 %v816_v46, %v815_v45  ;;  %v10250_v44 = vor.u32 %v13996_v40, %v10247_v43  ;;  %v10233_v46 = vld [vmem:[%s20396_s3 + $0x198] sm:$0xf]  ;;  %v13988_v40 = vld [vmem:[%s20396_s3 + $0x170] sm:$0xf0] }
  0x58   :  { %9981 = vmatmul.msk.bf16.vlgmr.msra.gmra.mxu1 %vm75_vm0, %v498_v34 }
  0x59   :  { %9979 = vmatmul.msk.bf16.vlgmr.msra.gmra.mxu0 %vm75_vm0, %v498_v34  ;;  %10023 = vmatmul.msk.bf16.vlgmr.msra.gmra.mxu2 %vm75_vm0, %v605_v35 }
  0x5a   :  { %10025 = vmatmul.msk.bf16.vlgmr.msra.gmra.mxu3 %vm75_vm0, %v605_v35  ;;  %1349 = vmatpush.bf16.msra.mxu2 %v10250_v44 }
  0x5e   :  { %1350 = vmatpush.bf16.msra.mxu2 %v10238_v51  ;;  %v10197_v51 = vld [vmem:[%s20396_s3 + $0x150] sm:$0xf] }
  0x68   :  { %9982 = vmatmul.msk.bf16.gmra.mxu1 %vm75_vm0, %v499_v41 }
  0x69   :  { %9980 = vmatmul.msk.bf16.gmra.mxu0 %vm75_vm0, %v499_v41  ;;  %10024 = vmatmul.msk.bf16.gmra.mxu2 %vm75_vm0, %v606_v42  ;;  %v45_v41 = vlaneseq }
  0x6a   :  { %10026 = vmatmul.msk.bf16.gmra.mxu3 %vm75_vm0, %v606_v42  ;;  %v10246_v42 = vor.u32 %v13997_v39, %v10245_v38  ;;  %v10209_v39 = vld [vmem:[%s20396_s3 + $0x168] sm:$0xf] }
  0x6b   :  { %vm15393_vm2 = vcmp.lt.s32.totalorder %v45_v41, 176  ;;  %vm16544_vm13 = vcmp.lt.s32.totalorder %v45_v41, 320 }
  0x6c   :  { %1313 = vmatpush.bf16.msra.mxu0 %v10246_v42  ;;  %52 = vst.msk [vmem:[#allocation3 + $0x14] ss:$8 sm:$0x3] %vm15393_vm2, %v14810_v53  ;;  %v13987_v42 = vld [vmem:[%s20396_s3 + $0x16c] sm:$0xf] }
  0x6d   :  { %55 = vst.msk [vmem:[#allocation3 + $0x15] ss:$8 sm:$0x3] %vm15393_vm2, %v14810_v53 }
  0x6e   :  { %49 = vst.msk [vmem:[#allocation3] ss:$8 sm:$0x3] %vm15393_vm2, %v14810_v53 }
  0x6f   :  { %58 = vst.msk [vmem:[#allocation3 + $0x31] ss:$8 sm:$0x3] %vm15393_vm2, %v14810_v53  ;;  %vm2530_vm2 = vcmask 522240  }
  0x70   :  { %65 = vst.msk [vmem:[#allocation4 + $0x1b] ss:$8 sm:$0x7] %vm16544_vm13, %v14810_v53 }
  0x71   :  { %68 = vst.msk [vmem:[#allocation4 + $0x1c] ss:$8 sm:$0x7] %vm16544_vm13, %v14810_v53 }
  0x72   :  { %62 = vst.msk [vmem:[#allocation4] ss:$8 sm:$0x7] %vm16544_vm13, %v14810_v53 }
  0x73   :  { %71 = vst.msk [vmem:[#allocation4 + $0x37] ss:$8 sm:$0x7] %vm16544_vm13, %v14810_v53  ;;  %v14186_v53 = vld [vmem:[%s20398_s5 + $0x380] sm:$0xf0] }
  0x78   :  { %10069 = vmatmul.msk.bf16.vlgmr.msrb.gmra.mxu1 %vm75_vm0, %v712_v47 }
  0x79   :  { %10067 = vmatmul.msk.bf16.vlgmr.msrb.gmra.mxu0 %vm75_vm0, %v712_v47  ;;  %10111 = vmatmul.msk.bf16.vlgmr.msrb.gmra.mxu2 %vm75_vm0, %v819_v48  ;;  %v13994_v47 = vld [vmem:[%s20396_s3 + $0x1a0] sm:$0xf0] }
  0x7a   :  { %10113 = vmatmul.msk.bf16.vlgmr.msrb.gmra.mxu3 %vm75_vm0, %v819_v48  ;;  %v10234_v48 = vor.u32 %v13994_v47, %v10233_v46 }
  0x7c   :  { %1314 = vmatpush.bf16.msra.mxu0 %v10234_v48  ;;  %v922_v48 = vld [vmem:[%s20395_s2] sm:$0x3]  ;;  %s9760_s2 = sshll.u32 %s20404_s11, 4  ;;  %s9761_s2 = int_to_ptr.hbm [resolvable:$true] %s9760_s2 }
  0x88   :  { %10070 = vmatmul.msk.bf16.gmra.mxu1 %vm75_vm0, %v713_v54 }
  0x89   :  { %10068 = vmatmul.msk.bf16.gmra.mxu0 %vm75_vm0, %v713_v54  ;;  %10112 = vmatmul.msk.bf16.gmra.mxu2 %vm75_vm0, %v820_v55 }
  0x8a   :  { %10114 = vmatmul.msk.bf16.gmra.mxu3 %vm75_vm0, %v820_v55 }
  0x95   :  { %v186_v57 = vpop.f32.mrf.mxu1 }
  0x96   :  { %v167_v56 = vpop.f32.mrf.mxu0 }
  0x9c   :  { %v251_v58 = vpop.f32.mrf.mxu2 }
  0x9d   :  { %v270_v59 = vpop.f32.mrf.mxu3  ;;  %v15312_v60 = vadd.f32 %v251_v58, %v167_v56  ;;  %v15318_v63 = vpop.f32.mrf.mxu1  ;;  %v13991_v58 = vld [vmem:[%s20396_s3 + $0x188] sm:$0xf0] }
  0x9e   :  { %v15314_v61 = vadd.f32 %v270_v59, %v186_v57  ;;  %v15316_v62 = vpop.f32.mrf.mxu0  ;;  %v10221_v57 = vld [vmem:[%s20396_s3 + $0x180] sm:$0xf]  ;;  %v13990_v59 = vld [vmem:[%s20396_s3 + $0x184] sm:$0xf] }
  0xa4   :  { %v15320_v0 = vpop.f32.mrf.mxu2 }
  0xa5   :  { %v15322_v1 = vpop.f32.mrf.mxu3  ;;  %v191_v3 = vpop.f32.mrf.mxu1 }
  0xa6   :  { %v172_v2 = vpop.f32.mrf.mxu0 }
  0xac   :  { %v256_v4 = vpop.f32.mrf.mxu2 }
  0xad   :  { %v275_v5 = vpop.f32.mrf.mxu3  ;;  %v15324_v6 = vadd.f32 %v256_v4, %v172_v2  ;;  %v15330_v9 = vpop.f32.mrf.mxu1  ;;  %v10222_v2 = vor.u32 %v13991_v58, %v10221_v57  ;;  %v254_v57 = vadd.f32 %v15320_v0, %v15316_v62  ;;  %v10199_v58 = vld [vmem:[%s20396_s3 + $0x15c] sm:$0xf0]  ;;  %v15486_v62 = vperm.slane %v922_v48, 1 }
  0xae   :  { %v15326_v7 = vadd.f32 %v275_v5, %v191_v3  ;;  %v15328_v8 = vpop.f32.mrf.mxu0  ;;  %v10223_v3 = vld [vmem:[%s20396_s3 + $0x18c] sm:$0xf0] }
  0xaf   :  { %v10226_v4 = vor.u32 %v13990_v59, %v10223_v3  ;;  %1315 = vmatpush.bf16.msra.mxu0 %v10222_v2 }
  0xb1   :  { %1351 = vmatpush.bf16.msra.mxu2 %v10226_v4 }
  0xb4   :  { %v15332_v10 = vpop.f32.mrf.mxu2 }
  0xb5   :  { %v15334_v11 = vpop.f32.mrf.mxu3  ;;  %v369_v13 = vpop.f32.mrf.mxu1 }
  0xb6   :  { %v350_v12 = vpop.f32.mrf.mxu0  ;;  %v380_v38 = vadd.f32 %v369_v13, %v15314_v61  ;;  %v10211_v61 = vld [vmem:[%s20396_s3 + $0x174] sm:$0xf0] }
  0xb7   :  { %v379_v5 = vadd.f32 %v350_v12, %v15312_v60  ;;  %v10210_v60 = vor.u32 %v13988_v40, %v10209_v39  ;;  %v10214_v47 = vor.u32 %v13987_v42, %v10211_v61 }
  0xb9   :  { %1316 = vmatpush.bf16.msra.mxu0 %v10210_v60  ;;  %1352 = vmatpush.bf16.msra.mxu2 %v10214_v47  ;;  %v10187_v60 = vld [vmem:[%s20396_s3 + $0x144] sm:$0xf0] }
  0xbc   :  { %v15336_v14 = vpop.f32.mrf.mxu2 }
  0xbd   :  { %v15338_v15 = vpop.f32.mrf.mxu3  ;;  %v15342_v17 = vpop.f32.mrf.mxu1  ;;  %v486_v12 = vadd.f32 %v15336_v14, %v379_v5  ;;  %v13985_v14 = vld [vmem:[%s20396_s3 + $0x158] sm:$0xf0] }
  0xbe   :  { %v15340_v16 = vpop.f32.mrf.mxu0  ;;  %v487_v13 = vadd.f32 %v15338_v15, %v380_v38  ;;  %v13984_v15 = vld [vmem:[%s20396_s3 + $0x154] sm:$0xf]  ;;  %v15484_v38 = vperm.slane %v922_v48, 0 }
  0xbf   :  { %v10202_v3 = vor.u32 %v13984_v15, %v10199_v58  ;;  %v381_v4 = vadd.f32 %v15340_v16, %v254_v57  ;;  %v13981_v16 = vld [vmem:[%s20396_s3 + $0x13c] sm:$0xf]  ;;  %v14006_v15 = vld [vmem:[%s20396_s3 + $0x200] sm:$0xf0] }
  0xc0   :  { %v14005_v57 = vld [vmem:[%s20396_s3 + $0x1fc] sm:$0xf] }
  0xc1   :  { %1353 = vmatpush.bf16.msra.mxu2 %v10202_v3 }
  0xc4   :  { %v15344_v18 = vpop.f32.mrf.mxu2 }
  0xc5   :  { %v15346_v19 = vpop.f32.mrf.mxu3  ;;  %v15350_v21 = vpop.f32.mrf.mxu1 }
  0xc6   :  { %v15348_v20 = vpop.f32.mrf.mxu0  ;;  %v384_v3 = vadd.f32 %v15350_v21, %v15326_v7 }
  0xcc   :  { %v15352_v22 = vpop.f32.mrf.mxu2 }
  0xcd   :  { %v15354_v23 = vpop.f32.mrf.mxu3  ;;  %v15358_v25 = vpop.f32.mrf.mxu1 }
  0xce   :  { %v15356_v24 = vpop.f32.mrf.mxu0 }
  0xd4   :  { %v15360_v26 = vpop.f32.mrf.mxu2 }
  0xd5   :  { %v15362_v27 = vpop.f32.mrf.mxu3  ;;  %v583_v29 = vpop.f32.mrf.mxu1 }
  0xd6   :  { %v564_v28 = vpop.f32.mrf.mxu0  ;;  %v594_v50 = vadd.f32 %v583_v29, %v487_v13  ;;  %v10198_v29 = vor.u32 %v13985_v14, %v10197_v51  ;;  %v10281_v14 = vld [vmem:[%s20396_s3 + $0x1f8] sm:$0xf] }
  0xd7   :  { %v593_v49 = vadd.f32 %v564_v28, %v486_v12  ;;  %v273_v28 = vadd.f32 %v15322_v1, %v15318_v63  ;;  %v10185_v1 = vld [vmem:[%s20396_s3 + $0x138] sm:$0xf] }
  0xd8   :  { %1317 = vmatpush.bf16.msra.mxu0 %v10198_v29  ;;  %v383_v29 = vadd.f32 %v15348_v20, %v15324_v6  ;;  %v14003_v6 = vld [vmem:[%s20396_s3 + $0x1e8] sm:$0xf0]  ;;  %v10175_v20 = vld [vmem:[%s20396_s3 + $0x12c] sm:$0xf0] }
  0xd9   :  { %v382_v5 = vadd.f32 %v15342_v17, %v273_v28  ;;  %v488_v17 = vadd.f32 %v15344_v18, %v381_v4 }
  0xdc   :  { %v15364_v30 = vpop.f32.mrf.mxu2 }
  0xdd   :  { %v15366_v31 = vpop.f32.mrf.mxu3  ;;  %v15370_v33 = vpop.f32.mrf.mxu1  ;;  %v700_v59 = vadd.f32 %v15364_v30, %v593_v49  ;;  %v13982_v30 = vld [vmem:[%s20396_s3 + $0x140] sm:$0xf0]  ;;  %v10173_v49 = vld [vmem:[%s20396_s3 + $0x120] sm:$0xf] }
  0xde   :  { %v15368_v32 = vpop.f32.mrf.mxu0  ;;  %v701_v2 = vadd.f32 %v15366_v31, %v594_v50  ;;  %v489_v31 = vadd.f32 %v15346_v19, %v382_v5  ;;  %v10186_v42 = vor.u32 %v13982_v30, %v10185_v1  ;;  %v13979_v50 = vld [vmem:[%s20396_s3 + $0x128] sm:$0xf0] }
  0xdf   :  { %v595_v47 = vadd.f32 %v15368_v32, %v488_v17  ;;  %v13978_v32 = vld [vmem:[%s20396_s3 + $0x124] sm:$0xf]  ;;  %v10174_v28 = vor.u32 %v13979_v50, %v10173_v49  ;;  %v10161_v17 = vld [vmem:[%s20396_s3 + $0x108] sm:$0xf] }
  0xe0   :  { %v596_v48 = vadd.f32 %v15370_v33, %v489_v31  ;;  %1318 = vmatpush.bf16.msra.mxu0 %v10186_v42  ;;  %v10178_v21 = vor.u32 %v13978_v32, %v10175_v20  ;;  %v490_v31 = vadd.f32 %v15352_v22, %v383_v29 }
  0xe4   :  { %v15372_v34 = vpop.f32.mrf.mxu2  ;;  %1319 = vmatpush.bf16.msra.mxu0 %v10174_v28 }
  0xe5   :  { %v15374_v35 = vpop.f32.mrf.mxu3  ;;  %v15378_v37 = vpop.f32.mrf.mxu1  ;;  %v702_v33 = vadd.f32 %v15372_v34, %v595_v47  ;;  %v10163_v47 = vld [vmem:[%s20396_s3 + $0x114] sm:$0xf0] }
  0xe6   :  { %v15376_v36 = vpop.f32.mrf.mxu0  ;;  %v703_v51 = vadd.f32 %v15374_v35, %v596_v48  ;;  %v10283_v35 = vld [vmem:[%s20396_s3 + $0x204] sm:$0xf0]  ;;  %v259_v48 = vadd.f32 %v15332_v10, %v15328_v8 }
  0xec   :  { %v15415_v52 = vpop.f32.mrf.mxu2 }
  0xed   :  { %v15417_v54 = vpop.f32.mrf.mxu3  ;;  %v15424_v56 = vpop.f32.mrf.mxu1 }
  0xee   :  { %v15422_v55 = vpop.f32.mrf.mxu0 }
  0xf4   :  { %v15452_v43 = vpop.f32.mrf.mxu2 }
  0xf5   :  { %v15454_v44 = vpop.f32.mrf.mxu3  ;;  %v797_v46 = vpop.f32.mrf.mxu1 }
  0xf6   :  { %v778_v45 = vpop.f32.mrf.mxu0  ;;  %v808_v0 = vadd.f32 %v797_v46, %v701_v2  ;;  %v10190_v46 = vor.u32 %v13981_v16, %v10187_v60  ;;  %v10269_v2 = vld [vmem:[%s20396_s3 + $0x1e0] sm:$0xf]  ;;  %v10271_v16 = vld [vmem:[%s20396_s3 + $0x1ec] sm:$0xf0] }
  0xf7   :  { %v807_v63 = vadd.f32 %v778_v45, %v700_v59  ;;  %v10282_v59 = vor.u32 %v14006_v15, %v10281_v14  ;;  %v10270_v7 = vor.u32 %v14003_v6, %v10269_v2  ;;  %v13998_v14 = vld [vmem:[%s20396_s3 + $0x1c0] sm:$0xf0]  ;;  %v278_v15 = vadd.f32 %v15334_v11, %v15330_v9  ;;  %v13995_v6 = vld [vmem:[%s20396_s3 + $0x1a8] sm:$0xf0] }
  0xf8   :  { %1354 = vmatpush.bf16.msra.mxu2 %v10190_v46  ;;  %v13975_v46 = vld [vmem:[%s20396_s3 + $0x10c] sm:$0xf]  ;;  %v385_v9 = vadd.f32 %v15356_v24, %v259_v48 }
  0xf9   :  { %1336 = vmatpush.bf16.msra.mxu1 %v10282_v59  ;;  %v10166_v32 = vor.u32 %v13975_v46, %v10163_v47  ;;  %v386_v11 = vadd.f32 %v15358_v25, %v278_v15  ;;  %v13989_v46 = vld [vmem:[%s20396_s3 + $0x178] sm:$0xf0] }
  0xfa   :  { %v492_v24 = vadd.f32 %v15360_v26, %v385_v9 }
  0xfb   :  { %v493_v25 = vadd.f32 %v15362_v27, %v386_v11  ;;  %v10193_v11 = vld [vmem:[%s20396_s3 + $0x140] sm:$0xf] }
  0xfc   :  { %v885_v39 = vpop.f32.mrf.mxu2  ;;  %1355 = vmatpush.bf16.msra.mxu2 %v10178_v21  ;;  %v10371_v21 = vld [vmem:[%s20396_s3 + $0x90] sm:$0xf] }
  0xfd   :  { %v904_v40 = vpop.f32.mrf.mxu3  ;;  %v914_v61 = vadd.f32 %v885_v39, %v807_v63  ;;  %v799_v45 = vpop.f32.mrf.mxu1  ;;  %v10286_v63 = vor.u32 %v14005_v57, %v10283_v35  ;;  %v491_v39 = vadd.f32 %v15354_v23, %v384_v3  ;;  %1337 = vmatpush.bf16.msra.mxu1 %v10270_v7 }
  0xfe   :  { %v915_v12 = vadd.f32 %v904_v40, %v808_v0  ;;  %v780_v13 = vpop.f32.mrf.mxu0  ;;  %v810_v5 = vadd.f32 %v799_v45, %v703_v51  ;;  %v14002_v0 = vld [vmem:[%s20396_s3 + $0x1e4] sm:$0xf]  ;;  %v10259_v51 = vld [vmem:[%s20396_s3 + $0x1d4] sm:$0xf0] }
  0xff   :  { %v928_v18 = vadd.f32 %v15484_v38, %v914_v61  ;;  %v809_v4 = vadd.f32 %v780_v13, %v702_v33  ;;  %1372 = vmatpush.bf16.msra.mxu3 %v10286_v63  ;;  %v10274_v60 = vor.u32 %v14002_v0, %v10271_v16  ;;  %v13976_v61 = vld [vmem:[%s20396_s3 + $0x110] sm:$0xf0]  ;;  %v13999_v33 = vld [vmem:[%s20396_s3 + $0x1cc] sm:$0xf]  ;;  %v13961_v16 = vld [vmem:[%s20396_s3 + $0x98] sm:$0xf0] }
 0x100   :  { %v929_v19 = vadd.f32 %v15486_v62, %v915_v12  ;;  %v10257_v12 = vld [vmem:[%s20396_s3 + $0x1c8] sm:$0xf]  ;;  %v14000_v13 = vld [vmem:[%s20396_s3 + $0x1d0] sm:$0xf0]  ;;  %v10162_v45 = vor.u32 %v13976_v61, %v10161_v17  ;;  %v10262_v28 = vor.u32 %v13999_v33, %v10259_v51  ;;  %1356 = vmatpush.bf16.msra.mxu2 %v10166_v32 }
 0x101   :  { %v936_v58 = vmax.f32 %v928_v18, 0.0  ;;  %v597_v18 = vadd.f32 %v15376_v36, %v490_v31  ;;  %v10258_v36 = vor.u32 %v14000_v13, %v10257_v12  ;;  %v10359_v12 = vld [vmem:[%s20396_s3 + $0x78] sm:$0xf]  ;;  %v13958_v13 = vld [vmem:[%s20396_s3 + $0x80] sm:$0xf0] }
 0x102   :  { %v937_v34 = vmax.f32 %v929_v19, 0.0  ;;  %v598_v19 = vadd.f32 %v15378_v37, %v491_v39  ;;  %1320 = vmatpush.bf16.msra.mxu0 %v10162_v45  ;;  %v10253_v37 = vld [vmem:[%s20396_s3 + $0x1b8] sm:$0xf]  ;;  %v599_v39 = vadd.f32 %v15422_v55, %v492_v24  ;;  %v10360_v45 = vor.u32 %v13958_v13, %v10359_v12 }
 0x103   :  { %v15545_v1 = vrot.slane %v936_v58, 7  ;;  %v704_v57 = vadd.f32 %v15415_v52, %v597_v18  ;;  %1373 = vmatpush.bf16.msra.mxu3 %v10274_v60  ;;  %v10254_v29 = vor.u32 %v13998_v14, %v10253_v37  ;;  %v10383_v58 = vld [vmem:[%s20396_s3 + $0xa8] sm:$0xf]  ;;  %1338 = vmatpush.bf16.msra.mxu1 %v10258_v36  ;;  %v13992_v60 = vld [vmem:[%s20396_s3 + $0x190] sm:$0xf0] }
 0x104   :  { %v15547_v30 = vrot.slane %v937_v34, 7  ;;  %v887_v40 = vpop.f32.mrf.mxu2  ;;  %v13964_v34 = vld [vmem:[%s20396_s3 + $0xb0] sm:$0xf0]  ;;  %v705_v59 = vadd.f32 %v15417_v54, %v598_v19  ;;  %v10241_v54 = vld [vmem:[%s20396_s3 + $0x1a0] sm:$0xf]  ;;  %v706_v47 = vadd.f32 %v15452_v43, %v599_v39 }
 0x105   :  { %v906_v42 = vpop.f32.mrf.mxu3  ;;  %959 = vst [vmem:[#allocation3] sm:$0xfe] %v15545_v1  ;;  %v916_v22 = vadd.f32 %v887_v40, %v809_v4  ;;  %v802_v50 = vpop.f32.mrf.mxu1  ;;  %v10384_v3 = vor.u32 %v13964_v34, %v10383_v58  ;;  %v10242_v7 = vor.u32 %v13995_v6, %v10241_v54  ;;  %v10372_v40 = vor.u32 %v13961_v16, %v10371_v21  ;;  %v10335_v58 = vld [vmem:[%s20396_s3 + $0x48] sm:$0xf]  ;;  %v13949_v54 = vld [vmem:[%s20396_s3 + $0x38] sm:$0xf0] }
 0x106   :  { %v917_v23 = vadd.f32 %v906_v42, %v810_v5  ;;  %961 = vst.msk [vmem:[#allocation3 + $0x8] sm:$0xfe] %vm960_vm3, %v15547_v30  ;;  %v783_v49 = vpop.f32.mrf.mxu0  ;;  %1385 = vmatpush.bf16.msrb.mxu0 %v10254_v29  ;;  %v812_v63 = vadd.f32 %v802_v50, %v705_v59  ;;  %v10229_v42 = vld [vmem:[%s20396_s3 + $0x188] sm:$0xf]  ;;  %v13955_v50 = vld [vmem:[%s20396_s3 + $0x68] sm:$0xf0] }
 0x107   :  { %v930_v8 = vadd.f32 %v15484_v38, %v916_v22  ;;  %v811_v5 = vadd.f32 %v783_v49, %v704_v57  ;;  %1603 = vmatpush.bf16.msrb.mxu2 %v10384_v3  ;;  %1374 = vmatpush.bf16.msra.mxu3 %v10262_v28  ;;  %v10230_v55 = vor.u32 %v13992_v60, %v10229_v42  ;;  %v10347_v49 = vld [vmem:[%s20396_s3 + $0x60] sm:$0xf]  ;;  %v10205_v28 = vld [vmem:[%s20396_s3 + $0x158] sm:$0xf]  ;;  %v13986_v29 = vld [vmem:[%s20396_s3 + $0x160] sm:$0xf0] }
 0x108   :  { %v931_v10 = vadd.f32 %v15486_v62, %v917_v23  ;;  %v10206_v34 = vor.u32 %v13986_v29, %v10205_v28  ;;  %v10419_v39 = vld [vmem:[%s20396_s3 + $0xf0] sm:$0xf]  ;;  %v13943_v28 = vld [vmem:[%s20396_s3 + $0x8] sm:$0xf0]  ;;  %vm5458_vm3 = vcmask 1043459  }
 0x109   :  { %v938_v35 = vmax.f32 %v930_v8, 0.0 }
 0x10a   :  { %v939_v2 = vmax.f32 %v931_v10, 0.0  ;;  %1386 = vmatpush.bf16.msrb.mxu0 %v10242_v7 }
 0x10b   :  { %v951_v52 = vrot.slane %v938_v35, 7  ;;  %1604 = vmatpush.bf16.msrb.mxu2 %v10372_v40 }
 0x10c   :  { %v953_v4 = vrot.slane %v939_v2, 7  ;;  %v890_v20 = vpop.f32.mrf.mxu2  ;;  %v1045_v2 = vld [vmem:[#allocation3] sm:$0xfe] }
 0x10d   :  { %v909_v0 = vpop.f32.mrf.mxu3  ;;  %v952_v17 = vsel %vm948_vm4, %v15545_v1, %v951_v52  ;;  %v918_v27 = vadd.f32 %v890_v20, %v811_v5  ;;  %v600_v1 = vadd.f32 %v15424_v56, %v493_v25  ;;  %v804_v23 = vpop.f32.mrf.mxu1  ;;  %v10217_v56 = vld [vmem:[%s20396_s3 + $0x170] sm:$0xf]  ;;  %v13983_v52 = vld [vmem:[%s20396_s3 + $0x148] sm:$0xf0] }
 0x10e   :  { %v954_v26 = vsel %vm948_vm4, %v15547_v30, %v953_v4  ;;  %v919_v31 = vadd.f32 %v909_v0, %v812_v63  ;;  %962 = vst [vmem:[#allocation3 + $0x10] sm:$0xf] %v952_v17  ;;  %v785_v22 = vpop.f32.mrf.mxu0  ;;  %1387 = vmatpush.bf16.msrb.mxu0 %v10230_v55  ;;  %v10218_v32 = vor.u32 %v13989_v46, %v10217_v56  ;;  %v10323_v63 = vld [vmem:[%s20396_s3 + $0x30] sm:$0xf]  ;;  %v1046_v0 = vld [vmem:[#allocation3 + $0x8] sm:$0xfe] }
 0x10f   :  { %964 = vst.msk [vmem:[#allocation3 + $0x18] sm:$0xf] %vm963_vm5, %v954_v26  ;;  %v932_v30 = vadd.f32 %v15484_v38, %v918_v27  ;;  %v707_v48 = vadd.f32 %v15454_v44, %v600_v1  ;;  %v813_v8 = vadd.f32 %v785_v22, %v706_v47  ;;  %1605 = vmatpush.bf16.msrb.mxu2 %v10360_v45  ;;  %v10289_v17 = vld [vmem:[%s20396_s3 + $0x200] sm:$0xf]  ;;  %v14007_v26 = vld [vmem:[%s20396_s3 + $0x208] sm:$0xf0] }
 0x110   :  { %v933_v61 = vadd.f32 %v15486_v62, %v919_v31  ;;  %v10348_v44 = vor.u32 %v13955_v50, %v10347_v49  ;;  %v10194_v5 = vor.u32 %v13983_v52, %v10193_v11  ;;  %v10324_v7 = vor.u32 %v13949_v54, %v10323_v63  ;;  %v10181_v55 = vld [vmem:[%s20396_s3 + $0x128] sm:$0xf]  ;;  %v14004_v47 = vld [vmem:[%s20396_s3 + $0x1f0] sm:$0xf0]  ;;  %v10407_v50 = vld [vmem:[%s20396_s3 + $0xd8] sm:$0xf] }
 0x111   :  { %v940_v18 = vmax.f32 %v932_v30, 0.0  ;;  %v814_v10 = vadd.f32 %v804_v23, %v707_v48  ;;  %v10290_v31 = vor.u32 %v14007_v26, %v10289_v17  ;;  %v13980_v23 = vld [vmem:[%s20396_s3 + $0x130] sm:$0xf0]  ;;  %v10277_v45 = vld [vmem:[%s20396_s3 + $0x1e8] sm:$0xf]  ;;  %vm5460_vm5 = vcmask 1042432  }
 0x112   :  { %v941_v19 = vmax.f32 %v933_v61, 0.0  ;;  %1388 = vmatpush.bf16.msrb.mxu0 %v10218_v32  ;;  %v13973_v61 = vld [vmem:[%s20396_s3 + $0xf8] sm:$0xf0]  ;;  %v10182_v46 = vor.u32 %v13980_v23, %v10181_v55  ;;  %v10311_v48 = vld [vmem:[%s20396_s3 + $0x18] sm:$0xf] }
 0x113   :  { %v970_v33 = vrot.slane %v940_v18, 4  ;;  %1606 = vmatpush.bf16.msrb.mxu2 %v10348_v44  ;;  %1408 = vmatpush.bf16.msrb.mxu1 %v10290_v31  ;;  %v10420_v22 = vor.u32 %v13973_v61, %v10419_v39  ;;  %v13946_v18 = vld [vmem:[%s20396_s3 + $0x20] sm:$0xf0]  ;;  %v1711_v44 = vld [vmem:[#allocation3] sm:$0xfc] }
 0x114   :  { %v971_v51 = vrot.slane %v941_v19, 4  ;;  %v892_v43 = vpop.f32.mrf.mxu2  ;;  %v10278_v19 = vor.u32 %v14004_v47, %v10277_v45  ;;  %v10312_v49 = vor.u32 %v13946_v18, %v10311_v48  ;;  %v13970_v32 = vld [vmem:[%s20396_s3 + $0xe0] sm:$0xf0]  ;;  %v2080_v29 = vld [vmem:[#allocation3] sm:$0xf8] }
 0x115   :  { %v911_v36 = vpop.f32.mrf.mxu3  ;;  %982 = vst [vmem:[#allocation3 + $0x10] sm:$0xc0] %v970_v33  ;;  %v920_v37 = vadd.f32 %v892_v43, %v813_v8  ;;  %1626 = vmatpush.bf16.msrb.mxu3 %v10420_v22  ;;  %v10408_v8 = vor.u32 %v13970_v32, %v10407_v50  ;;  %v10265_v43 = vld [vmem:[%s20396_s3 + $0x1d0] sm:$0xf]  ;;  %v13965_v11 = vld [vmem:[%s20396_s3 + $0xb8] sm:$0xf0] }
 0x116   :  { %v921_v14 = vadd.f32 %v911_v36, %v814_v10  ;;  %984 = vst.msk [vmem:[#allocation3 + $0x18] sm:$0xc0] %vm983_vm6, %v971_v51  ;;  %1389 = vmatpush.bf16.msrb.mxu0 %v10206_v34  ;;  %v13977_v10 = vld [vmem:[%s20396_s3 + $0x118] sm:$0xf0]  ;;  %v10373_v31 = vld [vmem:[%s20396_s3 + $0x9c] sm:$0xf0] }
 0x117   :  { %v934_v15 = vadd.f32 %v15484_v38, %v920_v37  ;;  %v13952_v38 = vld [vmem:[%s20396_s3 + $0x50] sm:$0xf0]  ;;  %v14001_v36 = vld [vmem:[%s20396_s3 + $0x1d8] sm:$0xf0]  ;;  %1409 = vmatpush.bf16.msrb.mxu1 %v10278_v19  ;;  %v10361_v48 = vld [vmem:[%s20396_s3 + $0x84] sm:$0xf0] }
 0x118   :  { %v935_v57 = vadd.f32 %v15486_v62, %v921_v14  ;;  %v10336_v35 = vor.u32 %v13952_v38, %v10335_v58  ;;  %v10266_v34 = vor.u32 %v14001_v36, %v10265_v43  ;;  %v10367_v18 = vld [vmem:[%s20396_s3 + $0x80] sm:$0xf]  ;;  %v13959_v32 = vld [vmem:[%s20396_s3 + $0x88] sm:$0xf0]  ;;  %v13954_v43 = vld [vmem:[%s20396_s3 + $0x64] sm:$0xf] }
 0x119   :  { %v942_v59 = vmax.f32 %v934_v15, 0.0  ;;  %1627 = vmatpush.bf16.msrb.mxu3 %v10408_v8  ;;  %v10355_v36 = vld [vmem:[%s20396_s3 + $0x68] sm:$0xf]  ;;  %vm18857_vm6 = vcmp.lt.s32.totalorder %v45_v41, 640 }
 0x11a   :  { %v943_v62 = vmax.f32 %v935_v57, 0.0  ;;  %1607 = vmatpush.bf16.msrb.mxu2 %v10336_v35  ;;  %1390 = vmatpush.bf16.msrb.mxu0 %v10194_v5  ;;  %v10299_v57 = vld [vmem:[%s20396_s3] sm:$0xf]  ;;  %v13963_v35 = vld [vmem:[%s20396_s3 + $0xac] sm:$0xf] }
 0x11b   :  { %v972_v3 = vrot.slane %v942_v59, 4  ;;  %v10300_v38 = vor.u32 %v13943_v28, %v10299_v57  ;;  %v10395_v59 = vld [vmem:[%s20396_s3 + $0xc0] sm:$0xf]  ;;  %1410 = vmatpush.bf16.msrb.mxu1 %v10266_v34  ;;  %v13956_v57 = vld [vmem:[%s20396_s3 + $0x70] sm:$0xf0] }
 0x11c   :  { %v974_v9 = vrot.slane %v943_v62, 4  ;;  %v15674_v4 = vld [vmem:[#allocation3 + $0x10] sm:$0xff]  ;;  %v13967_v62 = vld [vmem:[%s20396_s3 + $0xc8] sm:$0xf0] }
 0x11d   :  { %v15683_v6 = vsel %vm969_vm7, %v970_v33, %v972_v3  ;;  %988 = vst [vmem:[#allocation3 + $0x30] sm:$0x1] %v972_v3  ;;  %v1049_v25 = vpack.c.bf16 %v15674_v4, %v1045_v2  ;;  %v15687_v20 = vld [vmem:[#allocation3 + $0x18] sm:$0xff]  ;;  %v10169_v33 = vld [vmem:[%s20396_s3 + $0x110] sm:$0xf]  ;;  %v10396_v2 = vor.u32 %v13967_v62, %v10395_v59  ;;  %v1719_v52 = vpack.c.bf16 %v15674_v4, %v1711_v44 }
 0x11e   :  { %v975_v24 = vsel %vm969_vm7, %v971_v51, %v974_v9  ;;  %985 = vst [vmem:[#allocation3 + $0x20] sm:$0xff] %v15683_v6  ;;  %v15692_v21 = vpack.c.bf16 %v15683_v6, %v15683_v6  ;;  %v15695_v16 = vpack.c.bf16 %v15687_v20, %v1046_v0  ;;  %1608 = vmatpush.bf16.msrb.mxu2 %v10324_v7  ;;  %v10385_v3 = vld [vmem:[%s20396_s3 + $0xb4] sm:$0xf0]  ;;  %vm9751_vm7 = vcmask 41984  }
 0x11f   :  { %987 = vst.msk [vmem:[#allocation3 + $0x28] sm:$0xff] %vm986_vm9, %v975_v24  ;;  %v1102_v27 = vshll.u32 %v1049_v25, 16  ;;  %v1100_v40 = vshrl.u32 %v1049_v25, 16  ;;  %1391 = vmatpush.bf16.msrb.mxu0 %v10182_v46  ;;  %v10170_v15 = vor.u32 %v13977_v10, %v10169_v33  ;;  %v10388_v63 = vor.u32 %v13963_v35, %v10385_v3  ;;  %v1712_v25 = vld [vmem:[#allocation3 + $0x8] sm:$0xfc]  ;;  %1628 = vmatpush.bf16.msrb.mxu3 %v10396_v2 }
 0x120   :  { %990 = vst.msk [vmem:[#allocation3 + $0x38] sm:$0x1] %vm989_vm8, %v974_v9  ;;  %v1107_v42 = vshll.u32 %v15692_v21, 16  ;;  %v1112_v60 = vshrl.u32 %v15695_v16, 16  ;;  %v1114_v30 = vshll.u32 %v15695_v16, 16  ;;  %v1123_v13 = vshrl.u32 %v15692_v21, 16 }
 0x121   :  { %v1104_v1 = vrot.slane %v1102_v27, 1  ;;  %v10391_v9 = vld [vmem:[%s20396_s3 + $0xb0] sm:$0xf]  ;;  %v2084_v24 = vpack.c.bf16 %v15674_v4, %v2080_v29  ;;  %v13960_v27 = vld [vmem:[%s20396_s3 + $0x94] sm:$0xf]  ;;  %v10368_v10 = vor.u32 %v13959_v32, %v10367_v18 }
 0x122   :  { %v15717_v12 = vrot.slane %v1107_v42, 1  ;;  %v1116_v14 = vrot.slane %v1114_v30, 1  ;;  %1609 = vmatpush.bf16.msrb.mxu2 %v10312_v49  ;;  %v10392_v54 = vor.u32 %v13965_v11, %v10391_v9  ;;  %v10376_v42 = vor.u32 %v13960_v27, %v10373_v31  ;;  %v10349_v21 = vld [vmem:[%s20396_s3 + $0x6c] sm:$0xf0]  ;;  %v13945_v18 = vld [vmem:[%s20396_s3 + $0x1c] sm:$0xf] }
 0x123   :  { %v1105_v56 = vor.u32 %v1104_v1, %v1100_v40  ;;  %1392 = vmatpush.bf16.msrb.mxu0 %v10170_v15  ;;  %v1720_v40 = vpack.c.bf16 %v15687_v20, %v1712_v25  ;;  %v13962_v1 = vld [vmem:[%s20396_s3 + $0xa0] sm:$0xf0]  ;;  %v1773_v30 = vrot.slane %v1719_v52, 1  ;;  %v2135_v47 = vshrl.u32 %v2084_v24, 16  ;;  %v10343_v27 = vld [vmem:[%s20396_s3 + $0x50] sm:$0xf] }
 0x124   :  { %v1717_v0 = vld [vmem:[#allocation3 + $0x30] sm:$0x1]  ;;  %v1117_v17 = vor.u32 %v1116_v14, %v1112_v60  ;;  %v10379_v60 = vld [vmem:[%s20396_s3 + $0x98] sm:$0xf]  ;;  %v15834_v50 = vor.u32 %v1123_v13, %v15717_v12  ;;  %v10352_v3 = vor.u32 %v13954_v43, %v10349_v21  ;;  %v991_v21 = vld [vmem:[#allocation3] sm:$0xff] }
 0x125   :  { %v15746_v51 = vsel %vm1098_vm10, %v1105_v56, %v15717_v12  ;;  %v2082_v7 = vld [vmem:[#allocation3 + $0x30] sm:$0x3]  ;;  %v1721_v39 = vpack.c.bf16 %v1717_v0, %v15683_v6  ;;  %v10380_v23 = vor.u32 %v13962_v1, %v10379_v60  ;;  %v2081_v56 = vld [vmem:[#allocation3 + $0x8] sm:$0xf8]  ;;  %v1776_v12 = vrot.slane %v1720_v40, 1 }
 0x126   :  { %1321 = vmatmul.bf16.vlgmr.msra.gmra.mxu0 %v15746_v51  ;;  %v15758_v37 = vld [vmem:[#allocation3 + $0x28] sm:$0xff]  ;;  %1357 = vmatmul.bf16.vlgmr.msra.gmra.mxu2 %v15746_v51  ;;  %v2086_v61 = vpack.c.bf16 %v2082_v7, %v15683_v6  ;;  %v2085_v19 = vpack.c.bf16 %v15687_v20, %v2081_v56  ;;  %v2137_v44 = vrot.slane %v2135_v47, 1  ;;  %v10421_v56 = vld [vmem:[%s20396_s3 + $0xfc] sm:$0xf0] }
 0x127   :  { %v15769_v58 = vpack.c.bf16 %v15758_v37, %v15758_v37  ;;  %v1718_v16 = vld [vmem:[#allocation3 + $0x38] sm:$0x1]  ;;  %1610 = vmatpush.bf16.msrb.mxu2 %v10300_v38  ;;  %1639 = vmatpush.bf16.msra.mxu0 %v10388_v63  ;;  %v15814_v45 = vrot.slane %v1721_v39, 1  ;;  %v13957_v6 = vld [vmem:[%s20396_s3 + $0x7c] sm:$0xf] }
 0x128   :  { %v1722_v55 = vpack.c.bf16 %v1718_v16, %v15758_v37  ;;  %v2083_v46 = vld [vmem:[#allocation3 + $0x38] sm:$0x3]  ;;  %v10364_v8 = vor.u32 %v13957_v6, %v10361_v48  ;;  %v2143_v14 = vshrl.u32 %v2086_v61, 16  ;;  %v2146_v15 = vshll.u32 %v2086_v61, 16  ;;  %v13951_v16 = vld [vmem:[%s20396_s3 + $0x4c] sm:$0xf] }
 0x129   :  { %v1119_v5 = vshll.u32 %v15769_v58, 16  ;;  %v2087_v49 = vpack.c.bf16 %v2083_v46, %v15758_v37  ;;  %v15841_v33 = vsel %vm1772_vm11, %v1773_v30, %v15814_v45  ;;  %v2138_v37 = vshll.u32 %v2084_v24, 16  ;;  %v13953_v39 = vld [vmem:[%s20396_s3 + $0x58] sm:$0xf0]  ;;  %v13948_v30 = vld [vmem:[%s20396_s3 + $0x34] sm:$0xf] }
 0x12a   :  { %v15849_v13 = vrot.slane %v1722_v55, 1  ;;  %v2152_v29 = vshrl.u32 %v2085_v19, 16  ;;  %v2155_v34 = vshll.u32 %v2085_v19, 16  ;;  %v2145_v62 = vrot.slane %v2143_v14, 1  ;;  %v10325_v61 = vld [vmem:[%s20396_s3 + $0x3c] sm:$0xf0] }
 0x12b   :  { %v15792_v26 = vrot.slane %v1119_v5, 1  ;;  %1675 = vmatpush.bf16.msra.mxu2 %v10392_v54  ;;  %1640 = vmatpush.bf16.msra.mxu0 %v10376_v42  ;;  %v2160_v38 = vshrl.u32 %v2087_v49, 16  ;;  %v2140_v59 = vrot.slane %v2138_v37, 2  ;;  %v2148_v35 = vrot.slane %v2146_v15, 2  ;;  %v10331_v55 = vld [vmem:[%s20396_s3 + $0x38] sm:$0xf] }
 0x12c   :  { %v15859_v28 = vsel %vm1772_vm11, %v1776_v12, %v15849_v13  ;;  %v2163_v2 = vshll.u32 %v2087_v49, 16  ;;  %v2154_v9 = vrot.slane %v2152_v29, 1  ;;  %v2157_v11 = vrot.slane %v2155_v34, 2  ;;  %v10427_v47 = vld [vmem:[%s20396_s3 + $0xf8] sm:$0xf] }
 0x12d   :  { %v15812_v22 = vsel %vm1098_vm10, %v1117_v17, %v15792_v26  ;;  %v2162_v52 = vrot.slane %v2160_v38, 1  ;;  %v10356_v5 = vor.u32 %v13956_v57, %v10355_v36  ;;  %v2141_v63 = vor.u32 %v2140_v59, %v2137_v44  ;;  %v10337_v17 = vld [vmem:[%s20396_s3 + $0x54] sm:$0xf0]  ;;  %v13974_v48 = vld [vmem:[%s20396_s3 + $0x100] sm:$0xf0] }
 0x12e   :  { %10291 = vmatmul.msk.bf16.vlgmr.msra.gmra.mxu1 %vm986_vm9, %v15812_v22  ;;  %10293 = vmatmul.msk.bf16.vlgmr.msra.gmra.mxu3 %vm986_vm9, %v15812_v22  ;;  %v15861_v54 = vor.u32 %v2148_v35, %v2145_v62  ;;  %v2165_v24 = vrot.slane %v2163_v2, 2  ;;  %v2158_v0 = vor.u32 %v2157_v11, %v2154_v9  ;;  %v10340_v31 = vor.u32 %v13951_v16, %v10337_v17  ;;  %v10313_v19 = vld [vmem:[%s20396_s3 + $0x24] sm:$0xf0]  ;;  %v10319_v43 = vld [vmem:[%s20396_s3 + $0x20] sm:$0xf]  ;;  %v992_v17 = vld [vmem:[#allocation3 + $0x8] sm:$0xff] }
 0x12f   :  { %1676 = vmatpush.bf16.msra.mxu2 %v10380_v23  ;;  %1641 = vmatpush.bf16.msra.mxu0 %v10364_v8  ;;  %v1126_v42 = vshrl.u32 %v15769_v58, 16  ;;  %v10344_v60 = vor.u32 %v13953_v39, %v10343_v27  ;;  %v10328_v23 = vor.u32 %v13948_v30, %v10325_v61  ;;  %v13950_v58 = vld [vmem:[%s20396_s3 + $0x40] sm:$0xf0]  ;;  %v10428_v49 = vor.u32 %v13974_v48, %v10427_v47  ;;  %v13969_v8 = vld [vmem:[%s20396_s3 + $0xdc] sm:$0xf] }
 0x130   :  { %v15867_v25 = vsel %vm2133_vm12, %v2141_v63, %v15861_v54  ;;  %v15869_v7 = vor.u32 %v2165_v24, %v2162_v52  ;;  %v10332_v46 = vor.u32 %v13950_v58, %v10331_v55  ;;  %v10316_v32 = vor.u32 %v13945_v18, %v10313_v19  ;;  %v13947_v36 = vld [vmem:[%s20396_s3 + $0x28] sm:$0xf0]  ;;  %v10415_v44 = vld [vmem:[%s20396_s3 + $0xe0] sm:$0xf]  ;;  %v13942_v15 = vld [vmem:[%s20396_s3 + $0x4] sm:$0xf] }
 0x131   :  { %v15889_v1 = vor.u32 %v1126_v42, %v15792_v26  ;;  %v13972_v26 = vld [vmem:[%s20396_s3 + $0xf4] sm:$0xf]  ;;  %v13971_v37 = vld [vmem:[%s20396_s3 + $0xe8] sm:$0xf0]  ;;  %1698 = vmatpush.bf16.msra.mxu3 %v10428_v49  ;;  %v10320_v14 = vor.u32 %v13947_v36, %v10319_v43  ;;  %v10301_v57 = vld [vmem:[%s20396_s3 + $0xc] sm:$0xf0]  ;;  %v15962_v35 = vpack.c.bf16 %v15674_v4, %v991_v21  ;;  %v15985_v27 = vpack.c.bf16 %v15687_v20, %v992_v17 }
 0x132   :  { %v15885_v40 = vsel %vm2133_vm12, %v2158_v0, %v15869_v7  ;;  %v10424_v6 = vor.u32 %v13972_v26, %v10421_v56  ;;  %v13966_v29 = vld [vmem:[%s20396_s3 + $0xc4] sm:$0xf]  ;;  %v10416_v34 = vor.u32 %v13971_v37, %v10415_v44  ;;  %v10397_v38 = vld [vmem:[%s20396_s3 + $0xcc] sm:$0xf0]  ;;  %v10307_v59 = vld [vmem:[%s20396_s3 + $0x8] sm:$0xf]  ;;  %v10304_v2 = vor.u32 %v13942_v15, %v10301_v57 }
 0x133   :  { %1677 = vmatpush.bf16.msra.mxu2 %v10368_v10  ;;  %1642 = vmatpush.bf16.msra.mxu0 %v10352_v3  ;;  %v10409_v10 = vld [vmem:[%s20396_s3 + $0xe4] sm:$0xf0]  ;;  %v13944_v62 = vld [vmem:[%s20396_s3 + $0x10] sm:$0xf0]  ;;  %v10400_v11 = vor.u32 %v13966_v29, %v10397_v38  ;;  %v14030_v63 = vld [vmem:[%s20396_s3 + $0x2c0] sm:$0xf0] }
 0x134   :  { %1662 = vmatpush.bf16.msra.mxu1 %v10424_v6  ;;  %v10412_v12 = vor.u32 %v13969_v8, %v10409_v10  ;;  %v10403_v3 = vld [vmem:[%s20396_s3 + $0xc8] sm:$0xf]  ;;  %v13968_v9 = vld [vmem:[%s20396_s3 + $0xd0] sm:$0xf0]  ;;  %v10308_v52 = vor.u32 %v13944_v62, %v10307_v59  ;;  %v14029_v24 = vld [vmem:[%s20396_s3 + $0x2bc] sm:$0xf] }
 0x135   :  { %1699 = vmatpush.bf16.msra.mxu3 %v10416_v34  ;;  %v10404_v4 = vor.u32 %v13968_v9, %v10403_v3  ;;  %v10567_v0 = vld [vmem:[%s20396_s3 + $0x2c4] sm:$0xf0]  ;;  %v14027_v39 = vld [vmem:[%s20396_s3 + $0x2a8] sm:$0xf0]  ;;  %v14026_v42 = vld [vmem:[%s20396_s3 + $0x2a4] sm:$0xf] }
 0x136   :  { %1326 = vmatmul.bf16.gmra.mxu0 %v15834_v50  ;;  %1362 = vmatmul.bf16.gmra.mxu2 %v15834_v50  ;;  %v10570_v16 = vor.u32 %v14029_v24, %v10567_v0  ;;  %v10555_v30 = vld [vmem:[%s20396_s3 + $0x2ac] sm:$0xf0]  ;;  %v10541_v61 = vld [vmem:[%s20396_s3 + $0x288] sm:$0xf]  ;;  %v14024_v55 = vld [vmem:[%s20396_s3 + $0x290] sm:$0xf0] }
 0x137   :  { %1678 = vmatpush.bf16.msra.mxu2 %v10356_v5  ;;  %1643 = vmatpush.bf16.msra.mxu0 %v10340_v31  ;;  %v10565_v5 = vld [vmem:[%s20396_s3 + $0x2b8] sm:$0xf]  ;;  %v10553_v31 = vld [vmem:[%s20396_s3 + $0x2a0] sm:$0xf]  ;;  %v10558_v20 = vor.u32 %v14026_v42, %v10555_v30  ;;  %v10542_v58 = vor.u32 %v14024_v55, %v10541_v61  ;;  %v10529_v56 = vld [vmem:[%s20396_s3 + $0x270] sm:$0xf] }
 0x138   :  { %1663 = vmatpush.bf16.msra.mxu1 %v10412_v12  ;;  %v995_v47 = vld [vmem:[#allocation3 + $0x20] sm:$0x7f]  ;;  %v10531_v48 = vld [vmem:[%s20396_s3 + $0x27c] sm:$0xf0]  ;;  %v14018_v8 = vld [vmem:[%s20396_s3 + $0x260] sm:$0xf0] }
 0x139   :  { %1700 = vmatpush.bf16.msra.mxu3 %v10404_v4  ;;  %v14020_v6 = vld [vmem:[%s20396_s3 + $0x274] sm:$0xf]  ;;  %v16027_v19 = vpack.c.bf16 %v995_v47, %v995_v47  ;;  %v14017_v10 = vld [vmem:[%s20396_s3 + $0x25c] sm:$0xf]  ;;  %v10505_v44 = vld [vmem:[%s20396_s3 + $0x240] sm:$0xf] }
 0x13a   :  { %v10534_v49 = vor.u32 %v14020_v6, %v10531_v48  ;;  %v996_v43 = vld [vmem:[#allocation3 + $0x28] sm:$0x7f]  ;;  %v14015_v37 = vld [vmem:[%s20396_s3 + $0x248] sm:$0xf0]  ;;  %v10507_v57 = vld [vmem:[%s20396_s3 + $0x24c] sm:$0xf0] }
 0x13b   :  { %1679 = vmatpush.bf16.msra.mxu2 %v10344_v60  ;;  %1644 = vmatpush.bf16.msra.mxu0 %v10328_v23  ;;  %v10554_v60 = vor.u32 %v14027_v39, %v10553_v31  ;;  %v14023_v23 = vld [vmem:[%s20396_s3 + $0x28c] sm:$0xf]  ;;  %v16043_v36 = vpack.c.bf16 %v996_v43, %v996_v43  ;;  %v10506_v15 = vor.u32 %v14015_v37, %v10505_v44  ;;  %v10601_v29 = vld [vmem:[%s20396_s3 + $0x300] sm:$0xf]  ;;  %v14038_v59 = vld [vmem:[%s20396_s3 + $0x304] sm:$0xf] }
 0x13c   :  { %1664 = vmatpush.bf16.msra.mxu1 %v10400_v11  ;;  %v14039_v34 = vld [vmem:[%s20396_s3 + $0x308] sm:$0xf0]  ;;  %v14012_v3 = vld [vmem:[%s20396_s3 + $0x230] sm:$0xf0]  ;;  %v10495_v24 = vld [vmem:[%s20396_s3 + $0x234] sm:$0xf0] }
 0x13d   :  { %v10602_v62 = vor.u32 %v14039_v34, %v10601_v29  ;;  %v14036_v4 = vld [vmem:[%s20396_s3 + $0x2f0] sm:$0xf0]  ;;  %v10591_v0 = vld [vmem:[%s20396_s3 + $0x2f4] sm:$0xf0]  ;;  %v10481_v17 = vld [vmem:[%s20396_s3 + $0x210] sm:$0xf] }
 0x13e   :  { %10292 = vmatmul.msk.bf16.gmra.mxu1 %vm986_vm9, %v15889_v1  ;;  %10294 = vmatmul.msk.bf16.gmra.mxu3 %vm986_vm9, %v15889_v1  ;;  %v14009_v31 = vld [vmem:[%s20396_s3 + $0x218] sm:$0xf0]  ;;  %v10577_v39 = vld [vmem:[%s20396_s3 + $0x2d0] sm:$0xf]  ;;  %v10483_v61 = vld [vmem:[%s20396_s3 + $0x21c] sm:$0xf0] }
 0x13f   :  { %1680 = vmatpush.bf16.msra.mxu2 %v10332_v46  ;;  %1645 = vmatpush.bf16.msra.mxu0 %v10316_v32  ;;  %v14021_v46 = vld [vmem:[%s20396_s3 + $0x278] sm:$0xf0]  ;;  %v10517_v32 = vld [vmem:[%s20396_s3 + $0x258] sm:$0xf]  ;;  %v14063_v6 = vld [vmem:[%s20396_s3 + $0x3c8] sm:$0xf0] }
 0x140   :  { %v10530_v18 = vor.u32 %v14021_v46, %v10529_v56  ;;  %v10518_v21 = vor.u32 %v14018_v8, %v10517_v32  ;;  %v14033_v30 = vld [vmem:[%s20396_s3 + $0x2d8] sm:$0xf0]  ;;  %v10573_v56 = vld [vmem:[%s20396_s3 + $0x2c0] sm:$0xf]  ;;  %v14028_v48 = vld [vmem:[%s20396_s3 + $0x2b0] sm:$0xf0] }
 0x141   :  { %v10747_v46 = vld [vmem:[%s20396_s3 + $0x3c0] sm:$0xf]  ;;  %v14060_v32 = vld [vmem:[%s20396_s3 + $0x3b0] sm:$0xf0]  ;;  %v14025_v43 = vld [vmem:[%s20396_s3 + $0x298] sm:$0xf0] }
 0x142   :  { %v10537_v37 = vld [vmem:[%s20396_s3 + $0x278] sm:$0xf]  ;;  %v14054_v29 = vld [vmem:[%s20396_s3 + $0x380] sm:$0xf0] }
 0x143   :  { %1681 = vmatpush.bf16.msra.mxu2 %v10320_v14  ;;  %1646 = vmatpush.bf16.msra.mxu0 %v10304_v2  ;;  %v14014_v14 = vld [vmem:[%s20396_s3 + $0x244] sm:$0xf]  ;;  %v10493_v2 = vld [vmem:[%s20396_s3 + $0x228] sm:$0xf] }
 0x144   :  { %v10510_v38 = vor.u32 %v14014_v14, %v10507_v57  ;;  %v10494_v11 = vor.u32 %v14012_v3, %v10493_v2  ;;  %v14022_v14 = vld [vmem:[%s20396_s3 + $0x280] sm:$0xf0]  ;;  %v10711_v57 = vld [vmem:[%s20396_s3 + $0x378] sm:$0xf]  ;;  %v14051_v2 = vld [vmem:[%s20396_s3 + $0x368] sm:$0xf0] }
 0x145   :  { %v10712_v34 = vor.u32 %v14054_v29, %v10711_v57  ;;  %v14016_v3 = vld [vmem:[%s20396_s3 + $0x250] sm:$0xf0]  ;;  %v10743_v57 = vld [vmem:[%s20396_s3 + $0x3b0] sm:$0xf] }
 0x146   :  { %1393 = vmatmul.bf16.vlgmr.msrb.gmra.mxu0 %v15746_v51  ;;  %1611 = vmatmul.bf16.vlgmr.msrb.gmra.mxu2 %v15962_v35  ;;  %v10566_v51 = vor.u32 %v14030_v63, %v10565_v5  ;;  %v14011_v5 = vld [vmem:[%s20396_s3 + $0x22c] sm:$0xf] }
 0x147   :  { %1682 = vmatpush.bf16.msra.mxu2 %v10308_v52  ;;  %v10589_v52 = vld [vmem:[%s20396_s3 + $0x2e8] sm:$0xf] }
 0x148   :  { %1963 = vmatpush.bf16.msrb.mxu0 %v10566_v51  ;;  %v10590_v63 = vor.u32 %v14036_v4, %v10589_v52  ;;  %v14035_v51 = vld [vmem:[%s20396_s3 + $0x2ec] sm:$0xf]  ;;  %v14040_v52 = vld [vmem:[%s20396_s3 + $0x310] sm:$0xf0]  ;;  %v10687_v4 = vld [vmem:[%s20396_s3 + $0x348] sm:$0xf] }
 0x149   :  { %v10594_v42 = vor.u32 %v14035_v51, %v10591_v0  ;;  %v10783_v51 = vld [vmem:[%s20396_s3 + $0x408] sm:$0xf]  ;;  %v14072_v0 = vld [vmem:[%s20396_s3 + $0x410] sm:$0xf0] }
 0x14b   :  { %1999 = vmatpush.bf16.msrb.mxu2 %v10570_v16  ;;  %v10498_v16 = vor.u32 %v14011_v5, %v10495_v24  ;;  %v14048_v24 = vld [vmem:[%s20396_s3 + $0x350] sm:$0xf0] }
 0x14c   :  { %1964 = vmatpush.bf16.msrb.mxu0 %v10554_v60  ;;  %v10482_v60 = vor.u32 %v14009_v31, %v10481_v17  ;;  %v10501_v17 = vld [vmem:[%s20396_s3 + $0x230] sm:$0xf]  ;;  %v14013_v31 = vld [vmem:[%s20396_s3 + $0x238] sm:$0xf0] }
 0x14e   :  { %10295 = vmatmul.msk.bf16.vlgmr.msrb.gmra.mxu1 %vm986_vm9, %v15812_v22  ;;  %10429 = vmatmul.msk.bf16.vlgmr.msrb.gmra.mxu3 %vm986_vm9, %v15985_v27  ;;  %v10543_v22 = vld [vmem:[%s20396_s3 + $0x294] sm:$0xf0] }
 0x14f   :  { %2000 = vmatpush.bf16.msrb.mxu2 %v10558_v20  ;;  %v10546_v26 = vor.u32 %v14023_v23, %v10543_v22  ;;  %1986 = vmatpush.bf16.msrb.mxu1 %v10602_v62  ;;  %v14008_v20 = vld [vmem:[%s20396_s3 + $0x214] sm:$0xf]  ;;  %v10578_v22 = vor.u32 %v14033_v30, %v10577_v39  ;;  %v10699_v62 = vld [vmem:[%s20396_s3 + $0x360] sm:$0xf]  ;;  %v10597_v39 = vld [vmem:[%s20396_s3 + $0x2f0] sm:$0xf] }
 0x150   :  { %1965 = vmatpush.bf16.msrb.mxu0 %v10542_v58  ;;  %v10486_v55 = vor.u32 %v14008_v20, %v10483_v61  ;;  %v14032_v23 = vld [vmem:[%s20396_s3 + $0x2d4] sm:$0xf]  ;;  %v10579_v58 = vld [vmem:[%s20396_s3 + $0x2dc] sm:$0xf0]  ;;  %v10675_v30 = vld [vmem:[%s20396_s3 + $0x330] sm:$0xf] }
 0x151   :  { %v14045_v61 = vld [vmem:[%s20396_s3 + $0x338] sm:$0xf0] }
 0x153   :  { %2001 = vmatpush.bf16.msrb.mxu2 %v10546_v26  ;;  %1987 = vmatpush.bf16.msrb.mxu1 %v10590_v63  ;;  %v10582_v26 = vor.u32 %v14032_v23, %v10579_v58  ;;  %v14069_v23 = vld [vmem:[%s20396_s3 + $0x3f8] sm:$0xf0]  ;;  %v10502_v58 = vor.u32 %v14013_v31, %v10501_v17 }
 0x154   :  { %1966 = vmatpush.bf16.msrb.mxu0 %v10530_v18  ;;  %v10748_v18 = vor.u32 %v14063_v6, %v10747_v46  ;;  %v10585_v46 = vld [vmem:[%s20396_s3 + $0x2d8] sm:$0xf]  ;;  %v14034_v6 = vld [vmem:[%s20396_s3 + $0x2e0] sm:$0xf0] }
 0x156   :  { %1398 = vmatmul.bf16.gmra.mxu0 %v15834_v50  ;;  %1616 = vmatmul.bf16.gmra.mxu2 %v16027_v19  ;;  %v10519_v50 = vld [vmem:[%s20396_s3 + $0x264] sm:$0xf0] }
 0x157   :  { %2002 = vmatpush.bf16.msrb.mxu2 %v10534_v49  ;;  %v10522_v12 = vor.u32 %v14017_v10, %v10519_v50  ;;  %1988 = vmatpush.bf16.msrb.mxu1 %v10578_v22  ;;  %v10735_v49 = vld [vmem:[%s20396_s3 + $0x3a8] sm:$0xf]  ;;  %v10549_v10 = vld [vmem:[%s20396_s3 + $0x290] sm:$0xf] }
 0x158   :  { %1967 = vmatpush.bf16.msrb.mxu0 %v10518_v21  ;;  %v10736_v21 = vor.u32 %v14060_v32, %v10735_v49  ;;  %v10723_v50 = vld [vmem:[%s20396_s3 + $0x390] sm:$0xf]  ;;  %v10550_v44 = vor.u32 %v14025_v43, %v10549_v10  ;;  %v10759_v32 = vld [vmem:[%s20396_s3 + $0x3d8] sm:$0xf]  ;;  %v14062_v10 = vld [vmem:[%s20396_s3 + $0x3c4] sm:$0xf] }
 0x15b   :  { %2003 = vmatpush.bf16.msrb.mxu2 %v10522_v12  ;;  %v14057_v12 = vld [vmem:[%s20396_s3 + $0x398] sm:$0xf0] }
 0x15c   :  { %1968 = vmatpush.bf16.msrb.mxu0 %v10506_v15  ;;  %v10724_v15 = vor.u32 %v14057_v12, %v10723_v50  ;;  %v10755_v50 = vld [vmem:[%s20396_s3 + $0x3c8] sm:$0xf]  ;;  %v14064_v12 = vld [vmem:[%s20396_s3 + $0x3d0] sm:$0xf0] }
 0x15e   :  { %10296 = vmatmul.msk.bf16.gmra.mxu1 %vm986_vm9, %v15889_v1  ;;  %10430 = vmatmul.msk.bf16.gmra.mxu3 %vm986_vm9, %v16043_v36  ;;  %v10603_v1 = vld [vmem:[%s20396_s3 + $0x30c] sm:$0xf0] }
 0x15f   :  { %2004 = vmatpush.bf16.msrb.mxu2 %v10510_v38  ;;  %v10606_v9 = vor.u32 %v14038_v59, %v10603_v1  ;;  %v10525_v38 = vld [vmem:[%s20396_s3 + $0x260] sm:$0xf]  ;;  %v14019_v59 = vld [vmem:[%s20396_s3 + $0x268] sm:$0xf0] }
 0x160   :  { %1969 = vmatpush.bf16.msrb.mxu0 %v10494_v11  ;;  %v10526_v1 = vor.u32 %v14019_v59, %v10525_v38  ;;  %v10609_v11 = vld [vmem:[%s20396_s3 + $0x308] sm:$0xf]  ;;  %v10725_v38 = vld [vmem:[%s20396_s3 + $0x39c] sm:$0xf0] }
 0x161   :  { %2022 = vmatpush.bf16.msrb.mxu3 %v10606_v9  ;;  %v10700_v9 = vor.u32 %v14051_v2, %v10699_v62  ;;  %v10610_v63 = vor.u32 %v14040_v52, %v10609_v11  ;;  %v10731_v62 = vld [vmem:[%s20396_s3 + $0x398] sm:$0xf]  ;;  %v10719_v11 = vld [vmem:[%s20396_s3 + $0x380] sm:$0xf] }
 0x163   :  { %2005 = vmatpush.bf16.msrb.mxu2 %v10498_v16  ;;  %v10784_v16 = vor.u32 %v14072_v0, %v10783_v51  ;;  %v10707_v51 = vld [vmem:[%s20396_s3 + $0x368] sm:$0xf] }
 0x164   :  { %1970 = vmatpush.bf16.msrb.mxu0 %v10482_v60  ;;  %v14037_v60 = vld [vmem:[%s20396_s3 + $0x2f8] sm:$0xf0] }
 0x165   :  { %2023 = vmatpush.bf16.msrb.mxu3 %v10594_v42  ;;  %v10688_v42 = vor.u32 %v14048_v24, %v10687_v4  ;;  %v10598_v20 = vor.u32 %v14037_v60, %v10597_v39  ;;  %v14055_v4 = vld [vmem:[%s20396_s3 + $0x388] sm:$0xf0]  ;;  %v10701_v24 = vld [vmem:[%s20396_s3 + $0x36c] sm:$0xf0] }
 0x166   :  { %1647 = vmatmul.bf16.vlgmr.msra.gmra.mxu0 %v15962_v35  ;;  %1683 = vmatmul.bf16.vlgmr.msra.gmra.mxu2 %v15962_v35  ;;  %v14031_v35 = vld [vmem:[%s20396_s3 + $0x2c8] sm:$0xf0] }
 0x167   :  { %2006 = vmatpush.bf16.msrb.mxu2 %v10486_v55  ;;  %v10574_v47 = vor.u32 %v14031_v35, %v10573_v56  ;;  %v10771_v55 = vld [vmem:[%s20396_s3 + $0x3f0] sm:$0xf]  ;;  %v10489_v56 = vld [vmem:[%s20396_s3 + $0x218] sm:$0xf]  ;;  %v14010_v35 = vld [vmem:[%s20396_s3 + $0x220] sm:$0xf0] }
 0x168   :  { %v10772_v22 = vor.u32 %v14069_v23, %v10771_v55  ;;  %v14047_v39 = vld [vmem:[%s20396_s3 + $0x34c] sm:$0xf]  ;;  %v14049_v55 = vld [vmem:[%s20396_s3 + $0x358] sm:$0xf0] }
 0x169   :  { %2024 = vmatpush.bf16.msrb.mxu3 %v10582_v26  ;;  %2035 = vmatpush.bf16.msra.mxu0 %v10574_v47  ;;  %v10676_v26 = vor.u32 %v14045_v61, %v10675_v30  ;;  %v10490_v47 = vor.u32 %v14010_v35, %v10489_v56  ;;  %v14071_v60 = vld [vmem:[%s20396_s3 + $0x40c] sm:$0xf]  ;;  %v10695_v61 = vld [vmem:[%s20396_s3 + $0x350] sm:$0xf]  ;;  %v14044_v56 = vld [vmem:[%s20396_s3 + $0x334] sm:$0xf] }
 0x16b   :  { %2352 = vmatpush.bf16.msra.mxu2 %v10748_v18  ;;  %v10586_v18 = vor.u32 %v14034_v6, %v10585_v46  ;;  %v10677_v46 = vld [vmem:[%s20396_s3 + $0x33c] sm:$0xf0] }
 0x16c   :  { %v10773_v6 = vld [vmem:[%s20396_s3 + $0x3fc] sm:$0xf0] }
 0x16e   :  { %10431 = vmatmul.msk.bf16.vlgmr.msra.gmra.mxu1 %vm986_vm9, %v15985_v27  ;;  %10433 = vmatmul.msk.bf16.vlgmr.msra.gmra.mxu3 %vm986_vm9, %v15985_v27  ;;  %v10561_v27 = vld [vmem:[%s20396_s3 + $0x2a8] sm:$0xf] }
 0x16f   :  { %v10562_v8 = vor.u32 %v14028_v48, %v10561_v27  ;;  %2353 = vmatpush.bf16.msra.mxu2 %v10736_v21  ;;  %2058 = vmatpush.bf16.msra.mxu1 %v10610_v63  ;;  %v10663_v27 = vld [vmem:[%s20396_s3 + $0x318] sm:$0xf]  ;;  %v14042_v48 = vld [vmem:[%s20396_s3 + $0x320] sm:$0xf0]  ;;  %v10749_v21 = vld [vmem:[%s20396_s3 + $0x3cc] sm:$0xf0] }
 0x170   :  { %2375 = vmatpush.bf16.msra.mxu3 %v10784_v16  ;;  %v10664_v49 = vor.u32 %v14042_v48, %v10663_v27  ;;  %v14050_v63 = vld [vmem:[%s20396_s3 + $0x364] sm:$0xf]  ;;  %v14052_v16 = vld [vmem:[%s20396_s3 + $0x370] sm:$0xf0]  ;;  %v10680_v27 = vor.u32 %v14044_v56, %v10677_v46 }
 0x171   :  { %2036 = vmatpush.bf16.msra.mxu0 %v10562_v8  ;;  %v14066_v8 = vld [vmem:[%s20396_s3 + $0x3e0] sm:$0xf0]  ;;  %v10704_v0 = vor.u32 %v14050_v63, %v10701_v24  ;;  %v10708_v17 = vor.u32 %v14052_v16, %v10707_v51 }
 0x172   :  { %v10760_v43 = vor.u32 %v14066_v8, %v10759_v32  ;;  %v14070_v8 = vld [vmem:[%s20396_s3 + $0x400] sm:$0xf0] }
 0x173   :  { %2354 = vmatpush.bf16.msra.mxu2 %v10724_v15  ;;  %2059 = vmatpush.bf16.msra.mxu1 %v10598_v20  ;;  %v10737_v15 = vld [vmem:[%s20396_s3 + $0x3b4] sm:$0xf0] }
 0x174   :  { %2376 = vmatpush.bf16.msra.mxu3 %v10772_v22  ;;  %v10785_v20 = vld [vmem:[%s20396_s3 + $0x414] sm:$0xf0]  ;;  %v10791_v22 = vld [vmem:[%s20396_s3 + $0x410] sm:$0xf] }
 0x175   :  { %2037 = vmatpush.bf16.msra.mxu0 %v10550_v44  ;;  %v10752_v44 = vor.u32 %v14062_v10, %v10749_v21  ;;  %v10788_v23 = vor.u32 %v14071_v60, %v10785_v20 }
 0x176   :  { %1652 = vmatmul.bf16.gmra.mxu0 %v16027_v19  ;;  %1688 = vmatmul.bf16.gmra.mxu2 %v16027_v19  ;;  %v10538_v19 = vor.u32 %v14022_v14, %v10537_v37  ;;  %v10756_v37 = vor.u32 %v14064_v12, %v10755_v50  ;;  %v14059_v14 = vld [vmem:[%s20396_s3 + $0x3ac] sm:$0xf] }
 0x177   :  { %2355 = vmatpush.bf16.msra.mxu2 %v10712_v34  ;;  %2060 = vmatpush.bf16.msra.mxu1 %v10586_v18  ;;  %v10740_v29 = vor.u32 %v14059_v14, %v10737_v15  ;;  %v14056_v34 = vld [vmem:[%s20396_s3 + $0x394] sm:$0xf]  ;;  %v14046_v18 = vld [vmem:[%s20396_s3 + $0x340] sm:$0xf0]  ;;  %v14065_v14 = vld [vmem:[%s20396_s3 + $0x3dc] sm:$0xf] }
 0x178   :  { %2377 = vmatpush.bf16.msra.mxu3 %v10760_v43  ;;  %v10728_v2 = vor.u32 %v14056_v34, %v10725_v38 }
 0x179   :  { %2038 = vmatpush.bf16.msra.mxu0 %v10538_v19  ;;  %v14061_v19 = vld [vmem:[%s20396_s3 + $0x3b8] sm:$0xf0] }
 0x17a   :  { %v10744_v59 = vor.u32 %v14061_v19, %v10743_v57  ;;  %v10761_v57 = vld [vmem:[%s20396_s3 + $0x3e4] sm:$0xf0]  ;;  %v14043_v19 = vld [vmem:[%s20396_s3 + $0x328] sm:$0xf0] }
 0x17b   :  { %2356 = vmatpush.bf16.msra.mxu2 %v10700_v9  ;;  %v10713_v9 = vld [vmem:[%s20396_s3 + $0x384] sm:$0xf0]  ;;  %v10764_v34 = vor.u32 %v14065_v14, %v10761_v57 }
 0x17d   :  { %2039 = vmatpush.bf16.msra.mxu0 %v10526_v1  ;;  %v14058_v1 = vld [vmem:[%s20396_s3 + $0x3a0] sm:$0xf0] }
 0x17e   :  { %10432 = vmatmul.msk.bf16.gmra.mxu1 %vm986_vm9, %v16043_v36  ;;  %10434 = vmatmul.msk.bf16.gmra.mxu3 %vm986_vm9, %v16043_v36  ;;  %v10513_v36 = vld [vmem:[%s20396_s3 + $0x248] sm:$0xf] }
 0x17f   :  { %v10514_v5 = vor.u32 %v14016_v3, %v10513_v36  ;;  %2357 = vmatpush.bf16.msra.mxu2 %v10688_v42  ;;  %v10732_v36 = vor.u32 %v14058_v1, %v10731_v62  ;;  %v14053_v3 = vld [vmem:[%s20396_s3 + $0x37c] sm:$0xf]  ;;  %v10689_v42 = vld [vmem:[%s20396_s3 + $0x354] sm:$0xf0]  ;;  %v14067_v62 = vld [vmem:[%s20396_s3 + $0x3e8] sm:$0xf0] }
 0x180   :  { %v10716_v52 = vor.u32 %v14053_v3, %v10713_v9  ;;  %v10692_v30 = vor.u32 %v14047_v39, %v10689_v42 }
 0x181   :  { %2040 = vmatpush.bf16.msra.mxu0 %v10514_v5  ;;  %v10720_v5 = vor.u32 %v14055_v4, %v10719_v11 }
 0x183   :  { %2358 = vmatpush.bf16.msra.mxu2 %v10676_v26  ;;  %v14073_v26 = vld [vmem:[%s20396_s3 + $0x418] sm:$0xf0] }
 0x184   :  { %v10792_v35 = vor.u32 %v14073_v26, %v10791_v22 }
 0x185   :  { %2041 = vmatpush.bf16.msra.mxu0 %v10502_v58  ;;  %v10696_v58 = vor.u32 %v14049_v55, %v10695_v61 }
 0x186   :  { %1971 = vmatmul.bf16.vlgmr.msrb.gmra.mxu0 %v15841_v33  ;;  %2007 = vmatmul.bf16.vlgmr.msrb.gmra.mxu2 %v15841_v33 }
 0x187   :  { %2359 = vmatpush.bf16.msra.mxu2 %v10664_v49  ;;  %v10779_v49 = vld [vmem:[%s20396_s3 + $0x3f8] sm:$0xf] }
 0x188   :  { %v10780_v43 = vor.u32 %v14070_v8, %v10779_v49 }
 0x189   :  { %2042 = vmatpush.bf16.msra.mxu0 %v10490_v47  ;;  %v14068_v47 = vld [vmem:[%s20396_s3 + $0x3f4] sm:$0xf] }
 0x18a   :  { %v10776_v48 = vor.u32 %v14068_v47, %v10773_v6 }
 0x18b   :  { %2424 = vmatpush.bf16.msrb.mxu2 %v10756_v37  ;;  %v10665_v37 = vld [vmem:[%s20396_s3 + $0x324] sm:$0xf0] }
 0x18d   :  { %2388 = vmatpush.bf16.msrb.mxu0 %v10752_v44  ;;  %v14041_v44 = vld [vmem:[%s20396_s3 + $0x31c] sm:$0xf] }
 0x18e   :  { %10611 = vmatmul.msk.bf16.vlgmr.msrb.gmra.mxu1 %vm986_vm9, %v15859_v28  ;;  %10613 = vmatmul.msk.bf16.vlgmr.msrb.gmra.mxu3 %vm986_vm9, %v15859_v28  ;;  %v10668_v15 = vor.u32 %v14041_v44, %v10665_v37 }
 0x18f   :  { %2425 = vmatpush.bf16.msrb.mxu2 %v10744_v59  ;;  %2411 = vmatpush.bf16.msrb.mxu1 %v10788_v23  ;;  %v10767_v59 = vld [vmem:[%s20396_s3 + $0x3e0] sm:$0xf] }
 0x190   :  { %2447 = vmatpush.bf16.msrb.mxu3 %v10792_v35  ;;  %v10768_v1 = vor.u32 %v14067_v62, %v10767_v59 }
 0x191   :  { %2389 = vmatpush.bf16.msrb.mxu0 %v10740_v29  ;;  %v10671_v29 = vld [vmem:[%s20396_s3 + $0x320] sm:$0xf] }
 0x192   :  { %v10672_v38 = vor.u32 %v14043_v19, %v10671_v29 }
 0x193   :  { %2426 = vmatpush.bf16.msrb.mxu2 %v10732_v36  ;;  %2412 = vmatpush.bf16.msrb.mxu1 %v10776_v48 }
 0x194   :  { %2448 = vmatpush.bf16.msrb.mxu3 %v10780_v43 }
 0x195   :  { %2390 = vmatpush.bf16.msrb.mxu0 %v10728_v2 }
 0x196   :  { %1976 = vmatmul.bf16.gmra.mxu0 %v15814_v45  ;;  %2012 = vmatmul.bf16.gmra.mxu2 %v15814_v45 }
 0x197   :  { %2427 = vmatpush.bf16.msrb.mxu2 %v10720_v5  ;;  %2413 = vmatpush.bf16.msrb.mxu1 %v10764_v34 }
 0x198   :  { %2449 = vmatpush.bf16.msrb.mxu3 %v10768_v1 }
 0x199   :  { %2391 = vmatpush.bf16.msrb.mxu0 %v10716_v52 }
 0x19b   :  { %2428 = vmatpush.bf16.msrb.mxu2 %v10708_v17 }
 0x19d   :  { %2392 = vmatpush.bf16.msrb.mxu0 %v10704_v0 }
 0x19e   :  { %10612 = vmatmul.msk.bf16.gmra.mxu1 %vm986_vm9, %v15849_v13  ;;  %10614 = vmatmul.msk.bf16.gmra.mxu3 %vm986_vm9, %v15849_v13 }
 0x19f   :  { %2429 = vmatpush.bf16.msrb.mxu2 %v10696_v58 }
 0x1a1   :  { %2393 = vmatpush.bf16.msrb.mxu0 %v10692_v30 }
 0x1a3   :  { %v1322_v31 = vpop.f32.mrf.mxu0 }
 0x1a5   :  { %2394 = vmatpush.bf16.msrb.mxu0 %v10680_v27 }
 0x1a6   :  { %2043 = vmatmul.bf16.vlgmr.msra.gmra.mxu0 %v15841_v33  ;;  %2360 = vmatmul.bf16.vlgmr.msra.gmra.mxu2 %v15867_v25  ;;  %v10683_v33 = vld [vmem:[%s20396_s3 + $0x338] sm:$0xf] }
 0x1a7   :  { %v10684_v32 = vor.u32 %v14046_v18, %v10683_v33 }
 0x1a9   :  { %v1358_v10 = vpop.f32.mrf.mxu2  ;;  %2430 = vmatpush.bf16.msrb.mxu2 %v10684_v32  ;;  %2395 = vmatpush.bf16.msrb.mxu0 %v10668_v15 }
 0x1ab   :  { %v1340_v21 = vpop.f32.mrf.mxu1  ;;  %v16387_v50 = vpop.f32.mrf.mxu0 }
 0x1ac   :  { %v1341_v12 = vadd.f32 %v1340_v21, %v1322_v31 }
 0x1ad   :  { %2431 = vmatpush.bf16.msrb.mxu2 %v10672_v38 }
 0x1ae   :  { %10615 = vmatmul.msk.bf16.vlgmr.msra.gmra.mxu1 %vm986_vm9, %v15859_v28  ;;  %10793 = vmatmul.msk.bf16.vlgmr.msra.gmra.mxu3 %vm986_vm9, %v15885_v40 }
 0x1b1   :  { %v1376_v2 = vpop.f32.mrf.mxu3  ;;  %v16417_v36 = vpop.f32.mrf.mxu2 }
 0x1b2   :  { %v1377_v28 = vadd.f32 %v1376_v2, %v1358_v10 }
 0x1b3   :  { %v16419_v3 = vpop.f32.mrf.mxu1  ;;  %v1327_v9 = vpop.f32.mrf.mxu0 }
 0x1b6   :  { %2048 = vmatmul.bf16.gmra.mxu0 %v15814_v45  ;;  %2365 = vmatmul.bf16.gmra.mxu2 %v15861_v54 }
 0x1b9   :  { %v16423_v11 = vpop.f32.mrf.mxu3  ;;  %v1363_v52 = vpop.f32.mrf.mxu2 }
 0x1bb   :  { %v1345_v4 = vpop.f32.mrf.mxu1  ;;  %v1329_v5 = vpop.f32.mrf.mxu0 }
 0x1bc   :  { %v1346_v63 = vadd.f32 %v1345_v4, %v1327_v9 }
 0x1be   :  { %10616 = vmatmul.msk.bf16.gmra.mxu1 %vm986_vm9, %v15849_v13  ;;  %10794 = vmatmul.msk.bf16.gmra.mxu3 %vm986_vm9, %v15869_v7 }
 0x1c1   :  { %v1381_v24 = vpop.f32.mrf.mxu3  ;;  %v1365_v51 = vpop.f32.mrf.mxu2 }
 0x1c2   :  { %v1382_v0 = vadd.f32 %v1381_v24, %v1363_v52 }
 0x1c3   :  { %v1347_v16 = vpop.f32.mrf.mxu1  ;;  %v1394_v17 = vpop.f32.mrf.mxu0 }
 0x1c6   :  { %2396 = vmatmul.bf16.vlgmr.msrb.gmra.mxu0 %v15867_v25  ;;  %2432 = vmatmul.bf16.vlgmr.msrb.gmra.mxu2 %v15867_v25 }
 0x1c9   :  { %v1383_v45 = vpop.f32.mrf.mxu3  ;;  %v1612_v31 = vpop.f32.mrf.mxu2 }
 0x1ca   :  { %v1613_v39 = vadd.f32 %v1612_v31, %v1341_v12 }
 0x1cb   :  { %v1412_v42 = vpop.f32.mrf.mxu1  ;;  %v16431_v60 = vpop.f32.mrf.mxu0 }
 0x1cc   :  { %v1413_v30 = vadd.f32 %v1412_v42, %v1394_v17 }
 0x1ce   :  { %10795 = vmatmul.msk.bf16.vlgmr.msrb.gmra.mxu1 %vm986_vm9, %v15885_v40  ;;  %10797 = vmatmul.msk.bf16.vlgmr.msrb.gmra.mxu3 %vm986_vm9, %v15885_v40 }
 0x1d1   :  { %v1630_v13 = vpop.f32.mrf.mxu3  ;;  %v16437_v20 = vpop.f32.mrf.mxu2 }
 0x1d2   :  { %v16439_v61 = vadd.f32 %v1630_v13, %v1613_v39 }
 0x1d3   :  { %v16441_v55 = vpop.f32.mrf.mxu1  ;;  %v1399_v25 = vpop.f32.mrf.mxu0 }
 0x1d6   :  { %2401 = vmatmul.bf16.gmra.mxu0 %v15861_v54  ;;  %2437 = vmatmul.bf16.gmra.mxu2 %v15861_v54 }
 0x1d9   :  { %v16445_v23 = vpop.f32.mrf.mxu3  ;;  %v1617_v58 = vpop.f32.mrf.mxu2 }
 0x1da   :  { %v1618_v22 = vadd.f32 %v1617_v58, %v1346_v63 }
 0x1db   :  { %v1417_v26 = vpop.f32.mrf.mxu1  ;;  %v1401_v56 = vpop.f32.mrf.mxu0 }
 0x1dc   :  { %v1418_v35 = vadd.f32 %v1417_v26, %v1399_v25  ;;  %v14211_v26 = vld [vmem:[%s20398_s5 + $0x448] sm:$0xf0]  ;;  %v14209_v56 = vld [vmem:[%s20398_s5 + $0x43c] sm:$0xf] }
 0x1de   :  { %10796 = vmatmul.msk.bf16.gmra.mxu1 %vm986_vm9, %v15869_v7  ;;  %10798 = vmatmul.msk.bf16.gmra.mxu3 %vm986_vm9, %v15869_v7 }
 0x1e1   :  { %v1635_v40 = vpop.f32.mrf.mxu3  ;;  %v1619_v46 = vpop.f32.mrf.mxu2 }
 0x1e2   :  { %v16451_v47 = vadd.f32 %v1635_v40, %v1618_v22  ;;  %v11061_v22 = vld [vmem:[%s20398_s5 + $0x438] sm:$0xf]  ;;  %v11063_v40 = vld [vmem:[%s20398_s5 + $0x44c] sm:$0xf0] }
 0x1e3   :  { %v1419_v6 = vpop.f32.mrf.mxu1  ;;  %v1648_v27 = vpop.f32.mrf.mxu0  ;;  %v11041_v46 = vld [vmem:[%s20398_s5 + $0x410] sm:$0xf] }
 0x1e4   :  { %v1649_v54 = vadd.f32 %v1648_v27, %v1377_v28  ;;  %v14206_v6 = vld [vmem:[%s20398_s5 + $0x420] sm:$0xf0]  ;;  %v11066_v27 = vor.u32 %v14209_v56, %v11063_v40  ;;  %v10983_v56 = vld [vmem:[%s20398_s5 + $0x3ac] sm:$0xf0] }
 0x1e6   :  { %3429 = vmatpush.bf16.msra.mxu3 %v11066_v27 }
 0x1e9   :  { %v1637_v48 = vpop.f32.mrf.mxu3  ;;  %v1684_v33 = vpop.f32.mrf.mxu2 }
 0x1ea   :  { %v1685_v18 = vadd.f32 %v1684_v33, %v1413_v30  ;;  %v11043_v48 = vld [vmem:[%s20398_s5 + $0x424] sm:$0xf0]  ;;  %v11042_v33 = vor.u32 %v14206_v6, %v11041_v46 }
 0x1eb   :  { %v1666_v49 = vpop.f32.mrf.mxu1  ;;  %v16453_v32 = vpop.f32.mrf.mxu0 }
 0x1ec   :  { %v1667_v8 = vadd.f32 %v1666_v49, %v1649_v54  ;;  %v14204_v54 = vld [vmem:[%s20398_s5 + $0x414] sm:$0xf] }
 0x1f1   :  { %v1702_v10 = vpop.f32.mrf.mxu3  ;;  %v16455_v43 = vpop.f32.mrf.mxu2 }
 0x1f2   :  { %v16457_v21 = vadd.f32 %v1702_v10, %v1685_v18  ;;  %v11021_v10 = vld [vmem:[%s20398_s5 + $0x3e8] sm:$0xf] }
 0x1f3   :  { %v16459_v7 = vpop.f32.mrf.mxu1  ;;  %v1653_v12 = vpop.f32.mrf.mxu0 }
 0x1f4   :  { %v1654_v44 = vadd.f32 %v1653_v12, %v1382_v0  ;;  %v14201_v12 = vld [vmem:[%s20398_s5 + $0x3f8] sm:$0xf0] }
 0x1f9   :  { %v16461_v37 = vpop.f32.mrf.mxu3  ;;  %v1689_v14 = vpop.f32.mrf.mxu2 }
 0x1fa   :  { %v1690_v15 = vadd.f32 %v1689_v14, %v1418_v35  ;;  %v11062_v35 = vor.u32 %v14211_v26, %v11061_v22 }
 0x1fb   :  { %v1671_v57 = vpop.f32.mrf.mxu1  ;;  %v1655_v29 = vpop.f32.mrf.mxu0 }
 0x1fc   :  { %v1672_v19 = vadd.f32 %v1671_v57, %v1654_v44  ;;  %3375 = vmatpush.bf16.msra.mxu0 %v11062_v35  ;;  %v14199_v44 = vld [vmem:[%s20398_s5 + $0x3ec] sm:$0xf]  ;;  %v11023_v57 = vld [vmem:[%s20398_s5 + $0x3fc] sm:$0xf0]  ;;  %v11022_v29 = vor.u32 %v14201_v12, %v11021_v10 }
 0x200   :  { %3376 = vmatpush.bf16.msra.mxu0 %v11042_v33 }
 0x201   :  { %v1707_v34 = vpop.f32.mrf.mxu3  ;;  %v1691_v38 = vpop.f32.mrf.mxu2 }
 0x202   :  { %v16463_v59 = vadd.f32 %v1707_v34, %v1690_v15  ;;  %v11001_v34 = vld [vmem:[%s20398_s5 + $0x3c0] sm:$0xf]  ;;  %v14196_v38 = vld [vmem:[%s20398_s5 + $0x3d0] sm:$0xf0] }
 0x203   :  { %v1673_v62 = vpop.f32.mrf.mxu1  ;;  %v1972_v1 = vpop.f32.mrf.mxu0 }
 0x204   :  { %3377 = vmatpush.bf16.msra.mxu0 %v11022_v29 }
 0x209   :  { %v1709_v2 = vpop.f32.mrf.mxu3  ;;  %v2008_v28 = vpop.f32.mrf.mxu2 }
 0x20a   :  { %v14194_v2 = vld [vmem:[%s20398_s5 + $0x3c4] sm:$0xf] }
 0x20b   :  { %v1990_v9 = vpop.f32.mrf.mxu1  ;;  %v16465_v52 = vpop.f32.mrf.mxu0 }
 0x20c   :  { %v1991_v62 = vadd.f32 %v1990_v9, %v1972_v1  ;;  %v11002_v9 = vor.u32 %v14196_v38, %v11001_v34  ;;  %v14181_v38 = vld [vmem:[%s20398_s5 + $0x358] sm:$0xf0] }
 0x20e   :  { %3378 = vmatpush.bf16.msra.mxu0 %v11002_v9 }
 0x211   :  { %v2026_v4 = vpop.f32.mrf.mxu3  ;;  %v16467_v5 = vpop.f32.mrf.mxu2 }
 0x212   :  { %v2027_v63 = vadd.f32 %v2026_v4, %v2008_v28  ;;  %v11003_v28 = vld [vmem:[%s20398_s5 + $0x3d4] sm:$0xf0]  ;;  %v16538_v4 = vld [vmem:[%s20397_s4] sm:$0x7]  ;;  %s9758_s4 = sshll.u32 %s14811_s20, 4  ;;  %s9759_s4 = int_to_ptr.vmem [resolvable:$true] %s9758_s4 }
 0x213   :  { %v16469_v24 = vpop.f32.mrf.mxu1  ;;  %v16471_v51 = vpop.f32.mrf.mxu0  ;;  %v16562_v26 = vperm.slane %v16538_v4, 0 }
 0x214   :  { %v16473_v0 = vadd.f32 %v2027_v63, %v1667_v8  ;;  %v11046_v8 = vor.u32 %v14204_v54, %v11043_v48  ;;  %v10981_v63 = vld [vmem:[%s20398_s5 + $0x398] sm:$0xf]  ;;  %v1993_v48 = vadd.f32 %v16469_v24, %v16465_v52 }
 0x216   :  { %3430 = vmatpush.bf16.msra.mxu3 %v11046_v8 }
 0x219   :  { %v16475_v16 = vpop.f32.mrf.mxu3  ;;  %v2013_v17 = vpop.f32.mrf.mxu2 }
 0x21b   :  { %v16477_v45 = vpop.f32.mrf.mxu1  ;;  %v1979_v31 = vpop.f32.mrf.mxu0 }
 0x221   :  { %v2031_v39 = vpop.f32.mrf.mxu3  ;;  %v2015_v42 = vpop.f32.mrf.mxu2 }
 0x222   :  { %v2032_v30 = vadd.f32 %v2031_v39, %v2013_v17  ;;  %v14191_v17 = vld [vmem:[%s20398_s5 + $0x3a8] sm:$0xf0]  ;;  %v11006_v42 = vor.u32 %v14194_v2, %v11003_v28 }
 0x223   :  { %v1997_v13 = vpop.f32.mrf.mxu1  ;;  %v16479_v25 = vpop.f32.mrf.mxu0  ;;  %v10982_v6 = vor.u32 %v14191_v17, %v10981_v63  ;;  %v14179_v28 = vld [vmem:[%s20398_s5 + $0x34c] sm:$0xf]  ;;  %v10943_v63 = vld [vmem:[%s20398_s5 + $0x35c] sm:$0xf0]  ;;  %v11221_v17 = vld [vmem:[%s20398_s5 + $0x578] sm:$0xf] }
 0x224   :  { %v16481_v58 = vadd.f32 %v2032_v30, %v1672_v19  ;;  %v11026_v19 = vor.u32 %v14199_v44, %v11023_v57  ;;  %v14189_v30 = vld [vmem:[%s20398_s5 + $0x39c] sm:$0xf]  ;;  %v2071_v13 = vadd.f32 %v1991_v62, %v16439_v61  ;;  %v1343_v61 = vadd.f32 %v16419_v3, %v16387_v50  ;;  %v14184_v50 = vld [vmem:[%s20398_s5 + $0x374] sm:$0xf]  ;;  %v10963_v3 = vld [vmem:[%s20398_s5 + $0x384] sm:$0xf0] }
 0x225   :  { %v10986_v27 = vor.u32 %v14189_v30, %v10983_v56  ;;  %3379 = vmatpush.bf16.msra.mxu0 %v10982_v6  ;;  %v10966_v10 = vor.u32 %v14184_v50, %v10963_v3  ;;  %v1996_v62 = vadd.f32 %v16477_v45, %v16471_v51  ;;  %v10946_v9 = vor.u32 %v14179_v28, %v10943_v63  ;;  %v14251_v51 = vld [vmem:[%s20398_s5 + $0x588] sm:$0xf0]  ;;  %v10921_v45 = vld [vmem:[%s20398_s5 + $0x320] sm:$0xf]  ;;  %v14174_v30 = vld [vmem:[%s20398_s5 + $0x324] sm:$0xf] }
 0x226   :  { %3431 = vmatpush.bf16.msra.mxu3 %v11026_v19  ;;  %v1615_v54 = vadd.f32 %v16437_v20, %v1343_v61  ;;  %v11201_v6 = vld [vmem:[%s20398_s5 + $0x550] sm:$0xf]  ;;  %v14247_v63 = vld [vmem:[%s20398_s5 + $0x568] sm:$0xf0] }
 0x228   :  { %v1633_v20 = vadd.f32 %v16445_v23, %v1615_v54  ;;  %v10941_v23 = vld [vmem:[%s20398_s5 + $0x348] sm:$0xf] }
 0x229   :  { %v2033_v18 = vpop.f32.mrf.mxu3  ;;  %v2361_v49 = vpop.f32.mrf.mxu2  ;;  %v10942_v2 = vor.u32 %v14181_v38, %v10941_v23  ;;  %v11203_v23 = vld [vmem:[%s20398_s5 + $0x564] sm:$0xf0]  ;;  %v11209_v38 = vld [vmem:[%s20398_s5 + $0x558] sm:$0xf] }
 0x22a   :  { %3432 = vmatpush.bf16.msra.mxu3 %v11006_v42  ;;  %v10961_v18 = vld [vmem:[%s20398_s5 + $0x370] sm:$0xf]  ;;  %v2074_v12 = vadd.f32 %v1993_v48, %v1633_v20  ;;  %v14176_v42 = vld [vmem:[%s20398_s5 + $0x330] sm:$0xf0]  ;;  %v14249_v20 = vld [vmem:[%s20398_s5 + $0x57c] sm:$0xf] }
 0x22b   :  { %v16516_v14 = vpop.f32.mrf.mxu1  ;;  %v16518_v15 = vpop.f32.mrf.mxu0  ;;  %v10962_v24 = vor.u32 %v14186_v53, %v10961_v18  ;;  %v10922_v61 = vor.u32 %v14176_v42, %v10921_v45  ;;  %v11210_v45 = vor.u32 %v14247_v63, %v11209_v38  ;;  %v11183_v42 = vld [vmem:[%s20398_s5 + $0x53c] sm:$0xf0]  ;;  %v14232_v63 = vld [vmem:[%s20398_s5 + $0x4f0] sm:$0xf0] }
 0x22d   :  { %3380 = vmatpush.bf16.msra.mxu0 %v10962_v24  ;;  %v11223_v24 = vld [vmem:[%s20398_s5 + $0x58c] sm:$0xf0] }
 0x22e   :  { %3433 = vmatpush.bf16.msra.mxu3 %v10986_v27  ;;  %v14246_v27 = vld [vmem:[%s20398_s5 + $0x560] sm:$0xf0] }
 0x231   :  { %v2379_v31 = vpop.f32.mrf.mxu3  ;;  %v2363_v39 = vpop.f32.mrf.mxu2  ;;  %3381 = vmatpush.bf16.msra.mxu0 %v10942_v2 }
 0x232   :  { %v2380_v22 = vadd.f32 %v2379_v31, %v2361_v49  ;;  %3434 = vmatpush.bf16.msra.mxu3 %v10966_v10  ;;  %v11226_v10 = vor.u32 %v14249_v20, %v11223_v24  ;;  %v14226_v20 = vld [vmem:[%s20398_s5 + $0x4c0] sm:$0xf0]  ;;  %v1415_v24 = vadd.f32 %v16441_v55, %v16431_v60  ;;  %v16743_v60 = vld [vmem:[%s20398_s5 + $0x4dc] sm:$0xf] }
 0x233   :  { %v16570_v35 = vpop.f32.mrf.mxu1  ;;  %v16572_v40 = vpop.f32.mrf.mxu0 }
 0x234   :  { %v2460_v46 = vadd.f32 %v2380_v22, %v2071_v13  ;;  %v2077_v13 = vadd.f32 %v1996_v62, %v16451_v47 }
 0x235   :  { %3382 = vmatpush.bf16.msra.mxu0 %v10922_v61  ;;  %v2063_v61 = vadd.f32 %v16516_v14, %v16479_v25  ;;  %v11163_v25 = vld [vmem:[%s20398_s5 + $0x514] sm:$0xf0]  ;;  %v11169_v14 = vld [vmem:[%s20398_s5 + $0x508] sm:$0xf] }
 0x236   :  { %v2477_v33 = vadd.f32 %v16562_v26, %v2460_v46  ;;  %3435 = vmatpush.bf16.msra.mxu3 %v10946_v9  ;;  %v10923_v46 = vld [vmem:[%s20398_s5 + $0x334] sm:$0xf0]  ;;  %v14236_v9 = vld [vmem:[%s20398_s5 + $0x510] sm:$0xf0] }
 0x237   :  { %v10926_v47 = vor.u32 %v14174_v30, %v10923_v46 }
 0x238   :  { %v2486_v52 = vmax.f32 %v2477_v33, 0.0  ;;  %v11202_v33 = vor.u32 %v14246_v27, %v11201_v6  ;;  %v16697_v6 = vperm.slane %v16538_v4, 1 }
 0x239   :  { %v2381_v49 = vpop.f32.mrf.mxu3  ;;  %v2366_v8 = vpop.f32.mrf.mxu2  ;;  %3447 = vmatpush.bf16.msrb.mxu0 %v11226_v10  ;;  %v14271_v10 = vld [vmem:[%s20398_s5 + $0x628] sm:$0xf0] }
 0x23a   :  { %v2501_v44 = vrot.slane %v2486_v52, 7  ;;  %v2382_v57 = vadd.f32 %v2381_v49, %v2363_v39  ;;  %v11222_v39 = vor.u32 %v14251_v51, %v11221_v17  ;;  %3436 = vmatpush.bf16.msra.mxu3 %v10926_v47  ;;  %v11229_v49 = vld [vmem:[%s20398_s5 + $0x580] sm:$0xf]  ;;  %v1379_v17 = vadd.f32 %v16423_v11, %v16417_v36  ;;  %v14242_v36 = vld [vmem:[%s20398_s5 + $0x540] sm:$0xf0] }
 0x23b   :  { %v16596_v29 = vpop.f32.mrf.mxu1  ;;  %v2051_v19 = vpop.f32.mrf.mxu0  ;;  %v11141_v11 = vld [vmem:[%s20398_s5 + $0x4d8] sm:$0xf] }
 0x23c   :  { %2516 = vst [vmem:[#allocation4] sm:$0xfe] %v2501_v44  ;;  %v2463_v34 = vadd.f32 %v2382_v57, %v2074_v12  ;;  %3393 = vmatpush.bf16.msra.mxu1 %v11222_v39  ;;  %v14244_v57 = vld [vmem:[%s20398_s5 + $0x554] sm:$0xf]  ;;  %v14239_v39 = vld [vmem:[%s20398_s5 + $0x52c] sm:$0xf] }
 0x23d   :  { %v11206_v28 = vor.u32 %v14244_v57, %v11203_v23 }
 0x23e   :  { %v2480_v1 = vadd.f32 %v16562_v26, %v2463_v34 }
 0x23f   :  { %3448 = vmatpush.bf16.msrb.mxu0 %v11206_v28 }
 0x240   :  { %v2489_v31 = vmax.f32 %v2480_v1, 0.0  ;;  %3394 = vmatpush.bf16.msra.mxu1 %v11202_v33  ;;  %v11161_v1 = vld [vmem:[%s20398_s5 + $0x500] sm:$0xf] }
 0x241   :  { %v2384_v22 = vpop.f32.mrf.mxu3  ;;  %v2368_v56 = vpop.f32.mrf.mxu2 }
 0x242   :  { %v2504_v54 = vrot.slane %v2489_v31, 7  ;;  %2524 = vst [vmem:[#allocation4 + $0x18] sm:$0xe0] %v2489_v31  ;;  %v2385_v48 = vadd.f32 %v2384_v22, %v2366_v8  ;;  %v14252_v8 = vld [vmem:[%s20398_s5 + $0x590] sm:$0xf0]  ;;  %v11162_v31 = vor.u32 %v14236_v9, %v11161_v1  ;;  %v1651_v56 = vadd.f32 %v16453_v32, %v1379_v17 }
 0x243   :  { %v2069_v18 = vpop.f32.mrf.mxu1  ;;  %v2397_v53 = vpop.f32.mrf.mxu0  ;;  %v11230_v12 = vor.u32 %v14252_v8, %v11229_v49  ;;  %v2667_v51 = vld [vmem:[#allocation4] sm:$0xfe]  ;;  %v11186_v32 = vor.u32 %v14239_v39, %v11183_v42  ;;  %v1687_v9 = vadd.f32 %v16455_v43, %v1415_v24  ;;  %v14266_v39 = vld [vmem:[%s20398_s5 + $0x600] sm:$0xf0]  ;;  %v11101_v43 = vld [vmem:[%s20398_s5 + $0x488] sm:$0xf] }
 0x244   :  { %v2505_v50 = vsel %vm948_vm4, %v2501_v44, %v2504_v54  ;;  %v2466_v3 = vadd.f32 %v2385_v48, %v2077_v13  ;;  %v11181_v44 = vld [vmem:[%s20398_s5 + $0x528] sm:$0xf]  ;;  %v11189_v22 = vld [vmem:[%s20398_s5 + $0x530] sm:$0xf]  ;;  %v14231_v54 = vld [vmem:[%s20398_s5 + $0x4e8] sm:$0xf0]  ;;  %v1669_v49 = vadd.f32 %v16459_v7, %v1651_v56 }
 0x245   :  { %2520 = vst [vmem:[#allocation4 + $0x18] sm:$0x7] %v2505_v50  ;;  %3501 = vmatpush.bf16.msrb.mxu3 %v11230_v12  ;;  %v14234_v48 = vld [vmem:[%s20398_s5 + $0x504] sm:$0xf]  ;;  %v11190_v33 = vor.u32 %v14242_v36, %v11189_v22  ;;  %v14237_v18 = vld [vmem:[%s20398_s5 + $0x518] sm:$0xf0]  ;;  %v11142_v50 = vor.u32 %v14231_v54, %v11141_v11  ;;  %v2073_v12 = vadd.f32 %v2063_v61, %v16457_v21 }
 0x246   :  { %v2483_v52 = vadd.f32 %v16562_v26, %v2466_v3  ;;  %v14241_v26 = vld [vmem:[%s20398_s5 + $0x538] sm:$0xf0]  ;;  %v11121_v3 = vld [vmem:[%s20398_s5 + $0x4b0] sm:$0xf]  ;;  %3449 = vmatpush.bf16.msrb.mxu0 %v11186_v32  ;;  %v11123_v61 = vld [vmem:[%s20398_s5 + $0x4c4] sm:$0xf0] }
 0x247   :  { %v11182_v34 = vor.u32 %v14241_v26, %v11181_v44  ;;  %v16738_v26 = vperm.slane %v16538_v4, 2  ;;  %v11122_v21 = vor.u32 %v14226_v20, %v11121_v3  ;;  %v16750_v4 = vld [vmem:[%s20398_s5 + $0x4ec] sm:$0xf0]  ;;  %v11261_v32 = vld [vmem:[%s20398_s5 + $0x5c8] sm:$0xf] }
 0x248   :  { %v2492_v19 = vmax.f32 %v2483_v52, 0.0  ;;  %v11301_v52 = vld [vmem:[%s20398_s5 + $0x618] sm:$0xf]  ;;  %v11281_v1 = vld [vmem:[%s20398_s5 + $0x5f0] sm:$0xf] }
 0x249   :  { %v2386_v62 = vpop.f32.mrf.mxu3  ;;  %v2433_v2 = vpop.f32.mrf.mxu2  ;;  %3395 = vmatpush.bf16.msra.mxu1 %v11182_v34  ;;  %3502 = vmatpush.bf16.msrb.mxu3 %v11210_v45  ;;  %v11302_v57 = vor.u32 %v14271_v10, %v11301_v52  ;;  %v16755_v34 = vld [vmem:[%s20398_s5 + $0x4e0] sm:$0xf]  ;;  %v11282_v56 = vor.u32 %v14266_v39, %v11281_v1  ;;  %v14216_v20 = vld [vmem:[%s20398_s5 + $0x470] sm:$0xf0]  ;;  %v16825_v52 = vld [vmem:[%s20398_s5 + $0x48c] sm:$0xf] }
 0x24a   :  { %2528 = vst [vmem:[#allocation4 + $0x30] sm:$0x7f] %v2492_v19  ;;  %v11170_v19 = vor.u32 %v14237_v18, %v11169_v14  ;;  %v11150_v11 = vor.u32 %v14232_v63, %v16755_v34  ;;  %v14227_v14 = vld [vmem:[%s20398_s5 + $0x4c8] sm:$0xf0]  ;;  %v11081_v18 = vld [vmem:[%s20398_s5 + $0x460] sm:$0xf] }
 0x24b   :  { %v2415_v30 = vpop.f32.mrf.mxu1  ;;  %v2399_v13 = vpop.f32.mrf.mxu0  ;;  %3415 = vmatpush.bf16.msra.mxu2 %v11302_v57  ;;  %v14256_v57 = vld [vmem:[%s20398_s5 + $0x5b0] sm:$0xf0]  ;;  %v11049_v39 = vld [vmem:[%s20398_s5 + $0x418] sm:$0xf] }
 0x24c   :  { %v2416_v46 = vadd.f32 %v2415_v30, %v2397_v53  ;;  %v2535_v27 = vld [vmem:[#allocation4 + $0x18] sm:$0xff] }
 0x24d   :  { %v16705_v47 = vpack.c.bf16 %v2535_v27, %v2667_v51  ;;  %3396 = vmatpush.bf16.msra.mxu1 %v11162_v31  ;;  %3503 = vmatpush.bf16.msrb.mxu3 %v11190_v33  ;;  %v2065_v51 = vadd.f32 %v16570_v35, %v16518_v15  ;;  %v14221_v15 = vld [vmem:[%s20398_s5 + $0x498] sm:$0xf0]  ;;  %v11146_v35 = vor.u32 %v16743_v60, %v16750_v4 }
 0x24e   :  { %v2461_v53 = vadd.f32 %v2416_v46, %v16473_v0  ;;  %v2029_v0 = vadd.f32 %v16475_v16, %v16467_v5  ;;  %v11166_v16 = vor.u32 %v14234_v48, %v11163_v25  ;;  %v11129_v46 = vld [vmem:[%s20398_s5 + $0x4b8] sm:$0xf]  ;;  %v1705_v33 = vadd.f32 %v16461_v37, %v1687_v9 }
 0x24f   :  { %v2803_v8 = vshll.u32 %v16705_v47, 16  ;;  %v2801_v45 = vshrl.u32 %v16705_v47, 16  ;;  %v11102_v25 = vor.u32 %v14221_v15, %v11101_v43  ;;  %3416 = vmatpush.bf16.msra.mxu2 %v11282_v56  ;;  %v14202_v56 = vld [vmem:[%s20398_s5 + $0x400] sm:$0xf0] }
 0x250   :  { %v2478_v44 = vadd.f32 %v16697_v6, %v2461_v53  ;;  %v2075_v17 = vadd.f32 %v2029_v0, %v1669_v49  ;;  %3450 = vmatpush.bf16.msrb.mxu0 %v11166_v16  ;;  %v14261_v53 = vld [vmem:[%s20398_s5 + $0x5d8] sm:$0xf0]  ;;  %v2076_v24 = vadd.f32 %v2065_v51, %v1705_v33  ;;  %v11130_v16 = vor.u32 %v14227_v14, %v11129_v46 }
 0x251   :  { %v2451_v55 = vpop.f32.mrf.mxu3  ;;  %v16745_v7 = vpop.f32.mrf.mxu2  ;;  %v2670_v5 = vld [vmem:[#allocation4 + $0x30] sm:$0x7f]  ;;  %v2805_v28 = vrot.slane %v2803_v8, 1  ;;  %3397 = vmatpush.bf16.msra.mxu1 %v11142_v50  ;;  %3504 = vmatpush.bf16.msrb.mxu3 %v11170_v19  ;;  %v11262_v10 = vor.u32 %v14261_v53, %v11261_v32  ;;  %v11109_v19 = vld [vmem:[%s20398_s5 + $0x490] sm:$0xf] }
 0x252   :  { %v2487_v23 = vmax.f32 %v2478_v44, 0.0  ;;  %v2452_v38 = vadd.f32 %v2451_v55, %v2433_v2  ;;  %v16757_v62 = vpack.c.bf16 %v2670_v5, %v2670_v5  ;;  %v11241_v44 = vld [vmem:[%s20398_s5 + $0x5a0] sm:$0xf] }
 0x253   :  { %v2417_v2 = vpop.f32.mrf.mxu1  ;;  %v16769_v31 = vpop.f32.mrf.mxu0  ;;  %v2806_v48 = vor.u32 %v2805_v28, %v2801_v45  ;;  %3417 = vmatpush.bf16.msra.mxu2 %v11262_v10  ;;  %v14212_v28 = vld [vmem:[%s20398_s5 + $0x450] sm:$0xf0] }
 0x254   :  { %v16774_v42 = vrot.slane %v2487_v23, 7  ;;  %v2462_v30 = vadd.f32 %v2452_v38, %v2073_v12  ;;  %v2418_v22 = vadd.f32 %v2417_v2, %v2399_v13  ;;  %v2808_v36 = vshll.u32 %v16757_v62, 16  ;;  %v16789_v13 = vld [vmem:[%s20398_s5 + $0x4b4] sm:$0xf]  ;;  %v11103_v12 = vld [vmem:[%s20398_s5 + $0x49c] sm:$0xf0]  ;;  %3451 = vmatpush.bf16.msrb.mxu0 %v11146_v35 }
 0x255   :  { %3398 = vmatpush.bf16.msra.mxu1 %v11122_v21  ;;  %v11126_v8 = vor.u32 %v16789_v13, %v11123_v61  ;;  %3505 = vmatpush.bf16.msrb.mxu3 %v11150_v11  ;;  %v14222_v21 = vld [vmem:[%s20398_s5 + $0x4a0] sm:$0xf0]  ;;  %v11082_v23 = vor.u32 %v14216_v20, %v11081_v18  ;;  %v11242_v38 = vor.u32 %v14256_v57, %v11241_v44  ;;  %v11029_v11 = vld [vmem:[%s20398_s5 + $0x3f0] sm:$0xf]  ;;  %v14197_v20 = vld [vmem:[%s20398_s5 + $0x3d8] sm:$0xf0] }
 0x256   :  { %2517 = vst [vmem:[#allocation4 + $0x8] sm:$0xfe] %v16774_v42  ;;  %v2479_v27 = vadd.f32 %v16738_v26, %v2462_v30  ;;  %v2464_v54 = vadd.f32 %v2418_v22, %v2075_v17  ;;  %v16799_v47 = vrot.slane %v2808_v36, 1  ;;  %v2068_v17 = vadd.f32 %v16596_v29, %v16572_v40  ;;  %v14207_v30 = vld [vmem:[%s20398_s5 + $0x428] sm:$0xf0] }
 0x257   :  { %v11106_v51 = vor.u32 %v16825_v52, %v11103_v12  ;;  %v11110_v2 = vor.u32 %v14222_v21, %v11109_v19  ;;  %v14214_v29 = vld [vmem:[%s20398_s5 + $0x464] sm:$0xf]  ;;  %v11083_v36 = vld [vmem:[%s20398_s5 + $0x474] sm:$0xf0]  ;;  %3418 = vmatpush.bf16.msra.mxu2 %v11242_v38  ;;  %v11050_v35 = vor.u32 %v14207_v30, %v11049_v39  ;;  %v11030_v14 = vor.u32 %v14202_v56, %v11029_v11  ;;  %v11303_v18 = vld [vmem:[%s20398_s5 + $0x62c] sm:$0xf0] }
 0x258   :  { %v2488_v50 = vmax.f32 %v2479_v27, 0.0  ;;  %v2481_v3 = vadd.f32 %v16697_v6, %v2464_v54  ;;  %v16817_v37 = vsel %vm1098_vm10, %v2806_v48, %v16799_v47  ;;  %3452 = vmatpush.bf16.msrb.mxu0 %v11126_v8  ;;  %v2079_v13 = vadd.f32 %v2068_v17, %v16463_v59  ;;  %v14269_v59 = vld [vmem:[%s20398_s5 + $0x61c] sm:$0xf]  ;;  %v14264_v52 = vld [vmem:[%s20398_s5 + $0x5f4] sm:$0xf] }
 0x259   :  { %v2453_v49 = vpop.f32.mrf.mxu3  ;;  %3383 = vmatmul.bf16.vlgmr.msra.gmra.mxu0 %v16817_v37  ;;  %3437 = vmatmul.bf16.vlgmr.msra.gmra.mxu3 %v16817_v37  ;;  %v2438_v0 = vpop.f32.mrf.mxu2  ;;  %v11086_v27 = vor.u32 %v14214_v29, %v11083_v36  ;;  %v11309_v21 = vld [vmem:[%s20398_s5 + $0x620] sm:$0xf]  ;;  %v14259_v17 = vld [vmem:[%s20398_s5 + $0x5cc] sm:$0xf]  ;;  %v11289_v29 = vld [vmem:[%s20398_s5 + $0x5f8] sm:$0xf] }
 0x25a   :  { %v16839_v60 = vrot.slane %v2488_v50, 7  ;;  %v2490_v55 = vmax.f32 %v2481_v3, 0.0  ;;  %v2454_v5 = vadd.f32 %v2453_v49, %v16745_v7  ;;  %3399 = vmatpush.bf16.msra.mxu1 %v11102_v25  ;;  %v11069_v7 = vld [vmem:[%s20398_s5 + $0x440] sm:$0xf]  ;;  %3506 = vmatpush.bf16.msrb.mxu3 %v11130_v16  ;;  %v2836_v25 = vshrl.u32 %v16757_v62, 16 }
 0x25b   :  { %v2420_v4 = vpop.f32.mrf.mxu1  ;;  %v2404_v34 = vpop.f32.mrf.mxu0  ;;  %v11070_v45 = vor.u32 %v14212_v28, %v11069_v7  ;;  %v11306_v3 = vor.u32 %v14269_v59, %v11303_v18  ;;  %v11009_v62 = vld [vmem:[%s20398_s5 + $0x3c8] sm:$0xf]  ;;  %v14272_v7 = vld [vmem:[%s20398_s5 + $0x630] sm:$0xf0]  ;;  %v14270_v28 = vld [vmem:[%s20398_s5 + $0x624] sm:$0xf] }
 0x25c   :  { %2519 = vst.msk [vmem:[#allocation4 + $0x10] sm:$0xfe] %vm2518_vm14, %v16839_v60  ;;  %v2506_v63 = vrot.slane %v2490_v55, 7  ;;  %v2465_v1 = vadd.f32 %v2454_v5, %v2076_v24  ;;  %v2421_v9 = vadd.f32 %v2420_v4, %v16769_v31  ;;  %3453 = vmatpush.bf16.msrb.mxu0 %v11106_v51  ;;  %v11283_v24 = vld [vmem:[%s20398_s5 + $0x604] sm:$0xf0]  ;;  %v16917_v10 = vor.u32 %v2836_v25, %v16799_v47 }
 0x25d   :  { %2525 = vst [vmem:[#allocation4 + $0x20] sm:$0xe0] %v2490_v55  ;;  %3483 = vmatpush.bf16.msrb.mxu2 %v11070_v45  ;;  %v2668_v8 = vld [vmem:[#allocation4 + $0x8] sm:$0xfe]  ;;  %v11286_v44 = vor.u32 %v14264_v52, %v11283_v24  ;;  %v10989_v5 = vld [vmem:[%s20398_s5 + $0x3a0] sm:$0xf] }
 0x25e   :  { %v2507_v22 = vsel %vm948_vm4, %v16774_v42, %v2506_v63  ;;  %v2482_v31 = vadd.f32 %v16738_v26, %v2465_v1  ;;  %v2467_v40 = vadd.f32 %v2421_v9, %v16481_v58  ;;  %3400 = vmatpush.bf16.msra.mxu1 %v11082_v23  ;;  %v11089_v42 = vld [vmem:[%s20398_s5 + $0x468] sm:$0xf]  ;;  %v14217_v58 = vld [vmem:[%s20398_s5 + $0x478] sm:$0xf0]  ;;  %3507 = vmatpush.bf16.msrb.mxu3 %v11110_v2  ;;  %v14192_v47 = vld [vmem:[%s20398_s5 + $0x3b0] sm:$0xf0] }
 0x25f   :  { %2521 = vst [vmem:[#allocation4 + $0x20] sm:$0x7] %v2507_v22  ;;  %v11090_v32 = vor.u32 %v14217_v58, %v11089_v42  ;;  %v10990_v38 = vor.u32 %v14192_v47, %v10989_v5  ;;  %v11310_v1 = vor.u32 %v14272_v7, %v11309_v21  ;;  %v11311_v9 = vld [vmem:[%s20398_s5 + $0x634] sm:$0xf0]  ;;  %v11263_v51 = vld [vmem:[%s20398_s5 + $0x5dc] sm:$0xf0] }
 0x260   :  { %v2491_v43 = vmax.f32 %v2482_v31, 0.0  ;;  %v2484_v15 = vadd.f32 %v16697_v6, %v2467_v40  ;;  %3454 = vmatpush.bf16.msrb.mxu0 %v11086_v27  ;;  %v11314_v39 = vor.u32 %v14270_v28, %v11311_v9  ;;  %v11266_v30 = vor.u32 %v14259_v17, %v11263_v51  ;;  %v10969_v22 = vld [vmem:[%s20398_s5 + $0x378] sm:$0xf]  ;;  %v14187_v31 = vld [vmem:[%s20398_s5 + $0x388] sm:$0xf0] }
 0x261   :  { %v2456_v61 = vpop.f32.mrf.mxu3  ;;  %v2440_v46 = vpop.f32.mrf.mxu2  ;;  %3484 = vmatpush.bf16.msrb.mxu2 %v11050_v35  ;;  %v14267_v36 = vld [vmem:[%s20398_s5 + $0x608] sm:$0xf0]  ;;  %v14265_v35 = vld [vmem:[%s20398_s5 + $0x5fc] sm:$0xf]  ;;  %v11291_v11 = vld [vmem:[%s20398_s5 + $0x60c] sm:$0xf0] }
 0x262   :  { %v2508_v54 = vrot.slane %v2491_v43, 7  ;;  %2527 = vst.msk [vmem:[#allocation4 + $0x28] sm:$0xe0] %vm2526_vm15, %v2491_v43  ;;  %v2493_v6 = vmax.f32 %v2484_v15, 0.0  ;;  %v2457_v48 = vadd.f32 %v2456_v61, %v2438_v0  ;;  %3508 = vmatpush.bf16.msrb.mxu3 %v11090_v32  ;;  %3469 = vmatpush.bf16.msrb.mxu1 %v11306_v3  ;;  %v10970_v43 = vor.u32 %v14187_v31, %v10969_v22  ;;  %v14254_v46 = vld [vmem:[%s20398_s5 + $0x5a4] sm:$0xf] }
 0x263   :  { %v2422_v33 = vpop.f32.mrf.mxu1  ;;  %v2669_v19 = vld [vmem:[#allocation4 + $0x10] sm:$0xfe]  ;;  %v11290_v15 = vor.u32 %v14267_v36, %v11289_v29  ;;  %v11294_v61 = vor.u32 %v14265_v35, %v11291_v11  ;;  %v11269_v25 = vld [vmem:[%s20398_s5 + $0x5d0] sm:$0xf]  ;;  %v14260_v59 = vld [vmem:[%s20398_s5 + $0x5d4] sm:$0xf] }
 0x264   :  { %v2509_v53 = vsel %vm948_vm4, %v16839_v60, %v2508_v54  ;;  %2529 = vst [vmem:[#allocation4 + $0x38] sm:$0x7f] %v2493_v6  ;;  %v2468_v50 = vadd.f32 %v2457_v48, %v2079_v13  ;;  %v11010_v60 = vor.u32 %v14197_v20, %v11009_v62  ;;  %3523 = vmatpush.bf16.msra.mxu0 %v11310_v1  ;;  %v11243_v6 = vld [vmem:[%s20398_s5 + $0x5b4] sm:$0xf0]  ;;  %v10949_v48 = vld [vmem:[%s20398_s5 + $0x350] sm:$0xf] }
 0x265   :  { %2523 = vst.msk [vmem:[#allocation4 + $0x28] sm:$0x7] %vm2522_vm1, %v2509_v53  ;;  %3485 = vmatpush.bf16.msrb.mxu2 %v11030_v14  ;;  %v14182_v32 = vld [vmem:[%s20398_s5 + $0x360] sm:$0xf0]  ;;  %v11246_v33 = vor.u32 %v14254_v46, %v11243_v6  ;;  %v11271_v62 = vld [vmem:[%s20398_s5 + $0x5e4] sm:$0xf0] }
 0x266   :  { %v2485_v49 = vadd.f32 %v16738_v26, %v2468_v50  ;;  %v16914_v0 = vld [vmem:[#allocation4 + $0x20] sm:$0xff]  ;;  %3470 = vmatpush.bf16.msrb.mxu1 %v11286_v44  ;;  %3577 = vmatpush.bf16.msra.mxu3 %v11314_v39  ;;  %v14262_v14 = vld [vmem:[%s20398_s5 + $0x5e0] sm:$0xf0]  ;;  %v10950_v50 = vor.u32 %v14182_v32, %v10949_v48  ;;  %v11274_v52 = vor.u32 %v14260_v59, %v11271_v62  ;;  %v11071_v24 = vld [vmem:[%s20398_s5 + $0x454] sm:$0xf0] }
 0x267   :  { %v2674_v12 = vpack.c.bf16 %v16914_v0, %v2668_v8  ;;  %v11270_v3 = vor.u32 %v14262_v14, %v11269_v25  ;;  %v14210_v20 = vld [vmem:[%s20398_s5 + $0x444] sm:$0xf]  ;;  %v14177_v8 = vld [vmem:[%s20398_s5 + $0x338] sm:$0xf0]  ;;  %v14255_v5 = vld [vmem:[%s20398_s5 + $0x5ac] sm:$0xf] }
 0x268   :  { %v2494_v57 = vmax.f32 %v2485_v49, 0.0  ;;  %3524 = vmatpush.bf16.msra.mxu0 %v11290_v15  ;;  %v10929_v49 = vld [vmem:[%s20398_s5 + $0x328] sm:$0xf]  ;;  %v11251_v47 = vld [vmem:[%s20398_s5 + $0x5bc] sm:$0xf0] }
 0x269   :  { %v2458_v55 = vpop.f32.mrf.mxu3  ;;  %3388 = vmatmul.bf16.gmra.mxu0 %v16917_v10  ;;  %3442 = vmatmul.bf16.gmra.mxu3 %v16917_v10  ;;  %v2815_v26 = vshll.u32 %v2674_v12, 16  ;;  %v2813_v2 = vshrl.u32 %v2674_v12, 16  ;;  %v10930_v21 = vor.u32 %v14177_v8, %v10929_v49  ;;  %v14250_v28 = vld [vmem:[%s20398_s5 + $0x584] sm:$0xf]  ;;  %v11077_v1 = vld [vmem:[%s20398_s5 + $0x448] sm:$0xf] }
 0x26a   :  { %2531 = vst.msk [vmem:[#allocation4 + $0x40] sm:$0x7f] %vm2530_vm2, %v2494_v57  ;;  %3486 = vmatpush.bf16.msrb.mxu2 %v11010_v60  ;;  %3471 = vmatpush.bf16.msrb.mxu1 %v11266_v30  ;;  %v11074_v57 = vor.u32 %v14210_v20, %v11071_v24  ;;  %v11249_v60 = vld [vmem:[%s20398_s5 + $0x5a8] sm:$0xf]  ;;  %v14257_v55 = vld [vmem:[%s20398_s5 + $0x5b8] sm:$0xf0] }
 0x26b   :  { %v2671_v16 = vld [vmem:[#allocation4 + $0x38] sm:$0x7f]  ;;  %v2817_v34 = vrot.slane %v2815_v26, 1  ;;  %3578 = vmatpush.bf16.msra.mxu3 %v11294_v61  ;;  %v11250_v26 = vor.u32 %v14257_v55, %v11249_v60  ;;  %v11471_v17 = vld [vmem:[%s20398_s5 + $0x118] sm:$0xf] }
 0x26c   :  { %v16931_v4 = vpack.c.bf16 %v2671_v16, %v2671_v16  ;;  %v2537_v23 = vld [vmem:[#allocation4 + $0x28] sm:$0xff]  ;;  %3525 = vmatpush.bf16.msra.mxu0 %v11270_v3  ;;  %v14111_v51 = vld [vmem:[%s20398_s5 + $0x128] sm:$0xf0]  ;;  %v14200_v39 = vld [vmem:[%s20398_s5 + $0x3f4] sm:$0xf] }
 0x26d   :  { %v2675_v63 = vpack.c.bf16 %v2537_v23, %v2669_v19  ;;  %v2818_v42 = vor.u32 %v2817_v34, %v2813_v2  ;;  %v14205_v16 = vld [vmem:[%s20398_s5 + $0x41c] sm:$0xf]  ;;  %v11254_v34 = vor.u32 %v14255_v5, %v11251_v47  ;;  %v11051_v23 = vld [vmem:[%s20398_s5 + $0x42c] sm:$0xf0]  ;;  %v11031_v30 = vld [vmem:[%s20398_s5 + $0x404] sm:$0xf0] }
 0x26e   :  { %v2820_v45 = vshll.u32 %v16931_v4, 16  ;;  %3487 = vmatpush.bf16.msrb.mxu2 %v10990_v38  ;;  %3472 = vmatpush.bf16.msrb.mxu1 %v11246_v33  ;;  %v2839_v38 = vshrl.u32 %v16931_v4, 16  ;;  %v11054_v7 = vor.u32 %v14205_v16, %v11051_v23  ;;  %v14213_v4 = vld [vmem:[%s20398_s5 + $0x458] sm:$0xf0]  ;;  %v11211_v31 = vld [vmem:[%s20398_s5 + $0x56c] sm:$0xf0]  ;;  %v11034_v36 = vor.u32 %v14200_v39, %v11031_v30 }
 0x26f   :  { %v2827_v40 = vshll.u32 %v2675_v63, 16  ;;  %v2825_v18 = vshrl.u32 %v2675_v63, 16  ;;  %3579 = vmatpush.bf16.msra.mxu3 %v11274_v52  ;;  %v11231_v63 = vld [vmem:[%s20398_s5 + $0x594] sm:$0xf0]  ;;  %v11078_v2 = vor.u32 %v14213_v4, %v11077_v1  ;;  %v14245_v22 = vld [vmem:[%s20398_s5 + $0x55c] sm:$0xf] }
 0x270   :  { %v16961_v58 = vrot.slane %v2820_v45, 1  ;;  %3526 = vmatpush.bf16.msra.mxu0 %v11250_v26  ;;  %v11234_v9 = vor.u32 %v14250_v28, %v11231_v63  ;;  %v11472_v45 = vor.u32 %v14111_v51, %v11471_v17  ;;  %v14208_v29 = vld [vmem:[%s20398_s5 + $0x430] sm:$0xf0]  ;;  %v11451_v15 = vld [vmem:[%s20398_s5 + $0xf0] sm:$0xf] }
 0x271   :  { %v2672_v56 = vld [vmem:[#allocation4 + $0x40] sm:$0x7f]  ;;  %v2829_v13 = vrot.slane %v2827_v40, 1  ;;  %v11057_v40 = vld [vmem:[%s20398_s5 + $0x420] sm:$0xf] }
 0x272   :  { %v16974_v27 = vsel %vm1098_vm10, %v2818_v42, %v16961_v58  ;;  %v16976_v54 = vpack.c.bf16 %v2672_v56, %v2672_v56  ;;  %3488 = vmatpush.bf16.msrb.mxu2 %v10970_v43  ;;  %v11214_v42 = vor.u32 %v14245_v22, %v11211_v31  ;;  %v11058_v43 = vor.u32 %v14208_v29, %v11057_v40  ;;  %v14106_v35 = vld [vmem:[%s20398_s5 + $0x100] sm:$0xf0]  ;;  %v14195_v11 = vld [vmem:[%s20398_s5 + $0x3cc] sm:$0xf]  ;;  %v14240_v61 = vld [vmem:[%s20398_s5 + $0x534] sm:$0xf] }
 0x273   :  { %3401 = vmatmul.bf16.vlgmr.msra.gmra.mxu1 %v16974_v27  ;;  %v2830_v12 = vor.u32 %v2829_v13, %v2825_v18  ;;  %3580 = vmatpush.bf16.msra.mxu3 %v11254_v34  ;;  %v11452_v56 = vor.u32 %v14106_v35, %v11451_v15  ;;  %v11011_v13 = vld [vmem:[%s20398_s5 + $0x3dc] sm:$0xf0]  ;;  %v11191_v46 = vld [vmem:[%s20398_s5 + $0x544] sm:$0xf0]  ;;  %v11037_v6 = vld [vmem:[%s20398_s5 + $0x3f8] sm:$0xf]  ;;  %v17106_v33 = vor.u32 %v2839_v38, %v16961_v58 }
 0x274   :  { %v2832_v53 = vshll.u32 %v16976_v54, 16  ;;  %3537 = vmatpush.bf16.msra.mxu1 %v11074_v57  ;;  %v14203_v48 = vld [vmem:[%s20398_s5 + $0x408] sm:$0xf0]  ;;  %v11431_v32 = vld [vmem:[%s20398_s5 + $0xc8] sm:$0xf]  ;;  %v11194_v25 = vor.u32 %v14240_v61, %v11191_v46  ;;  %v11014_v59 = vor.u32 %v14195_v11, %v11011_v13  ;;  %v2842_v24 = vshrl.u32 %v16976_v54, 16 }
 0x275   :  { %v14101_v14 = vld [vmem:[%s20398_s5 + $0xd8] sm:$0xf0]  ;;  %v11038_v18 = vor.u32 %v14203_v48, %v11037_v6  ;;  %v10991_v58 = vld [vmem:[%s20398_s5 + $0x3b4] sm:$0xf0]  ;;  %v14235_v3 = vld [vmem:[%s20398_s5 + $0x50c] sm:$0xf] }
 0x276   :  { %v17013_v44 = vrot.slane %v2832_v53, 1  ;;  %3489 = vmatpush.bf16.msrb.mxu2 %v10950_v50  ;;  %v11432_v53 = vor.u32 %v14101_v14, %v11431_v32  ;;  %v14190_v50 = vld [vmem:[%s20398_s5 + $0x3a4] sm:$0xf]  ;;  %v11171_v62 = vld [vmem:[%s20398_s5 + $0x51c] sm:$0xf0] }
 0x277   :  { %v11017_v20 = vld [vmem:[%s20398_s5 + $0x3d0] sm:$0xf]  ;;  %v14198_v52 = vld [vmem:[%s20398_s5 + $0x3e0] sm:$0xf0]  ;;  %v11411_v49 = vld [vmem:[%s20398_s5 + $0xa0] sm:$0xf]  ;;  %v11174_v60 = vor.u32 %v14235_v3, %v11171_v62 }
 0x278   :  { %v17032_v19 = vsel %vm1098_vm10, %v2830_v12, %v17013_v44  ;;  %3538 = vmatpush.bf16.msra.mxu1 %v11054_v7  ;;  %v14096_v8 = vld [vmem:[%s20398_s5 + $0xb0] sm:$0xf0]  ;;  %v10994_v12 = vor.u32 %v14190_v50, %v10991_v58  ;;  %v17138_v57 = vor.u32 %v2842_v24, %v17013_v44  ;;  %v11018_v55 = vor.u32 %v14198_v52, %v11017_v20  ;;  %v14185_v54 = vld [vmem:[%s20398_s5 + $0x37c] sm:$0xf]  ;;  %v10971_v26 = vld [vmem:[%s20398_s5 + $0x38c] sm:$0xf0] }
 0x279   :  { %11319 = vmatmul.msk.bf16.vlgmr.msra.gmra.mxu2 %vm75_vm0, %v17032_v19  ;;  %3455 = vmatmul.bf16.vlgmr.msrb.gmra.mxu0 %v16974_v27  ;;  %v11412_v5 = vor.u32 %v14096_v8, %v11411_v49  ;;  %v10974_v44 = vor.u32 %v14185_v54, %v10971_v26  ;;  %v14230_v47 = vld [vmem:[%s20398_s5 + $0x4e4] sm:$0xf]  ;;  %v11151_v16 = vld [vmem:[%s20398_s5 + $0x4f4] sm:$0xf0]  ;;  %v14193_v23 = vld [vmem:[%s20398_s5 + $0x3b8] sm:$0xf0] }
 0x27a   :  { %3509 = vmatmul.bf16.vlgmr.msrb.gmra.mxu3 %v16974_v27  ;;  %3490 = vmatpush.bf16.msrb.mxu2 %v10930_v21  ;;  %v10997_v21 = vld [vmem:[%s20398_s5 + $0x3a8] sm:$0xf]  ;;  %v11154_v34 = vor.u32 %v14230_v47, %v11151_v16  ;;  %v11391_v38 = vld [vmem:[%s20398_s5 + $0x78] sm:$0xf]  ;;  %v14091_v7 = vld [vmem:[%s20398_s5 + $0x88] sm:$0xf0] }
 0x27b   :  { %3591 = vmatpush.bf16.msrb.mxu0 %v11078_v2  ;;  %4171 = vmatpush.bf16.msrb.mxu3 %v11472_v45  ;;  %v10998_v28 = vor.u32 %v14193_v23, %v10997_v21  ;;  %v11392_v63 = vor.u32 %v14091_v7, %v11391_v38  ;;  %v14180_v1 = vld [vmem:[%s20398_s5 + $0x354] sm:$0xf]  ;;  %v14225_v4 = vld [vmem:[%s20398_s5 + $0x4bc] sm:$0xf]  ;;  %v11131_v17 = vld [vmem:[%s20398_s5 + $0x4cc] sm:$0xf0] }
 0x27c   :  { %3539 = vmatpush.bf16.msra.mxu1 %v11034_v36  ;;  %v10977_v51 = vld [vmem:[%s20398_s5 + $0x380] sm:$0xf]  ;;  %v14188_v2 = vld [vmem:[%s20398_s5 + $0x390] sm:$0xf0]  ;;  %v11371_v39 = vld [vmem:[%s20398_s5 + $0x50] sm:$0xf]  ;;  %v11134_v22 = vor.u32 %v14225_v4, %v11131_v17 }
 0x27d   :  { %v14086_v30 = vld [vmem:[%s20398_s5 + $0x60] sm:$0xf0]  ;;  %v14175_v31 = vld [vmem:[%s20398_s5 + $0x32c] sm:$0xf]  ;;  %v10931_v40 = vld [vmem:[%s20398_s5 + $0x33c] sm:$0xf0]  ;;  %v10978_v29 = vor.u32 %v14188_v2, %v10977_v51 }
 0x27e   :  { %3555 = vmatpush.bf16.msra.mxu2 %v11234_v9  ;;  %v10951_v9 = vld [vmem:[%s20398_s5 + $0x364] sm:$0xf0]  ;;  %v11372_v36 = vor.u32 %v14086_v30, %v11371_v39  ;;  %v10957_v15 = vld [vmem:[%s20398_s5 + $0x358] sm:$0xf]  ;;  %v14183_v35 = vld [vmem:[%s20398_s5 + $0x368] sm:$0xf0]  ;;  %v10934_v13 = vor.u32 %v14175_v31, %v10931_v40 }
 0x27f   :  { %3592 = vmatpush.bf16.msrb.mxu0 %v11058_v43  ;;  %4172 = vmatpush.bf16.msrb.mxu3 %v11452_v56  ;;  %v10954_v45 = vor.u32 %v14180_v1, %v10951_v9  ;;  %v11111_v43 = vld [vmem:[%s20398_s5 + $0x4a4] sm:$0xf0]  ;;  %v14081_v56 = vld [vmem:[%s20398_s5 + $0x38] sm:$0xf0]  ;;  %v14215_v48 = vld [vmem:[%s20398_s5 + $0x46c] sm:$0xf]  ;;  %v10958_v32 = vor.u32 %v14183_v35, %v10957_v15 }
 0x280   :  { %3540 = vmatpush.bf16.msra.mxu1 %v11014_v59  ;;  %v11351_v11 = vld [vmem:[%s20398_s5 + $0x28] sm:$0xf]  ;;  %v14253_v6 = vld [vmem:[%s20398_s5 + $0x598] sm:$0xf0]  ;;  %v11091_v59 = vld [vmem:[%s20398_s5 + $0x47c] sm:$0xf0] }
 0x281   :  { %v11237_v46 = vld [vmem:[%s20398_s5 + $0x588] sm:$0xf]  ;;  %v11331_v50 = vld [vmem:[%s20398_s5] sm:$0xf]  ;;  %v14076_v58 = vld [vmem:[%s20398_s5 + $0x10] sm:$0xf0]  ;;  %v11094_v20 = vor.u32 %v14215_v48, %v11091_v59 }
 0x282   :  { %3556 = vmatpush.bf16.msra.mxu2 %v11214_v42  ;;  %v14220_v42 = vld [vmem:[%s20398_s5 + $0x494] sm:$0xf]  ;;  %v11238_v14 = vor.u32 %v14253_v6, %v11237_v46  ;;  %v11217_v3 = vld [vmem:[%s20398_s5 + $0x560] sm:$0xf]  ;;  %v11332_v49 = vor.u32 %v14076_v58, %v11331_v50  ;;  %v11631_v8 = vld [vmem:[%s20398_s5 + $0x258] sm:$0xf] }
 0x283   :  { %3406 = vmatmul.bf16.gmra.mxu1 %v17106_v33  ;;  %3593 = vmatpush.bf16.msrb.mxu0 %v11038_v18  ;;  %v11114_v61 = vor.u32 %v14220_v42, %v11111_v43  ;;  %v10937_v18 = vld [vmem:[%s20398_s5 + $0x330] sm:$0xf]  ;;  %v14248_v62 = vld [vmem:[%s20398_s5 + $0x570] sm:$0xf0]  ;;  %v11197_v26 = vld [vmem:[%s20398_s5 + $0x538] sm:$0xf] }
 0x284   :  { %4173 = vmatpush.bf16.msrb.mxu3 %v11432_v53  ;;  %3541 = vmatpush.bf16.msra.mxu1 %v10994_v12  ;;  %v14178_v53 = vld [vmem:[%s20398_s5 + $0x340] sm:$0xf0]  ;;  %v11218_v52 = vor.u32 %v14248_v62, %v11217_v3  ;;  %v14151_v12 = vld [vmem:[%s20398_s5 + $0x268] sm:$0xf0]  ;;  %v11633_v54 = vld [vmem:[%s20398_s5 + $0x26c] sm:$0xf0] }
 0x285   :  { %v10938_v24 = vor.u32 %v14178_v53, %v10937_v18  ;;  %v11611_v16 = vld [vmem:[%s20398_s5 + $0x230] sm:$0xf]  ;;  %v14146_v21 = vld [vmem:[%s20398_s5 + $0x240] sm:$0xf0]  ;;  %v11613_v38 = vld [vmem:[%s20398_s5 + $0x244] sm:$0xf0] }
 0x286   :  { %3557 = vmatpush.bf16.msra.mxu2 %v11194_v25  ;;  %v11352_v25 = vor.u32 %v14081_v56, %v11351_v11  ;;  %v11612_v23 = vor.u32 %v14146_v21, %v11611_v16  ;;  %v11177_v7 = vld [vmem:[%s20398_s5 + $0x510] sm:$0xf]  ;;  %v11591_v1 = vld [vmem:[%s20398_s5 + $0x208] sm:$0xf]  ;;  %v14141_v9 = vld [vmem:[%s20398_s5 + $0x218] sm:$0xf0] }
 0x287   :  { %3594 = vmatpush.bf16.msrb.mxu0 %v11018_v55  ;;  %v11632_v55 = vor.u32 %v14151_v12, %v11631_v8  ;;  %v14139_v4 = vld [vmem:[%s20398_s5 + $0x20c] sm:$0xf]  ;;  %v11593_v17 = vld [vmem:[%s20398_s5 + $0x21c] sm:$0xf0]  ;;  %v11592_v2 = vor.u32 %v14141_v9, %v11591_v1  ;;  %v11157_v39 = vld [vmem:[%s20398_s5 + $0x4e8] sm:$0xf] }
 0x288   :  { %4174 = vmatpush.bf16.msrb.mxu3 %v11412_v5  ;;  %3542 = vmatpush.bf16.msra.mxu1 %v10974_v44  ;;  %v14243_v5 = vld [vmem:[%s20398_s5 + $0x548] sm:$0xf0]  ;;  %v14233_v30 = vld [vmem:[%s20398_s5 + $0x4f8] sm:$0xf0]  ;;  %v14136_v40 = vld [vmem:[%s20398_s5 + $0x1f0] sm:$0xf0] }
 0x289   :  { %11320 = vmatmul.msk.bf16.gmra.mxu2 %vm75_vm0, %v17138_v57  ;;  %3460 = vmatmul.bf16.gmra.mxu0 %v17106_v33  ;;  %v11198_v47 = vor.u32 %v14243_v5, %v11197_v26  ;;  %v11158_v31 = vor.u32 %v14233_v30, %v11157_v39  ;;  %v11137_v42 = vld [vmem:[%s20398_s5 + $0x4c0] sm:$0xf]  ;;  %v14228_v43 = vld [vmem:[%s20398_s5 + $0x4d0] sm:$0xf0]  ;;  %v11317_v56 = vld [vmem:[%s20398_s5 + $0x628] sm:$0xf] }
 0x28a   :  { %3514 = vmatmul.bf16.gmra.mxu3 %v17106_v33  ;;  %3558 = vmatpush.bf16.msra.mxu2 %v11174_v60  ;;  %v14149_v60 = vld [vmem:[%s20398_s5 + $0x25c] sm:$0xf]  ;;  %v11138_v11 = vor.u32 %v14228_v43, %v11137_v42  ;;  %v14131_v6 = vld [vmem:[%s20398_s5 + $0x1c8] sm:$0xf0]  ;;  %v11117_v59 = vld [vmem:[%s20398_s5 + $0x498] sm:$0xf] }
 0x28b   :  { %3595 = vmatpush.bf16.msrb.mxu0 %v10998_v28  ;;  %v11636_v44 = vor.u32 %v14149_v60, %v11633_v54  ;;  %v14238_v28 = vld [vmem:[%s20398_s5 + $0x520] sm:$0xf0]  ;;  %v14129_v48 = vld [vmem:[%s20398_s5 + $0x1bc] sm:$0xf]  ;;  %v14223_v18 = vld [vmem:[%s20398_s5 + $0x4a8] sm:$0xf0] }
 0x28c   :  { %4175 = vmatpush.bf16.msrb.mxu3 %v11392_v63  ;;  %3543 = vmatpush.bf16.msra.mxu1 %v10954_v45  ;;  %v11178_v51 = vor.u32 %v14238_v28, %v11177_v7  ;;  %v11596_v45 = vor.u32 %v14139_v4, %v11593_v17  ;;  %v11297_v53 = vld [vmem:[%s20398_s5 + $0x600] sm:$0xf]  ;;  %v11118_v50 = vor.u32 %v14223_v18, %v11117_v59  ;;  %v14268_v58 = vld [vmem:[%s20398_s5 + $0x610] sm:$0xf0]  ;;  %v11531_v3 = vld [vmem:[%s20398_s5 + $0x190] sm:$0xf] }
 0x28d   :  { %v14126_v62 = vld [vmem:[%s20398_s5 + $0x1a0] sm:$0xf0]  ;;  %v11097_v8 = vld [vmem:[%s20398_s5 + $0x470] sm:$0xf]  ;;  %v14263_v54 = vld [vmem:[%s20398_s5 + $0x5e8] sm:$0xf0] }
 0x28e   :  { %3559 = vmatpush.bf16.msra.mxu2 %v11154_v34  ;;  %v14144_v34 = vld [vmem:[%s20398_s5 + $0x234] sm:$0xf]  ;;  %v14218_v60 = vld [vmem:[%s20398_s5 + $0x480] sm:$0xf0]  ;;  %v11511_v5 = vld [vmem:[%s20398_s5 + $0x168] sm:$0xf] }
 0x28f   :  { %3596 = vmatpush.bf16.msrb.mxu0 %v10978_v29  ;;  %v11616_v63 = vor.u32 %v14144_v34, %v11613_v38  ;;  %v14134_v29 = vld [vmem:[%s20398_s5 + $0x1e4] sm:$0xf]  ;;  %v11098_v26 = vor.u32 %v14218_v60, %v11097_v8  ;;  %v11513_v21 = vld [vmem:[%s20398_s5 + $0x17c] sm:$0xf0]  ;;  %v2532_v38 = vld [vmem:[#allocation4] sm:$0xff] }
 0x290   :  { %4176 = vmatpush.bf16.msrb.mxu3 %v11372_v36  ;;  %3544 = vmatpush.bf16.msra.mxu1 %v10934_v13  ;;  %v11573_v36 = vld [vmem:[%s20398_s5 + $0x1f4] sm:$0xf0]  ;;  %v14273_v13 = vld [vmem:[%s20398_s5 + $0x638] sm:$0xf0]  ;;  %v11257_v7 = vld [vmem:[%s20398_s5 + $0x5b0] sm:$0xf] }
 0x291   :  { %v11576_v35 = vor.u32 %v14134_v29, %v11573_v36  ;;  %v11318_v46 = vor.u32 %v14273_v13, %v11317_v56  ;;  %v14258_v28 = vld [vmem:[%s20398_s5 + $0x5c0] sm:$0xf0]  ;;  %v14116_v9 = vld [vmem:[%s20398_s5 + $0x150] sm:$0xf0]  ;;  %v11493_v17 = vld [vmem:[%s20398_s5 + $0x154] sm:$0xf0] }
 0x292   :  { %3560 = vmatpush.bf16.msra.mxu2 %v11134_v22  ;;  %v11571_v22 = vld [vmem:[%s20398_s5 + $0x1e0] sm:$0xf]  ;;  %v11258_v1 = vor.u32 %v14258_v28, %v11257_v7  ;;  %v14114_v4 = vld [vmem:[%s20398_s5 + $0x144] sm:$0xf]  ;;  %v14109_v30 = vld [vmem:[%s20398_s5 + $0x11c] sm:$0xf] }
 0x293   :  { %11321 = vmatmul.msk.bf16.vlgmr.msrb.gmra.mxu1 %vm75_vm0, %v17032_v19  ;;  %3597 = vmatpush.bf16.msrb.mxu0 %v10958_v32  ;;  %v11572_v15 = vor.u32 %v14136_v40, %v11571_v22  ;;  %v11553_v32 = vld [vmem:[%s20398_s5 + $0x1cc] sm:$0xf0]  ;;  %v11496_v39 = vor.u32 %v14114_v4, %v11493_v17  ;;  %v14104_v40 = vld [vmem:[%s20398_s5 + $0xf4] sm:$0xf]  ;;  %v14099_v29 = vld [vmem:[%s20398_s5 + $0xcc] sm:$0xf] }
 0x294   :  { %3609 = vmatpush.bf16.msrb.mxu1 %v11238_v14  ;;  %4177 = vmatpush.bf16.msrb.mxu3 %v11352_v25  ;;  %v11556_v14 = vor.u32 %v14129_v48, %v11553_v32  ;;  %v11473_v22 = vld [vmem:[%s20398_s5 + $0x12c] sm:$0xf0]  ;;  %v11433_v42 = vld [vmem:[%s20398_s5 + $0xdc] sm:$0xf0]  ;;  %v14094_v13 = vld [vmem:[%s20398_s5 + $0xa4] sm:$0xf] }
 0x295   :  { %v11436_v43 = vor.u32 %v14099_v29, %v11433_v42  ;;  %v14166_v48 = vld [vmem:[%s20398_s5 + $0x2e0] sm:$0xf0]  ;;  %v11393_v59 = vld [vmem:[%s20398_s5 + $0x8c] sm:$0xf0]  ;;  %v14169_v18 = vld [vmem:[%s20398_s5 + $0x2fc] sm:$0xf] }
 0x296   :  { %3561 = vmatpush.bf16.msra.mxu2 %v11114_v61  ;;  %v11551_v61 = vld [vmem:[%s20398_s5 + $0x1b8] sm:$0xf]  ;;  %v11373_v8 = vld [vmem:[%s20398_s5 + $0x64] sm:$0xf0]  ;;  %v11673_v7 = vld [vmem:[%s20398_s5 + $0x2bc] sm:$0xf0] }
 0x297   :  { %3598 = vmatpush.bf16.msrb.mxu0 %v10938_v24  ;;  %v11552_v25 = vor.u32 %v14131_v6, %v11551_v61  ;;  %v14124_v24 = vld [vmem:[%s20398_s5 + $0x194] sm:$0xf]  ;;  %v11413_v61 = vld [vmem:[%s20398_s5 + $0xb4] sm:$0xf0]  ;;  %v11479_v17 = vld [vmem:[%s20398_s5 + $0x120] sm:$0xf] }
 0x298   :  { %3610 = vmatpush.bf16.msrb.mxu1 %v11218_v52  ;;  %4178 = vmatpush.bf16.msrb.mxu3 %v11332_v49  ;;  %v11532_v52 = vor.u32 %v14126_v62, %v11531_v3  ;;  %v11533_v49 = vld [vmem:[%s20398_s5 + $0x1a4] sm:$0xf0]  ;;  %v11416_v6 = vor.u32 %v14094_v13, %v11413_v61  ;;  %v14110_v13 = vld [vmem:[%s20398_s5 + $0x124] sm:$0xf] }
 0x299   :  { %3491 = vmatmul.bf16.vlgmr.msrb.gmra.mxu2 %v16817_v37  ;;  %11323 = vmatmul.msk.bf16.vlgmr.msra.gmra.mxu0 %vm75_vm0, %v17032_v19  ;;  %v11536_v12 = vor.u32 %v14124_v24, %v11533_v49  ;;  %v14084_v49 = vld [vmem:[%s20398_s5 + $0x54] sm:$0xf]  ;;  %v11659_v29 = vld [vmem:[%s20398_s5 + $0x288] sm:$0xf] }
 0x29a   :  { %11325 = vmatmul.msk.bf16.vlgmr.msra.gmra.mxu3 %vm75_vm0, %v17032_v19  ;;  %3562 = vmatpush.bf16.msra.mxu2 %v11094_v20  ;;  %v11298_v20 = vor.u32 %v14268_v58, %v11297_v53  ;;  %v14172_v58 = vld [vmem:[%s20398_s5 + $0x310] sm:$0xf0]  ;;  %v11376_v60 = vor.u32 %v14084_v49, %v11373_v8 }
 0x29b   :  { %4189 = vmatpush.bf16.msra.mxu0 %v11632_v55  ;;  %v11277_v55 = vld [vmem:[%s20398_s5 + $0x5d8] sm:$0xf]  ;;  %v14108_v49 = vld [vmem:[%s20398_s5 + $0x110] sm:$0xf0] }
 0x29c   :  { %4243 = vmatpush.bf16.msra.mxu3 %v11636_v44  ;;  %3611 = vmatpush.bf16.msrb.mxu1 %v11198_v47  ;;  %v14121_v44 = vld [vmem:[%s20398_s5 + $0x178] sm:$0xf0]  ;;  %v14119_v47 = vld [vmem:[%s20398_s5 + $0x16c] sm:$0xf]  ;;  %v11278_v16 = vor.u32 %v14263_v54, %v11277_v55  ;;  %v11693_v55 = vld [vmem:[%s20398_s5 + $0x2e4] sm:$0xf0] }
 0x29d   :  { %v11512_v34 = vor.u32 %v14121_v44, %v11511_v5  ;;  %v11699_v54 = vld [vmem:[%s20398_s5 + $0x2d8] sm:$0xf] }
 0x29e   :  { %3631 = vmatpush.bf16.msrb.mxu2 %v11318_v46  ;;  %v11691_v46 = vld [vmem:[%s20398_s5 + $0x2d0] sm:$0xf] }
 0x29f   :  { %4190 = vmatpush.bf16.msra.mxu0 %v11612_v23  ;;  %v11516_v23 = vor.u32 %v14119_v47, %v11513_v21  ;;  %v11651_v47 = vld [vmem:[%s20398_s5 + $0x280] sm:$0xf]  ;;  %v14079_v21 = vld [vmem:[%s20398_s5 + $0x2c] sm:$0xf] }
 0x2a0   :  { %4244 = vmatpush.bf16.msra.mxu3 %v11616_v63  ;;  %3612 = vmatpush.bf16.msrb.mxu1 %v11178_v51  ;;  %v11491_v63 = vld [vmem:[%s20398_s5 + $0x140] sm:$0xf]  ;;  %v14780_v51 = vld [vmem:[#allocation4 + $0x18] sm:$0xff] }
 0x2a2   :  { %3632 = vmatpush.bf16.msrb.mxu2 %v11298_v20  ;;  %v11671_v20 = vld [vmem:[%s20398_s5 + $0x2a8] sm:$0xf] }
 0x2a3   :  { %11322 = vmatmul.msk.bf16.gmra.mxu1 %vm75_vm0, %v17138_v57  ;;  %4191 = vmatpush.bf16.msra.mxu0 %v11592_v2  ;;  %v17417_v2 = vpack.c.bf16 %v14780_v51, %v2532_v38  ;;  %v14159_v38 = vld [vmem:[%s20398_s5 + $0x2ac] sm:$0xf] }
 0x2a4   :  { %4245 = vmatpush.bf16.msra.mxu3 %v11596_v45  ;;  %3613 = vmatpush.bf16.msrb.mxu1 %v11158_v31  ;;  %v11492_v45 = vor.u32 %v14116_v9, %v11491_v63  ;;  %v11476_v31 = vor.u32 %v14109_v30, %v11473_v22  ;;  %v11676_v63 = vor.u32 %v14159_v38, %v11673_v7  ;;  %v14162_v9 = vld [vmem:[%s20398_s5 + $0x2c0] sm:$0xf0]  ;;  %v2539_v7 = vld [vmem:[#allocation4 + $0x38] sm:$0x3f] }
 0x2a5   :  { %v14074_v22 = vld [vmem:[%s20398_s5 + $0x4] sm:$0xf] }
 0x2a6   :  { %3633 = vmatpush.bf16.msrb.mxu2 %v11278_v16  ;;  %v14156_v16 = vld [vmem:[%s20398_s5 + $0x290] sm:$0xf0] }
 0x2a7   :  { %4192 = vmatpush.bf16.msra.mxu0 %v11572_v15  ;;  %v11711_v15 = vld [vmem:[%s20398_s5 + $0x2f8] sm:$0xf] }
 0x2a8   :  { %4246 = vmatpush.bf16.msra.mxu3 %v11576_v35  ;;  %3614 = vmatpush.bf16.msrb.mxu1 %v11138_v11  ;;  %v14171_v35 = vld [vmem:[%s20398_s5 + $0x308] sm:$0xf0]  ;;  %v2538_v11 = vld [vmem:[#allocation4 + $0x30] sm:$0x3f] }
 0x2a9   :  { %3496 = vmatmul.bf16.gmra.mxu2 %v16917_v10  ;;  %11324 = vmatmul.msk.bf16.gmra.mxu0 %vm75_vm0, %v17138_v57  ;;  %v11712_v56 = vor.u32 %v14171_v35, %v11711_v15  ;;  %v17459_v32 = vpack.c.bf16 %v2538_v11, %v2538_v11  ;;  %v11459_v15 = vld [vmem:[%s20398_s5 + $0xf8] sm:$0xf]  ;;  %v14107_v35 = vld [vmem:[%s20398_s5 + $0x108] sm:$0xf0] }
 0x2aa   :  { %11326 = vmatmul.msk.bf16.gmra.mxu3 %vm75_vm0, %v17138_v57  ;;  %3634 = vmatpush.bf16.msrb.mxu2 %v11258_v1  ;;  %v11679_v1 = vld [vmem:[%s20398_s5 + $0x2b0] sm:$0xf]  ;;  %v11460_v11 = vor.u32 %v14107_v35, %v11459_v15  ;;  %v14090_v15 = vld [vmem:[%s20398_s5 + $0x84] sm:$0xf] }
 0x2ab   :  { %4193 = vmatpush.bf16.msra.mxu0 %v11552_v25  ;;  %v11692_v25 = vor.u32 %v14166_v48, %v11691_v46  ;;  %v11680_v4 = vor.u32 %v14162_v9, %v11679_v1  ;;  %v11481_v46 = vld [vmem:[%s20398_s5 + $0x134] sm:$0xf0]  ;;  %v14113_v48 = vld [vmem:[%s20398_s5 + $0x138] sm:$0xf0] }
 0x2ac   :  { %4247 = vmatpush.bf16.msra.mxu3 %v11556_v14  ;;  %3615 = vmatpush.bf16.msrb.mxu1 %v11118_v50  ;;  %v14089_v14 = vld [vmem:[%s20398_s5 + $0x7c] sm:$0xf]  ;;  %v11719_v50 = vld [vmem:[%s20398_s5 + $0x300] sm:$0xf] }
 0x2ad   :  { %v11396_v53 = vor.u32 %v14089_v14, %v11393_v59  ;;  %v11720_v62 = vor.u32 %v14172_v58, %v11719_v50  ;;  %v11484_v14 = vor.u32 %v14110_v13, %v11481_v46  ;;  %v11619_v58 = vld [vmem:[%s20398_s5 + $0x238] sm:$0xf] }
 0x2af   :  { %4194 = vmatpush.bf16.msra.mxu0 %v11532_v52  ;;  %v14161_v52 = vld [vmem:[%s20398_s5 + $0x2b8] sm:$0xf0] }
 0x2b0   :  { %4248 = vmatpush.bf16.msra.mxu3 %v11536_v12  ;;  %3616 = vmatpush.bf16.msrb.mxu1 %v11098_v26  ;;  %v11672_v24 = vor.u32 %v14161_v52, %v11671_v20  ;;  %v14164_v12 = vld [vmem:[%s20398_s5 + $0x2d4] sm:$0xf]  ;;  %v14167_v26 = vld [vmem:[%s20398_s5 + $0x2e8] sm:$0xf0]  ;;  %v11461_v52 = vld [vmem:[%s20398_s5 + $0x10c] sm:$0xf0] }
 0x2b1   :  { %v11696_v5 = vor.u32 %v14164_v12, %v11693_v55  ;;  %v11700_v44 = vor.u32 %v14167_v26, %v11699_v54  ;;  %v14097_v55 = vld [vmem:[%s20398_s5 + $0xb8] sm:$0xf0]  ;;  %v11599_v54 = vld [vmem:[%s20398_s5 + $0x210] sm:$0xf] }
 0x2b3   :  { %3545 = vmatmul.bf16.vlgmr.msra.gmra.mxu1 %v16817_v37  ;;  %4195 = vmatpush.bf16.msra.mxu0 %v11512_v34  ;;  %v11652_v34 = vor.u32 %v14156_v16, %v11651_v47  ;;  %v11441_v47 = vld [vmem:[%s20398_s5 + $0xe4] sm:$0xf0] }
 0x2b4   :  { %4249 = vmatpush.bf16.msra.mxu3 %v11516_v23  ;;  %4211 = vmatpush.bf16.msra.mxu1 %v11712_v56  ;;  %v11353_v23 = vld [vmem:[%s20398_s5 + $0x3c] sm:$0xf0]  ;;  %v14152_v56 = vld [vmem:[%s20398_s5 + $0x270] sm:$0xf0] }
 0x2b5   :  { %v11356_v28 = vor.u32 %v14079_v21, %v11353_v23  ;;  %v14103_v23 = vld [vmem:[%s20398_s5 + $0xe8] sm:$0xf0] }
 0x2b7   :  { %4196 = vmatpush.bf16.msra.mxu0 %v11492_v45 }
 0x2b8   :  { %4250 = vmatpush.bf16.msra.mxu3 %v11496_v39  ;;  %4212 = vmatpush.bf16.msra.mxu1 %v11692_v25  ;;  %v2533_v39 = vld [vmem:[#allocation4 + $0x8] sm:$0xff] }
 0x2b9   :  { %3563 = vmatmul.bf16.vlgmr.msra.gmra.mxu2 %v16974_v27  ;;  %3599 = vmatmul.bf16.vlgmr.msrb.gmra.mxu0 %v16817_v37  ;;  %v11453_v37 = vld [vmem:[%s20398_s5 + $0x104] sm:$0xf0]  ;;  %v17540_v30 = vpack.c.bf16 %v16914_v0, %v2533_v39  ;;  %v11653_v0 = vld [vmem:[%s20398_s5 + $0x294] sm:$0xf0] }
 0x2ba   :  { %4179 = vmatmul.bf16.vlgmr.msrb.gmra.mxu3 %v17417_v2  ;;  %4225 = vmatpush.bf16.msra.mxu2 %v11476_v31  ;;  %v11456_v36 = vor.u32 %v14104_v40, %v11453_v37  ;;  %v11333_v31 = vld [vmem:[%s20398_s5 + $0x14] sm:$0xf0]  ;;  %v14154_v40 = vld [vmem:[%s20398_s5 + $0x284] sm:$0xf] }
 0x2bb   :  { %v11336_v37 = vor.u32 %v14074_v22, %v11333_v31  ;;  %v11656_v42 = vor.u32 %v14154_v40, %v11653_v0  ;;  %v11421_v22 = vld [vmem:[%s20398_s5 + $0xbc] sm:$0xf0]  ;;  %v11427_v31 = vld [vmem:[%s20398_s5 + $0xb0] sm:$0xf]  ;;  %v14098_v40 = vld [vmem:[%s20398_s5 + $0xc0] sm:$0xf0] }
 0x2bc   :  { %4319 = vmatpush.bf16.msrb.mxu3 %v11720_v62  ;;  %4213 = vmatpush.bf16.msra.mxu1 %v11672_v24  ;;  %v14105_v62 = vld [vmem:[%s20398_s5 + $0xfc] sm:$0xf]  ;;  %v11467_v24 = vld [vmem:[%s20398_s5 + $0x100] sm:$0xf]  ;;  %v11428_v0 = vor.u32 %v14098_v40, %v11427_v31 }
 0x2bd   :  { %v11464_v8 = vor.u32 %v14105_v62, %v11461_v52  ;;  %v11468_v12 = vor.u32 %v14108_v49, %v11467_v24  ;;  %v11387_v62 = vld [vmem:[%s20398_s5 + $0x60] sm:$0xf] }
 0x2be   :  { %4226 = vmatpush.bf16.msra.mxu2 %v11456_v36  ;;  %v14157_v36 = vld [vmem:[%s20398_s5 + $0x298] sm:$0xf0]  ;;  %v2534_v24 = vld [vmem:[#allocation4 + $0x10] sm:$0xff] }
 0x2c0   :  { %4320 = vmatpush.bf16.msrb.mxu3 %v11700_v44  ;;  %4214 = vmatpush.bf16.msra.mxu1 %v11652_v34  ;;  %v14100_v44 = vld [vmem:[%s20398_s5 + $0xd4] sm:$0xf]  ;;  %v11447_v34 = vld [vmem:[%s20398_s5 + $0xd8] sm:$0xf] }
 0x2c1   :  { %v11444_v21 = vor.u32 %v14100_v44, %v11441_v47  ;;  %v14080_v47 = vld [vmem:[%s20398_s5 + $0x34] sm:$0xf] }
 0x2c2   :  { %4227 = vmatpush.bf16.msra.mxu2 %v11436_v43  ;;  %v11660_v43 = vor.u32 %v14157_v36, %v11659_v29  ;;  %v11379_v29 = vld [vmem:[%s20398_s5 + $0x58] sm:$0xf]  ;;  %v14087_v36 = vld [vmem:[%s20398_s5 + $0x68] sm:$0xf0] }
 0x2c3   :  { %3550 = vmatmul.bf16.gmra.mxu1 %v16917_v10 }
 0x2c4   :  { %4321 = vmatpush.bf16.msrb.mxu3 %v11680_v4  ;;  %v17651_v4 = vpack.c.bf16 %v2539_v7, %v2539_v7  ;;  %v14083_v7 = vld [vmem:[%s20398_s5 + $0x48] sm:$0xf0] }
 0x2c6   :  { %4228 = vmatpush.bf16.msra.mxu2 %v11416_v6  ;;  %v11487_v6 = vld [vmem:[%s20398_s5 + $0x128] sm:$0xf] }
 0x2c7   :  { %v11488_v59 = vor.u32 %v14113_v48, %v11487_v6  ;;  %v11359_v6 = vld [vmem:[%s20398_s5 + $0x30] sm:$0xf]  ;;  %v14082_v48 = vld [vmem:[%s20398_s5 + $0x40] sm:$0xf0] }
 0x2c8   :  { %4322 = vmatpush.bf16.msrb.mxu3 %v11660_v43  ;;  %v14132_v43 = vld [vmem:[%s20398_s5 + $0x1d0] sm:$0xf0] }
 0x2c9   :  { %3568 = vmatmul.bf16.gmra.mxu2 %v17106_v33  ;;  %3604 = vmatmul.bf16.gmra.mxu0 %v16917_v10  ;;  %v11713_v10 = vld [vmem:[%s20398_s5 + $0x30c] sm:$0xf0] }
 0x2ca   :  { %4184 = vmatmul.bf16.gmra.mxu3 %v17459_v32  ;;  %v11716_v3 = vor.u32 %v14169_v18, %v11713_v10  ;;  %4229 = vmatpush.bf16.msra.mxu2 %v11396_v53  ;;  %v11439_v18 = vld [vmem:[%s20398_s5 + $0xd0] sm:$0xf]  ;;  %v14102_v53 = vld [vmem:[%s20398_s5 + $0xe0] sm:$0xf0] }
 0x2cb   :  { %v11440_v50 = vor.u32 %v14102_v53, %v11439_v18  ;;  %v11539_v18 = vld [vmem:[%s20398_s5 + $0x198] sm:$0xf]  ;;  %v14127_v53 = vld [vmem:[%s20398_s5 + $0x1a8] sm:$0xf0] }
 0x2cc   :  { %4265 = vmatpush.bf16.msrb.mxu0 %v11716_v3  ;;  %v14147_v3 = vld [vmem:[%s20398_s5 + $0x248] sm:$0xf0] }
 0x2cd   :  { %v11620_v20 = vor.u32 %v14147_v3, %v11619_v58  ;;  %v11540_v58 = vor.u32 %v14127_v53, %v11539_v18  ;;  %v11381_v3 = vld [vmem:[%s20398_s5 + $0x6c] sm:$0xf0]  ;;  %v14140_v18 = vld [vmem:[%s20398_s5 + $0x214] sm:$0xf]  ;;  %v11601_v53 = vld [vmem:[%s20398_s5 + $0x224] sm:$0xf0] }
 0x2ce   :  { %4230 = vmatpush.bf16.msra.mxu2 %v11376_v60  ;;  %v11419_v60 = vld [vmem:[%s20398_s5 + $0xa8] sm:$0xf] }
 0x2cf   :  { %v11420_v26 = vor.u32 %v14097_v55, %v11419_v60  ;;  %v17726_v60 = vld [vmem:[#allocation4 + $0x28] sm:$0xff] }
 0x2d0   :  { %4266 = vmatpush.bf16.msrb.mxu0 %v11696_v5  ;;  %v14142_v5 = vld [vmem:[%s20398_s5 + $0x220] sm:$0xf0]  ;;  %v17729_v55 = vpack.c.bf16 %v17726_v60, %v2534_v24 }
 0x2d1   :  { %v11600_v16 = vor.u32 %v14142_v5, %v11599_v54  ;;  %v11339_v54 = vld [vmem:[%s20398_s5 + $0x8] sm:$0xf]  ;;  %v11519_v5 = vld [vmem:[%s20398_s5 + $0x170] sm:$0xf] }
 0x2d2   :  { %4231 = vmatpush.bf16.msra.mxu2 %v11356_v28  ;;  %v11448_v28 = vor.u32 %v14103_v23, %v11447_v34  ;;  %v11367_v23 = vld [vmem:[%s20398_s5 + $0x38] sm:$0xf] }
 0x2d3   :  { %3617 = vmatmul.bf16.vlgmr.msrb.gmra.mxu1 %v16974_v27  ;;  %v14112_v27 = vld [vmem:[%s20398_s5 + $0x130] sm:$0xf0] }
 0x2d4   :  { %v11480_v51 = vor.u32 %v14112_v27, %v11479_v17  ;;  %4267 = vmatpush.bf16.msrb.mxu0 %v11676_v63  ;;  %v14092_v63 = vld [vmem:[%s20398_s5 + $0x90] sm:$0xf0]  ;;  %v11579_v17 = vld [vmem:[%s20398_s5 + $0x1e8] sm:$0xf]  ;;  %v14137_v27 = vld [vmem:[%s20398_s5 + $0x1f8] sm:$0xf0] }
 0x2d5   :  { %v11580_v39 = vor.u32 %v14137_v27, %v11579_v17 }
 0x2d6   :  { %v17537_v45 = vpop.f32.mrf.mxu0  ;;  %4279 = vmatpush.bf16.msrb.mxu1 %v11480_v51  ;;  %4232 = vmatpush.bf16.msra.mxu2 %v11336_v37  ;;  %v14095_v51 = vld [vmem:[%s20398_s5 + $0xac] sm:$0xf] }
 0x2d7   :  { %v11424_v37 = vor.u32 %v14095_v51, %v11421_v22  ;;  %v11499_v51 = vld [vmem:[%s20398_s5 + $0x148] sm:$0xf]  ;;  %v14075_v22 = vld [vmem:[%s20398_s5 + $0xc] sm:$0xf] }
 0x2d8   :  { %4268 = vmatpush.bf16.msrb.mxu0 %v11656_v42  ;;  %v11380_v42 = vor.u32 %v14087_v36, %v11379_v29  ;;  %v14078_v29 = vld [vmem:[%s20398_s5 + $0x20] sm:$0xf0] }
 0x2d9   :  { %11327 = vmatmul.msk.bf16.vlgmr.msrb.gmra.mxu2 %vm75_vm0, %v17032_v19  ;;  %4197 = vmatmul.bf16.vlgmr.msra.gmra.mxu0 %v17540_v30  ;;  %v11639_v19 = vld [vmem:[%s20398_s5 + $0x260] sm:$0xf] }
 0x2da   :  { %4251 = vmatmul.bf16.vlgmr.msra.gmra.mxu3 %v17540_v30  ;;  %v11640_v61 = vor.u32 %v14152_v56, %v11639_v19  ;;  %4280 = vmatpush.bf16.msrb.mxu1 %v11460_v11  ;;  %v11401_v11 = vld [vmem:[%s20398_s5 + $0x94] sm:$0xf0]  ;;  %v11407_v19 = vld [vmem:[%s20398_s5 + $0x88] sm:$0xf]  ;;  %v14093_v56 = vld [vmem:[%s20398_s5 + $0x98] sm:$0xf0] }
 0x2db   :  { %4387 = vmatpush.bf16.msra.mxu3 %v11488_v59  ;;  %v11408_v46 = vor.u32 %v14093_v56, %v11407_v19  ;;  %v11360_v59 = vor.u32 %v14082_v48, %v11359_v6  ;;  %v12161_v19 = vld [vmem:[%s20398_s5 + $0x898] sm:$0xf] }
 0x2dc   :  { %v17588_v25 = vpop.f32.mrf.mxu3  ;;  %4297 = vmatpush.bf16.msrb.mxu2 %v11640_v61  ;;  %4333 = vmatpush.bf16.msra.mxu0 %v11484_v14  ;;  %v11404_v61 = vor.u32 %v14090_v15, %v11401_v11  ;;  %v11621_v15 = vld [vmem:[%s20398_s5 + $0x24c] sm:$0xf0]  ;;  %v14153_v11 = vld [vmem:[%s20398_s5 + $0x278] sm:$0xf0] }
 0x2de   :  { %v17596_v10 = vpop.f32.mrf.mxu0  ;;  %4281 = vmatpush.bf16.msrb.mxu1 %v11440_v50  ;;  %v14085_v50 = vld [vmem:[%s20398_s5 + $0x5c] sm:$0xf] }
 0x2df   :  { %4388 = vmatpush.bf16.msra.mxu3 %v11468_v12  ;;  %v11384_v49 = vor.u32 %v14085_v50, %v11381_v3  ;;  %v11627_v3 = vld [vmem:[%s20398_s5 + $0x240] sm:$0xf] }
 0x2e0   :  { %4298 = vmatpush.bf16.msrb.mxu2 %v11620_v20  ;;  %4334 = vmatpush.bf16.msra.mxu0 %v11464_v8  ;;  %v14088_v20 = vld [vmem:[%s20398_s5 + $0x70] sm:$0xf0] }
 0x2e1   :  { %v11388_v8 = vor.u32 %v14088_v20, %v11387_v62  ;;  %v14148_v62 = vld [vmem:[%s20398_s5 + $0x250] sm:$0xf0]  ;;  %v12141_v20 = vld [vmem:[%s20398_s5 + $0x870] sm:$0xf] }
 0x2e2   :  { %4282 = vmatpush.bf16.msrb.mxu1 %v11420_v26  ;;  %v14077_v26 = vld [vmem:[%s20398_s5 + $0x18] sm:$0xf0]  ;;  %v11628_v24 = vor.u32 %v14148_v62, %v11627_v3  ;;  %v11701_v3 = vld [vmem:[%s20398_s5 + $0x2ec] sm:$0xf0]  ;;  %v11547_v62 = vld [vmem:[%s20398_s5 + $0x1a0] sm:$0xf] }
 0x2e3   :  { %3622 = vmatmul.bf16.gmra.mxu1 %v17106_v33  ;;  %v11399_v33 = vld [vmem:[%s20398_s5 + $0x80] sm:$0xf]  ;;  %4389 = vmatpush.bf16.msra.mxu3 %v11448_v28  ;;  %v11340_v44 = vor.u32 %v14077_v26, %v11339_v54 }
 0x2e4   :  { %v17641_v38 = vpop.f32.mrf.mxu3  ;;  %4299 = vmatpush.bf16.msrb.mxu2 %v11600_v16  ;;  %v11400_v9 = vor.u32 %v14092_v63, %v11399_v33  ;;  %4335 = vmatpush.bf16.msra.mxu0 %v11444_v21  ;;  %v11361_v16 = vld [vmem:[%s20398_s5 + $0x44] sm:$0xf0]  ;;  %v11368_v33 = vor.u32 %v14083_v7, %v11367_v23  ;;  %v14150_v63 = vld [vmem:[%s20398_s5 + $0x264] sm:$0xf] }
 0x2e5   :  { %v11364_v34 = vor.u32 %v14080_v47, %v11361_v16  ;;  %v12121_v47 = vld [vmem:[%s20398_s5 + $0x848] sm:$0xf]  ;;  %v14341_v16 = vld [vmem:[%s20398_s5 + $0x858] sm:$0xf0] }
 0x2e6   :  { %v17649_v1 = vpop.f32.mrf.mxu0  ;;  %4283 = vmatpush.bf16.msrb.mxu1 %v11400_v9  ;;  %v11641_v9 = vld [vmem:[%s20398_s5 + $0x274] sm:$0xf0] }
 0x2e7   :  { %4390 = vmatpush.bf16.msra.mxu3 %v11428_v0  ;;  %v11644_v27 = vor.u32 %v14150_v63, %v11641_v9  ;;  %v11347_v0 = vld [vmem:[%s20398_s5 + $0x10] sm:$0xf]  ;;  %v11561_v63 = vld [vmem:[%s20398_s5 + $0x1d4] sm:$0xf0] }
 0x2e8   :  { %4300 = vmatpush.bf16.msrb.mxu2 %v11580_v39  ;;  %4336 = vmatpush.bf16.msra.mxu0 %v11424_v37  ;;  %v14117_v39 = vld [vmem:[%s20398_s5 + $0x158] sm:$0xf0]  ;;  %v11341_v37 = vld [vmem:[%s20398_s5 + $0x1c] sm:$0xf0] }
 0x2e9   :  { %11328 = vmatmul.msk.bf16.gmra.mxu2 %vm75_vm0, %v17138_v57  ;;  %4202 = vmatmul.bf16.gmra.mxu0 %v17651_v4  ;;  %v11559_v57 = vld [vmem:[%s20398_s5 + $0x1c0] sm:$0xf]  ;;  %v11500_v40 = vor.u32 %v14117_v39, %v11499_v51  ;;  %v14138_v51 = vld [vmem:[%s20398_s5 + $0x200] sm:$0xf0] }
 0x2ea   :  { %4256 = vmatmul.bf16.gmra.mxu3 %v17651_v4  ;;  %v11560_v35 = vor.u32 %v14132_v43, %v11559_v57  ;;  %4284 = vmatpush.bf16.msrb.mxu1 %v11380_v42  ;;  %v11344_v42 = vor.u32 %v14075_v22, %v11341_v37  ;;  %v14145_v43 = vld [vmem:[%s20398_s5 + $0x23c] sm:$0xf]  ;;  %v12101_v39 = vld [vmem:[%s20398_s5 + $0x820] sm:$0xf]  ;;  %v14336_v37 = vld [vmem:[%s20398_s5 + $0x830] sm:$0xf0] }
 0x2eb   :  { %4391 = vmatpush.bf16.msra.mxu3 %v11408_v46 }
 0x2ec   :  { %v17699_v13 = vpop.f32.mrf.mxu3  ;;  %4301 = vmatpush.bf16.msrb.mxu2 %v11560_v35  ;;  %4337 = vmatpush.bf16.msra.mxu0 %v11404_v61  ;;  %v11624_v35 = vor.u32 %v14145_v43, %v11621_v15  ;;  %v14351_v61 = vld [vmem:[%s20398_s5 + $0x8a8] sm:$0xf0]  ;;  %v11567_v43 = vld [vmem:[%s20398_s5 + $0x1c8] sm:$0xf] }
 0x2ed   :  { %v12162_v6 = vor.u32 %v14351_v61, %v12161_v19 }
 0x2ee   :  { %v3391_v14 = vpop.f32.mrf.mxu0  ;;  %4285 = vmatpush.bf16.msrb.mxu1 %v11360_v59  ;;  %v2540_v59 = vld [vmem:[#allocation4 + $0x40] sm:$0x3f] }
 0x2ef   :  { %4392 = vmatpush.bf16.msra.mxu3 %v11388_v8  ;;  %v17834_v26 = vpack.c.bf16 %v2540_v59, %v2540_v59  ;;  %v14120_v59 = vld [vmem:[%s20398_s5 + $0x174] sm:$0xf] }
 0x2f0   :  { %v3402_v52 = vpop.f32.mrf.mxu1  ;;  %4302 = vmatpush.bf16.msrb.mxu2 %v11540_v58  ;;  %4338 = vmatpush.bf16.msra.mxu0 %v11384_v49  ;;  %v11604_v58 = vor.u32 %v14140_v18, %v11601_v53  ;;  %v14346_v49 = vld [vmem:[%s20398_s5 + $0x880] sm:$0xf0]  ;;  %v11521_v18 = vld [vmem:[%s20398_s5 + $0x184] sm:$0xf0] }
 0x2f1   :  { %v3403_v12 = vadd.f32 %v3402_v52, %v17537_v45  ;;  %v14122_v45 = vld [vmem:[%s20398_s5 + $0x180] sm:$0xf0] }
 0x2f2   :  { %v11520_v21 = vor.u32 %v14122_v45, %v11519_v5  ;;  %4286 = vmatpush.bf16.msrb.mxu1 %v11340_v44  ;;  %v14135_v5 = vld [vmem:[%s20398_s5 + $0x1ec] sm:$0xf]  ;;  %v11607_v44 = vld [vmem:[%s20398_s5 + $0x218] sm:$0xf] }
 0x2f3   :  { %11729 = vmatmul.msk.bf16.vlgmr.msra.gmra.mxu1 %vm75_vm0, %v17729_v55  ;;  %4393 = vmatpush.bf16.msra.mxu3 %v11368_v33  ;;  %v14130_v33 = vld [vmem:[%s20398_s5 + $0x1c4] sm:$0xf] }
 0x2f4   :  { %v3445_v28 = vpop.f32.mrf.mxu3  ;;  %4303 = vmatpush.bf16.msrb.mxu2 %v11520_v21  ;;  %4339 = vmatpush.bf16.msra.mxu0 %v11364_v34  ;;  %v12122_v34 = vor.u32 %v14341_v16, %v12121_v47  ;;  %v11681_v16 = vld [vmem:[%s20398_s5 + $0x2c4] sm:$0xf0] }
 0x2f6   :  { %v3456_v17 = vpop.f32.mrf.mxu0  ;;  %4351 = vmatpush.bf16.msra.mxu1 %v11644_v27  ;;  %v11587_v27 = vld [vmem:[%s20398_s5 + $0x1f0] sm:$0xf] }
 0x2f7   :  { %v17773_v31 = vadd.f32 %v3456_v17, %v17588_v25  ;;  %v11348_v25 = vor.u32 %v14078_v29, %v11347_v0  ;;  %v11564_v17 = vor.u32 %v14130_v33, %v11561_v63  ;;  %v12102_v29 = vor.u32 %v14336_v37, %v12101_v39  ;;  %v14321_v63 = vld [vmem:[%s20398_s5 + $0x7b8] sm:$0xf0]  ;;  %v14155_v39 = vld [vmem:[%s20398_s5 + $0x28c] sm:$0xf]  ;;  %v11507_v37 = vld [vmem:[%s20398_s5 + $0x150] sm:$0xf] }
 0x2f8   :  { %v3404_v36 = vpop.f32.mrf.mxu1  ;;  %4304 = vmatpush.bf16.msrb.mxu2 %v11500_v40  ;;  %4340 = vmatpush.bf16.msra.mxu0 %v11344_v42  ;;  %v11588_v40 = vor.u32 %v14138_v51, %v11587_v27  ;;  %v11541_v42 = vld [vmem:[%s20398_s5 + $0x1ac] sm:$0xf0] }
 0x2f9   :  { %v3405_v57 = vadd.f32 %v3404_v36, %v17596_v10  ;;  %4233 = vmatmul.bf16.vlgmr.msra.gmra.mxu2 %v17417_v2  ;;  %11731 = vmatmul.msk.bf16.vlgmr.msrb.gmra.mxu0 %vm75_vm0, %v17729_v55  ;;  %v11647_v10 = vld [vmem:[%s20398_s5 + $0x268] sm:$0xf]  ;;  %v14125_v36 = vld [vmem:[%s20398_s5 + $0x19c] sm:$0xf] }
 0x2fa   :  { %11733 = vmatmul.msk.bf16.vlgmr.msrb.gmra.mxu3 %vm75_vm0, %v17729_v55  ;;  %v11648_v56 = vor.u32 %v14153_v11, %v11647_v10  ;;  %4352 = vmatpush.bf16.msra.mxu1 %v11624_v35  ;;  %v14133_v35 = vld [vmem:[%s20398_s5 + $0x1d8] sm:$0xf0]  ;;  %v12081_v10 = vld [vmem:[%s20398_s5 + $0x7f8] sm:$0xf]  ;;  %v14331_v11 = vld [vmem:[%s20398_s5 + $0x808] sm:$0xf0] }
 0x2fb   :  { %4394 = vmatpush.bf16.msra.mxu3 %v11348_v25  ;;  %v14170_v25 = vld [vmem:[%s20398_s5 + $0x304] sm:$0xf]  ;;  %v12082_v61 = vor.u32 %v14331_v11, %v12081_v10 }
 0x2fc   :  { %v3420_v46 = vpop.f32.mrf.mxu2  ;;  %4405 = vmatpush.bf16.msrb.mxu0 %v11648_v56  ;;  %v11568_v56 = vor.u32 %v14133_v35, %v11567_v43  ;;  %v14311_v35 = vld [vmem:[%s20398_s5 + $0x768] sm:$0xf0] }
 0x2fd   :  { %v17808_v48 = vadd.f32 %v3420_v46, %v3403_v12  ;;  %v17810_v14 = vpop.f32.mrf.mxu3  ;;  %v12142_v12 = vor.u32 %v14346_v49, %v12141_v20  ;;  %v12061_v49 = vld [vmem:[%s20398_s5 + $0x7d0] sm:$0xf] }
 0x2fe   :  { %v3458_v50 = vpop.f32.mrf.mxu0  ;;  %4353 = vmatpush.bf16.msra.mxu1 %v11604_v58  ;;  %v14165_v58 = vld [vmem:[%s20398_s5 + $0x2dc] sm:$0xf] }
 0x2ff   :  { %5137 = vmatpush.bf16.msrb.mxu3 %v12162_v6  ;;  %v17828_v52 = vadd.f32 %v3458_v50, %v17641_v38  ;;  %v11581_v38 = vld [vmem:[%s20398_s5 + $0x1fc] sm:$0xf0]  ;;  %v11524_v50 = vor.u32 %v14120_v59, %v11521_v18  ;;  %v11704_v20 = vor.u32 %v14165_v58, %v11701_v3 }
 0x300   :  { %v3407_v8 = vpop.f32.mrf.mxu1  ;;  %4406 = vmatpush.bf16.msrb.mxu0 %v11628_v24  ;;  %v11584_v45 = vor.u32 %v14135_v5, %v11581_v38  ;;  %v14128_v24 = vld [vmem:[%s20398_s5 + $0x1b0] sm:$0xf0]  ;;  %v14115_v38 = vld [vmem:[%s20398_s5 + $0x14c] sm:$0xf] }
 0x301   :  { %v3408_v54 = vadd.f32 %v3407_v8, %v17649_v1  ;;  %v14143_v1 = vld [vmem:[%s20398_s5 + $0x228] sm:$0xf0]  ;;  %v14326_v8 = vld [vmem:[%s20398_s5 + $0x7e0] sm:$0xf0] }
 0x302   :  { %v11608_v21 = vor.u32 %v14143_v1, %v11607_v44  ;;  %4354 = vmatpush.bf16.msra.mxu1 %v11584_v45  ;;  %v12062_v5 = vor.u32 %v14326_v8, %v12061_v49  ;;  %v11501_v44 = vld [vmem:[%s20398_s5 + $0x15c] sm:$0xf0]  ;;  %v14160_v45 = vld [vmem:[%s20398_s5 + $0x2b4] sm:$0xf]  ;;  %v11727_v8 = vld [vmem:[%s20398_s5 + $0x308] sm:$0xf] }
 0x303   :  { %5138 = vmatpush.bf16.msrb.mxu3 %v12142_v12  ;;  %11730 = vmatmul.msk.bf16.gmra.mxu1 %vm75_vm0, %v17834_v26  ;;  %v11504_v47 = vor.u32 %v14115_v38, %v11501_v44 }
 0x304   :  { %v3422_v23 = vpop.f32.mrf.mxu2  ;;  %4407 = vmatpush.bf16.msrb.mxu0 %v11608_v21  ;;  %v11527_v21 = vld [vmem:[%s20398_s5 + $0x178] sm:$0xf] }
 0x305   :  { %v17856_v7 = vadd.f32 %v3422_v23, %v3405_v57  ;;  %v17858_v28 = vpop.f32.mrf.mxu3  ;;  %v11721_v57 = vld [vmem:[%s20398_s5 + $0x314] sm:$0xf0]  ;;  %v11684_v23 = vor.u32 %v14160_v45, %v11681_v16  ;;  %v11707_v45 = vld [vmem:[%s20398_s5 + $0x2e0] sm:$0xf] }
 0x306   :  { %v3461_v9 = vpop.f32.mrf.mxu0  ;;  %4355 = vmatpush.bf16.msra.mxu1 %v11564_v17  ;;  %v11724_v15 = vor.u32 %v14170_v25, %v11721_v57 }
 0x307   :  { %5139 = vmatpush.bf16.msrb.mxu3 %v12122_v34  ;;  %v17876_v22 = vadd.f32 %v3461_v9, %v17699_v13  ;;  %v11544_v13 = vor.u32 %v14125_v36, %v11541_v42  ;;  %v14123_v34 = vld [vmem:[%s20398_s5 + $0x188] sm:$0xf0]  ;;  %v12021_v36 = vld [vmem:[%s20398_s5 + $0x780] sm:$0xf]  ;;  %v14316_v42 = vld [vmem:[%s20398_s5 + $0x790] sm:$0xf0] }
 0x308   :  { %v3409_v0 = vpop.f32.mrf.mxu1  ;;  %4408 = vmatpush.bf16.msrb.mxu0 %v11588_v40  ;;  %4373 = vmatpush.bf16.msra.mxu2 %v11724_v15  ;;  %v11528_v33 = vor.u32 %v14123_v34, %v11527_v21  ;;  %v11661_v40 = vld [vmem:[%s20398_s5 + $0x29c] sm:$0xf0]  ;;  %v12022_v57 = vor.u32 %v14316_v42, %v12021_v36  ;;  %v12001_v15 = vld [vmem:[%s20398_s5 + $0x758] sm:$0xf]  ;;  %v14291_v34 = vld [vmem:[%s20398_s5 + $0x6c8] sm:$0xf0] }
 0x309   :  { %4238 = vmatmul.bf16.gmra.mxu2 %v17459_v32  ;;  %11732 = vmatmul.msk.bf16.gmra.mxu0 %vm75_vm0, %v17834_v26  ;;  %v11664_v0 = vor.u32 %v14155_v39, %v11661_v40  ;;  %v12002_v10 = vor.u32 %v14311_v35, %v12001_v15  ;;  %v11921_v21 = vld [vmem:[%s20398_s5 + $0x6b8] sm:$0xf]  ;;  %v4445_v40 = vld [vmem:[#allocation4 + $0x38] sm:$0xff]  ;;  %v11901_v36 = vld [vmem:[%s20398_s5 + $0x690] sm:$0xf] }
 0x30a   :  { %11734 = vmatmul.msk.bf16.gmra.mxu3 %vm75_vm0, %v17834_v26  ;;  %4356 = vmatpush.bf16.msra.mxu1 %v11544_v13  ;;  %v14286_v42 = vld [vmem:[%s20398_s5 + $0x6a0] sm:$0xf0]  ;;  %v4442_v35 = vld [vmem:[#allocation4 + $0x8] sm:$0xfc] }
 0x30b   :  { %5140 = vmatpush.bf16.msrb.mxu3 %v12102_v29  ;;  %v14118_v29 = vld [vmem:[%s20398_s5 + $0x160] sm:$0xf0] }
 0x30c   :  { %v3425_v19 = vpop.f32.mrf.mxu2  ;;  %4409 = vmatpush.bf16.msrb.mxu0 %v11568_v56  ;;  %4374 = vmatpush.bf16.msra.mxu2 %v11704_v20  ;;  %v11508_v25 = vor.u32 %v14118_v29, %v11507_v37  ;;  %v14163_v29 = vld [vmem:[%s20398_s5 + $0x2c8] sm:$0xf0] }
 0x30d   :  { %v17910_v46 = vadd.f32 %v3425_v19, %v3408_v54  ;;  %v17912_v6 = vpop.f32.mrf.mxu3  ;;  %v11548_v54 = vor.u32 %v14128_v24, %v11547_v62 }
 0x30e   :  { %v3463_v53 = vpop.f32.mrf.mxu0  ;;  %4357 = vmatpush.bf16.msra.mxu1 %v11524_v50  ;;  %v14301_v50 = vld [vmem:[%s20398_s5 + $0x718] sm:$0xf0] }
 0x30f   :  { %5141 = vmatpush.bf16.msrb.mxu3 %v12082_v61  ;;  %v14306_v61 = vld [vmem:[%s20398_s5 + $0x740] sm:$0xf0] }
 0x310   :  { %v3474_v12 = vpop.f32.mrf.mxu1  ;;  %4410 = vmatpush.bf16.msrb.mxu0 %v11548_v54  ;;  %4375 = vmatpush.bf16.msra.mxu2 %v11684_v23  ;;  %v12241_v23 = vld [vmem:[%s20398_s5 + $0x938] sm:$0xf] }
 0x311   :  { %v17948_v1 = vadd.f32 %v3474_v12, %v17773_v31  ;;  %v12041_v31 = vld [vmem:[%s20398_s5 + $0x7a8] sm:$0xf]  ;;  %v11941_v12 = vld [vmem:[%s20398_s5 + $0x6e0] sm:$0xf] }
 0x312   :  { %v12042_v9 = vor.u32 %v14321_v63, %v12041_v31  ;;  %4358 = vmatpush.bf16.msra.mxu1 %v11504_v47  ;;  %v14168_v47 = vld [vmem:[%s20398_s5 + $0x2f0] sm:$0xf0]  ;;  %v14369_v31 = vld [vmem:[%s20398_s5 + $0x93c] sm:$0xf]  ;;  %v12243_v63 = vld [vmem:[%s20398_s5 + $0x94c] sm:$0xf0] }
 0x313   :  { %4287 = vmatmul.bf16.vlgmr.msrb.gmra.mxu1 %v17417_v2  ;;  %5142 = vmatpush.bf16.msrb.mxu3 %v12062_v5  ;;  %v11708_v16 = vor.u32 %v14168_v47, %v11707_v45 }
 0x314   :  { %v3427_v17 = vpop.f32.mrf.mxu2  ;;  %4411 = vmatpush.bf16.msrb.mxu0 %v11528_v33  ;;  %4376 = vmatpush.bf16.msra.mxu2 %v11664_v0  ;;  %v11922_v33 = vor.u32 %v14291_v34, %v11921_v21  ;;  %v11687_v0 = vld [vmem:[%s20398_s5 + $0x2b8] sm:$0xf]  ;;  %v12003_v21 = vld [vmem:[%s20398_s5 + $0x76c] sm:$0xf0] }
 0x315   :  { %v3517_v27 = vpop.f32.mrf.mxu3 }
 0x316   :  { %v3528_v51 = vpop.f32.mrf.mxu0  ;;  %v12246_v27 = vor.u32 %v14369_v31, %v12243_v63  ;;  %v14276_v31 = vld [vmem:[%s20398_s5 + $0x650] sm:$0xf0]  ;;  %v12181_v63 = vld [vmem:[%s20398_s5 + $0x8c0] sm:$0xf] }
 0x317   :  { %5143 = vmatpush.bf16.msrb.mxu3 %v12042_v9 }
 0x318   :  { %v3476_v13 = vpop.f32.mrf.mxu1  ;;  %4412 = vmatpush.bf16.msrb.mxu0 %v11508_v25  ;;  %v14366_v25 = vld [vmem:[%s20398_s5 + $0x920] sm:$0xf0] }
 0x319   :  { %v17985_v43 = vadd.f32 %v3476_v13, %v17828_v52  ;;  %4305 = vmatmul.bf16.vlgmr.msrb.gmra.mxu2 %v17540_v30  ;;  %4341 = vmatmul.bf16.vlgmr.msra.gmra.mxu0 %v17417_v2  ;;  %v12221_v13 = vld [vmem:[%s20398_s5 + $0x910] sm:$0xf] }
 0x31a   :  { %4395 = vmatmul.bf16.vlgmr.msra.gmra.mxu3 %v17417_v2  ;;  %5119 = vmatpush.bf16.msrb.mxu2 %v12002_v10  ;;  %v11981_v2 = vld [vmem:[%s20398_s5 + $0x730] sm:$0xf]  ;;  %v11902_v10 = vor.u32 %v14286_v42, %v11901_v36  ;;  %v14304_v36 = vld [vmem:[%s20398_s5 + $0x734] sm:$0xf] }
 0x31b   :  { %5144 = vmatpush.bf16.msrb.mxu3 %v12022_v57  ;;  %v11982_v59 = vor.u32 %v14306_v61, %v11981_v2  ;;  %v4451_v2 = vpack.c.bf16 %v4445_v40, %v4445_v40  ;;  %v12183_v40 = vld [vmem:[%s20398_s5 + $0x8d4] sm:$0xf0] }
 0x31c   :  { %v3492_v52 = vpop.f32.mrf.mxu2 }
 0x31d   :  { %v3511_v11 = vadd.f32 %v17810_v14, %v3492_v52  ;;  %v17997_v19 = vpop.f32.mrf.mxu3  ;;  %v11961_v14 = vld [vmem:[%s20398_s5 + $0x708] sm:$0xf]  ;;  %v12222_v52 = vor.u32 %v14366_v25, %v12221_v13  ;;  %v18117_v47 = vrot.slane %v4451_v2, 1  ;;  %v12163_v13 = vld [vmem:[%s20398_s5 + $0x8ac] sm:$0xf0] }
 0x31e   :  { %v3530_v56 = vpop.f32.mrf.mxu0  ;;  %5120 = vmatpush.bf16.msrb.mxu2 %v11982_v59  ;;  %v11962_v3 = vor.u32 %v14301_v50, %v11961_v14  ;;  %v11667_v59 = vld [vmem:[%s20398_s5 + $0x290] sm:$0xf]  ;;  %v11881_v14 = vld [vmem:[%s20398_s5 + $0x668] sm:$0xf]  ;;  %v12009_v25 = vld [vmem:[%s20398_s5 + $0x760] sm:$0xf] }
 0x31f   :  { %v18005_v18 = vadd.f32 %v3528_v51, %v3511_v11  ;;  %5213 = vmatpush.bf16.msra.mxu3 %v12246_v27  ;;  %v14364_v11 = vld [vmem:[%s20398_s5 + $0x914] sm:$0xf] }
 0x320   :  { %v3479_v53 = vpop.f32.mrf.mxu1  ;;  %v14782_v50 = vld [vmem:[#allocation4 + $0x20] sm:$0xff] }
 0x321   :  { %v18014_v58 = vadd.f32 %v3479_v53, %v17876_v22  ;;  %v14173_v22 = vld [vmem:[%s20398_s5 + $0x318] sm:$0xf0]  ;;  %v14158_v53 = vld [vmem:[%s20398_s5 + $0x2a0] sm:$0xf0]  ;;  %v14356_v27 = vld [vmem:[%s20398_s5 + $0x8d0] sm:$0xf0] }
 0x322   :  { %5121 = vmatpush.bf16.msrb.mxu2 %v11962_v3  ;;  %v11728_v54 = vor.u32 %v14173_v22, %v11727_v8  ;;  %v4448_v3 = vpack.c.bf16 %v14782_v50, %v4442_v35  ;;  %v14361_v8 = vld [vmem:[%s20398_s5 + $0x8f8] sm:$0xf0]  ;;  %v11963_v50 = vld [vmem:[%s20398_s5 + $0x71c] sm:$0xf0] }
 0x323   :  { %4292 = vmatmul.bf16.gmra.mxu1 %v17459_v32 }
 0x324   :  { %v3494_v62 = vpop.f32.mrf.mxu2  ;;  %4427 = vmatpush.bf16.msrb.mxu1 %v11728_v54  ;;  %v14359_v54 = vld [vmem:[%s20398_s5 + $0x8ec] sm:$0xf] }
 0x325   :  { %v3513_v20 = vadd.f32 %v17858_v28, %v3494_v62  ;;  %v18018_v24 = vpop.f32.mrf.mxu3  ;;  %v14296_v28 = vld [vmem:[%s20398_s5 + $0x6f0] sm:$0xf0]  ;;  %v11668_v62 = vor.u32 %v14158_v53, %v11667_v59 }
 0x326   :  { %v3533_v49 = vpop.f32.mrf.mxu0  ;;  %v11942_v44 = vor.u32 %v14296_v28, %v11941_v12  ;;  %v12203_v28 = vld [vmem:[%s20398_s5 + $0x8fc] sm:$0xf0] }
 0x327   :  { %v18032_v5 = vadd.f32 %v3530_v56, %v3513_v20  ;;  %v12223_v56 = vld [vmem:[%s20398_s5 + $0x924] sm:$0xf0]  ;;  %v14281_v20 = vld [vmem:[%s20398_s5 + $0x678] sm:$0xf0] }
 0x328   :  { %v3481_v38 = vpop.f32.mrf.mxu1  ;;  %5122 = vmatpush.bf16.msrb.mxu2 %v11942_v44  ;;  %4428 = vmatpush.bf16.msrb.mxu1 %v11708_v16  ;;  %v12226_v61 = vor.u32 %v14364_v11, %v12223_v56  ;;  %v11882_v22 = vor.u32 %v14281_v20, %v11881_v14  ;;  %v12206_v44 = vor.u32 %v14359_v54, %v12203_v28  ;;  %v14309_v16 = vld [vmem:[%s20398_s5 + $0x75c] sm:$0xf]  ;;  %v12011_v11 = vld [vmem:[%s20398_s5 + $0x774] sm:$0xf0]  ;;  %v14299_v14 = vld [vmem:[%s20398_s5 + $0x70c] sm:$0xf] }
 0x329   :  { %4310 = vmatmul.bf16.gmra.mxu2 %v17651_v4  ;;  %4346 = vmatmul.bf16.gmra.mxu0 %v17459_v32  ;;  %v11966_v20 = vor.u32 %v14299_v14, %v11963_v50  ;;  %v14307_v54 = vld [vmem:[%s20398_s5 + $0x748] sm:$0xf0]  ;;  %v14305_v28 = vld [vmem:[%s20398_s5 + $0x73c] sm:$0xf]  ;;  %v11903_v14 = vld [vmem:[%s20398_s5 + $0x6a4] sm:$0xf0] }
 0x32a   :  { %4400 = vmatmul.bf16.gmra.mxu3 %v17459_v32  ;;  %v14371_v32 = vld [vmem:[%s20398_s5 + $0x948] sm:$0xf0] }
 0x32b   :  { %v12242_v17 = vor.u32 %v14371_v32, %v12241_v23  ;;  %5214 = vmatpush.bf16.msra.mxu3 %v12226_v61  ;;  %v4583_v23 = vrot.slane %v4448_v3, 1  ;;  %v11861_v32 = vld [vmem:[%s20398_s5 + $0x640] sm:$0xf] }
 0x32c   :  { %v3497_v9 = vpop.f32.mrf.mxu2  ;;  %5123 = vmatpush.bf16.msrb.mxu2 %v11922_v33  ;;  %v12006_v33 = vor.u32 %v14309_v16, %v12003_v21  ;;  %v11943_v16 = vld [vmem:[%s20398_s5 + $0x6f4] sm:$0xf0]  ;;  %v14339_v21 = vld [vmem:[%s20398_s5 + $0x84c] sm:$0xf] }
 0x32d   :  { %v3516_v51 = vadd.f32 %v17912_v6, %v3497_v9  ;;  %v18062_v39 = vpop.f32.mrf.mxu3  ;;  %5159 = vmatpush.bf16.msra.mxu0 %v12242_v17  ;;  %v11688_v6 = vor.u32 %v14163_v29, %v11687_v0  ;;  %v11862_v17 = vor.u32 %v14276_v31, %v11861_v32  ;;  %v12182_v0 = vor.u32 %v14356_v27, %v12181_v63  ;;  %v11969_v32 = vld [vmem:[%s20398_s5 + $0x710] sm:$0xf]  ;;  %v14302_v31 = vld [vmem:[%s20398_s5 + $0x720] sm:$0xf0]  ;;  %v14300_v27 = vld [vmem:[%s20398_s5 + $0x714] sm:$0xf] }
 0x32e   :  { %v3535_v37 = vpop.f32.mrf.mxu0 }
 0x32f   :  { %v18082_v57 = vadd.f32 %v3533_v49, %v3516_v51  ;;  %4429 = vmatpush.bf16.msrb.mxu1 %v11688_v6  ;;  %v12201_v49 = vld [vmem:[%s20398_s5 + $0x8e8] sm:$0xf]  ;;  %5215 = vmatpush.bf16.msra.mxu3 %v12206_v44  ;;  %v14354_v51 = vld [vmem:[%s20398_s5 + $0x8c4] sm:$0xf]  ;;  %v18152_v37 = vsel %vm1772_vm11, %v4583_v23, %v18117_v47 }
 0x330   :  { %v18084_v15 = vpop.f32.mrf.mxu1  ;;  %5124 = vmatpush.bf16.msrb.mxu2 %v11902_v10  ;;  %v12202_v12 = vor.u32 %v14361_v8, %v12201_v49  ;;  %v12186_v29 = vor.u32 %v14354_v51, %v12183_v40  ;;  %v11983_v6 = vld [vmem:[%s20398_s5 + $0x744] sm:$0xf0]  ;;  %v14312_v10 = vld [vmem:[%s20398_s5 + $0x770] sm:$0xf0]  ;;  %v11989_v8 = vld [vmem:[%s20398_s5 + $0x738] sm:$0xf] }
 0x331   :  { %5160 = vmatpush.bf16.msra.mxu0 %v12222_v52  ;;  %v11986_v42 = vor.u32 %v14304_v36, %v11983_v6  ;;  %v14310_v52 = vld [vmem:[%s20398_s5 + $0x764] sm:$0xf]  ;;  %v12010_v2 = vor.u32 %v14312_v10, %v12009_v25  ;;  %v12143_v49 = vld [vmem:[%s20398_s5 + $0x884] sm:$0xf0]  ;;  %v11990_v44 = vor.u32 %v14307_v54, %v11989_v8  ;;  %v14289_v6 = vld [vmem:[%s20398_s5 + $0x6bc] sm:$0xf] }
 0x332   :  { %v12014_v61 = vor.u32 %v14310_v52, %v12011_v11  ;;  %v11971_v51 = vld [vmem:[%s20398_s5 + $0x724] sm:$0xf0]  ;;  %v14292_v8 = vld [vmem:[%s20398_s5 + $0x6d0] sm:$0xf0]  ;;  %v11931_v54 = vld [vmem:[%s20398_s5 + $0x6d4] sm:$0xf0] }
 0x333   :  { %4359 = vmatmul.bf16.vlgmr.msra.gmra.mxu1 %v17540_v30  ;;  %5216 = vmatpush.bf16.msra.mxu3 %v12186_v29  ;;  %v11949_v10 = vld [vmem:[%s20398_s5 + $0x6e8] sm:$0xf] }
 0x334   :  { %v3499_v38 = vpop.f32.mrf.mxu2  ;;  %4430 = vmatpush.bf16.msrb.mxu1 %v11668_v62  ;;  %5125 = vmatpush.bf16.msrb.mxu2 %v11882_v22 }
 0x335   :  { %v3589_v45 = vpop.f32.mrf.mxu3  ;;  %5161 = vmatpush.bf16.msra.mxu0 %v12202_v12  ;;  %v11991_v38 = vld [vmem:[%s20398_s5 + $0x74c] sm:$0xf0] }
 0x336   :  { %v18125_v34 = vpop.f32.mrf.mxu0  ;;  %v11994_v45 = vor.u32 %v14305_v28, %v11991_v38  ;;  %v4444_v38 = vld [vmem:[#allocation4 + $0x30] sm:$0xff] }
 0x338   :  { %v18136_v9 = vpop.f32.mrf.mxu1  ;;  %5173 = vmatpush.bf16.msra.mxu1 %v12006_v33  ;;  %5126 = vmatpush.bf16.msrb.mxu2 %v11862_v17  ;;  %v12123_v33 = vld [vmem:[%s20398_s5 + $0x85c] sm:$0xf0]  ;;  %v11970_v17 = vor.u32 %v14302_v31, %v11969_v32 }
 0x339   :  { %11735 = vmatmul.msk.bf16.vlgmr.msra.gmra.mxu2 %vm75_vm0, %v17729_v55  ;;  %4413 = vmatmul.bf16.vlgmr.msrb.gmra.mxu0 %v17540_v30  ;;  %v14349_v30 = vld [vmem:[%s20398_s5 + $0x89c] sm:$0xf]  ;;  %v12126_v63 = vor.u32 %v14339_v21, %v12123_v33  ;;  %v4446_v21 = vld [vmem:[#allocation4 + $0x40] sm:$0xff]  ;;  %v11883_v33 = vld [vmem:[%s20398_s5 + $0x67c] sm:$0xf0] }
 0x33a   :  { %5145 = vmatmul.bf16.vlgmr.msrb.gmra.mxu3 %v18152_v37  ;;  %5162 = vmatpush.bf16.msra.mxu0 %v12182_v0  ;;  %v12166_v35 = vor.u32 %v14349_v30, %v12163_v13  ;;  %v11974_v0 = vor.u32 %v14300_v27, %v11971_v51  ;;  %v11909_v27 = vld [vmem:[%s20398_s5 + $0x698] sm:$0xf]  ;;  %v4450_v51 = vpack.c.bf16 %v4444_v38, %v4444_v38  ;;  %v12169_v38 = vld [vmem:[%s20398_s5 + $0x8a0] sm:$0xf] }
 0x33b   :  { %5281 = vmatpush.bf16.msrb.mxu3 %v12014_v61  ;;  %v11951_v61 = vld [vmem:[%s20398_s5 + $0x6fc] sm:$0xf0] }
 0x33c   :  { %v3564_v56 = vpop.f32.mrf.mxu2  ;;  %5174 = vmatpush.bf16.msra.mxu1 %v11986_v42  ;;  %5191 = vmatpush.bf16.msra.mxu2 %v12166_v35  ;;  %v11923_v42 = vld [vmem:[%s20398_s5 + $0x6cc] sm:$0xf0]  ;;  %v12103_v35 = vld [vmem:[%s20398_s5 + $0x834] sm:$0xf0] }
 0x33d   :  { %v3565_v59 = vadd.f32 %v3564_v56, %v18084_v15  ;;  %v4180_v53 = vpop.f32.mrf.mxu3  ;;  %v14344_v15 = vld [vmem:[%s20398_s5 + $0x874] sm:$0xf]  ;;  %v11926_v25 = vor.u32 %v14289_v6, %v11923_v42  ;;  %v14297_v56 = vld [vmem:[%s20398_s5 + $0x6f8] sm:$0xf0] }
 0x33e   :  { %v18187_v3 = vadd.f32 %v4180_v53, %v17808_v48  ;;  %v18189_v62 = vpop.f32.mrf.mxu0  ;;  %5227 = vmatpush.bf16.msrb.mxu0 %v12010_v2  ;;  %v12146_v12 = vor.u32 %v14344_v15, %v12143_v49  ;;  %v14295_v2 = vld [vmem:[%s20398_s5 + $0x6ec] sm:$0xf]  ;;  %v14284_v53 = vld [vmem:[%s20398_s5 + $0x694] sm:$0xf]  ;;  %v11929_v15 = vld [vmem:[%s20398_s5 + $0x6c0] sm:$0xf] }
 0x33f   :  { %v18201_v48 = vadd.f32 %v17997_v19, %v3565_v59  ;;  %v14294_v19 = vld [vmem:[%s20398_s5 + $0x6e4] sm:$0xf]  ;;  %5282 = vmatpush.bf16.msrb.mxu3 %v11994_v45  ;;  %v11954_v59 = vor.u32 %v14295_v2, %v11951_v61  ;;  %v11906_v50 = vor.u32 %v14284_v53, %v11903_v14  ;;  %v4441_v42 = vld [vmem:[#allocation4] sm:$0xfc]  ;;  %v11863_v61 = vld [vmem:[%s20398_s5 + $0x654] sm:$0xf0] }
 0x340   :  { %v18203_v22 = vpop.f32.mrf.mxu1  ;;  %5175 = vmatpush.bf16.msra.mxu1 %v11966_v20  ;;  %5192 = vmatpush.bf16.msra.mxu2 %v12146_v12  ;;  %v11946_v23 = vor.u32 %v14294_v19, %v11943_v16  ;;  %v14329_v20 = vld [vmem:[%s20398_s5 + $0x7fc] sm:$0xf]  ;;  %v14290_v12 = vld [vmem:[%s20398_s5 + $0x6c4] sm:$0xf]  ;;  %v18355_v14 = vrot.slane %v4450_v51, 1 }
 0x341   :  { %v11934_v45 = vor.u32 %v14290_v12, %v11931_v54  ;;  %v14282_v53 = vld [vmem:[%s20398_s5 + $0x680] sm:$0xf0] }
 0x342   :  { %5228 = vmatpush.bf16.msrb.mxu0 %v11990_v44  ;;  %v11930_v44 = vor.u32 %v14292_v8, %v11929_v15  ;;  %v11891_v15 = vld [vmem:[%s20398_s5 + $0x684] sm:$0xf0] }
 0x343   :  { %4364 = vmatmul.bf16.gmra.mxu1 %v17651_v4  ;;  %5283 = vmatpush.bf16.msrb.mxu3 %v11974_v0  ;;  %v14285_v0 = vld [vmem:[%s20398_s5 + $0x69c] sm:$0xf] }
 0x344   :  { %v3566_v40 = vpop.f32.mrf.mxu2  ;;  %5176 = vmatpush.bf16.msra.mxu1 %v11946_v23  ;;  %5193 = vmatpush.bf16.msra.mxu2 %v12126_v63  ;;  %v14279_v23 = vld [vmem:[%s20398_s5 + $0x66c] sm:$0xf] }
 0x345   :  { %v3567_v29 = vadd.f32 %v3566_v40, %v18136_v9  ;;  %v4182_v36 = vpop.f32.mrf.mxu3  ;;  %v14334_v9 = vld [vmem:[%s20398_s5 + $0x824] sm:$0xf]  ;;  %v11886_v63 = vor.u32 %v14279_v23, %v11883_v33  ;;  %v11869_v23 = vld [vmem:[%s20398_s5 + $0x648] sm:$0xf] }
 0x346   :  { %v18247_v30 = vadd.f32 %v4182_v36, %v17856_v7  ;;  %v18249_v13 = vpop.f32.mrf.mxu0  ;;  %5229 = vmatpush.bf16.msrb.mxu0 %v11970_v17  ;;  %v12106_v11 = vor.u32 %v14334_v9, %v12103_v35  ;;  %v12063_v17 = vld [vmem:[%s20398_s5 + $0x7e4] sm:$0xf0]  ;;  %v4452_v9 = vpack.c.bf16 %v4446_v21, %v4446_v21  ;;  %v12023_v21 = vld [vmem:[%s20398_s5 + $0x794] sm:$0xf0] }
 0x347   :  { %v18261_v7 = vadd.f32 %v18018_v24, %v3567_v29  ;;  %v11950_v24 = vor.u32 %v14297_v56, %v11949_v10  ;;  %5284 = vmatpush.bf16.msrb.mxu3 %v11954_v59  ;;  %v11911_v29 = vld [vmem:[%s20398_s5 + $0x6ac] sm:$0xf0] }
 0x348   :  { %v3553_v52 = vpop.f32.mrf.mxu1  ;;  %5177 = vmatpush.bf16.msra.mxu1 %v11926_v25  ;;  %5194 = vmatpush.bf16.msra.mxu2 %v12106_v11  ;;  %v4443_v25 = vld [vmem:[#allocation4 + $0x10] sm:$0xfc]  ;;  %v11914_v10 = vor.u32 %v14285_v0, %v11911_v29  ;;  %v14783_v11 = vld [vmem:[#allocation4 + $0x18] sm:$0xff]  ;;  %v18363_v8 = vrot.slane %v4452_v9, 1  ;;  %v12149_v29 = vld [vmem:[%s20398_s5 + $0x878] sm:$0xf] }
 0x349   :  { %11736 = vmatmul.msk.bf16.gmra.mxu2 %vm75_vm0, %v17834_v26  ;;  %4418 = vmatmul.bf16.gmra.mxu0 %v17651_v4  ;;  %v12083_v4 = vld [vmem:[%s20398_s5 + $0x80c] sm:$0xf0]  ;;  %v4447_v56 = vpack.c.bf16 %v14783_v11, %v4441_v42  ;;  %v4449_v2 = vpack.c.bf16 %v17726_v60, %v4443_v25  ;;  %v12171_v25 = vld [vmem:[%s20398_s5 + $0x8b4] sm:$0xf0]  ;;  %v12177_v9 = vld [vmem:[%s20398_s5 + $0x8a8] sm:$0xf] }
 0x34a   :  { %5150 = vmatmul.bf16.gmra.mxu3 %v18117_v47  ;;  %5230 = vmatpush.bf16.msrb.mxu0 %v11950_v24  ;;  %v12086_v49 = vor.u32 %v14329_v20, %v12083_v4  ;;  %v14319_v24 = vld [vmem:[%s20398_s5 + $0x7ac] sm:$0xf]  ;;  %v11889_v60 = vld [vmem:[%s20398_s5 + $0x670] sm:$0xf]  ;;  %v14280_v4 = vld [vmem:[%s20398_s5 + $0x674] sm:$0xf] }
 0x34b   :  { %5285 = vmatpush.bf16.msrb.mxu3 %v11934_v45  ;;  %v11890_v20 = vor.u32 %v14282_v53, %v11889_v60  ;;  %v11894_v12 = vor.u32 %v14280_v4, %v11891_v15  ;;  %v4580_v54 = vrot.slane %v4447_v56, 1  ;;  %v12129_v60 = vld [vmem:[%s20398_s5 + $0x850] sm:$0xf]  ;;  %v14345_v53 = vld [vmem:[%s20398_s5 + $0x87c] sm:$0xf] }
 0x34c   :  { %v3569_v28 = vpop.f32.mrf.mxu2  ;;  %5178 = vmatpush.bf16.msra.mxu1 %v11906_v50  ;;  %5195 = vmatpush.bf16.msra.mxu2 %v12086_v49 }
 0x34d   :  { %v3570_v19 = vadd.f32 %v3569_v28, %v18203_v22  ;;  %v4185_v16 = vpop.f32.mrf.mxu3  ;;  %v14324_v22 = vld [vmem:[%s20398_s5 + $0x7d4] sm:$0xf]  ;;  %v4586_v28 = vrot.slane %v4449_v2, 1 }
 0x34e   :  { %v18308_v32 = vadd.f32 %v4185_v16, %v17910_v46  ;;  %v3607_v31 = vpop.f32.mrf.mxu0  ;;  %5231 = vmatpush.bf16.msrb.mxu0 %v11930_v44  ;;  %v12066_v40 = vor.u32 %v14324_v22, %v12063_v17  ;;  %v14287_v46 = vld [vmem:[%s20398_s5 + $0x6a8] sm:$0xf0]  ;;  %v14352_v44 = vld [vmem:[%s20398_s5 + $0x8b0] sm:$0xf0]  ;;  %v14314_v16 = vld [vmem:[%s20398_s5 + $0x784] sm:$0xf] }
 0x34f   :  { %v18329_v36 = vadd.f32 %v18062_v39, %v3570_v19  ;;  %v11910_v35 = vor.u32 %v14287_v46, %v11909_v27  ;;  %v14274_v39 = vld [vmem:[%s20398_s5 + $0x644] sm:$0xf]  ;;  %5286 = vmatpush.bf16.msrb.mxu3 %v11914_v10  ;;  %v12170_v19 = vor.u32 %v14352_v44, %v12169_v38  ;;  %v18385_v31 = vsel %vm1772_vm11, %v4580_v54, %v18355_v14  ;;  %v14277_v22 = vld [vmem:[%s20398_s5 + $0x658] sm:$0xf0]  ;;  %v14275_v17 = vld [vmem:[%s20398_s5 + $0x64c] sm:$0xf] }
 0x350   :  { %v3618_v6 = vpop.f32.mrf.mxu1  ;;  %5179 = vmatpush.bf16.msra.mxu1 %v11886_v63  ;;  %5196 = vmatpush.bf16.msra.mxu2 %v12066_v40  ;;  %v11866_v59 = vor.u32 %v14274_v39, %v11863_v61  ;;  %v12026_v63 = vor.u32 %v14314_v16, %v12023_v21  ;;  %v11871_v27 = vld [vmem:[%s20398_s5 + $0x65c] sm:$0xf0]  ;;  %v18398_v51 = vsel %vm1772_vm11, %v4586_v28, %v18363_v8  ;;  %v14353_v10 = vld [vmem:[%s20398_s5 + $0x8b8] sm:$0xf0]  ;;  %v12137_v38 = vld [vmem:[%s20398_s5 + $0x858] sm:$0xf] }
 0x351   :  { %v18332_v52 = vadd.f32 %v3618_v6, %v18125_v34  ;;  %v12043_v34 = vld [vmem:[%s20398_s5 + $0x7bc] sm:$0xf0]  ;;  %v11870_v40 = vor.u32 %v14277_v22, %v11869_v23  ;;  %v11874_v46 = vor.u32 %v14275_v17, %v11871_v27  ;;  %v14347_v6 = vld [vmem:[%s20398_s5 + $0x888] sm:$0xf0]  ;;  %v12178_v56 = vor.u32 %v14353_v10, %v12177_v9  ;;  %v14332_v27 = vld [vmem:[%s20398_s5 + $0x810] sm:$0xf0] }
 0x352   :  { %5232 = vmatpush.bf16.msrb.mxu0 %v11910_v35  ;;  %v12046_v50 = vor.u32 %v14319_v24, %v12043_v34  ;;  %v12150_v42 = vor.u32 %v14347_v6, %v12149_v29  ;;  %v14343_v44 = vld [vmem:[%s20398_s5 + $0x868] sm:$0xf0]  ;;  %v12089_v17 = vld [vmem:[%s20398_s5 + $0x800] sm:$0xf]  ;;  %v14372_v10 = vld [vmem:[%s20398_s5 + $0x950] sm:$0xf0] }
 0x353   :  { %11737 = vmatmul.msk.bf16.vlgmr.msrb.gmra.mxu1 %vm75_vm0, %v17729_v55  ;;  %5287 = vmatpush.bf16.msrb.mxu3 %v11894_v12  ;;  %v14337_v12 = vld [vmem:[%s20398_s5 + $0x838] sm:$0xf0] }
 0x354   :  { %v3571_v49 = vpop.f32.mrf.mxu2  ;;  %5180 = vmatpush.bf16.msra.mxu1 %v11866_v59  ;;  %5197 = vmatpush.bf16.msra.mxu2 %v12046_v50 }
 0x355   :  { %v4187_v55 = vpop.f32.mrf.mxu3  ;;  %v12109_v49 = vld [vmem:[%s20398_s5 + $0x828] sm:$0xf] }
 0x356   :  { %v4198_v45 = vpop.f32.mrf.mxu0  ;;  %5233 = vmatpush.bf16.msrb.mxu0 %v11890_v20  ;;  %v14348_v20 = vld [vmem:[%s20398_s5 + $0x890] sm:$0xf0]  ;;  %v12110_v28 = vor.u32 %v14337_v12, %v12109_v49  ;;  %v12229_v49 = vld [vmem:[%s20398_s5 + $0x918] sm:$0xf] }
 0x357   :  { %v18381_v33 = vadd.f32 %v4198_v45, %v18187_v3  ;;  %5288 = vmatpush.bf16.msrb.mxu3 %v11874_v46  ;;  %v14340_v55 = vld [vmem:[%s20398_s5 + $0x854] sm:$0xf]  ;;  %v12117_v46 = vld [vmem:[%s20398_s5 + $0x830] sm:$0xf] }
 0x358   :  { %v3620_v3 = vpop.f32.mrf.mxu1  ;;  %5245 = vmatpush.bf16.msrb.mxu1 %v12170_v19  ;;  %5198 = vmatpush.bf16.msra.mxu2 %v12026_v63  ;;  %v12138_v63 = vor.u32 %v14343_v44, %v12137_v38  ;;  %v12077_v38 = vld [vmem:[%s20398_s5 + $0x7e0] sm:$0xf]  ;;  %v14328_v44 = vld [vmem:[%s20398_s5 + $0x7f0] sm:$0xf0] }
 0x359   :  { %v3621_v0 = vadd.f32 %v3620_v3, %v18189_v62  ;;  %5127 = vmatmul.bf16.vlgmr.msrb.gmra.mxu2 %v18385_v31  ;;  %12259 = vmatmul.msk.bf16.vlgmr.msra.gmra.mxu0 %vm75_vm0, %v18398_v51  ;;  %v14350_v62 = vld [vmem:[%s20398_s5 + $0x8a4] sm:$0xf]  ;;  %v12090_v3 = vor.u32 %v14332_v27, %v12089_v17  ;;  %v12209_v17 = vld [vmem:[%s20398_s5 + $0x8f0] sm:$0xf] }
 0x35a   :  { %12261 = vmatmul.msk.bf16.vlgmr.msra.gmra.mxu3 %vm75_vm0, %v18398_v51  ;;  %5234 = vmatpush.bf16.msrb.mxu0 %v11870_v40  ;;  %v12174_v35 = vor.u32 %v14350_v62, %v12171_v25  ;;  %v12111_v40 = vld [vmem:[%s20398_s5 + $0x83c] sm:$0xf0]  ;;  %v14327_v62 = vld [vmem:[%s20398_s5 + $0x7e8] sm:$0xf0]  ;;  %v14362_v27 = vld [vmem:[%s20398_s5 + $0x900] sm:$0xf0] }
 0x35b   :  { %5353 = vmatpush.bf16.msra.mxu3 %v12178_v56  ;;  %v12249_v25 = vld [vmem:[%s20398_s5 + $0x940] sm:$0xf]  ;;  %v12091_v56 = vld [vmem:[%s20398_s5 + $0x814] sm:$0xf0] }
 0x35c   :  { %v3636_v11 = vpop.f32.mrf.mxu2  ;;  %5246 = vmatpush.bf16.msrb.mxu1 %v12150_v42  ;;  %v12069_v42 = vld [vmem:[%s20398_s5 + $0x7d8] sm:$0xf] }
 0x35d   :  { %v18425_v2 = vadd.f32 %v3636_v11, %v18332_v52  ;;  %v18427_v39 = vpop.f32.mrf.mxu3  ;;  %v14342_v52 = vld [vmem:[%s20398_s5 + $0x860] sm:$0xf0] }
 0x35e   :  { %5299 = vmatpush.bf16.msra.mxu0 %v12174_v35  ;;  %v4200_v61 = vpop.f32.mrf.mxu0  ;;  %v12130_v50 = vor.u32 %v14342_v52, %v12129_v60  ;;  %v12070_v35 = vor.u32 %v14327_v62, %v12069_v42  ;;  %v14330_v11 = vld [vmem:[%s20398_s5 + $0x804] sm:$0xf]  ;;  %v12250_v60 = vor.u32 %v14372_v10, %v12249_v25  ;;  %v12097_v52 = vld [vmem:[%s20398_s5 + $0x808] sm:$0xf]  ;;  %v14323_v42 = vld [vmem:[%s20398_s5 + $0x7c8] sm:$0xf0] }
 0x35f   :  { %v18430_v24 = vadd.f32 %v4200_v61, %v18247_v30  ;;  %v12151_v30 = vld [vmem:[%s20398_s5 + $0x88c] sm:$0xf0]  ;;  %v14315_v10 = vld [vmem:[%s20398_s5 + $0x78c] sm:$0xf] }
 0x360   :  { %v3623_v59 = vpop.f32.mrf.mxu1  ;;  %v12154_v4 = vor.u32 %v14345_v53, %v12151_v30  ;;  %5247 = vmatpush.bf16.msrb.mxu1 %v12130_v50  ;;  %v14333_v53 = vld [vmem:[%s20398_s5 + $0x818] sm:$0xf0]  ;;  %v12094_v30 = vor.u32 %v14330_v11, %v12091_v56  ;;  %5267 = vmatpush.bf16.msrb.mxu2 %v12250_v60  ;;  %v12031_v56 = vld [vmem:[%s20398_s5 + $0x79c] sm:$0xf0]  ;;  %v12037_v60 = vld [vmem:[%s20398_s5 + $0x790] sm:$0xf] }
 0x361   :  { %v3624_v34 = vadd.f32 %v3623_v59, %v18249_v13  ;;  %v12157_v13 = vld [vmem:[%s20398_s5 + $0x880] sm:$0xf] }
 0x362   :  { %v12158_v15 = vor.u32 %v14348_v20, %v12157_v13  ;;  %5300 = vmatpush.bf16.msra.mxu0 %v12154_v4  ;;  %v12098_v13 = vor.u32 %v14333_v53, %v12097_v52  ;;  %v12049_v4 = vld [vmem:[%s20398_s5 + $0x7b0] sm:$0xf]  ;;  %v14318_v52 = vld [vmem:[%s20398_s5 + $0x7a0] sm:$0xf0] }
 0x363   :  { %11738 = vmatmul.msk.bf16.gmra.mxu1 %vm75_vm0, %v17834_v26  ;;  %v12131_v26 = vld [vmem:[%s20398_s5 + $0x864] sm:$0xf0] }
 0x364   :  { %v3638_v54 = vpop.f32.mrf.mxu2  ;;  %5354 = vmatpush.bf16.msra.mxu3 %v12158_v15  ;;  %v12134_v21 = vor.u32 %v14340_v55, %v12131_v26  ;;  %5248 = vmatpush.bf16.msrb.mxu1 %v12110_v28  ;;  %v14322_v15 = vld [vmem:[%s20398_s5 + $0x7c0] sm:$0xf0]  ;;  %v14367_v55 = vld [vmem:[%s20398_s5 + $0x928] sm:$0xf0] }
 0x365   :  { %v18471_v45 = vadd.f32 %v3638_v54, %v3621_v0  ;;  %v18473_v19 = vpop.f32.mrf.mxu3  ;;  %v14338_v0 = vld [vmem:[%s20398_s5 + $0x840] sm:$0xf0]  ;;  %v12050_v12 = vor.u32 %v14322_v15, %v12049_v4  ;;  %v12071_v54 = vld [vmem:[%s20398_s5 + $0x7ec] sm:$0xf0]  ;;  %v12230_v28 = vor.u32 %v14367_v55, %v12229_v49 }
 0x366   :  { %v4203_v16 = vpop.f32.mrf.mxu0  ;;  %5301 = vmatpush.bf16.msra.mxu0 %v12134_v21  ;;  %v12118_v6 = vor.u32 %v14338_v0, %v12117_v46  ;;  %v12051_v46 = vld [vmem:[%s20398_s5 + $0x7c4] sm:$0xf0]  ;;  %v12057_v0 = vld [vmem:[%s20398_s5 + $0x7b8] sm:$0xf] }
 0x367   :  { %v18476_v23 = vadd.f32 %v4203_v16, %v18308_v32  ;;  %v14335_v32 = vld [vmem:[%s20398_s5 + $0x82c] sm:$0xf]  ;;  %v12029_v16 = vld [vmem:[%s20398_s5 + $0x788] sm:$0xf]  ;;  %5268 = vmatpush.bf16.msrb.mxu2 %v12230_v28  ;;  %v12058_v25 = vor.u32 %v14323_v42, %v12057_v0  ;;  %v14308_v28 = vld [vmem:[%s20398_s5 + $0x750] sm:$0xf0] }
 0x368   :  { %v3625_v22 = vpop.f32.mrf.mxu1  ;;  %5355 = vmatpush.bf16.msra.mxu3 %v12138_v63  ;;  %v12114_v29 = vor.u32 %v14335_v32, %v12111_v40  ;;  %5249 = vmatpush.bf16.msrb.mxu1 %v12090_v3  ;;  %v12078_v63 = vor.u32 %v14328_v44, %v12077_v38  ;;  %v14320_v40 = vld [vmem:[%s20398_s5 + $0x7b4] sm:$0xf]  ;;  %v14298_v0 = vld [vmem:[%s20398_s5 + $0x700] sm:$0xf0] }
 0x369   :  { %5132 = vmatmul.bf16.gmra.mxu2 %v18355_v14  ;;  %12260 = vmatmul.msk.bf16.gmra.mxu0 %vm75_vm0, %v18363_v8  ;;  %v14317_v22 = vld [vmem:[%s20398_s5 + $0x798] sm:$0xf0]  ;;  %v12054_v62 = vor.u32 %v14320_v40, %v12051_v46  ;;  %v11957_v40 = vld [vmem:[%s20398_s5 + $0x6f0] sm:$0xf] }
 0x36a   :  { %12262 = vmatmul.msk.bf16.gmra.mxu3 %vm75_vm0, %v18363_v8  ;;  %5302 = vmatpush.bf16.msra.mxu0 %v12114_v29  ;;  %v12030_v3 = vor.u32 %v14317_v22, %v12029_v16  ;;  %v14303_v16 = vld [vmem:[%s20398_s5 + $0x728] sm:$0xf0]  ;;  %v11958_v42 = vor.u32 %v14298_v0, %v11957_v40  ;;  %v14278_v0 = vld [vmem:[%s20398_s5 + $0x660] sm:$0xf0] }
 0x36c   :  { %v3641_v9 = vpop.f32.mrf.mxu2  ;;  %5356 = vmatpush.bf16.msra.mxu3 %v12118_v6  ;;  %5250 = vmatpush.bf16.msrb.mxu1 %v12070_v35  ;;  %v12210_v6 = vor.u32 %v14362_v27, %v12209_v17  ;;  %v14357_v35 = vld [vmem:[%s20398_s5 + $0x8d8] sm:$0xf0] }
 0x36d   :  { %v18519_v61 = vadd.f32 %v3641_v9, %v3624_v34  ;;  %v18521_v59 = vpop.f32.mrf.mxu3  ;;  %v12189_v9 = vld [vmem:[%s20398_s5 + $0x8c8] sm:$0xf] }
 0x36e   :  { %v4205_v50 = vpop.f32.mrf.mxu0  ;;  %5303 = vmatpush.bf16.msra.mxu0 %v12094_v30  ;;  %5269 = vmatpush.bf16.msrb.mxu2 %v12210_v6  ;;  %v12017_v30 = vld [vmem:[%s20398_s5 + $0x768] sm:$0xf] }
 0x36f   :  { %v12190_v50 = vor.u32 %v14357_v35, %v12189_v9  ;;  %v14293_v9 = vld [vmem:[%s20398_s5 + $0x6d8] sm:$0xf0]  ;;  %v12257_v35 = vld [vmem:[%s20398_s5 + $0x948] sm:$0xf] }
 0x370   :  { %v4216_v20 = vpop.f32.mrf.mxu1  ;;  %5357 = vmatpush.bf16.msra.mxu3 %v12098_v13  ;;  %5251 = vmatpush.bf16.msrb.mxu1 %v12050_v12  ;;  %v14313_v13 = vld [vmem:[%s20398_s5 + $0x778] sm:$0xf0] }
 0x371   :  { %v18530_v34 = vadd.f32 %v4216_v20, %v18381_v33  ;;  %v14325_v33 = vld [vmem:[%s20398_s5 + $0x7dc] sm:$0xf]  ;;  %v12038_v20 = vor.u32 %v14318_v52, %v12037_v60  ;;  %v12018_v15 = vor.u32 %v14313_v13, %v12017_v30 }
 0x372   :  { %v12074_v26 = vor.u32 %v14325_v33, %v12071_v54  ;;  %5270 = vmatpush.bf16.msrb.mxu2 %v12190_v50  ;;  %v11997_v54 = vld [vmem:[%s20398_s5 + $0x740] sm:$0xf] }
 0x373   :  { %5181 = vmatmul.bf16.vlgmr.msra.gmra.mxu1 %v18385_v31  ;;  %v11998_v38 = vor.u32 %v14308_v28, %v11997_v54 }
 0x374   :  { %v3643_v21 = vpop.f32.mrf.mxu2  ;;  %5304 = vmatpush.bf16.msra.mxu0 %v12074_v26  ;;  %5358 = vmatpush.bf16.msra.mxu3 %v12078_v63 }
 0x375   :  { %v4259_v32 = vpop.f32.mrf.mxu3  ;;  %5252 = vmatpush.bf16.msrb.mxu1 %v12030_v3  ;;  %v12251_v3 = vld [vmem:[%s20398_s5 + $0x954] sm:$0xf0] }
 0x376   :  { %v4270_v29 = vpop.f32.mrf.mxu0  ;;  %v14370_v32 = vld [vmem:[%s20398_s5 + $0x944] sm:$0xf] }
 0x378   :  { %v4218_v11 = vpop.f32.mrf.mxu1  ;;  %5305 = vmatpush.bf16.msra.mxu0 %v12054_v62  ;;  %5359 = vmatpush.bf16.msra.mxu3 %v12058_v25  ;;  %v11937_v25 = vld [vmem:[%s20398_s5 + $0x6c8] sm:$0xf] }
 0x379   :  { %v18600_v53 = vadd.f32 %v4218_v11, %v18430_v24  ;;  %5199 = vmatmul.bf16.vlgmr.msra.gmra.mxu2 %v18152_v37  ;;  %5235 = vmatmul.bf16.vlgmr.msrb.gmra.mxu0 %v18385_v31  ;;  %v12034_v24 = vor.u32 %v14315_v10, %v12031_v56  ;;  %v14373_v10 = vld [vmem:[%s20398_s5 + $0x958] sm:$0xf0]  ;;  %v11938_v56 = vor.u32 %v14293_v9, %v11937_v25 }
 0x37a   :  { %5289 = vmatmul.bf16.vlgmr.msrb.gmra.mxu3 %v18385_v31  ;;  %5335 = vmatpush.bf16.msra.mxu2 %v12018_v15  ;;  %v12258_v60 = vor.u32 %v14373_v10, %v12257_v35 }
 0x37c   :  { %v4234_v4 = vpop.f32.mrf.mxu2  ;;  %5306 = vmatpush.bf16.msra.mxu0 %v12034_v24  ;;  %5360 = vmatpush.bf16.msra.mxu3 %v12038_v20  ;;  %v14360_v24 = vld [vmem:[%s20398_s5 + $0x8f4] sm:$0xf]  ;;  %v12211_v20 = vld [vmem:[%s20398_s5 + $0x904] sm:$0xf0] }
 0x37d   :  { %v4235_v49 = vadd.f32 %v4234_v4, %v17948_v1  ;;  %v18612_v12 = vpop.f32.mrf.mxu3  ;;  %v11917_v4 = vld [vmem:[%s20398_s5 + $0x6a0] sm:$0xf]  ;;  %v12214_v15 = vor.u32 %v14360_v24, %v12211_v20 }
 0x37e   :  { %v4272_v55 = vpop.f32.mrf.mxu0  ;;  %5336 = vmatpush.bf16.msra.mxu2 %v11998_v38  ;;  %v14355_v38 = vld [vmem:[%s20398_s5 + $0x8cc] sm:$0xf] }
 0x37f   :  { %v4253_v33 = vadd.f32 %v18427_v39, %v4235_v49  ;;  %v11977_v39 = vld [vmem:[%s20398_s5 + $0x718] sm:$0xf]  ;;  %v14288_v49 = vld [vmem:[%s20398_s5 + $0x6b0] sm:$0xf0] }
 0x380   :  { %v4221_v26 = vpop.f32.mrf.mxu1  ;;  %v11978_v63 = vor.u32 %v14303_v16, %v11977_v39  ;;  %5375 = vmatpush.bf16.msrb.mxu0 %v12258_v60  ;;  %v11918_v28 = vor.u32 %v14288_v49, %v11917_v4  ;;  %v12191_v39 = vld [vmem:[%s20398_s5 + $0x8dc] sm:$0xf0]  ;;  %v11897_v16 = vld [vmem:[%s20398_s5 + $0x678] sm:$0xf] }
 0x381   :  { %v18621_v1 = vadd.f32 %v4270_v29, %v4253_v33  ;;  %v18624_v44 = vadd.f32 %v4221_v26, %v18476_v23  ;;  %v12231_v29 = vld [vmem:[%s20398_s5 + $0x92c] sm:$0xf0] }
 0x382   :  { %5337 = vmatpush.bf16.msra.mxu2 %v11978_v63  ;;  %v12217_v63 = vld [vmem:[%s20398_s5 + $0x8f8] sm:$0xf] }
 0x383   :  { %5186 = vmatmul.bf16.gmra.mxu1 %v18355_v14 }
 0x384   :  { %v4236_v21 = vpop.f32.mrf.mxu2 }
 0x385   :  { %v4237_v22 = vadd.f32 %v4236_v21, %v17985_v43  ;;  %v18634_v17 = vpop.f32.mrf.mxu3  ;;  %v12254_v43 = vor.u32 %v14370_v32, %v12251_v3  ;;  %v12194_v21 = vor.u32 %v14355_v38, %v12191_v39 }
 0x386   :  { %v4275_v27 = vpop.f32.mrf.mxu0  ;;  %5338 = vmatpush.bf16.msra.mxu2 %v11958_v42 }
 0x387   :  { %v4255_v23 = vadd.f32 %v18473_v19, %v4237_v22  ;;  %v14365_v19 = vld [vmem:[%s20398_s5 + $0x91c] sm:$0xf]  ;;  %5321 = vmatpush.bf16.msra.mxu1 %v12254_v43  ;;  %v14363_v22 = vld [vmem:[%s20398_s5 + $0x908] sm:$0xf0]  ;;  %v11877_v43 = vld [vmem:[%s20398_s5 + $0x650] sm:$0xf] }
 0x388   :  { %v4223_v46 = vpop.f32.mrf.mxu1  ;;  %v12234_v62 = vor.u32 %v14365_v19, %v12231_v29  ;;  %v12197_v19 = vld [vmem:[%s20398_s5 + $0x8d0] sm:$0xf]  ;;  %v11878_v42 = vor.u32 %v14278_v0, %v11877_v43 }
 0x389   :  { %v18655_v6 = vadd.f32 %v4272_v55, %v4255_v23  ;;  %5204 = vmatmul.bf16.gmra.mxu2 %v18117_v47  ;;  %5240 = vmatmul.bf16.gmra.mxu0 %v18355_v14  ;;  %v14368_v55 = vld [vmem:[%s20398_s5 + $0x930] sm:$0xf0] }
 0x38a   :  { %5294 = vmatmul.bf16.gmra.mxu3 %v18355_v14  ;;  %5339 = vmatpush.bf16.msra.mxu2 %v11938_v56 }
 0x38b   :  { %5322 = vmatpush.bf16.msra.mxu1 %v12234_v62 }
 0x38c   :  { %v4239_v11 = vpop.f32.mrf.mxu2 }
 0x38d   :  { %v4240_v52 = vadd.f32 %v4239_v11, %v18014_v58  ;;  %v18673_v50 = vpop.f32.mrf.mxu3 }
 0x38e   :  { %v4277_v30 = vpop.f32.mrf.mxu0  ;;  %5340 = vmatpush.bf16.msra.mxu2 %v11918_v28 }
 0x38f   :  { %v4258_v13 = vadd.f32 %v18521_v59, %v4240_v52  ;;  %v12237_v59 = vld [vmem:[%s20398_s5 + $0x920] sm:$0xf]  ;;  %5323 = vmatpush.bf16.msra.mxu1 %v12214_v15 }
 0x390   :  { %v4288_v58 = vpop.f32.mrf.mxu1  ;;  %v12238_v26 = vor.u32 %v14368_v55, %v12237_v59 }
 0x391   :  { %v18694_v33 = vadd.f32 %v4275_v27, %v4258_v13  ;;  %v4289_v54 = vadd.f32 %v4288_v58, %v18005_v18  ;;  %v14283_v18 = vld [vmem:[%s20398_s5 + $0x688] sm:$0xf0]  ;;  %v12218_v27 = vor.u32 %v14363_v22, %v12217_v63 }
 0x392   :  { %5376 = vmatpush.bf16.msrb.mxu0 %v12238_v26  ;;  %v11898_v32 = vor.u32 %v14283_v18, %v11897_v16 }
 0x393   :  { %5253 = vmatmul.bf16.vlgmr.msrb.gmra.mxu1 %v18152_v37 }
 0x394   :  { %v4241_v23 = vpop.f32.mrf.mxu2  ;;  %5324 = vmatpush.bf16.msra.mxu1 %v12194_v21  ;;  %5341 = vmatpush.bf16.msra.mxu2 %v11898_v32 }
 0x395   :  { %v4331_v3 = vpop.f32.mrf.mxu3 }
 0x396   :  { %v4342_v40 = vpop.f32.mrf.mxu0  ;;  %5377 = vmatpush.bf16.msrb.mxu0 %v12218_v27 }
 0x397   :  { %v4343_v46 = vadd.f32 %v4342_v40, %v18201_v48  ;;  %v14358_v48 = vld [vmem:[%s20398_s5 + $0x8e0] sm:$0xf0] }
 0x398   :  { %v18726_v29 = vpop.f32.mrf.mxu1  ;;  %v12198_v62 = vor.u32 %v14358_v48, %v12197_v19  ;;  %5342 = vmatpush.bf16.msra.mxu2 %v11878_v42 }
 0x399   :  { %12263 = vmatmul.msk.bf16.vlgmr.msrb.gmra.mxu2 %vm75_vm0, %v18398_v51  ;;  %5307 = vmatmul.bf16.vlgmr.msra.gmra.mxu0 %v18152_v37 }
 0x39a   :  { %5361 = vmatmul.bf16.vlgmr.msra.gmra.mxu3 %v18152_v37  ;;  %5378 = vmatpush.bf16.msrb.mxu0 %v12198_v62 }
 0x39c   :  { %v4306_v25 = vpop.f32.mrf.mxu2 }
 0x39d   :  { %v4307_v9 = vadd.f32 %v4306_v25, %v4289_v54  ;;  %v4396_v35 = vpop.f32.mrf.mxu3 }
 0x39e   :  { %v4397_v10 = vadd.f32 %v4396_v35, %v18425_v2  ;;  %v18736_v11 = vpop.f32.mrf.mxu0 }
 0x39f   :  { %v18739_v56 = vadd.f32 %v18612_v12, %v4307_v9 }
 0x3a0   :  { %v4293_v60 = vpop.f32.mrf.mxu1 }
 0x3a1   :  { %v4294_v52 = vadd.f32 %v4293_v60, %v18082_v57 }
 0x3a3   :  { %5258 = vmatmul.bf16.gmra.mxu1 %v18117_v47 }
 0x3a4   :  { %v18743_v30 = vpop.f32.mrf.mxu2 }
 0x3a5   :  { %v18745_v37 = vpop.f32.mrf.mxu3 }
 0x3a6   :  { %v4347_v13 = vpop.f32.mrf.mxu0 }
 0x3a7   :  { %v4348_v24 = vadd.f32 %v4347_v13, %v18329_v36 }
 0x3a8   :  { %v4295_v20 = vpop.f32.mrf.mxu1 }
 0x3a9   :  { %12264 = vmatmul.msk.bf16.gmra.mxu2 %vm75_vm0, %v18363_v8  ;;  %5312 = vmatmul.bf16.gmra.mxu0 %v18117_v47 }
 0x3aa   :  { %5366 = vmatmul.bf16.gmra.mxu3 %v18117_v47 }
 0x3ac   :  { %v4311_v2 = vpop.f32.mrf.mxu2 }
 0x3ad   :  { %v4312_v12 = vadd.f32 %v4311_v2, %v4294_v52  ;;  %v4401_v57 = vpop.f32.mrf.mxu3 }
 0x3ae   :  { %v4402_v4 = vadd.f32 %v4401_v57, %v18519_v61  ;;  %v4349_v58 = vpop.f32.mrf.mxu0 }
 0x3af   :  { %v18754_v15 = vadd.f32 %v18673_v50, %v4312_v12 }
 0x3b0   :  { %v4360_v49 = vpop.f32.mrf.mxu1 }
 0x3b1   :  { %v4361_v59 = vadd.f32 %v4360_v49, %v4343_v46 }
 0x3b3   :  { %12265 = vmatmul.msk.bf16.vlgmr.msra.gmra.mxu1 %vm75_vm0, %v18398_v51 }
 0x3b4   :  { %v4313_v36 = vpop.f32.mrf.mxu2 }
 0x3b5   :  { %v4403_v55 = vpop.f32.mrf.mxu3 }
 0x3b6   :  { %v4414_v54 = vpop.f32.mrf.mxu0 }
 0x3b7   :  { %v4415_v28 = vadd.f32 %v4414_v54, %v4397_v10 }
 0x3b8   :  { %v18758_v26 = vpop.f32.mrf.mxu1 }
 0x3b9   :  { %5343 = vmatmul.bf16.vlgmr.msra.gmra.mxu2 %v18385_v31  ;;  %12267 = vmatmul.msk.bf16.vlgmr.msrb.gmra.mxu0 %vm75_vm0, %v18398_v51 }
 0x3bc   :  { %v4378_v47 = vpop.f32.mrf.mxu2 }
 0x3bd   :  { %v18763_v61 = vadd.f32 %v4378_v47, %v4361_v59  ;;  %v5146_v50 = vpop.f32.mrf.mxu3 }
 0x3be   :  { %v18765_v38 = vpop.f32.mrf.mxu0 }
 0x3c0   :  { %v4365_v39 = vpop.f32.mrf.mxu1 }
 0x3c1   :  { %v4366_v16 = vadd.f32 %v4365_v39, %v4348_v24 }
 0x3c3   :  { %12266 = vmatmul.msk.bf16.gmra.mxu1 %vm75_vm0, %v18363_v8 }
 0x3c4   :  { %v18769_v21 = vpop.f32.mrf.mxu2 }
 0x3c5   :  { %v5148_v18 = vpop.f32.mrf.mxu3 }
 0x3c6   :  { %v4419_v63 = vpop.f32.mrf.mxu0 }
 0x3c7   :  { %v4420_v22 = vadd.f32 %v4419_v63, %v4402_v4 }
 0x3c8   :  { %v4367_v31 = vpop.f32.mrf.mxu1 }
 0x3c9   :  { %5348 = vmatmul.bf16.gmra.mxu2 %v18355_v14  ;;  %12268 = vmatmul.msk.bf16.gmra.mxu0 %vm75_vm0, %v18363_v8  ;;  %v18783_v14 = vld [vmem:[%s20399_s6] sm:$0x1f]  ;;  %vm5456_vm0 = vcmask 1041408  }
 0x3ca   :  { %v5406_v9 = vperm.slane %v18783_v14, 0 }
 0x3cc   :  { %v4383_v51 = vpop.f32.mrf.mxu2 }
 0x3cd   :  { %v18774_v27 = vadd.f32 %v4383_v51, %v4366_v16  ;;  %v5151_v23 = vpop.f32.mrf.mxu3 }
 0x3ce   :  { %v4421_v32 = vpop.f32.mrf.mxu0 }
 0x3d0   :  { %v4432_v3 = vpop.f32.mrf.mxu1 }
 0x3d1   :  { %v18776_v40 = vadd.f32 %v4432_v3, %v4415_v28 }
 0x3d4   :  { %v4385_v46 = vpop.f32.mrf.mxu2 }
 0x3d5   :  { %v5153_v43 = vpop.f32.mrf.mxu3 }
 0x3d6   :  { %v5164_v0 = vpop.f32.mrf.mxu0 }
 0x3d8   :  { %v18778_v19 = vpop.f32.mrf.mxu1 }
 0x3dc   :  { %v5128_v42 = vpop.f32.mrf.mxu2 }
 0x3dd   :  { %v5147_v8 = vadd.f32 %v5146_v50, %v5128_v42  ;;  %v5218_v48 = vpop.f32.mrf.mxu3 }
 0x3de   :  { %v5166_v62 = vpop.f32.mrf.mxu0 }
 0x3df   :  { %v5165_v25 = vadd.f32 %v5164_v0, %v5147_v8 }
 0x3e0   :  { %v4437_v35 = vpop.f32.mrf.mxu1 }
 0x3e1   :  { %v5389_v10 = vadd.f32 %v5165_v25, %v18530_v34  ;;  %v18787_v60 = vadd.f32 %v4437_v35, %v4420_v22 }
 0x3e3   :  { %v5416_v52 = vadd.f32 %v5406_v9, %v5389_v10 }
 0x3e4   :  { %v5130_v13 = vpop.f32.mrf.mxu2 }
 0x3e5   :  { %v18789_v24 = vmax.f32 %v5416_v52, 0.0  ;;  %v5149_v20 = vadd.f32 %v5148_v18, %v5130_v13  ;;  %v5220_v2 = vpop.f32.mrf.mxu3 }
 0x3e6   :  { %v5169_v12 = vpop.f32.mrf.mxu0 }
 0x3e7   :  { %5466 = vst [vmem:[#allocation1] sm:$0xff] %v18789_v24  ;;  %v5167_v57 = vadd.f32 %v5166_v62, %v5149_v20 }
 0x3e8   :  { %v4439_v4 = vpop.f32.mrf.mxu1 }
 0x3e9   :  { %v5394_v58 = vadd.f32 %v5167_v57, %v18600_v53 }
 0x3eb   :  { %v18793_v49 = vadd.f32 %v5406_v9, %v5394_v58 }
 0x3ec   :  { %v5133_v59 = vpop.f32.mrf.mxu2 }
 0x3ed   :  { %v5152_v36 = vadd.f32 %v5151_v23, %v5133_v59  ;;  %v5223_v34 = vpop.f32.mrf.mxu3  ;;  %v5407_v23 = vperm.slane %v18783_v14, 1 }
 0x3ee   :  { %v5171_v55 = vpop.f32.mrf.mxu0 }
 0x3ef   :  { %v5170_v54 = vadd.f32 %v5169_v12, %v5152_v36 }
 0x3f0   :  { %v5182_v28 = vpop.f32.mrf.mxu1 }
 0x3f1   :  { %v5399_v47 = vadd.f32 %v5170_v54, %v18624_v44 }
 0x3f3   :  { %v18796_v50 = vadd.f32 %v5406_v9, %v5399_v47 }
 0x3f4   :  { %v5135_v39 = vpop.f32.mrf.mxu2 }
 0x3f5   :  { %v5225_v16 = vpop.f32.mrf.mxu3 }
 0x3f6   :  { %v5236_v18 = vpop.f32.mrf.mxu0 }
 0x3f8   :  { %v5184_v63 = vpop.f32.mrf.mxu1 }
 0x3fc   :  { %v5200_v22 = vpop.f32.mrf.mxu2 }
 0x3fd   :  { %v5201_v31 = vadd.f32 %v5200_v22, %v5182_v28  ;;  %v5290_v51 = vpop.f32.mrf.mxu3 }
 0x3fe   :  { %v18798_v53 = vpop.f32.mrf.mxu0 }
 0x3ff   :  { %v5219_v32 = vadd.f32 %v5218_v48, %v5201_v31 }
 0x400   :  { %v5187_v3 = vpop.f32.mrf.mxu1 }
 0x401   :  { %v5390_v46 = vadd.f32 %v5219_v32, %v18621_v1 }
 0x403   :  { %v5417_v43 = vadd.f32 %v5407_v23, %v5390_v46 }
 0x404   :  { %v5202_v0 = vpop.f32.mrf.mxu2 }
 0x405   :  { %v18802_v44 = vmax.f32 %v5417_v43, 0.0  ;;  %v5203_v42 = vadd.f32 %v5202_v0, %v5184_v63  ;;  %v5292_v8 = vpop.f32.mrf.mxu3 }
 0x406   :  { %v5241_v62 = vpop.f32.mrf.mxu0 }
 0x407   :  { %5467 = vst [vmem:[#allocation1 + $0x9] sm:$0xff] %v18802_v44  ;;  %v5221_v25 = vadd.f32 %v5220_v2, %v5203_v42 }
 0x408   :  { %v5189_v9 = vpop.f32.mrf.mxu1 }
 0x409   :  { %v5395_v35 = vadd.f32 %v5221_v25, %v18655_v6  ;;  %v5408_v6 = vperm.slane %v18783_v14, 2 }
 0x40b   :  { %v18806_v10 = vadd.f32 %v5407_v23, %v5395_v35  ;;  %v18822_v35 = vperm.slane %v18783_v14, 3 }
 0x40c   :  { %v5205_v48 = vpop.f32.mrf.mxu2 }
 0x40d   :  { %v5206_v52 = vadd.f32 %v5205_v48, %v5187_v3  ;;  %v5295_v13 = vpop.f32.mrf.mxu3 }
 0x40e   :  { %v5243_v20 = vpop.f32.mrf.mxu0 }
 0x40f   :  { %v5224_v1 = vadd.f32 %v5223_v34, %v5206_v52 }
 0x410   :  { %v5254_v12 = vpop.f32.mrf.mxu1 }
 0x411   :  { %v5400_v57 = vadd.f32 %v5224_v1, %v18694_v33  ;;  %v5255_v2 = vadd.f32 %v5254_v12, %v5236_v18 }
 0x413   :  { %v18809_v4 = vadd.f32 %v5407_v23, %v5400_v57 }
 0x414   :  { %v5207_v58 = vpop.f32.mrf.mxu2 }
 0x415   :  { %v5297_v59 = vpop.f32.mrf.mxu3 }
 0x416   :  { %v5308_v36 = vpop.f32.mrf.mxu0  ;;  %v4345_v59 = vadd.f32 %v18736_v11, %v18261_v7 }
 0x417   :  { %v5309_v42 = vadd.f32 %v5308_v36, %v5290_v51  ;;  %v4291_v51 = vadd.f32 %v18726_v29, %v18032_v5 }
 0x418   :  { %v5256_v55 = vpop.f32.mrf.mxu1 }
 0x419   :  { %v5257_v58 = vadd.f32 %v5256_v55, %v18798_v53 }
 0x41c   :  { %v5272_v54 = vpop.f32.mrf.mxu2 }
 0x41d   :  { %v5273_v28 = vadd.f32 %v5272_v54, %v5255_v2  ;;  %v5362_v47 = vpop.f32.mrf.mxu3 }
 0x41e   :  { %v5310_v39 = vpop.f32.mrf.mxu0 }
 0x41f   :  { %v5391_v16 = vadd.f32 %v5273_v28, %v18739_v56  ;;  %v5311_v2 = vadd.f32 %v5310_v39, %v5292_v8  ;;  %v4399_v8 = vadd.f32 %v18745_v37, %v18471_v45 }
 0x420   :  { %v5259_v63 = vpop.f32.mrf.mxu1 }
 0x421   :  { %v5418_v34 = vadd.f32 %v5408_v6, %v5391_v16  ;;  %v5260_v22 = vadd.f32 %v5259_v63, %v5241_v62  ;;  %v4363_v63 = vadd.f32 %v18758_v26, %v4345_v59 }
 0x423   :  { %v18813_v31 = vmax.f32 %v5418_v34, 0.0  ;;  %v4381_v53 = vadd.f32 %v18769_v21, %v4363_v63 }
 0x424   :  { %v5274_v33 = vpop.f32.mrf.mxu2 }
 0x425   :  { %5468 = vst [vmem:[#allocation1 + $0x12] sm:$0xff] %v18813_v31  ;;  %v5364_v32 = vpop.f32.mrf.mxu3  ;;  %v5275_v54 = vadd.f32 %v5274_v33, %v5257_v58  ;;  %v5452_v33 = vrot.slane %v18813_v31, 6 }
 0x426   :  { %v5313_v23 = vpop.f32.mrf.mxu0 }
 0x427   :  { %v5314_v5 = vadd.f32 %v5313_v23, %v5295_v13  ;;  %v4417_v13 = vadd.f32 %v18765_v38, %v4399_v8 }
 0x428   :  { %v5261_v3 = vpop.f32.mrf.mxu1 }
 0x429   :  { %v4435_v3 = vadd.f32 %v18778_v19, %v4417_v13  ;;  %v18862_v19 = vmax.f32 %v18806_v10, 0.0 }
 0x42b   :  { %v5541_v10 = vrot.slane %v18862_v19, 7 }
 0x42c   :  { %v5277_v18 = vpop.f32.mrf.mxu2 }
 0x42d   :  { %v5278_v46 = vadd.f32 %v5277_v18, %v5260_v22  ;;  %v18816_v43 = vpop.f32.mrf.mxu3  ;;  %v18838_v22 = vperm.slane %v18783_v14, 4  ;;  %v5451_v14 = vrot.slane %v18802_v44, 7 }
 0x42e   :  { %v5315_v0 = vpop.f32.mrf.mxu0 }
 0x42f   :  { %v5401_v25 = vadd.f32 %v5278_v46, %v18754_v15  ;;  %v4309_v15 = vadd.f32 %v18743_v30, %v4291_v51 }
 0x430   :  { %v5326_v56 = vpop.f32.mrf.mxu1 }
 0x431   :  { %v18819_v9 = vadd.f32 %v5408_v6, %v5401_v25  ;;  %v5327_v62 = vadd.f32 %v5326_v56, %v5309_v42  ;;  %v4327_v16 = vadd.f32 %v18634_v17, %v4309_v15 }
 0x433   :  { %v5392_v48 = vadd.f32 %v5327_v62, %v18763_v61  ;;  %v5396_v55 = vadd.f32 %v5275_v54, %v4327_v16 }
 0x434   :  { %v5279_v52 = vpop.f32.mrf.mxu2 }
 0x435   :  { %v5419_v20 = vadd.f32 %v18822_v35, %v5392_v48  ;;  %v5369_v1 = vpop.f32.mrf.mxu3  ;;  %v5423_v21 = vadd.f32 %v5408_v6, %v5396_v55  ;;  %v14460_v6 = vld [vmem:[%s20400_s7 + $0x2b0] sm:$0xff] }
 0x436   :  { %v5380_v61 = vpop.f32.mrf.mxu0  ;;  %v18881_v1 = vmax.f32 %v18793_v49, 0.0 }
 0x437   :  { %v18826_v12 = vmax.f32 %v5419_v20, 0.0  ;;  %v18866_v0 = vmax.f32 %v5423_v21, 0.0  ;;  %v14405_v21 = vld [vmem:[%s20400_s7 + $0xf8] sm:$0xff] }
 0x438   :  { %v5328_v57 = vpop.f32.mrf.mxu1  ;;  %v5545_v58 = vsel %vm948_vm4, %v18881_v1, %v5541_v10  ;;  %9101 = vmatpush.bf16.msra.mxu0 %v14405_v21  ;;  %v14385_v10 = vld [vmem:[%s20400_s7 + $0x58] sm:$0xff]  ;;  %v14415_v21 = vld [vmem:[%s20400_s7 + $0x148] sm:$0xff] }
 0x439   :  { %5469 = vst [vmem:[#allocation1 + $0x1b] sm:$0xff] %v18826_v12  ;;  %v5329_v29 = vadd.f32 %v5328_v57, %v5311_v2  ;;  %v5453_v45 = vrot.slane %v18826_v12, 5  ;;  %v5542_v52 = vrot.slane %v18866_v0, 6 }
 0x43b   :  { %v5546_v59 = vsel %vm5456_vm0, %v5545_v58, %v5542_v52  ;;  %v14393_v52 = vld [vmem:[%s20400_s7 + $0x98] sm:$0xff]  ;;  %v14399_v58 = vld [vmem:[%s20400_s7 + $0xc8] sm:$0xff] }
 0x43c   :  { %v5344_v36 = vpop.f32.mrf.mxu2 }
 0x43d   :  { %v5363_v28 = vadd.f32 %v5362_v47, %v5344_v36  ;;  %v5397_v47 = vadd.f32 %v5329_v29, %v4381_v53  ;;  %v18909_v29 = vmax.f32 %v18809_v4, 0.0 }
 0x43e   :  { %v5382_v37 = vpop.f32.mrf.mxu0 }
 0x43f   :  { %v5381_v34 = vadd.f32 %v5380_v61, %v5363_v28 }
 0x440   :  { %v5331_v30 = vpop.f32.mrf.mxu1 }
 0x441   :  { %v5393_v7 = vadd.f32 %v5381_v34, %v18776_v40  ;;  %v5332_v11 = vadd.f32 %v5331_v30, %v5314_v5  ;;  %v18912_v34 = vmax.f32 %v18819_v9, 0.0 }
 0x443   :  { %v5420_v17 = vadd.f32 %v18838_v22, %v5393_v7  ;;  %v5402_v26 = vadd.f32 %v5332_v11, %v18774_v27  ;;  %v5424_v27 = vadd.f32 %v18822_v35, %v5397_v47  ;;  %v5608_v4 = vrot.slane %v18912_v34, 6 }
 0x444   :  { %v5346_v39 = vpop.f32.mrf.mxu2 }
 0x445   :  { %v18849_v23 = vmax.f32 %v5420_v17, 0.0  ;;  %v5365_v40 = vadd.f32 %v5364_v32, %v5346_v39  ;;  %v5455_v32 = vsel %vm948_vm4, %v18789_v24, %v5451_v14  ;;  %v18871_v41 = vmax.f32 %v5424_v27, 0.0  ;;  %v14379_v27 = vld [vmem:[%s20400_s7 + $0x28] sm:$0xff] }
 0x446   :  { %v5457_v42 = vsel %vm5456_vm0, %v5455_v32, %v5452_v33  ;;  %v5385_v2 = vpop.f32.mrf.mxu0  ;;  %v5429_v63 = vadd.f32 %v18822_v35, %v5402_v26  ;;  %v14397_v33 = vld [vmem:[%s20400_s7 + $0xb8] sm:$0xff]  ;;  %v14403_v32 = vld [vmem:[%s20400_s7 + $0xe8] sm:$0xff] }
 0x447   :  { %v5454_v38 = vrot.slane %v18849_v23, 4  ;;  %5470 = vst [vmem:[#allocation1 + $0x24] sm:$0xff] %v18849_v23  ;;  %v5383_v18 = vadd.f32 %v5382_v37, %v5365_v40  ;;  %v5543_v57 = vrot.slane %v18871_v41, 5  ;;  %9088 = vmatpush.bf16.msrb.mxu3 %v14397_v33  ;;  %v14380_v40 = vld [vmem:[%s20400_s7 + $0x30] sm:$0xff]  ;;  %v14407_v33 = vld [vmem:[%s20400_s7 + $0x108] sm:$0xff] }
 0x448   :  { %v5333_v46 = vpop.f32.mrf.mxu1  ;;  %v18916_v55 = vmax.f32 %v5429_v63, 0.0  ;;  %v14404_v37 = vld [vmem:[%s20400_s7 + $0xf0] sm:$0xff]  ;;  %v14437_v63 = vld [vmem:[%s20400_s7 + $0x1f8] sm:$0xff] }
 0x449   :  { %v5398_v25 = vadd.f32 %v5383_v18, %v4435_v3  ;;  %v5459_v56 = vsel %vm5458_vm3, %v5453_v45, %v5454_v38  ;;  %v14388_v3 = vld [vmem:[%s20400_s7 + $0x70] sm:$0xff]  ;;  %9102 = vmatpush.bf16.msra.mxu0 %v14404_v37  ;;  %v14387_v38 = vld [vmem:[%s20400_s7 + $0x68] sm:$0xff]  ;;  %v14378_v46 = vld [vmem:[%s20400_s7 + $0x20] sm:$0xff] }
 0x44a   :  { %v5461_v62 = vsel %vm5460_vm5, %v5457_v42, %v5459_v56  ;;  %v14396_v45 = vld [vmem:[%s20400_s7 + $0xb0] sm:$0xff]  ;;  %v14395_v18 = vld [vmem:[%s20400_s7 + $0xa8] sm:$0xff]  ;;  %v14386_v42 = vld [vmem:[%s20400_s7 + $0x60] sm:$0xff] }
 0x44b   :  { %v5425_v48 = vadd.f32 %v18838_v22, %v5398_v25  ;;  %5465 = vst.msk [vmem:[#allocation5] ss:$2 sm:$0x1f] %vm18857_vm6, %v5461_v62  ;;  %9089 = vmatpush.bf16.msrb.mxu3 %v14396_v45  ;;  %v14394_v25 = vld [vmem:[%s20400_s7 + $0xa0] sm:$0xff] }
 0x44c   :  { %v5349_v54 = vpop.f32.mrf.mxu2  ;;  %v14402_v56 = vld [vmem:[%s20400_s7 + $0xe0] sm:$0xff] }
 0x44d   :  { %v18878_v20 = vmax.f32 %v5425_v48, 0.0  ;;  %v5368_v28 = vadd.f32 %v18816_v43, %v5349_v54  ;;  %v5607_v43 = vrot.slane %v18909_v29, 7  ;;  %9103 = vmatpush.bf16.msra.mxu0 %v14403_v32  ;;  %v14377_v48 = vld [vmem:[%s20400_s7 + $0x18] sm:$0xff]  ;;  %v14406_v45 = vld [vmem:[%s20400_s7 + $0x100] sm:$0xff] }
 0x44e   :  { %v5472_v51 = vld [vmem:[#allocation1 + $0x1] ss:$9 sm:$0xff]  ;;  %v5387_v16 = vpop.f32.mrf.mxu0 }
 0x44f   :  { %5476 = vst [vmem:[#allocation1] sm:$0xff] %v18789_v24  ;;  %v5544_v15 = vrot.slane %v18878_v20, 4  ;;  %v5386_v5 = vadd.f32 %v5385_v2, %v5368_v28  ;;  %9090 = vmatpush.bf16.msrb.mxu3 %v14395_v18  ;;  %v14398_v2 = vld [vmem:[%s20400_s7 + $0xc0] sm:$0xff]  ;;  %v14413_v54 = vld [vmem:[%s20400_s7 + $0x138] sm:$0xff] }
 0x450   :  { %5477 = vst [vmem:[#allocation1 + $0x9] sm:$0xff] %v18802_v44  ;;  %v14421_v28 = vld [vmem:[%s20400_s7 + $0x178] sm:$0xff]  ;;  %v14414_v37 = vld [vmem:[%s20400_s7 + $0x140] sm:$0xff] }
 0x451   :  { %5478 = vst [vmem:[#allocation1 + $0x12] sm:$0xff] %v18813_v31  ;;  %v5547_v61 = vsel %vm5458_vm3, %v5543_v57, %v5544_v15  ;;  %v5403_v30 = vadd.f32 %v5386_v5, %v18787_v60  ;;  %v18926_v60 = vmax.f32 %v18796_v50, 0.0  ;;  %9104 = vmatpush.bf16.msra.mxu0 %v14402_v56  ;;  %v14376_v57 = vld [vmem:[%s20400_s7 + $0x10] sm:$0xff]  ;;  %v14383_v15 = vld [vmem:[%s20400_s7 + $0x48] sm:$0xff]  ;;  %v14429_v16 = vld [vmem:[%s20400_s7 + $0x1b8] sm:$0xff] }
 0x452   :  { %5479 = vst [vmem:[#allocation1 + $0x1b] sm:$0xff] %v18826_v12  ;;  %v5548_v49 = vsel %vm5460_vm5, %v5546_v59, %v5547_v61  ;;  %v14374_v61 = vld [vmem:[%s20400_s7] sm:$0xff]  ;;  %v14412_v5 = vld [vmem:[%s20400_s7 + $0x130] sm:$0xff] }
 0x453   :  { %5480 = vst [vmem:[#allocation1 + $0x24] sm:$0xff] %v18849_v23  ;;  %v5430_v7 = vadd.f32 %v18838_v22, %v5403_v30  ;;  %v5609_v22 = vrot.slane %v18916_v55, 5  ;;  %v5611_v8 = vsel %vm948_vm4, %v18926_v60, %v5607_v43  ;;  %9091 = vmatpush.bf16.msrb.mxu3 %v14394_v25  ;;  %v14420_v30 = vld [vmem:[%s20400_s7 + $0x170] sm:$0xff]  ;;  %v14411_v43 = vld [vmem:[%s20400_s7 + $0x128] sm:$0xff]  ;;  %v14445_v25 = vld [vmem:[%s20400_s7 + $0x238] sm:$0xff]  ;;  %vm9734_vm4 = vcmask 261120  }
 0x454   :  { %5475 = vst.msk [vmem:[#allocation5 + $0xa] ss:$2 sm:$0x1f] %vm18857_vm6, %v5472_v51  ;;  %v5351_v35 = vpop.f32.mrf.mxu2  ;;  %v5612_v47 = vsel %vm5456_vm0, %v5611_v8, %v5608_v4  ;;  %v14401_v51 = vld [vmem:[%s20400_s7 + $0xd8] sm:$0xff]  ;;  %v14427_v4 = vld [vmem:[%s20400_s7 + $0x1a8] sm:$0xff]  ;;  %v14410_v8 = vld [vmem:[%s20400_s7 + $0x120] sm:$0xff] }
 0x455   :  { %5551 = vst.msk [vmem:[#allocation5 + $0x50] ss:$2 sm:$0x1f] %vm18857_vm6, %v5548_v49  ;;  %v18923_v9 = vmax.f32 %v5430_v7, 0.0  ;;  %9105 = vmatpush.bf16.msra.mxu0 %v14401_v51  ;;  %v14382_v49 = vld [vmem:[%s20400_s7 + $0x40] sm:$0xff]  ;;  %v14436_v7 = vld [vmem:[%s20400_s7 + $0x1f0] sm:$0xff] }
 0x456   :  { %v14419_v35 = vld [vmem:[%s20400_s7 + $0x168] sm:$0xff]  ;;  %v14469_v51 = vld [vmem:[%s20400_s7 + $0x2f8] sm:$0xff] }
 0x457   :  { %v5610_v11 = vrot.slane %v18923_v9, 4  ;;  %9092 = vmatpush.bf16.msrb.mxu3 %v14393_v52 }
 0x459   :  { %v5613_v17 = vsel %vm5458_vm3, %v5609_v22, %v5610_v11  ;;  %v14435_v22 = vld [vmem:[%s20400_s7 + $0x1e8] sm:$0xff] }
 0x45a   :  { %v5482_v36 = vld [vmem:[#allocation1 + $0x2] ss:$9 sm:$0xff]  ;;  %v5614_v50 = vsel %vm5460_vm5, %v5612_v47, %v5613_v17 }
 0x45b   :  { %5486 = vst [vmem:[#allocation1] sm:$0xff] %v18789_v24  ;;  %v14418_v47 = vld [vmem:[%s20400_s7 + $0x160] sm:$0xff] }
 0x45c   :  { %5487 = vst [vmem:[#allocation1 + $0x9] sm:$0xff] %v18802_v44  ;;  %v14426_v17 = vld [vmem:[%s20400_s7 + $0x1a0] sm:$0xff] }
 0x45d   :  { %5488 = vst [vmem:[#allocation1 + $0x12] sm:$0xff] %v18813_v31 }
 0x45e   :  { %5489 = vst [vmem:[#allocation1 + $0x1b] sm:$0xff] %v18826_v12 }
 0x45f   :  { %5490 = vst [vmem:[#allocation1 + $0x24] sm:$0xff] %v18849_v23 }
 0x460   :  { %5485 = vst.msk [vmem:[#allocation5 + $0x14] ss:$2 sm:$0x1f] %vm18857_vm6, %v5482_v36  ;;  %v14390_v36 = vld [vmem:[%s20400_s7 + $0x80] sm:$0xff] }
 0x461   :  { %5617 = vst.msk [vmem:[#allocation5 + $0x29] ss:$2 sm:$0x1f] %vm18857_vm6, %v5614_v50  ;;  %v14434_v50 = vld [vmem:[%s20400_s7 + $0x1e0] sm:$0xff] }
 0x466   :  { %v5492_v53 = vld [vmem:[#allocation1 + $0x3] ss:$9 sm:$0xff] }
 0x467   :  { %5496 = vst [vmem:[#allocation1] sm:$0xff] %v18789_v24 }
 0x468   :  { %5497 = vst [vmem:[#allocation1 + $0x9] sm:$0xff] %v18802_v44 }
 0x469   :  { %5498 = vst [vmem:[#allocation1 + $0x12] sm:$0xff] %v18813_v31 }
 0x46a   :  { %5499 = vst [vmem:[#allocation1 + $0x1b] sm:$0xff] %v18826_v12 }
 0x46b   :  { %5500 = vst [vmem:[#allocation1 + $0x24] sm:$0xff] %v18849_v23 }
 0x46c   :  { %5495 = vst.msk [vmem:[#allocation5 + $0x1e] ss:$2 sm:$0x1f] %vm18857_vm6, %v5492_v53  ;;  %v14428_v53 = vld [vmem:[%s20400_s7 + $0x1b0] sm:$0xff] }
 0x472   :  { %v5502_v26 = vld [vmem:[#allocation1 + $0x4] ss:$9 sm:$0xff] }
 0x473   :  { %5506 = vst [vmem:[#allocation1] sm:$0xff] %v18789_v24 }
 0x474   :  { %5507 = vst [vmem:[#allocation1 + $0x9] sm:$0xff] %v18802_v44 }
 0x475   :  { %5508 = vst [vmem:[#allocation1 + $0x12] sm:$0xff] %v18813_v31 }
 0x476   :  { %5509 = vst [vmem:[#allocation1 + $0x1b] sm:$0xff] %v18826_v12 }
 0x477   :  { %5510 = vst [vmem:[#allocation1 + $0x24] sm:$0xff] %v18849_v23 }
 0x478   :  { %5505 = vst.msk [vmem:[#allocation5 + $0x28] ss:$2 sm:$0x1f] %vm18857_vm6, %v5502_v26  ;;  %v14409_v26 = vld [vmem:[%s20400_s7 + $0x118] sm:$0xff] }
 0x47e   :  { %v5512_v13 = vld [vmem:[#allocation1 + $0x5] ss:$9 sm:$0xff] }
 0x47f   :  { %5516 = vst [vmem:[#allocation1] sm:$0xff] %v18789_v24 }
 0x480   :  { %5517 = vst [vmem:[#allocation1 + $0x9] sm:$0xff] %v18802_v44 }
 0x481   :  { %5518 = vst [vmem:[#allocation1 + $0x12] sm:$0xff] %v18813_v31 }
 0x482   :  { %5519 = vst [vmem:[#allocation1 + $0x1b] sm:$0xff] %v18826_v12 }
 0x483   :  { %5520 = vst [vmem:[#allocation1 + $0x24] sm:$0xff] %v18849_v23 }
 0x484   :  { %5515 = vst.msk [vmem:[#allocation5 + $0x32] ss:$2 sm:$0x1f] %vm18857_vm6, %v5512_v13  ;;  %v14417_v13 = vld [vmem:[%s20400_s7 + $0x158] sm:$0xff] }
 0x48a   :  { %v5522_v14 = vld [vmem:[#allocation1 + $0x6] ss:$9 sm:$0xff] }
 0x48b   :  { %5526 = vst [vmem:[#allocation1] sm:$0xff] %v18789_v24 }
 0x48c   :  { %5527 = vst [vmem:[#allocation1 + $0x9] sm:$0xff] %v18802_v44 }
 0x48d   :  { %5528 = vst [vmem:[#allocation1 + $0x12] sm:$0xff] %v18813_v31  ;;  %v14381_v31 = vld [vmem:[%s20400_s7 + $0x38] sm:$0xff] }
 0x48e   :  { %5529 = vst [vmem:[#allocation1 + $0x1b] sm:$0xff] %v18826_v12  ;;  %v14389_v12 = vld [vmem:[%s20400_s7 + $0x78] sm:$0xff]  ;;  %9062 = vmatpush.bf16.msrb.mxu1 %v14381_v31  ;;  %v14424_v31 = vld [vmem:[%s20400_s7 + $0x190] sm:$0xff] }
 0x48f   :  { %5530 = vst [vmem:[#allocation1 + $0x24] sm:$0xff] %v18849_v23  ;;  %9075 = vmatpush.bf16.msrb.mxu2 %v14389_v12  ;;  %v14432_v12 = vld [vmem:[%s20400_s7 + $0x1d0] sm:$0xff] }
 0x490   :  { %5525 = vst.msk [vmem:[#allocation5 + $0x3c] ss:$2 sm:$0x1f] %vm18857_vm6, %v5522_v14  ;;  %v14425_v14 = vld [vmem:[%s20400_s7 + $0x198] sm:$0xff] }
 0x492   :  { %9063 = vmatpush.bf16.msrb.mxu1 %v14380_v40  ;;  %v14431_v40 = vld [vmem:[%s20400_s7 + $0x1c8] sm:$0xff] }
 0x493   :  { %9076 = vmatpush.bf16.msrb.mxu2 %v14388_v3 }
 0x496   :  { %v5532_v39 = vld [vmem:[#allocation1 + $0x7] ss:$9 sm:$0xff]  ;;  %9064 = vmatpush.bf16.msrb.mxu1 %v14379_v27 }
 0x497   :  { %5535 = vst.msk [vmem:[#allocation5 + $0x46] ss:$2 sm:$0x1f] %vm18857_vm6, %v5532_v39  ;;  %9077 = vmatpush.bf16.msrb.mxu2 %v14387_v38  ;;  %v14433_v39 = vld [vmem:[%s20400_s7 + $0x1d8] sm:$0xff]  ;;  %v14422_v27 = vld [vmem:[%s20400_s7 + $0x180] sm:$0xff] }
 0x498   :  { %5552 = vst [vmem:[#allocation1] sm:$0xff] %v18881_v1  ;;  %v14430_v38 = vld [vmem:[%s20400_s7 + $0x1c0] sm:$0xff] }
 0x499   :  { %5553 = vst [vmem:[#allocation1 + $0x9] sm:$0xff] %v18862_v19 }
 0x49a   :  { %5554 = vst [vmem:[#allocation1 + $0x12] sm:$0xff] %v18866_v0  ;;  %9065 = vmatpush.bf16.msrb.mxu1 %v14378_v46 }
 0x49b   :  { %5555 = vst [vmem:[#allocation1 + $0x1b] sm:$0xff] %v18871_v41  ;;  %9078 = vmatpush.bf16.msrb.mxu2 %v14386_v42 }
 0x49c   :  { %5556 = vst [vmem:[#allocation1 + $0x24] sm:$0xff] %v18878_v20 }
 0x49e   :  { %9066 = vmatpush.bf16.msrb.mxu1 %v14377_v48 }
 0x49f   :  { %9079 = vmatpush.bf16.msrb.mxu2 %v14385_v10 }
 0x4a2   :  { %9067 = vmatpush.bf16.msrb.mxu1 %v14376_v57 }
 0x4a3   :  { %v5558_v24 = vld [vmem:[#allocation1 + $0x1] ss:$9 sm:$0xff] }
 0x4a4   :  { %5562 = vst [vmem:[#allocation1] sm:$0xff] %v18881_v1 }
 0x4a5   :  { %5563 = vst [vmem:[#allocation1 + $0x9] sm:$0xff] %v18862_v19 }
 0x4a6   :  { %5564 = vst [vmem:[#allocation1 + $0x12] sm:$0xff] %v18866_v0 }
 0x4a7   :  { %5565 = vst [vmem:[#allocation1 + $0x1b] sm:$0xff] %v18871_v41 }
 0x4a8   :  { %5566 = vst [vmem:[#allocation1 + $0x24] sm:$0xff] %v18878_v20 }
 0x4a9   :  { %5561 = vst.msk [vmem:[#allocation5 + $0x5a] ss:$2 sm:$0x1f] %vm18857_vm6, %v5558_v24  ;;  %v14408_v24 = vld [vmem:[%s20400_s7 + $0x110] sm:$0xff] }
 0x4af   :  { %v5568_v44 = vld [vmem:[#allocation1 + $0x4] ss:$9 sm:$0xff] }
 0x4b0   :  { %5571 = vst.msk [vmem:[#allocation5 + $0x1] ss:$2 sm:$0x1f] %vm18857_vm6, %v5568_v44  ;;  %v14416_v44 = vld [vmem:[%s20400_s7 + $0x150] sm:$0xff] }
 0x4b1   :  { %5572 = vst [vmem:[#allocation1] sm:$0xff] %v18881_v1 }
 0x4b2   :  { %5573 = vst [vmem:[#allocation1 + $0x9] sm:$0xff] %v18862_v19 }
 0x4b3   :  { %5574 = vst [vmem:[#allocation1 + $0x12] sm:$0xff] %v18866_v0 }
 0x4b4   :  { %5575 = vst [vmem:[#allocation1 + $0x1b] sm:$0xff] %v18871_v41 }
 0x4b5   :  { %5576 = vst [vmem:[#allocation1 + $0x24] sm:$0xff] %v18878_v20 }
 0x4b7   :  { %v5668_v46 = vld [vmem:[#allocation5] sm:$0xff] }
 0x4bc   :  { %v5578_v23 = vld [vmem:[#allocation1 + $0x5] ss:$9 sm:$0xff] }
 0x4bd   :  { %5581 = vst.msk [vmem:[#allocation5 + $0xb] ss:$2 sm:$0x1f] %vm18857_vm6, %v5578_v23  ;;  %v14423_v23 = vld [vmem:[%s20400_s7 + $0x188] sm:$0xff] }
 0x4be   :  { %5582 = vst [vmem:[#allocation1] sm:$0xff] %v18881_v1 }
 0x4bf   :  { %5583 = vst [vmem:[#allocation1 + $0x9] sm:$0xff] %v18862_v19 }
 0x4c0   :  { %5584 = vst [vmem:[#allocation1 + $0x12] sm:$0xff] %v18866_v0 }
 0x4c1   :  { %5585 = vst [vmem:[#allocation1 + $0x1b] sm:$0xff] %v18871_v41 }
 0x4c2   :  { %5586 = vst [vmem:[#allocation1 + $0x24] sm:$0xff] %v18878_v20 }
 0x4c9   :  { %v5588_v62 = vld [vmem:[#allocation1 + $0x6] ss:$9 sm:$0xff] }
 0x4ca   :  { %5591 = vst.msk [vmem:[#allocation5 + $0x15] ss:$2 sm:$0x1f] %vm18857_vm6, %v5588_v62 }
 0x4cb   :  { %5592 = vst [vmem:[#allocation1] sm:$0xff] %v18881_v1  ;;  %v14384_v1 = vld [vmem:[%s20400_s7 + $0x50] sm:$0xff] }
 0x4cc   :  { %5593 = vst [vmem:[#allocation1 + $0x9] sm:$0xff] %v18862_v19  ;;  %v14392_v19 = vld [vmem:[%s20400_s7 + $0x90] sm:$0xff]  ;;  %9080 = vmatpush.bf16.msrb.mxu2 %v14384_v1  ;;  %v5669_v1 = vld [vmem:[#allocation5 + $0x8] sm:$0xff] }
 0x4cd   :  { %5594 = vst [vmem:[#allocation1 + $0x12] sm:$0xff] %v18866_v0  ;;  %v14400_v0 = vld [vmem:[%s20400_s7 + $0xd0] sm:$0xff]  ;;  %9093 = vmatpush.bf16.msrb.mxu3 %v14392_v19 }
 0x4ce   :  { %5595 = vst [vmem:[#allocation1 + $0x1b] sm:$0xff] %v18871_v41  ;;  %9106 = vmatpush.bf16.msra.mxu0 %v14400_v0  ;;  %v14375_v41 = vld [vmem:[%s20400_s7 + $0x8] sm:$0xff]  ;;  %v14444_v19 = vld [vmem:[%s20400_s7 + $0x230] sm:$0xff] }
 0x4cf   :  { %5596 = vst [vmem:[#allocation1 + $0x24] sm:$0xff] %v18878_v20  ;;  %v14391_v20 = vld [vmem:[%s20400_s7 + $0x88] sm:$0xff]  ;;  %9068 = vmatpush.bf16.msrb.mxu1 %v14375_v41  ;;  %v14452_v0 = vld [vmem:[%s20400_s7 + $0x270] sm:$0xff] }
 0x4d0   :  { %9081 = vmatpush.bf16.msrb.mxu2 %v14383_v15  ;;  %v14468_v41 = vld [vmem:[%s20400_s7 + $0x2f0] sm:$0xff]  ;;  %v14443_v15 = vld [vmem:[%s20400_s7 + $0x228] sm:$0xff] }
 0x4d1   :  { %9094 = vmatpush.bf16.msrb.mxu3 %v14391_v20  ;;  %v5670_v42 = vld [vmem:[#allocation5 + $0x10] sm:$0xff] }
 0x4d2   :  { %9107 = vmatpush.bf16.msra.mxu0 %v14399_v58  ;;  %v14451_v20 = vld [vmem:[%s20400_s7 + $0x268] sm:$0xff] }
 0x4d3   :  { %9069 = vmatpush.bf16.msrb.mxu1 %v14374_v61  ;;  %v14459_v58 = vld [vmem:[%s20400_s7 + $0x2a8] sm:$0xff] }
 0x4d4   :  { %9082 = vmatpush.bf16.msrb.mxu2 %v14382_v49 }
 0x4d5   :  { %9095 = vmatpush.bf16.msrb.mxu3 %v14390_v36 }
 0x4d6   :  { %v5598_v59 = vld [vmem:[#allocation1 + $0x7] ss:$9 sm:$0xff]  ;;  %9108 = vmatpush.bf16.msra.mxu0 %v14398_v2 }
 0x4d7   :  { %5601 = vst.msk [vmem:[#allocation5 + $0x1f] ss:$2 sm:$0x1f] %vm18857_vm6, %v5598_v59  ;;  %9114 = vmatpush.bf16.msra.mxu1 %v14413_v54  ;;  %v14467_v59 = vld [vmem:[%s20400_s7 + $0x2e8] sm:$0xff] }
 0x4d8   :  { %5618 = vst [vmem:[#allocation1] sm:$0xff] %v18926_v60  ;;  %9127 = vmatpush.bf16.msra.mxu2 %v14421_v28 }
 0x4d9   :  { %5619 = vst [vmem:[#allocation1 + $0x9] sm:$0xff] %v18909_v29  ;;  %9140 = vmatpush.bf16.msra.mxu3 %v14429_v16 }
 0x4da   :  { %5620 = vst [vmem:[#allocation1 + $0x12] sm:$0xff] %v18912_v34  ;;  %9153 = vmatpush.bf16.msrb.mxu0 %v14437_v63 }
 0x4db   :  { %5621 = vst [vmem:[#allocation1 + $0x1b] sm:$0xff] %v18916_v55  ;;  %9115 = vmatpush.bf16.msra.mxu1 %v14412_v5  ;;  %v14442_v5 = vld [vmem:[%s20400_s7 + $0x220] sm:$0xff] }
 0x4dc   :  { %5622 = vst [vmem:[#allocation1 + $0x24] sm:$0xff] %v18923_v9  ;;  %9128 = vmatpush.bf16.msra.mxu2 %v14420_v30  ;;  %v14450_v30 = vld [vmem:[%s20400_s7 + $0x260] sm:$0xff] }
 0x4dd   :  { %9141 = vmatpush.bf16.msra.mxu3 %v14428_v53 }
 0x4de   :  { %9154 = vmatpush.bf16.msrb.mxu0 %v14436_v7  ;;  %v5672_v2 = vld [vmem:[#allocation5 + $0x20] sm:$0xff]  ;;  %v14458_v7 = vld [vmem:[%s20400_s7 + $0x2a0] sm:$0xff] }
 0x4df   :  { %9116 = vmatpush.bf16.msra.mxu1 %v14411_v43  ;;  %v14466_v43 = vld [vmem:[%s20400_s7 + $0x2e0] sm:$0xff] }
 0x4e0   :  { %9129 = vmatpush.bf16.msra.mxu2 %v14419_v35  ;;  %v5671_v35 = vld [vmem:[#allocation5 + $0x18] sm:$0xff] }
 0x4e1   :  { %9142 = vmatpush.bf16.msra.mxu3 %v14427_v4 }
 0x4e2   :  { %9155 = vmatpush.bf16.msrb.mxu0 %v14435_v22 }
 0x4e3   :  { %v5624_v11 = vld [vmem:[#allocation1 + $0x1] ss:$9 sm:$0xff]  ;;  %9117 = vmatpush.bf16.msra.mxu1 %v14410_v8 }
 0x4e4   :  { %5627 = vst.msk [vmem:[#allocation5 + $0x33] ss:$2 sm:$0x1f] %vm18857_vm6, %v5624_v11  ;;  %9130 = vmatpush.bf16.msra.mxu2 %v14418_v47  ;;  %v14441_v11 = vld [vmem:[%s20400_s7 + $0x218] sm:$0xff] }
 0x4e5   :  { %5628 = vst [vmem:[#allocation1] sm:$0xff] %v18926_v60  ;;  %9143 = vmatpush.bf16.msra.mxu3 %v14426_v17  ;;  %v14449_v8 = vld [vmem:[%s20400_s7 + $0x258] sm:$0xff] }
 0x4e6   :  { %5629 = vst [vmem:[#allocation1 + $0x9] sm:$0xff] %v18909_v29  ;;  %9156 = vmatpush.bf16.msrb.mxu0 %v14434_v50  ;;  %v14457_v50 = vld [vmem:[%s20400_s7 + $0x298] sm:$0xff] }
 0x4e7   :  { %5630 = vst [vmem:[#allocation1 + $0x12] sm:$0xff] %v18912_v34  ;;  %9118 = vmatpush.bf16.msra.mxu1 %v14409_v26  ;;  %v14465_v26 = vld [vmem:[%s20400_s7 + $0x2d8] sm:$0xff] }
 0x4e8   :  { %5631 = vst [vmem:[#allocation1 + $0x1b] sm:$0xff] %v18916_v55  ;;  %9131 = vmatpush.bf16.msra.mxu2 %v14417_v13  ;;  %v14440_v13 = vld [vmem:[%s20400_s7 + $0x210] sm:$0xff] }
 0x4e9   :  { %5632 = vst [vmem:[#allocation1 + $0x24] sm:$0xff] %v18923_v9  ;;  %9144 = vmatpush.bf16.msra.mxu3 %v14425_v14  ;;  %v14448_v14 = vld [vmem:[%s20400_s7 + $0x250] sm:$0xff] }
 0x4ea   :  { %9157 = vmatpush.bf16.msrb.mxu0 %v14433_v39  ;;  %v14456_v39 = vld [vmem:[%s20400_s7 + $0x290] sm:$0xff] }
 0x4eb   :  { %9119 = vmatpush.bf16.msra.mxu1 %v14408_v24  ;;  %v14464_v24 = vld [vmem:[%s20400_s7 + $0x2d0] sm:$0xff] }
 0x4ec   :  { %9132 = vmatpush.bf16.msra.mxu2 %v14416_v44 }
 0x4ed   :  { %9145 = vmatpush.bf16.msra.mxu3 %v14424_v31  ;;  %v5673_v31 = vld [vmem:[#allocation5 + $0x28] sm:$0xff] }
 0x4ee   :  { %9158 = vmatpush.bf16.msrb.mxu0 %v14432_v12  ;;  %v14439_v12 = vld [vmem:[%s20400_s7 + $0x208] sm:$0xff] }
 0x4ef   :  { %9120 = vmatpush.bf16.msra.mxu1 %v14407_v33  ;;  %v14447_v33 = vld [vmem:[%s20400_s7 + $0x248] sm:$0xff] }
 0x4f0   :  { %v5634_v3 = vld [vmem:[#allocation1 + $0x2] ss:$9 sm:$0xff]  ;;  %9133 = vmatpush.bf16.msra.mxu2 %v14415_v21 }
 0x4f1   :  { %5637 = vst.msk [vmem:[#allocation5 + $0x3d] ss:$2 sm:$0x1f] %vm18857_vm6, %v5634_v3  ;;  %9146 = vmatpush.bf16.msra.mxu3 %v14423_v23  ;;  %v14455_v3 = vld [vmem:[%s20400_s7 + $0x288] sm:$0xff] }
 0x4f2   :  { %5638 = vst [vmem:[#allocation1] sm:$0xff] %v18926_v60  ;;  %9159 = vmatpush.bf16.msrb.mxu0 %v14431_v40  ;;  %v5674_v40 = vld [vmem:[#allocation5 + $0x30] sm:$0xff] }
 0x4f3   :  { %5639 = vst [vmem:[#allocation1 + $0x9] sm:$0xff] %v18909_v29  ;;  %9121 = vmatpush.bf16.msra.mxu1 %v14406_v45 }
 0x4f4   :  { %5640 = vst [vmem:[#allocation1 + $0x12] sm:$0xff] %v18912_v34  ;;  %9134 = vmatpush.bf16.msra.mxu2 %v14414_v37 }
 0x4f5   :  { %5641 = vst [vmem:[#allocation1 + $0x1b] sm:$0xff] %v18916_v55  ;;  %9147 = vmatpush.bf16.msra.mxu3 %v14422_v27 }
 0x4f6   :  { %5642 = vst [vmem:[#allocation1 + $0x24] sm:$0xff] %v18923_v9  ;;  %9160 = vmatpush.bf16.msrb.mxu0 %v14430_v38 }
 0x4fd   :  { %v5644_v18 = vld [vmem:[#allocation1 + $0x3] ss:$9 sm:$0xff] }
 0x4fe   :  { %5647 = vst.msk [vmem:[#allocation5 + $0x47] ss:$2 sm:$0x1f] %vm18857_vm6, %v5644_v18  ;;  %v14463_v18 = vld [vmem:[%s20400_s7 + $0x2c8] sm:$0xff] }
 0x4ff   :  { %5652 = vst [vmem:[#allocation1 + $0x24] sm:$0xff] %v18923_v9 }
 0x500   :  { %5648 = vst [vmem:[#allocation1] sm:$0xff] %v18926_v60 }
 0x501   :  { %5649 = vst [vmem:[#allocation1 + $0x9] sm:$0xff] %v18909_v29 }
 0x502   :  { %5650 = vst [vmem:[#allocation1 + $0x12] sm:$0xff] %v18912_v34 }
 0x503   :  { %5651 = vst [vmem:[#allocation1 + $0x1b] sm:$0xff] %v18916_v55 }
 0x50a   :  { %v5654_v32 = vld [vmem:[#allocation1 + $0x4] ss:$9 sm:$0xff] }
 0x50b   :  { %5658 = vst [vmem:[#allocation1] sm:$0xff] %v18926_v60 }
 0x50c   :  { %5659 = vst [vmem:[#allocation1 + $0x9] sm:$0xff] %v18909_v29  ;;  %v14453_v29 = vld [vmem:[%s20400_s7 + $0x278] sm:$0xff] }
 0x50d   :  { %5660 = vst [vmem:[#allocation1 + $0x12] sm:$0xff] %v18912_v34 }
 0x50e   :  { %5661 = vst [vmem:[#allocation1 + $0x1b] sm:$0xff] %v18916_v55 }
 0x50f   :  { %5694 = vst [vmem:[#allocation1] ss:$4 sm:$0xff] %v5668_v46  ;;  %v14438_v46 = vld [vmem:[%s20400_s7 + $0x200] sm:$0xff] }
 0x510   :  { %5657 = vst.msk [vmem:[#allocation5 + $0x51] ss:$2 sm:$0x1f] %vm18857_vm6, %v5654_v32 }
 0x511   :  { %5662 = vst [vmem:[#allocation1 + $0x24] sm:$0xff] %v18923_v9  ;;  %v14461_v9 = vld [vmem:[%s20400_s7 + $0x2b8] sm:$0xff] }
 0x516   :  { %v5697_v60 = vld.sshfl [vmem:[#allocation1] sm:$0xff pattern:$0x73625140]  ;;  %v5698_v34 = vld.sshfl [vmem:[#allocation1 + $0x8] sm:$0xff pattern:$0x73625140] }
 0x517   :  { %v5808_v56 = vpack.c.bf16 %v5697_v60, %v5697_v60  ;;  %v5809_v62 = vpack.c.bf16 %v5698_v34, %v5698_v34  ;;  %v5699_v55 = vld.sshfl [vmem:[#allocation1 + $0x10] sm:$0xff pattern:$0x73625140]  ;;  %v5700_v48 = vld.sshfl [vmem:[#allocation1 + $0x18] sm:$0xff pattern:$0x73625140] }
 0x518   :  { %v5810_v10 = vpack.c.bf16 %v5699_v55, %v5699_v55  ;;  %v5811_v52 = vpack.c.bf16 %v5700_v48, %v5700_v48  ;;  %5705 = vst [vmem:[#allocation1] ss:$4 sm:$0xff] %v5670_v42  ;;  %v5664_v57 = vld [vmem:[#allocation1 + $0x5] ss:$9 sm:$0xff] }
 0x519   :  { %9070 = vmatmul.bf16.vlgmr.msrb.gmra.mxu1 %v5808_v56  ;;  %9083 = vmatmul.bf16.vlgmr.msrb.gmra.mxu2 %v5809_v62  ;;  %5667 = vst.msk [vmem:[#allocation5 + $0x5b] ss:$2 sm:$0x1f] %vm18857_vm6, %v5664_v57  ;;  %v14446_v42 = vld [vmem:[%s20400_s7 + $0x240] sm:$0xff]  ;;  %v14477_v60 = vld [vmem:[%s20400_s7 + $0x338] sm:$0xff]  ;;  %v5675_v55 = vld [vmem:[#allocation5 + $0x38] sm:$0xff] }
 0x51a   :  { %9096 = vmatmul.bf16.vlgmr.msrb.gmra.mxu3 %v5810_v10  ;;  %9109 = vmatmul.bf16.vlgmr.msra.gmra.mxu0 %v5811_v52  ;;  %5696 = vst [vmem:[#allocation1 + $0x20] ss:$4 sm:$0xff] %v5669_v1  ;;  %v14485_v34 = vld [vmem:[%s20400_s7 + $0x378] sm:$0xff]  ;;  %v14476_v48 = vld [vmem:[%s20400_s7 + $0x330] sm:$0xff] }
 0x51b   :  { %9166 = vmatpush.bf16.msrb.mxu1 %v14445_v25  ;;  %9179 = vmatpush.bf16.msrb.mxu2 %v14453_v29  ;;  %v14454_v25 = vld [vmem:[%s20400_s7 + $0x280] sm:$0xff]  ;;  %v14493_v56 = vld [vmem:[%s20400_s7 + $0x3b8] sm:$0xff]  ;;  %v14484_v10 = vld [vmem:[%s20400_s7 + $0x370] sm:$0xff] }
 0x51c   :  { %9192 = vmatpush.bf16.msrb.mxu3 %v14461_v9  ;;  %9205 = vmatpush.bf16.msra.mxu0 %v14469_v51  ;;  %v14462_v29 = vld [vmem:[%s20400_s7 + $0x2c0] sm:$0xff]  ;;  %v14501_v62 = vld [vmem:[%s20400_s7 + $0x3f8] sm:$0xff]  ;;  %v14492_v9 = vld [vmem:[%s20400_s7 + $0x3b0] sm:$0xff] }
 0x51f   :  { %9167 = vmatpush.bf16.msrb.mxu1 %v14444_v19  ;;  %9180 = vmatpush.bf16.msrb.mxu2 %v14452_v0  ;;  %v19262_v61 = vld.sshfl [vmem:[#allocation1] sm:$0xff pattern:$0x73625140]  ;;  %v19264_v49 = vld.sshfl [vmem:[#allocation1 + $0x8] sm:$0xff pattern:$0x73625140] }
 0x520   :  { %9193 = vmatpush.bf16.msrb.mxu3 %v14460_v6  ;;  %9206 = vmatpush.bf16.msra.mxu0 %v14468_v41  ;;  %v19266_v36 = vld.sshfl [vmem:[#allocation1 + $0x10] sm:$0xff pattern:$0x73625140]  ;;  %v19274_v53 = vld.sshfl [vmem:[#allocation1 + $0x18] sm:$0xff pattern:$0x73625140]  ;;  %v5816_v1 = vpack.c.bf16 %v19262_v61, %v19262_v61  ;;  %v5817_v19 = vpack.c.bf16 %v19264_v49, %v19264_v49 }
 0x521   :  { %v5701_v54 = vld.sshfl [vmem:[#allocation1 + $0x20] sm:$0xff pattern:$0x73625140]  ;;  %v5702_v28 = vld.sshfl [vmem:[#allocation1 + $0x28] sm:$0xff pattern:$0x73625140]  ;;  %v5818_v41 = vpack.c.bf16 %v19266_v36, %v19266_v36 }
 0x522   :  { %v5703_v16 = vld.sshfl [vmem:[#allocation1 + $0x30] sm:$0xff pattern:$0x73625140]  ;;  %v5704_v63 = vld.sshfl [vmem:[#allocation1 + $0x38] sm:$0xff pattern:$0x73625140]  ;;  %v5812_v4 = vpack.c.bf16 %v5701_v54, %v5701_v54  ;;  %v5813_v22 = vpack.c.bf16 %v5702_v28, %v5702_v28 }
 0x523   :  { %9168 = vmatpush.bf16.msrb.mxu1 %v14443_v15  ;;  %9181 = vmatpush.bf16.msrb.mxu2 %v14451_v20  ;;  %5715 = vst [vmem:[#allocation1] ss:$4 sm:$0xff] %v5672_v2  ;;  %v5814_v47 = vpack.c.bf16 %v5703_v16, %v5703_v16  ;;  %v5815_v17 = vpack.c.bf16 %v5704_v63, %v5704_v63  ;;  %v14500_v20 = vld [vmem:[%s20400_s7 + $0x3f0] sm:$0xff]  ;;  %v5676_v61 = vld [vmem:[#allocation5 + $0x40] sm:$0xff]  ;;  %v14475_v36 = vld [vmem:[%s20400_s7 + $0x328] sm:$0xff] }
 0x524   :  { %9194 = vmatpush.bf16.msrb.mxu3 %v14459_v58  ;;  %9207 = vmatpush.bf16.msra.mxu0 %v14467_v59  ;;  %5706 = vst [vmem:[#allocation1 + $0x20] ss:$4 sm:$0xff] %v5671_v35  ;;  %v5819_v15 = vpack.c.bf16 %v19274_v53, %v19274_v53  ;;  %v14483_v2 = vld [vmem:[%s20400_s7 + $0x368] sm:$0xff]  ;;  %v14474_v16 = vld [vmem:[%s20400_s7 + $0x320] sm:$0xff] }
 0x525   :  { %v14491_v54 = vld [vmem:[%s20400_s7 + $0x3a8] sm:$0xff]  ;;  %v5677_v63 = vld [vmem:[#allocation5 + $0x48] sm:$0xff] }
 0x526   :  { %v14499_v28 = vld [vmem:[%s20400_s7 + $0x3e8] sm:$0xff]  ;;  %v14498_v53 = vld [vmem:[%s20400_s7 + $0x3e0] sm:$0xff] }
 0x527   :  { %9169 = vmatpush.bf16.msrb.mxu1 %v14442_v5  ;;  %9182 = vmatpush.bf16.msrb.mxu2 %v14450_v30  ;;  %v14482_v5 = vld [vmem:[%s20400_s7 + $0x360] sm:$0xff] }
 0x528   :  { %9195 = vmatpush.bf16.msrb.mxu3 %v14458_v7  ;;  %9208 = vmatpush.bf16.msra.mxu0 %v14466_v43  ;;  %v14490_v30 = vld [vmem:[%s20400_s7 + $0x3a0] sm:$0xff] }
 0x529   :  { %9122 = vmatmul.bf16.vlgmr.msra.gmra.mxu1 %v5812_v4  ;;  %9135 = vmatmul.bf16.vlgmr.msra.gmra.mxu2 %v5813_v22  ;;  %v5678_v22 = vld [vmem:[#allocation5 + $0x50] sm:$0xff] }
 0x52a   :  { %9148 = vmatmul.bf16.vlgmr.msra.gmra.mxu3 %v5814_v47  ;;  %9161 = vmatmul.bf16.vlgmr.msrb.gmra.mxu0 %v5815_v17  ;;  %v19306_v44 = vld.sshfl [vmem:[#allocation1] sm:$0xff pattern:$0x73625140]  ;;  %v19323_v37 = vld.sshfl [vmem:[#allocation1 + $0x8] sm:$0xff pattern:$0x73625140] }
 0x52b   :  { %9170 = vmatpush.bf16.msrb.mxu1 %v14441_v11  ;;  %9183 = vmatpush.bf16.msrb.mxu2 %v14449_v8  ;;  %v19314_v21 = vld.sshfl [vmem:[#allocation1 + $0x20] sm:$0xff pattern:$0x73625140]  ;;  %v19316_v23 = vld.sshfl [vmem:[#allocation1 + $0x28] sm:$0xff pattern:$0x73625140] }
 0x52c   :  { %9196 = vmatpush.bf16.msrb.mxu3 %v14457_v50  ;;  %9209 = vmatpush.bf16.msra.mxu0 %v14465_v26  ;;  %v19321_v45 = vld.sshfl [vmem:[#allocation1 + $0x30] sm:$0xff pattern:$0x73625140]  ;;  %v19325_v27 = vld.sshfl [vmem:[#allocation1 + $0x38] sm:$0xff pattern:$0x73625140] }
 0x52d   :  { %v19327_v38 = vld.sshfl [vmem:[#allocation1 + $0x10] sm:$0xff pattern:$0x73625140]  ;;  %5716 = vst [vmem:[#allocation1 + $0x20] ss:$4 sm:$0xff] %v5673_v31  ;;  %v14473_v11 = vld [vmem:[%s20400_s7 + $0x318] sm:$0xff] }
 0x52e   :  { %v19332_v32 = vld.sshfl [vmem:[#allocation1 + $0x18] sm:$0xff pattern:$0x73625140]  ;;  %v14488_v31 = vld [vmem:[%s20400_s7 + $0x390] sm:$0xff] }
 0x52f   :  { %9171 = vmatpush.bf16.msrb.mxu1 %v14440_v13  ;;  %9184 = vmatpush.bf16.msrb.mxu2 %v14448_v14  ;;  %5725 = vst [vmem:[#allocation1] ss:$4 sm:$0xff] %v5674_v40  ;;  %v14481_v8 = vld [vmem:[%s20400_s7 + $0x358] sm:$0xff] }
 0x530   :  { %9197 = vmatpush.bf16.msrb.mxu3 %v14456_v39  ;;  %9210 = vmatpush.bf16.msra.mxu0 %v14464_v24  ;;  %v14489_v26 = vld [vmem:[%s20400_s7 + $0x398] sm:$0xff]  ;;  %v14472_v39 = vld [vmem:[%s20400_s7 + $0x310] sm:$0xff] }
 0x531   :  { %v14497_v13 = vld [vmem:[%s20400_s7 + $0x3d8] sm:$0xff]  ;;  %v14480_v24 = vld [vmem:[%s20400_s7 + $0x350] sm:$0xff] }
 0x533   :  { %9172 = vmatpush.bf16.msrb.mxu1 %v14439_v12  ;;  %9185 = vmatpush.bf16.msrb.mxu2 %v14447_v33  ;;  %v14496_v12 = vld [vmem:[%s20400_s7 + $0x3d0] sm:$0xff] }
 0x534   :  { %9198 = vmatpush.bf16.msrb.mxu3 %v14455_v3  ;;  %9211 = vmatpush.bf16.msra.mxu0 %v14463_v18  ;;  %v19364_v52 = vld.sshfl [vmem:[#allocation1 + $0x20] sm:$0xff pattern:$0x73625140]  ;;  %v19369_v51 = vld.sshfl [vmem:[#allocation1 + $0x28] sm:$0xff pattern:$0x73625140] }
 0x535   :  { %v19371_v57 = vld.sshfl [vmem:[#allocation1 + $0x30] sm:$0xff pattern:$0x73625140]  ;;  %v19377_v0 = vld.sshfl [vmem:[#allocation1 + $0x38] sm:$0xff pattern:$0x73625140] }
 0x536   :  { %v19379_v6 = vld.sshfl [vmem:[#allocation1] sm:$0xff pattern:$0x73625140]  ;;  %5726 = vst [vmem:[#allocation1 + $0x20] ss:$4 sm:$0xff] %v5675_v55  ;;  %v5679_v18 = vld [vmem:[#allocation5 + $0x58] sm:$0xff] }
 0x537   :  { %9173 = vmatpush.bf16.msrb.mxu1 %v14438_v46  ;;  %9186 = vmatpush.bf16.msrb.mxu2 %v14446_v42  ;;  %v19388_v58 = vld.sshfl [vmem:[#allocation1 + $0x8] sm:$0xff pattern:$0x73625140]  ;;  %v19390_v59 = vld.sshfl [vmem:[#allocation1 + $0x10] sm:$0xff pattern:$0x73625140] }
 0x538   :  { %9199 = vmatpush.bf16.msrb.mxu3 %v14454_v25  ;;  %9212 = vmatpush.bf16.msra.mxu0 %v14462_v29  ;;  %v19392_v49 = vld.sshfl [vmem:[#allocation1 + $0x18] sm:$0xff pattern:$0x73625140]  ;;  %v14471_v46 = vld [vmem:[%s20400_s7 + $0x308] sm:$0xff] }
 0x539   :  { %5735 = vst [vmem:[#allocation1] ss:$4 sm:$0xff] %v5676_v61  ;;  %v14479_v25 = vld [vmem:[%s20400_s7 + $0x348] sm:$0xff]  ;;  %v5680_v55 = vld [vmem:[#allocation5 + $0x60] sm:$0xf] }
 0x53a   :  { %9174 = vmatmul.bf16.vlgmr.msrb.gmra.mxu1 %v5816_v1  ;;  %9187 = vmatmul.bf16.vlgmr.msrb.gmra.mxu2 %v5817_v19  ;;  %v14487_v29 = vld [vmem:[%s20400_s7 + $0x388] sm:$0xff]  ;;  %v14486_v1 = vld [vmem:[%s20400_s7 + $0x380] sm:$0xff]  ;;  %v14533_v61 = vld [vmem:[%s20400_s7 + $0x4f8] sm:$0xff] }
 0x53b   :  { %9218 = vmatpush.bf16.msra.mxu1 %v14477_v60  ;;  %9231 = vmatpush.bf16.msra.mxu2 %v14485_v34  ;;  %v14495_v60 = vld [vmem:[%s20400_s7 + $0x3c8] sm:$0xff]  ;;  %v14494_v19 = vld [vmem:[%s20400_s7 + $0x3c0] sm:$0xff] }
 0x53c   :  { %9244 = vmatpush.bf16.msra.mxu3 %v14493_v56  ;;  %9257 = vmatpush.bf16.msrb.mxu0 %v14501_v62 }
 0x53d   :  { %9200 = vmatmul.bf16.vlgmr.msrb.gmra.mxu3 %v5818_v41  ;;  %9213 = vmatmul.bf16.vlgmr.msra.gmra.mxu0 %v5819_v15  ;;  %v19418_v7 = vld.sshfl [vmem:[#allocation1 + $0x20] sm:$0xff pattern:$0x73625140]  ;;  %v19420_v43 = vld.sshfl [vmem:[#allocation1 + $0x28] sm:$0xff pattern:$0x73625140] }
 0x53e   :  { %v19422_v35 = vld.sshfl [vmem:[#allocation1 + $0x30] sm:$0xff pattern:$0x73625140]  ;;  %v19424_v4 = vld.sshfl [vmem:[#allocation1 + $0x38] sm:$0xff pattern:$0x73625140] }
 0x53f   :  { %9219 = vmatpush.bf16.msra.mxu1 %v14476_v48  ;;  %9232 = vmatpush.bf16.msra.mxu2 %v14484_v10  ;;  %5736 = vst [vmem:[#allocation1 + $0x20] ss:$4 sm:$0xff] %v5677_v63  ;;  %v14470_v10 = vld [vmem:[%s20400_s7 + $0x300] sm:$0xff]  ;;  %v14509_v41 = vld [vmem:[%s20400_s7 + $0x438] sm:$0xff]  ;;  %v5823_v63 = vpack.c.bf16 %v19325_v27, %v19325_v27  ;;  %v14515_v27 = vld [vmem:[%s20400_s7 + $0x468] sm:$0xff] }
 0x540   :  { %9245 = vmatpush.bf16.msra.mxu3 %v14492_v9  ;;  %9258 = vmatpush.bf16.msrb.mxu0 %v14500_v20  ;;  %v19432_v47 = vld.sshfl [vmem:[#allocation1] sm:$0xff pattern:$0x73625140]  ;;  %v19434_v17 = vld.sshfl [vmem:[#allocation1 + $0x8] sm:$0xff pattern:$0x73625140] }
 0x541   :  { %v19436_v50 = vld.sshfl [vmem:[#allocation1 + $0x10] sm:$0xff pattern:$0x73625140]  ;;  %v19444_v14 = vld.sshfl [vmem:[#allocation1 + $0x18] sm:$0xff pattern:$0x73625140] }
 0x542   :  { %5745 = vst [vmem:[#allocation1] ss:$4 sm:$0xff] %v5678_v22  ;;  %v14478_v9 = vld [vmem:[%s20400_s7 + $0x340] sm:$0xff]  ;;  %v14517_v15 = vld [vmem:[%s20400_s7 + $0x478] sm:$0xff] }
 0x543   :  { %9220 = vmatpush.bf16.msra.mxu1 %v14475_v36  ;;  %9233 = vmatpush.bf16.msra.mxu2 %v14483_v2  ;;  %v14525_v20 = vld [vmem:[%s20400_s7 + $0x4b8] sm:$0xff]  ;;  %v5820_v36 = vpack.c.bf16 %v19314_v21, %v19314_v21  ;;  %v5821_v2 = vpack.c.bf16 %v19316_v23, %v19316_v23  ;;  %v14524_v21 = vld [vmem:[%s20400_s7 + $0x4b0] sm:$0xff]  ;;  %v14514_v22 = vld [vmem:[%s20400_s7 + $0x460] sm:$0xff] }
 0x544   :  { %9246 = vmatpush.bf16.msra.mxu3 %v14491_v54  ;;  %9259 = vmatpush.bf16.msrb.mxu0 %v14499_v28  ;;  %v14508_v54 = vld [vmem:[%s20400_s7 + $0x430] sm:$0xff] }
 0x545   :  { %v14516_v28 = vld [vmem:[%s20400_s7 + $0x470] sm:$0xff] }
 0x546   :  { %v19458_v33 = vld.sshfl [vmem:[#allocation1 + $0x20] sm:$0xff pattern:$0x73625140]  ;;  %v19460_v40 = vld.sshfl [vmem:[#allocation1 + $0x28] sm:$0xff pattern:$0x73625140] }
 0x547   :  { %9221 = vmatpush.bf16.msra.mxu1 %v14474_v16  ;;  %9234 = vmatpush.bf16.msra.mxu2 %v14482_v5  ;;  %v19462_v3 = vld.sshfl [vmem:[#allocation1 + $0x30] sm:$0xff pattern:$0x73625140]  ;;  %v19467_v42 = vld.sshfl [vmem:[#allocation1 + $0x38] sm:$0xff pattern:$0x73625140]  ;;  %v5822_v16 = vpack.c.bf16 %v19321_v45, %v19321_v45 }
 0x548   :  { %9247 = vmatpush.bf16.msra.mxu3 %v14490_v30  ;;  %9260 = vmatpush.bf16.msrb.mxu0 %v14498_v53  ;;  %5746 = vst [vmem:[#allocation1 + $0x20] ss:$4 sm:$0xff] %v5679_v18  ;;  %v14532_v23 = vld [vmem:[%s20400_s7 + $0x4f0] sm:$0xff]  ;;  %v14507_v45 = vld [vmem:[%s20400_s7 + $0x428] sm:$0xff]  ;;  %v14506_v53 = vld [vmem:[%s20400_s7 + $0x420] sm:$0xff] }
 0x549   :  { %v19478_v34 = vld.sshfl [vmem:[#allocation1] sm:$0xff pattern:$0x73625140]  ;;  %v19480_v56 = vld.sshfl [vmem:[#allocation1 + $0x8] sm:$0xff pattern:$0x73625140] }
 0x54a   :  { %v19482_v62 = vld.sshfl [vmem:[#allocation1 + $0x10] sm:$0xff pattern:$0x73625140]  ;;  %v19484_v48 = vld.sshfl [vmem:[#allocation1 + $0x18] sm:$0xff pattern:$0x73625140] }
 0x54b   :  { %9222 = vmatpush.bf16.msra.mxu1 %v14473_v11  ;;  %9235 = vmatpush.bf16.msra.mxu2 %v14481_v8  ;;  %5755 = vst [vmem:[#allocation1] ss:$4 sm:$0xff] %v5680_v55  ;;  %v14523_v5 = vld [vmem:[%s20400_s7 + $0x4a8] sm:$0xff]  ;;  %v14522_v11 = vld [vmem:[%s20400_s7 + $0x4a0] sm:$0xff]  ;;  %v14520_v18 = vld [vmem:[%s20400_s7 + $0x490] sm:$0xff] }
 0x54c   :  { %9248 = vmatpush.bf16.msra.mxu3 %v14489_v26  ;;  %9261 = vmatpush.bf16.msrb.mxu0 %v14497_v13  ;;  %v14531_v30 = vld [vmem:[%s20400_s7 + $0x4e8] sm:$0xff]  ;;  %v14530_v8 = vld [vmem:[%s20400_s7 + $0x4e0] sm:$0xff]  ;;  %v14505_v26 = vld [vmem:[%s20400_s7 + $0x418] sm:$0xff] }
 0x54d   :  { %v14513_v13 = vld [vmem:[%s20400_s7 + $0x458] sm:$0xff]  ;;  %v14527_v55 = vld [vmem:[%s20400_s7 + $0x4c8] sm:$0xff] }
 0x54f   :  { %9223 = vmatpush.bf16.msra.mxu1 %v14472_v39  ;;  %9236 = vmatpush.bf16.msra.mxu2 %v14480_v24  ;;  %v14521_v39 = vld [vmem:[%s20400_s7 + $0x498] sm:$0xff] }
 0x550   :  { %9249 = vmatpush.bf16.msra.mxu3 %v14488_v31  ;;  %9262 = vmatpush.bf16.msrb.mxu0 %v14496_v12  ;;  %v14529_v24 = vld [vmem:[%s20400_s7 + $0x4d8] sm:$0xff]  ;;  %v14504_v31 = vld [vmem:[%s20400_s7 + $0x410] sm:$0xff] }
 0x551   :  { %v14512_v12 = vld [vmem:[%s20400_s7 + $0x450] sm:$0xff] }
 0x553   :  { %9224 = vmatpush.bf16.msra.mxu1 %v14471_v46  ;;  %9237 = vmatpush.bf16.msra.mxu2 %v14479_v25  ;;  %v14528_v46 = vld [vmem:[%s20400_s7 + $0x4d0] sm:$0xff]  ;;  %v14503_v25 = vld [vmem:[%s20400_s7 + $0x408] sm:$0xff] }
 0x554   :  { %9250 = vmatpush.bf16.msra.mxu3 %v14487_v29  ;;  %9263 = vmatpush.bf16.msrb.mxu0 %v14495_v60  ;;  %v14511_v29 = vld [vmem:[%s20400_s7 + $0x448] sm:$0xff] }
 0x555   :  { %v14519_v60 = vld [vmem:[%s20400_s7 + $0x488] sm:$0xff] }
 0x557   :  { %9225 = vmatpush.bf16.msra.mxu1 %v14470_v10  ;;  %9238 = vmatpush.bf16.msra.mxu2 %v14478_v9  ;;  %v14502_v10 = vld [vmem:[%s20400_s7 + $0x400] sm:$0xff] }
 0x558   :  { %9251 = vmatpush.bf16.msra.mxu3 %v14486_v1  ;;  %9264 = vmatpush.bf16.msrb.mxu0 %v14494_v19  ;;  %v14510_v9 = vld [vmem:[%s20400_s7 + $0x440] sm:$0xff] }
 0x559   :  { %v14518_v1 = vld [vmem:[%s20400_s7 + $0x480] sm:$0xff] }
 0x55a   :  { %9226 = vmatmul.bf16.vlgmr.msra.gmra.mxu1 %v5820_v36  ;;  %9239 = vmatmul.bf16.vlgmr.msra.gmra.mxu2 %v5821_v2  ;;  %v14526_v19 = vld [vmem:[%s20400_s7 + $0x4c0] sm:$0xff]  ;;  %v5824_v36 = vpack.c.bf16 %v19306_v44, %v19306_v44  ;;  %v5825_v2 = vpack.c.bf16 %v19323_v37, %v19323_v37  ;;  %v14556_v44 = vld [vmem:[%s20400_s7 + $0x5b0] sm:$0xff] }
 0x55b   :  { %9270 = vmatpush.bf16.msrb.mxu1 %v14509_v41  ;;  %9283 = vmatpush.bf16.msrb.mxu2 %v14517_v15  ;;  %v14541_v41 = vld [vmem:[%s20400_s7 + $0x538] sm:$0xff]  ;;  %v14564_v37 = vld [vmem:[%s20400_s7 + $0x5f0] sm:$0xff] }
 0x55c   :  { %9296 = vmatpush.bf16.msrb.mxu3 %v14525_v20  ;;  %9309 = vmatpush.bf16.msra.mxu0 %v14533_v61  ;;  %v14549_v15 = vld [vmem:[%s20400_s7 + $0x578] sm:$0xff] }
 0x55d   :  { %9252 = vmatmul.bf16.vlgmr.msra.gmra.mxu3 %v5822_v16  ;;  %9265 = vmatmul.bf16.vlgmr.msrb.gmra.mxu0 %v5823_v63  ;;  %v14557_v20 = vld [vmem:[%s20400_s7 + $0x5b8] sm:$0xff]  ;;  %v5826_v16 = vpack.c.bf16 %v19327_v38, %v19327_v38  ;;  %v5827_v63 = vpack.c.bf16 %v19332_v32, %v19332_v32  ;;  %v14539_v38 = vld [vmem:[%s20400_s7 + $0x528] sm:$0xff] }
 0x55e   :  { %v14565_v61 = vld [vmem:[%s20400_s7 + $0x5f8] sm:$0xff]  ;;  %v14547_v32 = vld [vmem:[%s20400_s7 + $0x568] sm:$0xff] }
 0x55f   :  { %9271 = vmatpush.bf16.msrb.mxu1 %v14508_v54  ;;  %9284 = vmatpush.bf16.msrb.mxu2 %v14516_v28  ;;  %v14540_v54 = vld [vmem:[%s20400_s7 + $0x530] sm:$0xff] }
 0x560   :  { %9297 = vmatpush.bf16.msrb.mxu3 %v14524_v21  ;;  %9310 = vmatpush.bf16.msra.mxu0 %v14532_v23  ;;  %v14548_v28 = vld [vmem:[%s20400_s7 + $0x570] sm:$0xff]  ;;  %v14555_v21 = vld [vmem:[%s20400_s7 + $0x5a8] sm:$0xff] }
 0x561   :  { %v14563_v23 = vld [vmem:[%s20400_s7 + $0x5e8] sm:$0xff] }
 0x563   :  { %9272 = vmatpush.bf16.msrb.mxu1 %v14507_v45  ;;  %9285 = vmatpush.bf16.msrb.mxu2 %v14515_v27  ;;  %v14538_v45 = vld [vmem:[%s20400_s7 + $0x520] sm:$0xff] }
 0x564   :  { %9298 = vmatpush.bf16.msrb.mxu3 %v14523_v5  ;;  %9311 = vmatpush.bf16.msra.mxu0 %v14531_v30  ;;  %v14546_v27 = vld [vmem:[%s20400_s7 + $0x560] sm:$0xff] }
 0x565   :  { %v14554_v5 = vld [vmem:[%s20400_s7 + $0x5a0] sm:$0xff] }
 0x566   :  { %v14562_v30 = vld [vmem:[%s20400_s7 + $0x5e0] sm:$0xff] }
 0x567   :  { %9273 = vmatpush.bf16.msrb.mxu1 %v14506_v53  ;;  %9286 = vmatpush.bf16.msrb.mxu2 %v14514_v22  ;;  %v14537_v53 = vld [vmem:[%s20400_s7 + $0x518] sm:$0xff] }
 0x568   :  { %9299 = vmatpush.bf16.msrb.mxu3 %v14522_v11  ;;  %9312 = vmatpush.bf16.msra.mxu0 %v14530_v8  ;;  %v14545_v22 = vld [vmem:[%s20400_s7 + $0x558] sm:$0xff] }
 0x569   :  { %v14553_v11 = vld [vmem:[%s20400_s7 + $0x598] sm:$0xff] }
 0x56a   :  { %v14561_v8 = vld [vmem:[%s20400_s7 + $0x5d8] sm:$0xff] }
 0x56b   :  { %9274 = vmatpush.bf16.msrb.mxu1 %v14505_v26  ;;  %9287 = vmatpush.bf16.msrb.mxu2 %v14513_v13  ;;  %v14536_v26 = vld [vmem:[%s20400_s7 + $0x510] sm:$0xff] }
 0x56c   :  { %9300 = vmatpush.bf16.msrb.mxu3 %v14521_v39  ;;  %9313 = vmatpush.bf16.msra.mxu0 %v14529_v24  ;;  %v14544_v13 = vld [vmem:[%s20400_s7 + $0x550] sm:$0xff] }
 0x56d   :  { %v14552_v39 = vld [vmem:[%s20400_s7 + $0x590] sm:$0xff] }
 0x56e   :  { %v14560_v24 = vld [vmem:[%s20400_s7 + $0x5d0] sm:$0xff] }
 0x56f   :  { %9275 = vmatpush.bf16.msrb.mxu1 %v14504_v31  ;;  %9288 = vmatpush.bf16.msrb.mxu2 %v14512_v12  ;;  %v14535_v31 = vld [vmem:[%s20400_s7 + $0x508] sm:$0xff] }
 0x570   :  { %9301 = vmatpush.bf16.msrb.mxu3 %v14520_v18  ;;  %9314 = vmatpush.bf16.msra.mxu0 %v14528_v46  ;;  %v14543_v12 = vld [vmem:[%s20400_s7 + $0x548] sm:$0xff] }
 0x571   :  { %v14551_v18 = vld [vmem:[%s20400_s7 + $0x588] sm:$0xff] }
 0x572   :  { %v14559_v46 = vld [vmem:[%s20400_s7 + $0x5c8] sm:$0xff] }
 0x573   :  { %9276 = vmatpush.bf16.msrb.mxu1 %v14503_v25  ;;  %9289 = vmatpush.bf16.msrb.mxu2 %v14511_v29  ;;  %v14534_v25 = vld [vmem:[%s20400_s7 + $0x500] sm:$0xff] }
 0x574   :  { %9302 = vmatpush.bf16.msrb.mxu3 %v14519_v60  ;;  %9315 = vmatpush.bf16.msra.mxu0 %v14527_v55  ;;  %v14542_v29 = vld [vmem:[%s20400_s7 + $0x540] sm:$0xff] }
 0x575   :  { %v14550_v60 = vld [vmem:[%s20400_s7 + $0x580] sm:$0xff] }
 0x576   :  { %v14558_v55 = vld [vmem:[%s20400_s7 + $0x5c0] sm:$0xff] }
 0x577   :  { %9277 = vmatpush.bf16.msrb.mxu1 %v14502_v10  ;;  %9290 = vmatpush.bf16.msrb.mxu2 %v14510_v9  ;;  %v14573_v10 = vld [vmem:[%s20400_s7 + $0x638] sm:$0xff] }
 0x578   :  { %9303 = vmatpush.bf16.msrb.mxu3 %v14518_v1  ;;  %9316 = vmatpush.bf16.msra.mxu0 %v14526_v19  ;;  %v14581_v9 = vld [vmem:[%s20400_s7 + $0x678] sm:$0xff] }
 0x579   :  { %v14589_v1 = vld [vmem:[%s20400_s7 + $0x6b8] sm:$0xff] }
 0x57a   :  { %9278 = vmatmul.bf16.vlgmr.msrb.gmra.mxu1 %v5824_v36  ;;  %9291 = vmatmul.bf16.vlgmr.msrb.gmra.mxu2 %v5825_v2  ;;  %v14597_v19 = vld [vmem:[%s20400_s7 + $0x6f8] sm:$0xff]  ;;  %v5830_v36 = vpack.c.bf16 %v19371_v57, %v19371_v57  ;;  %v5831_v2 = vpack.c.bf16 %v19377_v0, %v19377_v0  ;;  %v14571_v57 = vld [vmem:[%s20400_s7 + $0x628] sm:$0xff] }
 0x57b   :  { %9322 = vmatpush.bf16.msra.mxu1 %v14541_v41  ;;  %9335 = vmatpush.bf16.msra.mxu2 %v14549_v15  ;;  %v5828_v41 = vpack.c.bf16 %v19364_v52, %v19364_v52  ;;  %v5829_v15 = vpack.c.bf16 %v19369_v51, %v19369_v51  ;;  %v14588_v52 = vld [vmem:[%s20400_s7 + $0x6b0] sm:$0xff]  ;;  %v14579_v0 = vld [vmem:[%s20400_s7 + $0x668] sm:$0xff] }
 0x57c   :  { %9348 = vmatpush.bf16.msra.mxu3 %v14557_v20  ;;  %9361 = vmatpush.bf16.msrb.mxu0 %v14565_v61  ;;  %v14572_v20 = vld [vmem:[%s20400_s7 + $0x630] sm:$0xff] }
 0x57d   :  { %9304 = vmatmul.bf16.vlgmr.msrb.gmra.mxu3 %v5826_v16  ;;  %9317 = vmatmul.bf16.vlgmr.msra.gmra.mxu0 %v5827_v63  ;;  %v14580_v61 = vld [vmem:[%s20400_s7 + $0x670] sm:$0xff]  ;;  %v14587_v63 = vld [vmem:[%s20400_s7 + $0x6a8] sm:$0xff] }
 0x57e   :  { %v14596_v51 = vld [vmem:[%s20400_s7 + $0x6f0] sm:$0xff] }
 0x57f   :  { %9323 = vmatpush.bf16.msra.mxu1 %v14540_v54  ;;  %9336 = vmatpush.bf16.msra.mxu2 %v14548_v28  ;;  %v14778_v28 = vld [vmem:[%s20401_s8] ss:$0 sm:$0xff] }
 0x580   :  { %9349 = vmatpush.bf16.msra.mxu3 %v14556_v44  ;;  %9362 = vmatpush.bf16.msrb.mxu0 %v14564_v37  ;;  %v14595_v44 = vld [vmem:[%s20400_s7 + $0x6e8] sm:$0xff] }
 0x583   :  { %9324 = vmatpush.bf16.msra.mxu1 %v14539_v38  ;;  %9337 = vmatpush.bf16.msra.mxu2 %v14547_v32  ;;  %v14570_v38 = vld [vmem:[%s20400_s7 + $0x620] sm:$0xff] }
 0x584   :  { %9350 = vmatpush.bf16.msra.mxu3 %v14555_v21  ;;  %9363 = vmatpush.bf16.msrb.mxu0 %v14563_v23  ;;  %v14578_v32 = vld [vmem:[%s20400_s7 + $0x660] sm:$0xff] }
 0x585   :  { %v14586_v21 = vld [vmem:[%s20400_s7 + $0x6a0] sm:$0xff] }
 0x586   :  { %v14594_v23 = vld [vmem:[%s20400_s7 + $0x6e0] sm:$0xff] }
 0x587   :  { %9325 = vmatpush.bf16.msra.mxu1 %v14538_v45  ;;  %9338 = vmatpush.bf16.msra.mxu2 %v14546_v27 }
 0x588   :  { %9351 = vmatpush.bf16.msra.mxu3 %v14554_v5  ;;  %9364 = vmatpush.bf16.msrb.mxu0 %v14562_v30 }
 0x58b   :  { %9326 = vmatpush.bf16.msra.mxu1 %v14537_v53  ;;  %9339 = vmatpush.bf16.msra.mxu2 %v14545_v22  ;;  %v14569_v22 = vld [vmem:[%s20400_s7 + $0x618] sm:$0xff] }
 0x58c   :  { %9352 = vmatpush.bf16.msra.mxu3 %v14553_v11  ;;  %9365 = vmatpush.bf16.msrb.mxu0 %v14561_v8  ;;  %v14577_v11 = vld [vmem:[%s20400_s7 + $0x658] sm:$0xff] }
 0x58f   :  { %9327 = vmatpush.bf16.msra.mxu1 %v14536_v26  ;;  %9340 = vmatpush.bf16.msra.mxu2 %v14544_v13  ;;  %v14585_v26 = vld [vmem:[%s20400_s7 + $0x698] sm:$0xff] }
 0x590   :  { %9353 = vmatpush.bf16.msra.mxu3 %v14552_v39  ;;  %9366 = vmatpush.bf16.msrb.mxu0 %v14560_v24  ;;  %v14593_v13 = vld [vmem:[%s20400_s7 + $0x6d8] sm:$0xff]  ;;  %v14568_v24 = vld [vmem:[%s20400_s7 + $0x610] sm:$0xff] }
 0x593   :  { %9328 = vmatpush.bf16.msra.mxu1 %v14535_v31  ;;  %9341 = vmatpush.bf16.msra.mxu2 %v14543_v12  ;;  %v14576_v31 = vld [vmem:[%s20400_s7 + $0x650] sm:$0xff] }
 0x594   :  { %9354 = vmatpush.bf16.msra.mxu3 %v14551_v18  ;;  %9367 = vmatpush.bf16.msrb.mxu0 %v14559_v46  ;;  %v14584_v12 = vld [vmem:[%s20400_s7 + $0x690] sm:$0xff] }
 0x595   :  { %v14592_v18 = vld [vmem:[%s20400_s7 + $0x6d0] sm:$0xff] }
 0x596   :  { %v9071_v54 = vpop.f32.mrf.mxu1 }
 0x597   :  { %9329 = vmatpush.bf16.msra.mxu1 %v14534_v25  ;;  %9342 = vmatpush.bf16.msra.mxu2 %v14542_v29  ;;  %v9110_v16 = vpop.f32.mrf.mxu0  ;;  %v9072_v37 = vadd.f32 %v14778_v28, %v9071_v54 }
 0x598   :  { %9355 = vmatpush.bf16.msra.mxu3 %v14550_v60  ;;  %9368 = vmatpush.bf16.msrb.mxu0 %v14558_v55  ;;  %v14567_v60 = vld [vmem:[%s20400_s7 + $0x608] sm:$0xff] }
 0x599   :  { %v14575_v55 = vld [vmem:[%s20400_s7 + $0x648] sm:$0xff] }
 0x59a   :  { %9330 = vmatmul.bf16.vlgmr.msra.gmra.mxu1 %v5828_v41  ;;  %9343 = vmatmul.bf16.vlgmr.msra.gmra.mxu2 %v5829_v15  ;;  %v14566_v41 = vld [vmem:[%s20400_s7 + $0x600] sm:$0xff] }
 0x59b   :  { %9374 = vmatpush.bf16.msrb.mxu1 %v14573_v10  ;;  %9387 = vmatpush.bf16.msrb.mxu2 %v14581_v9  ;;  %v14574_v15 = vld [vmem:[%s20400_s7 + $0x640] sm:$0xff] }
 0x59c   :  { %9400 = vmatpush.bf16.msrb.mxu3 %v14589_v1  ;;  %9413 = vmatpush.bf16.msra.mxu0 %v14597_v19  ;;  %v9084_v45 = vpop.f32.mrf.mxu2  ;;  %v14583_v1 = vld [vmem:[%s20400_s7 + $0x688] sm:$0xff] }
 0x59d   :  { %9356 = vmatmul.bf16.vlgmr.msra.gmra.mxu3 %v5830_v36  ;;  %9369 = vmatmul.bf16.vlgmr.msrb.gmra.mxu0 %v5831_v2  ;;  %v9085_v27 = vadd.f32 %v9084_v45, %v9072_v37  ;;  %v9097_v5 = vpop.f32.mrf.mxu3  ;;  %v14591_v19 = vld [vmem:[%s20400_s7 + $0x6c8] sm:$0xff]  ;;  %v14605_v2 = vld [vmem:[%s20400_s7 + $0x738] sm:$0xff]  ;;  %v5832_v37 = vpack.c.bf16 %v19379_v6, %v19379_v6  ;;  %v5835_v45 = vpack.c.bf16 %v19392_v49, %v19392_v49  ;;  %v14620_v6 = vld [vmem:[%s20400_s7 + $0x7b0] sm:$0xff] }
 0x59e   :  { %v9073_v30 = vpop.f32.mrf.mxu1  ;;  %v14611_v49 = vld [vmem:[%s20400_s7 + $0x768] sm:$0xff] }
 0x59f   :  { %9375 = vmatpush.bf16.msrb.mxu1 %v14572_v20  ;;  %9388 = vmatpush.bf16.msrb.mxu2 %v14580_v61  ;;  %v9098_v53 = vadd.f32 %v9097_v5, %v9085_v27  ;;  %v9112_v8 = vpop.f32.mrf.mxu0  ;;  %v14582_v20 = vld [vmem:[%s20400_s7 + $0x680] sm:$0xff]  ;;  %v14619_v30 = vld [vmem:[%s20400_s7 + $0x7a8] sm:$0xff] }
 0x5a0   :  { %9401 = vmatpush.bf16.msrb.mxu3 %v14588_v52  ;;  %9414 = vmatpush.bf16.msra.mxu0 %v14596_v51  ;;  %v14590_v61 = vld [vmem:[%s20400_s7 + $0x6c0] sm:$0xff]  ;;  %v14613_v52 = vld [vmem:[%s20400_s7 + $0x778] sm:$0xff] }
 0x5a1   :  { %v9111_v39 = vadd.f32 %v9110_v16, %v9098_v53  ;;  %v14627_v53 = vld [vmem:[%s20400_s7 + $0x7e8] sm:$0xff] }
 0x5a3   :  { %9376 = vmatpush.bf16.msrb.mxu1 %v14571_v57  ;;  %9389 = vmatpush.bf16.msrb.mxu2 %v14579_v0  ;;  %v14621_v57 = vld [vmem:[%s20400_s7 + $0x7b8] sm:$0xff] }
 0x5a4   :  { %9402 = vmatpush.bf16.msrb.mxu3 %v14587_v63  ;;  %9415 = vmatpush.bf16.msra.mxu0 %v14595_v44  ;;  %v9086_v46 = vpop.f32.mrf.mxu2  ;;  %v14629_v0 = vld [vmem:[%s20400_s7 + $0x7f8] sm:$0xff] }
 0x5a5   :  { %v9099_v25 = vpop.f32.mrf.mxu3  ;;  %v14625_v46 = vld [vmem:[%s20400_s7 + $0x7d8] sm:$0xff] }
 0x5a6   :  { %v9123_v29 = vpop.f32.mrf.mxu1 }
 0x5a7   :  { %9377 = vmatpush.bf16.msrb.mxu1 %v14570_v38  ;;  %9390 = vmatpush.bf16.msrb.mxu2 %v14578_v32  ;;  %v9124_v10 = vadd.f32 %v9123_v29, %v9111_v39  ;;  %v9162_v9 = vpop.f32.mrf.mxu0  ;;  %v5833_v38 = vpack.c.bf16 %v19388_v58, %v19388_v58  ;;  %v14604_v32 = vld [vmem:[%s20400_s7 + $0x730] sm:$0xff]  ;;  %v14618_v39 = vld [vmem:[%s20400_s7 + $0x7a0] sm:$0xff] }
 0x5a8   :  { %9403 = vmatpush.bf16.msrb.mxu3 %v14586_v21  ;;  %9416 = vmatpush.bf16.msra.mxu0 %v14594_v23  ;;  %v14612_v21 = vld [vmem:[%s20400_s7 + $0x770] sm:$0xff]  ;;  %v5834_v23 = vpack.c.bf16 %v19390_v59, %v19390_v59  ;;  %v14603_v59 = vld [vmem:[%s20400_s7 + $0x728] sm:$0xff] }
 0x5a9   :  { %v14628_v58 = vld [vmem:[%s20400_s7 + $0x7f0] sm:$0xff] }
 0x5ab   :  { %9378 = vmatpush.bf16.msrb.mxu1 %v14569_v22  ;;  %9391 = vmatpush.bf16.msrb.mxu2 %v14577_v11 }
 0x5ac   :  { %9404 = vmatpush.bf16.msrb.mxu3 %v14585_v26  ;;  %9417 = vmatpush.bf16.msra.mxu0 %v14593_v13  ;;  %v9136_v36 = vpop.f32.mrf.mxu2  ;;  %v14602_v26 = vld [vmem:[%s20400_s7 + $0x720] sm:$0xff] }
 0x5ad   :  { %v9137_v51 = vadd.f32 %v9136_v36, %v9124_v10  ;;  %v9149_v54 = vpop.f32.mrf.mxu3  ;;  %v14610_v13 = vld [vmem:[%s20400_s7 + $0x760] sm:$0xff]  ;;  %v14607_v36 = vld [vmem:[%s20400_s7 + $0x748] sm:$0xff] }
 0x5ae   :  { %v9125_v28 = vpop.f32.mrf.mxu1 }
 0x5af   :  { %9379 = vmatpush.bf16.msrb.mxu1 %v14568_v24  ;;  %9392 = vmatpush.bf16.msrb.mxu2 %v14576_v31  ;;  %v9150_v16 = vadd.f32 %v9149_v54, %v9137_v51  ;;  %v9164_v63 = vpop.f32.mrf.mxu0  ;;  %v14626_v24 = vld [vmem:[%s20400_s7 + $0x7e0] sm:$0xff]  ;;  %v14601_v31 = vld [vmem:[%s20400_s7 + $0x718] sm:$0xff] }
 0x5b0   :  { %9405 = vmatpush.bf16.msrb.mxu3 %v14584_v12  ;;  %9418 = vmatpush.bf16.msra.mxu0 %v14592_v18  ;;  %v14609_v12 = vld [vmem:[%s20400_s7 + $0x758] sm:$0xff]  ;;  %v14614_v28 = vld [vmem:[%s20400_s7 + $0x780] sm:$0xff] }
 0x5b1   :  { %v9163_v44 = vadd.f32 %v9162_v9, %v9150_v16  ;;  %v14617_v18 = vld [vmem:[%s20400_s7 + $0x798] sm:$0xff]  ;;  %v14622_v16 = vld [vmem:[%s20400_s7 + $0x7c0] sm:$0xff] }
 0x5b2   :  { %v14637_v63 = vld [vmem:[%s20400_s7 + $0x838] sm:$0xff] }
 0x5b3   :  { %9380 = vmatpush.bf16.msrb.mxu1 %v14567_v60  ;;  %9393 = vmatpush.bf16.msrb.mxu2 %v14575_v55 }
 0x5b4   :  { %9406 = vmatpush.bf16.msrb.mxu3 %v14583_v1  ;;  %9419 = vmatpush.bf16.msra.mxu0 %v14591_v19  ;;  %v9138_v27 = vpop.f32.mrf.mxu2  ;;  %v14600_v1 = vld [vmem:[%s20400_s7 + $0x710] sm:$0xff] }
 0x5b5   :  { %v9151_v5 = vpop.f32.mrf.mxu3  ;;  %v14608_v19 = vld [vmem:[%s20400_s7 + $0x750] sm:$0xff]  ;;  %v14651_v27 = vld [vmem:[%s20400_s7 + $0x8a8] sm:$0xff] }
 0x5b7   :  { %9381 = vmatpush.bf16.msrb.mxu1 %v14566_v41  ;;  %9394 = vmatpush.bf16.msrb.mxu2 %v14574_v15  ;;  %v9175_v22 = vpop.f32.mrf.mxu1  ;;  %v14616_v41 = vld [vmem:[%s20400_s7 + $0x790] sm:$0xff] }
 0x5b8   :  { %9407 = vmatpush.bf16.msrb.mxu3 %v14582_v20  ;;  %9420 = vmatpush.bf16.msra.mxu0 %v14590_v61  ;;  %v9176_v11 = vadd.f32 %v9175_v22, %v9163_v44  ;;  %v14624_v15 = vld [vmem:[%s20400_s7 + $0x7d0] sm:$0xff]  ;;  %v14599_v61 = vld [vmem:[%s20400_s7 + $0x708] sm:$0xff]  ;;  %v14645_v44 = vld [vmem:[%s20400_s7 + $0x878] sm:$0xff] }
 0x5b9   :  { %v14642_v22 = vld [vmem:[%s20400_s7 + $0x860] sm:$0xff] }
 0x5ba   :  { %9382 = vmatmul.bf16.vlgmr.msrb.gmra.mxu1 %v5832_v37  ;;  %9395 = vmatmul.bf16.vlgmr.msrb.gmra.mxu2 %v5833_v38  ;;  %v9214_v8 = vpop.f32.mrf.mxu0  ;;  %v14653_v37 = vld [vmem:[%s20400_s7 + $0x8b8] sm:$0xff] }
 0x5bb   :  { %9426 = vmatpush.bf16.msra.mxu1 %v14605_v2  ;;  %9439 = vmatpush.bf16.msra.mxu2 %v14613_v52  ;;  %v14615_v2 = vld [vmem:[%s20400_s7 + $0x788] sm:$0xff]  ;;  %v14661_v38 = vld [vmem:[%s20400_s7 + $0x8f8] sm:$0xff] }
 0x5bc   :  { %9452 = vmatpush.bf16.msra.mxu3 %v14621_v57  ;;  %9465 = vmatpush.bf16.msrb.mxu0 %v14629_v0  ;;  %v14623_v52 = vld [vmem:[%s20400_s7 + $0x7c8] sm:$0xff]  ;;  %v14598_v57 = vld [vmem:[%s20400_s7 + $0x700] sm:$0xff] }
 0x5bd   :  { %9408 = vmatmul.bf16.vlgmr.msrb.gmra.mxu3 %v5834_v23  ;;  %9421 = vmatmul.bf16.vlgmr.msra.gmra.mxu0 %v5835_v45  ;;  %v9188_v25 = vpop.f32.mrf.mxu2  ;;  %v14606_v0 = vld [vmem:[%s20400_s7 + $0x740] sm:$0xff]  ;;  %v14636_v23 = vld [vmem:[%s20400_s7 + $0x830] sm:$0xff] }
 0x5be   :  { %v9189_v29 = vadd.f32 %v9188_v25, %v9176_v11  ;;  %v14644_v45 = vld [vmem:[%s20400_s7 + $0x870] sm:$0xff]  ;;  %v14650_v11 = vld [vmem:[%s20400_s7 + $0x8a0] sm:$0xff] }
 0x5bf   :  { %9427 = vmatpush.bf16.msra.mxu1 %v14604_v32  ;;  %9440 = vmatpush.bf16.msra.mxu2 %v14612_v21  ;;  %v9177_v55 = vpop.f32.mrf.mxu1  ;;  %v5836_v32 = vpack.c.bf16 %v19418_v7, %v19418_v7  ;;  %v5837_v21 = vpack.c.bf16 %v19420_v43, %v19420_v43  ;;  %v14652_v7 = vld [vmem:[%s20400_s7 + $0x8b0] sm:$0xff] }
 0x5c0   :  { %9453 = vmatpush.bf16.msra.mxu3 %v14620_v6  ;;  %9466 = vmatpush.bf16.msrb.mxu0 %v14628_v58  ;;  %v9201_v60 = vpop.f32.mrf.mxu3  ;;  %v5838_v6 = vpack.c.bf16 %v19422_v35, %v19422_v35  ;;  %v5839_v58 = vpack.c.bf16 %v19424_v4, %v19424_v4  ;;  %v14660_v43 = vld [vmem:[%s20400_s7 + $0x8f0] sm:$0xff]  ;;  %v14635_v35 = vld [vmem:[%s20400_s7 + $0x828] sm:$0xff] }
 0x5c1   :  { %v9202_v10 = vadd.f32 %v9201_v60, %v9189_v29  ;;  %v14643_v4 = vld [vmem:[%s20400_s7 + $0x868] sm:$0xff]  ;;  %v14632_v60 = vld [vmem:[%s20400_s7 + $0x810] sm:$0xff] }
 0x5c2   :  { %v9216_v9 = vpop.f32.mrf.mxu0  ;;  %v14640_v55 = vld [vmem:[%s20400_s7 + $0x850] sm:$0xff] }
 0x5c3   :  { %9428 = vmatpush.bf16.msra.mxu1 %v14603_v59  ;;  %9441 = vmatpush.bf16.msra.mxu2 %v14611_v49  ;;  %v9215_v20 = vadd.f32 %v9214_v8, %v9202_v10  ;;  %v14659_v59 = vld [vmem:[%s20400_s7 + $0x8e8] sm:$0xff]  ;;  %v14658_v8 = vld [vmem:[%s20400_s7 + $0x8e0] sm:$0xff]  ;;  %v14648_v10 = vld [vmem:[%s20400_s7 + $0x890] sm:$0xff] }
 0x5c4   :  { %9454 = vmatpush.bf16.msra.mxu3 %v14619_v30  ;;  %9467 = vmatpush.bf16.msrb.mxu0 %v14627_v53  ;;  %v14634_v53 = vld [vmem:[%s20400_s7 + $0x820] sm:$0xff]  ;;  %v14656_v9 = vld [vmem:[%s20400_s7 + $0x8d0] sm:$0xff] }
 0x5c5   :  { %v9190_v51 = vpop.f32.mrf.mxu2 }
 0x5c6   :  { %v14646_v51 = vld [vmem:[%s20400_s7 + $0x880] sm:$0xff] }
 0x5c7   :  { %9429 = vmatpush.bf16.msra.mxu1 %v14602_v26  ;;  %9442 = vmatpush.bf16.msra.mxu2 %v14610_v13  ;;  %v14633_v26 = vld [vmem:[%s20400_s7 + $0x818] sm:$0xff] }
 0x5c8   :  { %9455 = vmatpush.bf16.msra.mxu3 %v14618_v39  ;;  %9468 = vmatpush.bf16.msrb.mxu0 %v14626_v24  ;;  %v9203_v54 = vpop.f32.mrf.mxu3  ;;  %v14641_v13 = vld [vmem:[%s20400_s7 + $0x858] sm:$0xff] }
 0x5c9   :  { %v14649_v39 = vld [vmem:[%s20400_s7 + $0x898] sm:$0xff]  ;;  %v14654_v54 = vld [vmem:[%s20400_s7 + $0x8c0] sm:$0xff] }
 0x5ca   :  { %v14657_v24 = vld [vmem:[%s20400_s7 + $0x8d8] sm:$0xff] }
 0x5cb   :  { %9430 = vmatpush.bf16.msra.mxu1 %v14601_v31  ;;  %9443 = vmatpush.bf16.msra.mxu2 %v14609_v12 }
 0x5cc   :  { %9456 = vmatpush.bf16.msra.mxu3 %v14617_v18  ;;  %9469 = vmatpush.bf16.msrb.mxu0 %v14625_v46 }
 0x5cf   :  { %9431 = vmatpush.bf16.msra.mxu1 %v14600_v1  ;;  %9444 = vmatpush.bf16.msra.mxu2 %v14608_v19  ;;  %v14631_v19 = vld [vmem:[%s20400_s7 + $0x808] sm:$0xff] }
 0x5d0   :  { %9457 = vmatpush.bf16.msra.mxu3 %v14616_v41  ;;  %9470 = vmatpush.bf16.msrb.mxu0 %v14624_v15  ;;  %v14639_v41 = vld [vmem:[%s20400_s7 + $0x848] sm:$0xff] }
 0x5d1   :  { %v14647_v15 = vld [vmem:[%s20400_s7 + $0x888] sm:$0xff] }
 0x5d3   :  { %9432 = vmatpush.bf16.msra.mxu1 %v14599_v61  ;;  %9445 = vmatpush.bf16.msra.mxu2 %v14607_v36 }
 0x5d4   :  { %9458 = vmatpush.bf16.msra.mxu3 %v14615_v2  ;;  %9471 = vmatpush.bf16.msrb.mxu0 %v14623_v52  ;;  %v14630_v2 = vld [vmem:[%s20400_s7 + $0x800] sm:$0xff] }
 0x5d5   :  { %v14638_v52 = vld [vmem:[%s20400_s7 + $0x840] sm:$0xff] }
 0x5d7   :  { %9433 = vmatpush.bf16.msra.mxu1 %v14598_v57  ;;  %9446 = vmatpush.bf16.msra.mxu2 %v14606_v0  ;;  %v9227_v49 = vpop.f32.mrf.mxu1  ;;  %v14669_v57 = vld [vmem:[%s20400_s7 + $0x938] sm:$0xff] }
 0x5d8   :  { %9459 = vmatpush.bf16.msra.mxu3 %v14614_v28  ;;  %9472 = vmatpush.bf16.msrb.mxu0 %v14622_v16  ;;  %v9228_v5 = vadd.f32 %v9227_v49, %v9215_v20  ;;  %v14655_v20 = vld [vmem:[%s20400_s7 + $0x8c8] sm:$0xff]  ;;  %v14677_v0 = vld [vmem:[%s20400_s7 + $0x978] sm:$0xff] }
 0x5d9   :  { %v14685_v28 = vld [vmem:[%s20400_s7 + $0x9b8] sm:$0xff] }
 0x5da   :  { %9434 = vmatmul.bf16.vlgmr.msra.gmra.mxu1 %v5836_v32  ;;  %9447 = vmatmul.bf16.vlgmr.msra.gmra.mxu2 %v5837_v21  ;;  %v9266_v30 = vpop.f32.mrf.mxu0  ;;  %v14693_v16 = vld [vmem:[%s20400_s7 + $0x9f8] sm:$0xff]  ;;  %v5842_v32 = vpack.c.bf16 %v19436_v50, %v19436_v50  ;;  %v5843_v21 = vpack.c.bf16 %v19444_v14, %v19444_v14  ;;  %v14667_v50 = vld [vmem:[%s20400_s7 + $0x928] sm:$0xff] }
 0x5db   :  { %9478 = vmatpush.bf16.msrb.mxu1 %v14637_v63  ;;  %9491 = vmatpush.bf16.msrb.mxu2 %v14645_v44  ;;  %v5840_v63 = vpack.c.bf16 %v19432_v47, %v19432_v47  ;;  %v5841_v44 = vpack.c.bf16 %v19434_v17, %v19434_v17  ;;  %v14684_v47 = vld [vmem:[%s20400_s7 + $0x9b0] sm:$0xff]  ;;  %v14675_v14 = vld [vmem:[%s20400_s7 + $0x968] sm:$0xff]  ;;  %v14673_v49 = vld [vmem:[%s20400_s7 + $0x958] sm:$0xff] }
 0x5dc   :  { %9504 = vmatpush.bf16.msrb.mxu3 %v14653_v37  ;;  %9517 = vmatpush.bf16.msra.mxu0 %v14661_v38  ;;  %v14668_v37 = vld [vmem:[%s20400_s7 + $0x930] sm:$0xff] }
 0x5dd   :  { %9460 = vmatmul.bf16.vlgmr.msra.gmra.mxu3 %v5838_v6  ;;  %9473 = vmatmul.bf16.vlgmr.msrb.gmra.mxu0 %v5839_v58  ;;  %v9240_v31 = vpop.f32.mrf.mxu2  ;;  %v14676_v38 = vld [vmem:[%s20400_s7 + $0x970] sm:$0xff] }
 0x5de   :  { %v9241_v12 = vadd.f32 %v9240_v31, %v9228_v5  ;;  %v14692_v17 = vld [vmem:[%s20400_s7 + $0x9f0] sm:$0xff]  ;;  %v14681_v5 = vld [vmem:[%s20400_s7 + $0x998] sm:$0xff] }
 0x5df   :  { %9479 = vmatpush.bf16.msrb.mxu1 %v14636_v23  ;;  %9492 = vmatpush.bf16.msrb.mxu2 %v14644_v45  ;;  %v9229_v46 = vpop.f32.mrf.mxu1  ;;  %v14683_v23 = vld [vmem:[%s20400_s7 + $0x9a8] sm:$0xff]  ;;  %v14680_v31 = vld [vmem:[%s20400_s7 + $0x990] sm:$0xff] }
 0x5e0   :  { %9505 = vmatpush.bf16.msrb.mxu3 %v14652_v7  ;;  %9518 = vmatpush.bf16.msra.mxu0 %v14660_v43  ;;  %v9253_v18 = vpop.f32.mrf.mxu3  ;;  %v14691_v45 = vld [vmem:[%s20400_s7 + $0x9e8] sm:$0xff]  ;;  %v14666_v43 = vld [vmem:[%s20400_s7 + $0x920] sm:$0xff] }
 0x5e1   :  { %v9254_v25 = vadd.f32 %v9253_v18, %v9241_v12  ;;  %v14688_v12 = vld [vmem:[%s20400_s7 + $0x9d0] sm:$0xff]  ;;  %v14663_v46 = vld [vmem:[%s20400_s7 + $0x908] sm:$0xff] }
 0x5e2   :  { %v9268_v29 = vpop.f32.mrf.mxu0 }
 0x5e3   :  { %9480 = vmatpush.bf16.msrb.mxu1 %v14635_v35  ;;  %9493 = vmatpush.bf16.msrb.mxu2 %v14643_v4  ;;  %v9267_v1 = vadd.f32 %v9266_v30, %v9254_v25  ;;  %v14674_v35 = vld [vmem:[%s20400_s7 + $0x960] sm:$0xff]  ;;  %v14689_v30 = vld [vmem:[%s20400_s7 + $0x9d8] sm:$0xff]  ;;  %v14671_v25 = vld [vmem:[%s20400_s7 + $0x948] sm:$0xff] }
 0x5e4   :  { %9506 = vmatpush.bf16.msrb.mxu3 %v14651_v27  ;;  %9519 = vmatpush.bf16.msra.mxu0 %v14659_v59  ;;  %v14682_v4 = vld [vmem:[%s20400_s7 + $0x9a0] sm:$0xff]  ;;  %v14665_v59 = vld [vmem:[%s20400_s7 + $0x918] sm:$0xff]  ;;  %v14679_v29 = vld [vmem:[%s20400_s7 + $0x988] sm:$0xff] }
 0x5e5   :  { %v9242_v61 = vpop.f32.mrf.mxu2  ;;  %v14690_v27 = vld [vmem:[%s20400_s7 + $0x9e0] sm:$0xff] }
 0x5e6   :  { %v14717_v61 = vld [vmem:[%s20400_s7 + $0xab8] sm:$0xff] }
 0x5e7   :  { %9481 = vmatpush.bf16.msrb.mxu1 %v14634_v53  ;;  %9494 = vmatpush.bf16.msrb.mxu2 %v14642_v22 }
 0x5e8   :  { %9507 = vmatpush.bf16.msrb.mxu3 %v14650_v11  ;;  %9520 = vmatpush.bf16.msra.mxu0 %v14658_v8  ;;  %v9255_v36 = vpop.f32.mrf.mxu3 }
 0x5e9   :  { %v14725_v36 = vld [vmem:[%s20400_s7 + $0xaf8] sm:$0xff] }
 0x5eb   :  { %9482 = vmatpush.bf16.msrb.mxu1 %v14633_v26  ;;  %9495 = vmatpush.bf16.msrb.mxu2 %v14641_v13 }
 0x5ec   :  { %9508 = vmatpush.bf16.msrb.mxu3 %v14649_v39  ;;  %9521 = vmatpush.bf16.msra.mxu0 %v14657_v24  ;;  %v14664_v39 = vld [vmem:[%s20400_s7 + $0x910] sm:$0xff] }
 0x5ed   :  { %v14672_v24 = vld [vmem:[%s20400_s7 + $0x950] sm:$0xff] }
 0x5ef   :  { %9483 = vmatpush.bf16.msrb.mxu1 %v14632_v60  ;;  %9496 = vmatpush.bf16.msrb.mxu2 %v14640_v55  ;;  %v14687_v60 = vld [vmem:[%s20400_s7 + $0x9c8] sm:$0xff] }
 0x5f0   :  { %9509 = vmatpush.bf16.msrb.mxu3 %v14648_v10  ;;  %9522 = vmatpush.bf16.msra.mxu0 %v14656_v9  ;;  %v14662_v9 = vld [vmem:[%s20400_s7 + $0x900] sm:$0xff] }
 0x5f3   :  { %9484 = vmatpush.bf16.msrb.mxu1 %v14631_v19  ;;  %9497 = vmatpush.bf16.msrb.mxu2 %v14639_v41  ;;  %v14678_v19 = vld [vmem:[%s20400_s7 + $0x980] sm:$0xff] }
 0x5f4   :  { %9510 = vmatpush.bf16.msrb.mxu3 %v14647_v15  ;;  %9523 = vmatpush.bf16.msra.mxu0 %v14655_v20  ;;  %v14686_v41 = vld [vmem:[%s20400_s7 + $0x9c0] sm:$0xff]  ;;  %v14701_v15 = vld [vmem:[%s20400_s7 + $0xa38] sm:$0xff] }
 0x5f5   :  { %v14709_v20 = vld [vmem:[%s20400_s7 + $0xa78] sm:$0xff] }
 0x5f7   :  { %9485 = vmatpush.bf16.msrb.mxu1 %v14630_v2  ;;  %9498 = vmatpush.bf16.msrb.mxu2 %v14638_v52  ;;  %v9279_v6 = vpop.f32.mrf.mxu1  ;;  %v5844_v2 = vpack.c.bf16 %v19458_v33, %v19458_v33  ;;  %v5845_v52 = vpack.c.bf16 %v19460_v40, %v19460_v40  ;;  %v14716_v33 = vld [vmem:[%s20400_s7 + $0xab0] sm:$0xff] }
 0x5f8   :  { %9511 = vmatpush.bf16.msrb.mxu3 %v14646_v51  ;;  %9524 = vmatpush.bf16.msra.mxu0 %v14654_v54  ;;  %v9280_v58 = vadd.f32 %v9279_v6, %v9267_v1  ;;  %v14670_v1 = vld [vmem:[%s20400_s7 + $0x940] sm:$0xff]  ;;  %v14700_v51 = vld [vmem:[%s20400_s7 + $0xa30] sm:$0xff] }
 0x5f9   :  { %v14708_v54 = vld [vmem:[%s20400_s7 + $0xa70] sm:$0xff] }
 0x5fa   :  { %9486 = vmatmul.bf16.vlgmr.msrb.gmra.mxu1 %v5840_v63  ;;  %9499 = vmatmul.bf16.vlgmr.msrb.gmra.mxu2 %v5841_v44  ;;  %v9318_v7 = vpop.f32.mrf.mxu0  ;;  %v14724_v40 = vld [vmem:[%s20400_s7 + $0xaf0] sm:$0xff] }
 0x5fb   :  { %9530 = vmatpush.bf16.msra.mxu1 %v14669_v57  ;;  %9543 = vmatpush.bf16.msra.mxu2 %v14677_v0  ;;  %v5846_v57 = vpack.c.bf16 %v19462_v3, %v19462_v3  ;;  %v5847_v0 = vpack.c.bf16 %v19467_v42, %v19467_v42  ;;  %v14699_v3 = vld [vmem:[%s20400_s7 + $0xa28] sm:$0xff] }
 0x5fc   :  { %9556 = vmatpush.bf16.msra.mxu3 %v14685_v28  ;;  %9569 = vmatpush.bf16.msrb.mxu0 %v14693_v16  ;;  %v14707_v42 = vld [vmem:[%s20400_s7 + $0xa68] sm:$0xff] }
 0x5fd   :  { %9512 = vmatmul.bf16.vlgmr.msrb.gmra.mxu3 %v5842_v32  ;;  %9525 = vmatmul.bf16.vlgmr.msra.gmra.mxu0 %v5843_v21  ;;  %v9292_v53 = vpop.f32.mrf.mxu2  ;;  %v14715_v28 = vld [vmem:[%s20400_s7 + $0xaa8] sm:$0xff]  ;;  %v14706_v32 = vld [vmem:[%s20400_s7 + $0xa60] sm:$0xff] }
 0x5fe   :  { %v9293_v22 = vadd.f32 %v9292_v53, %v9280_v58  ;;  %v14723_v16 = vld [vmem:[%s20400_s7 + $0xae8] sm:$0xff]  ;;  %v14714_v21 = vld [vmem:[%s20400_s7 + $0xaa0] sm:$0xff] }
 0x5ff   :  { %9531 = vmatpush.bf16.msra.mxu1 %v14668_v37  ;;  %9544 = vmatpush.bf16.msra.mxu2 %v14676_v38  ;;  %v9281_v8 = vpop.f32.mrf.mxu1  ;;  %v14698_v38 = vld [vmem:[%s20400_s7 + $0xa20] sm:$0xff]  ;;  %v14703_v53 = vld [vmem:[%s20400_s7 + $0xa48] sm:$0xff] }
 0x600   :  { %9557 = vmatpush.bf16.msra.mxu3 %v14684_v47  ;;  %9570 = vmatpush.bf16.msrb.mxu0 %v14692_v17  ;;  %v9305_v11 = vpop.f32.mrf.mxu3  ;;  %v14722_v47 = vld [vmem:[%s20400_s7 + $0xae0] sm:$0xff]  ;;  %v14697_v17 = vld [vmem:[%s20400_s7 + $0xa18] sm:$0xff] }
 0x601   :  { %v9306_v26 = vadd.f32 %v9305_v11, %v9293_v22  ;;  %v14711_v22 = vld [vmem:[%s20400_s7 + $0xa88] sm:$0xff] }
 0x602   :  { %v9320_v13 = vpop.f32.mrf.mxu0  ;;  %v14719_v11 = vld [vmem:[%s20400_s7 + $0xac8] sm:$0xff] }
 0x603   :  { %9532 = vmatpush.bf16.msra.mxu1 %v14667_v50  ;;  %9545 = vmatpush.bf16.msra.mxu2 %v14675_v14  ;;  %v9319_v18 = vadd.f32 %v9318_v7, %v9306_v26  ;;  %v14705_v50 = vld [vmem:[%s20400_s7 + $0xa58] sm:$0xff]  ;;  %v14694_v13 = vld [vmem:[%s20400_s7 + $0xa00] sm:$0xff] }
 0x604   :  { %9558 = vmatpush.bf16.msra.mxu3 %v14683_v23  ;;  %9571 = vmatpush.bf16.msrb.mxu0 %v14691_v45  ;;  %v14713_v14 = vld [vmem:[%s20400_s7 + $0xa98] sm:$0xff] }
 0x605   :  { %v9294_v55 = vpop.f32.mrf.mxu2  ;;  %v14721_v23 = vld [vmem:[%s20400_s7 + $0xad8] sm:$0xff] }
 0x606   :  { %v14732_v55 = vld [vmem:[%s20400_s7 + $0xb30] sm:$0xff] }
 0x607   :  { %9533 = vmatpush.bf16.msra.mxu1 %v14666_v43  ;;  %9546 = vmatpush.bf16.msra.mxu2 %v14674_v35 }
 0x608   :  { %9559 = vmatpush.bf16.msra.mxu3 %v14682_v4  ;;  %9572 = vmatpush.bf16.msrb.mxu0 %v14690_v27  ;;  %v9307_v10 = vpop.f32.mrf.mxu3  ;;  %v14696_v4 = vld [vmem:[%s20400_s7 + $0xa10] sm:$0xff] }
 0x609   :  { %v14704_v27 = vld [vmem:[%s20400_s7 + $0xa50] sm:$0xff] }
 0x60a   :  { %v14740_v10 = vld [vmem:[%s20400_s7 + $0xb70] sm:$0xff] }
 0x60b   :  { %9534 = vmatpush.bf16.msra.mxu1 %v14665_v59  ;;  %9547 = vmatpush.bf16.msra.mxu2 %v14673_v49  ;;  %v14712_v59 = vld [vmem:[%s20400_s7 + $0xa90] sm:$0xff] }
 0x60c   :  { %9560 = vmatpush.bf16.msra.mxu3 %v14681_v5  ;;  %9573 = vmatpush.bf16.msrb.mxu0 %v14689_v30  ;;  %v14720_v49 = vld [vmem:[%s20400_s7 + $0xad0] sm:$0xff]  ;;  %v14695_v30 = vld [vmem:[%s20400_s7 + $0xa08] sm:$0xff] }
 0x60f   :  { %9535 = vmatpush.bf16.msra.mxu1 %v14664_v39  ;;  %9548 = vmatpush.bf16.msra.mxu2 %v14672_v24  ;;  %v14702_v39 = vld [vmem:[%s20400_s7 + $0xa40] sm:$0xff] }
 0x610   :  { %9561 = vmatpush.bf16.msra.mxu3 %v14680_v31  ;;  %9574 = vmatpush.bf16.msrb.mxu0 %v14688_v12  ;;  %v14710_v24 = vld [vmem:[%s20400_s7 + $0xa80] sm:$0xff]  ;;  %v14733_v12 = vld [vmem:[%s20400_s7 + $0xb38] sm:$0xff] }
 0x611   :  { %v14718_v31 = vld [vmem:[%s20400_s7 + $0xac0] sm:$0xff] }
 0x613   :  { %9536 = vmatpush.bf16.msra.mxu1 %v14663_v46  ;;  %9549 = vmatpush.bf16.msra.mxu2 %v14671_v25  ;;  %v14749_v46 = vld [vmem:[%s20400_s7 + $0xbb8] sm:$0xff] }
 0x614   :  { %9562 = vmatpush.bf16.msra.mxu3 %v14679_v29  ;;  %9575 = vmatpush.bf16.msrb.mxu0 %v14687_v60  ;;  %v14757_v25 = vld [vmem:[%s20400_s7 + $0xbf8] sm:$0xff]  ;;  %v5848_v29 = vpack.c.bf16 %v19478_v34, %v19478_v34  ;;  %v5849_v60 = vpack.c.bf16 %v19480_v56, %v19480_v56  ;;  %v14748_v34 = vld [vmem:[%s20400_s7 + $0xbb0] sm:$0xff] }
 0x615   :  { %v14756_v56 = vld [vmem:[%s20400_s7 + $0xbf0] sm:$0xff] }
 0x617   :  { %9537 = vmatpush.bf16.msra.mxu1 %v14662_v9  ;;  %9550 = vmatpush.bf16.msra.mxu2 %v14670_v1  ;;  %v9331_v63 = vpop.f32.mrf.mxu1  ;;  %v5850_v9 = vpack.c.bf16 %v19482_v62, %v19482_v62  ;;  %v5851_v1 = vpack.c.bf16 %v19484_v48, %v19484_v48  ;;  %v14731_v62 = vld [vmem:[%s20400_s7 + $0xb28] sm:$0xff] }
 0x618   :  { %9563 = vmatpush.bf16.msra.mxu3 %v14678_v19  ;;  %9576 = vmatpush.bf16.msrb.mxu0 %v14686_v41  ;;  %v9332_v44 = vadd.f32 %v9331_v63, %v9319_v18  ;;  %v14741_v18 = vld [vmem:[%s20400_s7 + $0xb78] sm:$0xff]  ;;  %v14739_v48 = vld [vmem:[%s20400_s7 + $0xb68] sm:$0xff] }
 0x619   :  { %v14747_v19 = vld [vmem:[%s20400_s7 + $0xba8] sm:$0xff] }
 0x61a   :  { %9538 = vmatmul.bf16.vlgmr.msra.gmra.mxu1 %v5844_v2  ;;  %9551 = vmatmul.bf16.vlgmr.msra.gmra.mxu2 %v5845_v52  ;;  %v9370_v37 = vpop.f32.mrf.mxu0  ;;  %v14755_v41 = vld [vmem:[%s20400_s7 + $0xbe8] sm:$0xff]  ;;  %v14738_v2 = vld [vmem:[%s20400_s7 + $0xb60] sm:$0xff] }
 0x61b   :  { %9582 = vmatpush.bf16.msrb.mxu1 %v14701_v15  ;;  %9595 = vmatpush.bf16.msrb.mxu2 %v14709_v20  ;;  %v14746_v52 = vld [vmem:[%s20400_s7 + $0xba0] sm:$0xff] }
 0x61c   :  { %9608 = vmatpush.bf16.msrb.mxu3 %v14717_v61  ;;  %9621 = vmatpush.bf16.msra.mxu0 %v14725_v36  ;;  %v14730_v36 = vld [vmem:[%s20400_s7 + $0xb20] sm:$0xff] }
 0x61d   :  { %9564 = vmatmul.bf16.vlgmr.msra.gmra.mxu3 %v5846_v57  ;;  %9577 = vmatmul.bf16.vlgmr.msrb.gmra.mxu0 %v5847_v0  ;;  %v9344_v45 = vpop.f32.mrf.mxu2  ;;  %v14737_v57 = vld [vmem:[%s20400_s7 + $0xb58] sm:$0xff] }
 0x61e   :  { %v9345_v6 = vadd.f32 %v9344_v45, %v9332_v44  ;;  %v14745_v0 = vld [vmem:[%s20400_s7 + $0xb98] sm:$0xff]  ;;  %v14728_v44 = vld [vmem:[%s20400_s7 + $0xb10] sm:$0xff] }
 0x61f   :  { %9583 = vmatpush.bf16.msrb.mxu1 %v14700_v51  ;;  %9596 = vmatpush.bf16.msrb.mxu2 %v14708_v54  ;;  %v9333_v7 = vpop.f32.mrf.mxu1  ;;  %v14754_v51 = vld [vmem:[%s20400_s7 + $0xbe0] sm:$0xff]  ;;  %v14729_v54 = vld [vmem:[%s20400_s7 + $0xb18] sm:$0xff] }
 0x620   :  { %9609 = vmatpush.bf16.msrb.mxu3 %v14716_v33  ;;  %9622 = vmatpush.bf16.msra.mxu0 %v14724_v40  ;;  %v9357_v58 = vpop.f32.mrf.mxu3  ;;  %v14753_v33 = vld [vmem:[%s20400_s7 + $0xbd8] sm:$0xff]  ;;  %v14742_v7 = vld [vmem:[%s20400_s7 + $0xb80] sm:$0xff] }
 0x621   :  { %v9358_v43 = vadd.f32 %v9357_v58, %v9345_v6  ;;  %v14726_v6 = vld [vmem:[%s20400_s7 + $0xb00] sm:$0xff] }
 0x622   :  { %v9372_v35 = vpop.f32.mrf.mxu0  ;;  %v14734_v58 = vld [vmem:[%s20400_s7 + $0xb40] sm:$0xff] }
 0x623   :  { %9584 = vmatpush.bf16.msrb.mxu1 %v14699_v3  ;;  %9597 = vmatpush.bf16.msrb.mxu2 %v14707_v42  ;;  %v9371_v5 = vadd.f32 %v9370_v37, %v9358_v43  ;;  %v14736_v37 = vld [vmem:[%s20400_s7 + $0xb50] sm:$0xff]  ;;  %v14750_v43 = vld [vmem:[%s20400_s7 + $0xbc0] sm:$0xff] }
 0x624   :  { %9610 = vmatpush.bf16.msrb.mxu3 %v14715_v28  ;;  %9623 = vmatpush.bf16.msra.mxu0 %v14723_v16  ;;  %v5751_v35 = vld.sshfl [vmem:[#allocation1 + $0x20] sm:$0xff pattern:$0x73625140] }
 0x625   :  { %v9346_v8 = vpop.f32.mrf.mxu2 }
 0x626   :  { %v14764_v8 = vld [vmem:[%s20400_s7 + $0xc30] sm:$0xff] }
 0x627   :  { %9585 = vmatpush.bf16.msrb.mxu1 %v14698_v38  ;;  %9598 = vmatpush.bf16.msrb.mxu2 %v14706_v32  ;;  %v14744_v38 = vld [vmem:[%s20400_s7 + $0xb90] sm:$0xff] }
 0x628   :  { %9611 = vmatpush.bf16.msrb.mxu3 %v14714_v21  ;;  %9624 = vmatpush.bf16.msra.mxu0 %v14722_v47  ;;  %v9359_v26 = vpop.f32.mrf.mxu3  ;;  %v14752_v32 = vld [vmem:[%s20400_s7 + $0xbd0] sm:$0xff]  ;;  %v14727_v47 = vld [vmem:[%s20400_s7 + $0xb08] sm:$0xff] }
 0x629   :  { %v14772_v26 = vld [vmem:[%s20400_s7 + $0xc70] sm:$0xff] }
 0x62b   :  { %9586 = vmatpush.bf16.msrb.mxu1 %v14697_v17  ;;  %9599 = vmatpush.bf16.msrb.mxu2 %v14705_v50  ;;  %v14735_v17 = vld [vmem:[%s20400_s7 + $0xb48] sm:$0xff] }
 0x62c   :  { %9612 = vmatpush.bf16.msrb.mxu3 %v14713_v14  ;;  %9625 = vmatpush.bf16.msra.mxu0 %v14721_v23  ;;  %v14743_v50 = vld [vmem:[%s20400_s7 + $0xb88] sm:$0xff] }
 0x62d   :  { %v14751_v14 = vld [vmem:[%s20400_s7 + $0xbc8] sm:$0xff] }
 0x62f   :  { %9587 = vmatpush.bf16.msrb.mxu1 %v14696_v4  ;;  %9600 = vmatpush.bf16.msrb.mxu2 %v14704_v27  ;;  %v14765_v4 = vld [vmem:[%s20400_s7 + $0xc38] sm:$0xff] }
 0x630   :  { %9613 = vmatpush.bf16.msrb.mxu3 %v14712_v59  ;;  %9626 = vmatpush.bf16.msra.mxu0 %v14720_v49  ;;  %v14773_v27 = vld [vmem:[%s20400_s7 + $0xc78] sm:$0xff]  ;;  %v5752_v59 = vld.sshfl [vmem:[#allocation1 + $0x28] sm:$0xff pattern:$0x73625140] }
 0x631   :  { %v5753_v49 = vld.sshfl [vmem:[#allocation1 + $0x30] sm:$0xff pattern:$0x73625140] }
 0x633   :  { %9588 = vmatpush.bf16.msrb.mxu1 %v14695_v30  ;;  %9601 = vmatpush.bf16.msrb.mxu2 %v14703_v53  ;;  %v5852_v30 = vpack.c.bf16 %v5751_v35, %v5751_v35  ;;  %v5853_v53 = vpack.c.bf16 %v5752_v59, %v5752_v59 }
 0x634   :  { %9614 = vmatpush.bf16.msrb.mxu3 %v14711_v22  ;;  %9627 = vmatpush.bf16.msra.mxu0 %v14719_v11  ;;  %v5854_v22 = vpack.c.bf16 %v5753_v49, %v5753_v49 }
 0x637   :  { %9589 = vmatpush.bf16.msrb.mxu1 %v14694_v13  ;;  %9602 = vmatpush.bf16.msrb.mxu2 %v14702_v39  ;;  %v9383_v15 = vpop.f32.mrf.mxu1  ;;  %v14763_v13 = vld [vmem:[%s20400_s7 + $0xc28] sm:$0xff] }
 0x638   :  { %9615 = vmatpush.bf16.msrb.mxu3 %v14710_v24  ;;  %9628 = vmatpush.bf16.msra.mxu0 %v14718_v31  ;;  %v9384_v20 = vadd.f32 %v9383_v15, %v9371_v5  ;;  %v5754_v5 = vld.sshfl [vmem:[#allocation1 + $0x38] sm:$0xff pattern:$0x73625140]  ;;  %v14771_v39 = vld [vmem:[%s20400_s7 + $0xc68] sm:$0xff] }
 0x639   :  { %v5855_v11 = vpack.c.bf16 %v5754_v5, %v5754_v5 }
 0x63a   :  { %9590 = vmatmul.bf16.vlgmr.msrb.gmra.mxu1 %v5848_v29  ;;  %9603 = vmatmul.bf16.vlgmr.msrb.gmra.mxu2 %v5849_v60  ;;  %v9422_v61 = vpop.f32.mrf.mxu0  ;;  %v14769_v29 = vld [vmem:[%s20400_s7 + $0xc58] sm:$0xff] }
 0x63b   :  { %9634 = vmatpush.bf16.msra.mxu1 %v14733_v12  ;;  %9647 = vmatpush.bf16.msra.mxu2 %v14741_v18  ;;  %v14762_v18 = vld [vmem:[%s20400_s7 + $0xc20] sm:$0xff] }
 0x63c   :  { %9660 = vmatpush.bf16.msra.mxu3 %v14749_v46  ;;  %9673 = vmatpush.bf16.msrb.mxu0 %v14757_v25  ;;  %v14770_v46 = vld [vmem:[%s20400_s7 + $0xc60] sm:$0xff]  ;;  %v14761_v25 = vld [vmem:[%s20400_s7 + $0xc18] sm:$0xff] }
 0x63d   :  { %9616 = vmatmul.bf16.vlgmr.msrb.gmra.mxu3 %v5850_v9  ;;  %9629 = vmatmul.bf16.vlgmr.msra.gmra.mxu0 %v5851_v1  ;;  %v9396_v40 = vpop.f32.mrf.mxu2 }
 0x63e   :  { %v9397_v3 = vadd.f32 %v9396_v40, %v9384_v20 }
 0x63f   :  { %9635 = vmatpush.bf16.msra.mxu1 %v14732_v55  ;;  %9648 = vmatpush.bf16.msra.mxu2 %v14740_v10  ;;  %v9385_v28 = vpop.f32.mrf.mxu1 }
 0x640   :  { %9661 = vmatpush.bf16.msra.mxu3 %v14748_v34  ;;  %9674 = vmatpush.bf16.msrb.mxu0 %v14756_v56  ;;  %v9409_v42 = vpop.f32.mrf.mxu3  ;;  %v14760_v56 = vld [vmem:[%s20400_s7 + $0xc10] sm:$0xff] }
 0x641   :  { %v9410_v16 = vadd.f32 %v9409_v42, %v9397_v3 }
 0x642   :  { %v9424_v63 = vpop.f32.mrf.mxu0 }
 0x643   :  { %9636 = vmatpush.bf16.msra.mxu1 %v14731_v62  ;;  %9649 = vmatpush.bf16.msra.mxu2 %v14739_v48  ;;  %v9423_v21 = vadd.f32 %v9422_v61, %v9410_v16  ;;  %v14768_v62 = vld [vmem:[%s20400_s7 + $0xc50] sm:$0xff]  ;;  %v14758_v61 = vld [vmem:[%s20400_s7 + $0xc00] sm:$0xff] }
 0x644   :  { %9662 = vmatpush.bf16.msra.mxu3 %v14747_v19  ;;  %9675 = vmatpush.bf16.msrb.mxu0 %v14755_v41  ;;  %v14759_v19 = vld [vmem:[%s20400_s7 + $0xc08] sm:$0xff] }
 0x645   :  { %v9398_v23 = vpop.f32.mrf.mxu2  ;;  %v14767_v41 = vld [vmem:[%s20400_s7 + $0xc48] sm:$0xff] }
 0x647   :  { %9637 = vmatpush.bf16.msra.mxu1 %v14730_v36  ;;  %9650 = vmatpush.bf16.msra.mxu2 %v14738_v2  ;;  %v14766_v36 = vld [vmem:[%s20400_s7 + $0xc40] sm:$0xff] }
 0x648   :  { %9663 = vmatpush.bf16.msra.mxu3 %v14746_v52  ;;  %9676 = vmatpush.bf16.msrb.mxu0 %v14754_v51  ;;  %v9411_v45 = vpop.f32.mrf.mxu3  ;;  %v5756_v2 = vld.sshfl [vmem:[#allocation1] sm:$0xff pattern:$0x73625140]  ;;  %v5757_v52 = vld.sshfl [vmem:[#allocation1 + $0x8] sm:$0xff pattern:$0x73625140] }
 0x649   :  { %v5856_v51 = vpack.c.bf16 %v5756_v2, %v5756_v2 }
 0x64b   :  { %9638 = vmatpush.bf16.msra.mxu1 %v14729_v54  ;;  %9651 = vmatpush.bf16.msra.mxu2 %v14737_v57  ;;  %v5857_v54 = vpack.c.bf16 %v5757_v52, %v5757_v52 }
 0x64c   :  { %9664 = vmatpush.bf16.msra.mxu3 %v14745_v0  ;;  %9677 = vmatpush.bf16.msrb.mxu0 %v14753_v33 }
 0x64f   :  { %9639 = vmatpush.bf16.msra.mxu1 %v14728_v44  ;;  %9652 = vmatpush.bf16.msra.mxu2 %v14736_v37 }
 0x650   :  { %9665 = vmatpush.bf16.msra.mxu3 %v14744_v38  ;;  %9678 = vmatpush.bf16.msrb.mxu0 %v14752_v32 }
 0x653   :  { %9640 = vmatpush.bf16.msra.mxu1 %v14727_v47  ;;  %9653 = vmatpush.bf16.msra.mxu2 %v14735_v17 }
 0x654   :  { %9666 = vmatpush.bf16.msra.mxu3 %v14743_v50  ;;  %9679 = vmatpush.bf16.msrb.mxu0 %v14751_v14 }
 0x657   :  { %9641 = vmatpush.bf16.msra.mxu1 %v14726_v6  ;;  %9654 = vmatpush.bf16.msra.mxu2 %v14734_v58  ;;  %v9435_v24 = vpop.f32.mrf.mxu1 }
 0x658   :  { %9667 = vmatpush.bf16.msra.mxu3 %v14742_v7  ;;  %9680 = vmatpush.bf16.msrb.mxu0 %v14750_v43  ;;  %v9436_v31 = vadd.f32 %v9435_v24, %v9423_v21 }
 0x65a   :  { %9642 = vmatmul.bf16.vlgmr.msra.gmra.mxu1 %v5852_v30  ;;  %9655 = vmatmul.bf16.vlgmr.msra.gmra.mxu2 %v5853_v53  ;;  %v9474_v12 = vpop.f32.mrf.mxu0  ;;  %v14775_v30 = vld [vmem:[%s20402_s9 + $0x8] sm:$0xff] }
 0x65b   :  { %9686 = vmatpush.bf16.msrb.mxu1 %v14765_v4  ;;  %9699 = vmatpush.bf16.msrb.mxu2 %v14773_v27 }
 0x65c   :  { %9668 = vmatmul.bf16.vlgmr.msra.gmra.mxu3 %v5854_v22  ;;  %9681 = vmatmul.bf16.vlgmr.msrb.gmra.mxu0 %v5855_v11  ;;  %v14774_v11 = vld [vmem:[%s20402_s9] sm:$0xff] }
 0x65d   :  { %v9448_v60 = vpop.f32.mrf.mxu2  ;;  %9744 = vmatpush.bf16.msrb.mxu3 %v14775_v30 }
 0x65e   :  { %v9449_v55 = vadd.f32 %v9448_v60, %v9436_v31 }
 0x65f   :  { %9687 = vmatpush.bf16.msrb.mxu1 %v14764_v8  ;;  %9700 = vmatpush.bf16.msrb.mxu2 %v14772_v26  ;;  %v9437_v9 = vpop.f32.mrf.mxu1 }
 0x660   :  { %v9461_v10 = vpop.f32.mrf.mxu3 }
 0x661   :  { %v9462_v1 = vadd.f32 %v9461_v10, %v9449_v55  ;;  %9745 = vmatpush.bf16.msrb.mxu3 %v14774_v11 }
 0x662   :  { %v9476_v34 = vpop.f32.mrf.mxu0 }
 0x663   :  { %9688 = vmatpush.bf16.msrb.mxu1 %v14763_v13  ;;  %9701 = vmatpush.bf16.msrb.mxu2 %v14771_v39  ;;  %v9475_v48 = vadd.f32 %v9474_v12, %v9462_v1 }
 0x665   :  { %v9450_v15 = vpop.f32.mrf.mxu2 }
 0x667   :  { %9689 = vmatpush.bf16.msrb.mxu1 %v14762_v18  ;;  %9702 = vmatpush.bf16.msrb.mxu2 %v14770_v46 }
 0x668   :  { %v9463_v20 = vpop.f32.mrf.mxu3 }
 0x66b   :  { %9690 = vmatpush.bf16.msrb.mxu1 %v14761_v25  ;;  %9703 = vmatpush.bf16.msrb.mxu2 %v14769_v29 }
 0x66f   :  { %9691 = vmatpush.bf16.msrb.mxu1 %v14760_v56  ;;  %9704 = vmatpush.bf16.msrb.mxu2 %v14768_v62 }
 0x673   :  { %9692 = vmatpush.bf16.msrb.mxu1 %v14759_v19  ;;  %9705 = vmatpush.bf16.msrb.mxu2 %v14767_v41 }
 0x677   :  { %9693 = vmatpush.bf16.msrb.mxu1 %v14758_v61  ;;  %9706 = vmatpush.bf16.msrb.mxu2 %v14766_v36  ;;  %v9487_v57 = vpop.f32.mrf.mxu1  ;;  %v14779_v61 = vld [vmem:[%s20403_s10] ss:$0 sm:$0xff] }
 0x678   :  { %v9488_v0 = vadd.f32 %v9487_v57, %v9475_v48 }
 0x67a   :  { %9694 = vmatmul.bf16.vlgmr.msrb.gmra.mxu1 %v5856_v51  ;;  %9707 = vmatmul.bf16.vlgmr.msrb.gmra.mxu2 %v5857_v54  ;;  %v9526_v33 = vpop.f32.mrf.mxu0 }
 0x67d   :  { %v9500_v40 = vpop.f32.mrf.mxu2 }
 0x67e   :  { %v9501_v3 = vadd.f32 %v9500_v40, %v9488_v0 }
 0x67f   :  { %v9489_v28 = vpop.f32.mrf.mxu1 }
 0x680   :  { %v9513_v42 = vpop.f32.mrf.mxu3 }
 0x681   :  { %v9514_v16 = vadd.f32 %v9513_v42, %v9501_v3 }
 0x682   :  { %v9528_v63 = vpop.f32.mrf.mxu0 }
 0x683   :  { %v9527_v44 = vadd.f32 %v9526_v33, %v9514_v16 }
 0x685   :  { %v9502_v37 = vpop.f32.mrf.mxu2 }
 0x688   :  { %v9515_v38 = vpop.f32.mrf.mxu3 }
 0x697   :  { %v9539_v32 = vpop.f32.mrf.mxu1 }
 0x698   :  { %v9540_v21 = vadd.f32 %v9539_v32, %v9527_v44 }
 0x69a   :  { %v9578_v47 = vpop.f32.mrf.mxu0 }
 0x69d   :  { %v9552_v17 = vpop.f32.mrf.mxu2 }
 0x69e   :  { %v9553_v50 = vadd.f32 %v9552_v17, %v9540_v21 }
 0x69f   :  { %v9541_v23 = vpop.f32.mrf.mxu1 }
 0x6a0   :  { %v9565_v14 = vpop.f32.mrf.mxu3 }
 0x6a1   :  { %v9566_v45 = vadd.f32 %v9565_v14, %v9553_v50 }
 0x6a2   :  { %v9580_v6 = vpop.f32.mrf.mxu0 }
 0x6a3   :  { %v9579_v58 = vadd.f32 %v9578_v47, %v9566_v45 }
 0x6a5   :  { %v9554_v7 = vpop.f32.mrf.mxu2 }
 0x6a8   :  { %v9567_v43 = vpop.f32.mrf.mxu3 }
 0x6b7   :  { %v9591_v35 = vpop.f32.mrf.mxu1 }
 0x6b8   :  { %v9592_v12 = vadd.f32 %v9591_v35, %v9579_v58 }
 0x6ba   :  { %v9630_v4 = vpop.f32.mrf.mxu0 }
 0x6bd   :  { %v9604_v27 = vpop.f32.mrf.mxu2 }
 0x6be   :  { %v9605_v18 = vadd.f32 %v9604_v27, %v9592_v12 }
 0x6bf   :  { %v9593_v49 = vpop.f32.mrf.mxu1 }
 0x6c0   :  { %v9617_v59 = vpop.f32.mrf.mxu3 }
 0x6c1   :  { %v9618_v29 = vadd.f32 %v9617_v59, %v9605_v18 }
 0x6c2   :  { %v9632_v5 = vpop.f32.mrf.mxu0 }
 0x6c3   :  { %v9631_v60 = vadd.f32 %v9630_v4, %v9618_v29 }
 0x6c5   :  { %v9606_v53 = vpop.f32.mrf.mxu2 }
 0x6c8   :  { %v9619_v22 = vpop.f32.mrf.mxu3 }
 0x6d7   :  { %v9643_v8 = vpop.f32.mrf.mxu1 }
 0x6d8   :  { %v9644_v55 = vadd.f32 %v9643_v8, %v9631_v60 }
 0x6d9   :  { %v9682_v26 = vpop.f32.mrf.mxu0 }
 0x6dd   :  { %v9656_v13 = vpop.f32.mrf.mxu2 }
 0x6de   :  { %v9657_v10 = vadd.f32 %v9656_v13, %v9644_v55 }
 0x6df   :  { %v9669_v39 = vpop.f32.mrf.mxu3  ;;  %v9645_v24 = vpop.f32.mrf.mxu1 }
 0x6e0   :  { %v9670_v9 = vadd.f32 %v9669_v39, %v9657_v10 }
 0x6e1   :  { %v9684_v31 = vpop.f32.mrf.mxu0 }
 0x6e2   :  { %v9683_v34 = vadd.f32 %v9682_v26, %v9670_v9 }
 0x6e5   :  { %v9658_v46 = vpop.f32.mrf.mxu2 }
 0x6e7   :  { %v9671_v25 = vpop.f32.mrf.mxu3 }
 0x6f7   :  { %v9695_v1 = vpop.f32.mrf.mxu1 }
 0x6f8   :  { %v9696_v56 = vadd.f32 %v9695_v1, %v9683_v34 }
 0x6fd   :  { %v9708_v62 = vpop.f32.mrf.mxu2 }
 0x6fe   :  { %v9709_v48 = vadd.f32 %v9708_v62, %v9696_v56 }
 0x6ff   :  { %v9697_v19 = vpop.f32.mrf.mxu1 }
 0x700   :  { %v9712_v41 = vmax.f32 %v9709_v48, 0.0 }
 0x702   :  { %v9713_v15 = vpack.c.bf16 %v9712_v41, %v9712_v41 }
 0x704   :  { %13877 = vmatmul.msk.bf16.vlgmr.msrb.gmra.mxu3 %vm9734_vm4, %v9713_v15 }
 0x705   :  { %v9710_v20 = vpop.f32.mrf.mxu2 }
 0x787   :  { %v9747_v36 = vpop.f32.mrf.mxu3 }
 0x788   :  { %v9748_v2 = vadd.f32 %v14779_v61, %v9747_v36 }
 0x78a   :  { %9752 = vst.msk [vmem:[#allocation6] sm:$0x3] %vm9751_vm7, %v9748_v2 }
 0x78b   :  { %9763 = dma.vmem_to_hbm [thread:$0]  %s9759_s4, 32, %s9761_s2, [#allocation7]  }
 0x78f   :  { %v9749_v52 = vpop.f32.mrf.mxu3 }
 0x790   :  { %14808 = dma.done.wait [#allocation7], 32  }
 0x791   :  { %14809 = vsyncadd [#allocation7], 4294967264 }
 0x792   :  { %9768 = vsyncpa [#allocation7], 1 }

</bundles_post_ra>
